<compile_context>
chip_gen: v7x
topology: tpu7x:2x2x1
jax: 0.10.0
libtpu: 0.0.40
codegen_flags: <defaults>
</compile_context>

<pallas_src>
import numpy as np
import jax
import jax.numpy as jnp
from jax.experimental import pallas as pl
from jax.experimental.pallas import tpu as pltpu

N_QUBITS = 10
N_LAYERS = 2
DIM = 1 << N_QUBITS          # 1024
U_COL_BLOCK = 256            # columns of U^T per grid step (4 parallel blocks)
N_PAD = 128                  # zsign padded to a full lane width

_VMEM_SPEC = pl.BlockSpec(memory_space=pltpu.MemorySpace.VMEM)


# ----------------------------------------------------------------------------
# Pallas kernels
# ----------------------------------------------------------------------------
def _conv_pool_kernel(w_ref, rhs_ref, b_ref, o_ref):
    """out = maxpool2x2(relu(conv)) as max over 4 quadrant GEMMs; bias/relu fused."""
    w = w_ref[...]                                   # (O, C*kh*kw)
    acc = jnp.dot(w, rhs_ref[0], preferred_element_type=jnp.float32)
    for q in range(1, 4):                            # same flop count as the un-pooled conv
        acc = jnp.maximum(acc, jnp.dot(w, rhs_ref[q], preferred_element_type=jnp.float32))
    # relu(max_q(conv_q) + b) == maxpool(relu(conv + b)) since bias is per-row and relu monotone
    o_ref[...] = jnp.maximum(acc + b_ref[...], 0.0)


def _tail_kernel(h_ref, w1_ref, b1_ref, w2_ref, b2_ref, utr_ref, uti_ref, z_ref, o_ref):
    """fc1 -> relu -> fc2 -> pi*sigmoid -> RX product state -> U (column block) -> <Z>."""
    B = h_ref.shape[0]
    # Tiny FC head; recomputed per U-column block so grid steps are fully independent
    # (safe for dimension_semantics=("parallel",) / megacore split).
    z1 = jnp.dot(h_ref[...], w1_ref[...], preferred_element_type=jnp.float32) + b1_ref[...]
    z1 = jnp.maximum(z1, 0.0)
    z2 = jnp.dot(z1, w2_ref[...], preferred_element_type=jnp.float32) + b2_ref[...]
    angles = jnp.float32(np.pi) / (1.0 + jnp.exp(-z2))        # pi * sigmoid, (B, n_qubits)

    # AngleEmbedding(RX) product state on |0..0>: |amp(b)| = prod_i (cos or sin of a_i/2),
    # phase = (-i)^popcount(b); wire 0 is the most-significant bit (PennyLane convention).
    half = 0.5 * angles
    cosv = jnp.cos(half)
    sinv = jnp.sin(half)
    idx = jax.lax.broadcasted_iota(jnp.int32, (1, DIM), 1)
    mag = jnp.ones((B, DIM), jnp.float32)
    pop = jnp.zeros((1, DIM), jnp.int32)
    for q in range(N_QUBITS):
        bit = (idx >> (N_QUBITS - 1 - q)) & 1
        mag = mag * jnp.where(bit == 1, sinv[:, q:q + 1], cosv[:, q:q + 1])
        pop = pop + bit
    pop4 = pop & 3
    ph_r = jnp.where(pop4 == 0, 1.0, jnp.where(pop4 == 2, -1.0, 0.0))
    ph_i = jnp.where(pop4 == 1, -1.0, jnp.where(pop4 == 3, 1.0, 0.0))
    psi_r = mag * ph_r
    psi_i = mag * ph_i

    # psi' = psi @ U^T restricted to this block's columns (complex matmul via 4 real ones)
    utr, uti = utr_ref[...], uti_ref[...]
    nr = (jnp.dot(psi_r, utr, preferred_element_type=jnp.float32)
          - jnp.dot(psi_i, uti, preferred_element_type=jnp.float32))
    ni = (jnp.dot(psi_r, uti, preferred_element_type=jnp.float32)
          + jnp.dot(psi_i, utr, preferred_element_type=jnp.float32))
    prob = nr * nr + ni * ni                                   # (B, U_COL_BLOCK)
    o_ref[0, :, :] = jnp.dot(prob, z_ref[...], preferred_element_type=jnp.float32)


# ----------------------------------------------------------------------------
# Kernel wrappers (+ im2col / quadrant extraction glue)
# ----------------------------------------------------------------------------
def _build_pool_patches(a, kh, kw):
    """a: (C, B, H, W) channel-major -> (4, C*kh*kw, B*Hp*Wp) quadrant patch matrices."""
    C, B, H, W = a.shape
    Ho, Wo = H - kh + 1, W - kw + 1
    Hp, Wp = Ho // 2, Wo // 2
    slabs = []
    for di in range(kh):
        for dj in range(kw):
            slabs.append(a[:, :, di:di + Ho, dj:dj + Wo])      # (C, B, Ho, Wo)
    pat = jnp.stack(slabs, axis=1)                             # (C, kh*kw, B, Ho, Wo)
    pat = pat.reshape(C * kh * kw, B, Ho, Wo)                  # row = c*kh*kw + di*kw + dj
    quads = []
    for qi in range(2):
        for qj in range(2):
            quads.append(pat[:, :, qi::2, qj::2].reshape(C * kh * kw, B * Hp * Wp))
    return jnp.stack(quads, axis=0), Hp, Wp


def conv_relu_pool(a, wm, b_col, kh, kw):
    """a: (C, B, H, W); wm: (O, C*kh*kw); b_col: (O, 1) -> (O, B, Hp, Wp)."""
    C, B, H, W = a.shape
    O = wm.shape[0]
    rhs, Hp, Wp = _build_pool_patches(a, kh, kw)
    out = pl.pallas_call(
        _conv_pool_kernel,
        out_shape=jax.ShapeDtypeStruct((O, B * Hp * Wp), jnp.float32),
        in_specs=[_VMEM_SPEC, _VMEM_SPEC, _VMEM_SPEC],
        out_specs=_VMEM_SPEC,
    )(wm, rhs, b_col)
    return out.reshape(O, B, Hp, Wp)


def quantum_tail(params, h):
    """h: (B, 256) flattened CNN features -> (B, n_qubits) <Z> expectations."""
    B = h.shape[0]
    nblk = DIM // U_COL_BLOCK
    partials = pl.pallas_call(
        _tail_kernel,
        out_shape=jax.ShapeDtypeStruct((nblk, B, N_PAD), jnp.float32),
        grid=(nblk,),
        in_specs=[
            pl.BlockSpec((B, 256), lambda j: (0, 0)),
            pl.BlockSpec((256, 120), lambda j: (0, 0)),
            pl.BlockSpec((1, 120), lambda j: (0, 0)),
            pl.BlockSpec((120, N_QUBITS), lambda j: (0, 0)),
            pl.BlockSpec((1, N_QUBITS), lambda j: (0, 0)),
            pl.BlockSpec((DIM, U_COL_BLOCK), lambda j: (0, j)),
            pl.BlockSpec((DIM, U_COL_BLOCK), lambda j: (0, j)),
            pl.BlockSpec((U_COL_BLOCK, N_PAD), lambda j: (j, 0)),
        ],
        out_specs=pl.BlockSpec((1, B, N_PAD), lambda j: (j, 0, 0)),
        compiler_params=pltpu.CompilerParams(dimension_semantics=("parallel",)),
    )(h, params["fc1_wT"], params["fc1_b"], params["fc2_wT"], params["fc2_b"],
      params["ut_r"], params["ut_i"], params["zsign"])
    return jnp.sum(partials, axis=0)[:, :N_QUBITS]


def hybrid_forward(params, x):
    """x: (B, 1, 28, 28) NCHW -> (B, n_qubits) <Z_i> expectations."""
    B = x.shape[0]
    a = jnp.transpose(x, (1, 0, 2, 3))                                   # (1, B, 28, 28)
    a = conv_relu_pool(a, params["conv1_wm"], params["conv1_b"], 5, 5)   # (6, B, 12, 12)
    a = conv_relu_pool(a, params["conv2_wm"], params["conv2_b"], 5, 5)   # (16, B, 4, 4)
    # torch flatten order of (B, 16, 4, 4): feature index = c*16 + i*4 + j
    h = a.reshape(16, B, 16).transpose(1, 0, 2).reshape(B, 256)
    return quantum_tail(params, h)


# ----------------------------------------------------------------------------
# Setup-time (numpy) construction of the StronglyEntanglingLayers unitary & <Z> signs
# ----------------------------------------------------------------------------
def _rot_matrix(phi, theta, omega):
    c, s = np.cos(theta / 2.0), np.sin(theta / 2.0)
    return np.array(
        [[np.exp(-0.5j * (phi + omega)) * c, -np.exp(0.5j * (phi - omega)) * s],
         [np.exp(-0.5j * (phi - omega)) * s, np.exp(0.5j * (phi + omega)) * c]],
        dtype=np.complex128)


def build_entangling_unitary(weights):
    """Dense unitary of qml.StronglyEntanglingLayers(weights) on N_QUBITS wires."""
    L, n, _ = weights.shape
    dim = 1 << n
    U = np.eye(dim, dtype=np.complex128)
    idx = np.arange(dim)
    for l in range(L):
        r = (l % (n - 1)) + 1                       # PennyLane default ranges
        for w in range(n):                          # Rot gates
            phi, theta, omega = weights[l, w]
            g = _rot_matrix(phi, theta, omega)
            left, right = 1 << w, 1 << (n - 1 - w)
            Ur = U.reshape(left, 2, right * dim)
            U = np.einsum("ab,lbk->lak", g, Ur).reshape(dim, dim)
        for w in range(n):                          # CNOT(w, (w+r) % n)
            c, t = w, (w + r) % n
            cbit, tbit = 1 << (n - 1 - c), 1 << (n - 1 - t)
            perm = np.where(idx & cbit, idx ^ tbit, idx)
            U = U[perm, :]
    return U


def build_zsign(n, n_pad=None):
    dim = 1 << n
    cols = n if n_pad is None else n_pad
    z = np.zeros((dim, cols), dtype=np.float32)
    idx = np.arange(dim)
    for q in range(n):
        bit = 1 << (n - 1 - q)
        z[:, q] = np.where(idx & bit, -1.0, 1.0)
    return z


# ----------------------------------------------------------------------------
# Parameters
# ----------------------------------------------------------------------------
def init_raw_params(key):
    keys = jax.random.split(key, 9)
    return {
        "conv1_w": jax.random.normal(keys[0], (6, 1, 5, 5), jnp.float32) * 0.1,
        "conv1_b": jax.random.normal(keys[1], (6,), jnp.float32) * 0.1,
        "conv2_w": jax.random.normal(keys[2], (16, 6, 5, 5), jnp.float32) * 0.1,
        "conv2_b": jax.random.normal(keys[3], (16,), jnp.float32) * 0.1,
        "fc1_w": jax.random.normal(keys[4], (120, 256), jnp.float32) * 0.05,
        "fc1_b": jax.random.normal(keys[5], (120,), jnp.float32) * 0.05,
        "fc2_w": jax.random.normal(keys[6], (N_QUBITS, 120), jnp.float32) * 0.05,
        "fc2_b": jax.random.normal(keys[7], (N_QUBITS,), jnp.float32) * 0.05,
        "q_weights": jax.random.normal(keys[8], (N_LAYERS, N_QUBITS, 3), jnp.float32) * 0.01,
    }


def prepare_params(raw):
    """Pre-flatten / pre-transpose weights and precompute the circuit unitary (setup time)."""
    U = build_entangling_unitary(np.asarray(raw["q_weights"], dtype=np.float64))
    Ut = U.T                                        # row-vector convention in the kernel
    p = {
        "conv1_wm": raw["conv1_w"].reshape(6, 25),
        "conv1_b": raw["conv1_b"].reshape(6, 1),
        "conv2_wm": raw["conv2_w"].reshape(16, 150),
        "conv2_b": raw["conv2_b"].reshape(16, 1),
        "fc1_wT": raw["fc1_w"].T,                   # (256, 120)
        "fc1_b": raw["fc1_b"].reshape(1, 120),
        "fc2_wT": raw["fc2_w"].T,                   # (120, 10)
        "fc2_b": raw["fc2_b"].reshape(1, N_QUBITS),
        "ut_r": jnp.asarray(Ut.real, dtype=jnp.float32),
        "ut_i": jnp.asarray(Ut.imag, dtype=jnp.float32),
        "zsign": jnp.asarray(build_zsign(N_QUBITS, N_PAD)),
    }
    return p, U


# ----------------------------------------------------------------------------
# Pure-JAX reference (mirrors the PyTorch module; used only for a sanity check)
# ----------------------------------------------------------------------------
def reference_forward(raw, U, x):
    prec = jax.lax.Precision.HIGHEST
    h = jax.lax.conv_general_dilated(x, raw["conv1_w"], (1, 1), "VALID",
                                     dimension_numbers=("NCHW", "OIHW", "NCHW"),
                                     precision=prec)
    h = jax.nn.relu(h + raw["conv1_b"][None, :, None, None])
    h = jax.lax.reduce_window(h, -jnp.inf, jax.lax.max, (1, 1, 2, 2), (1, 1, 2, 2), "VALID")
    h = jax.lax.conv_general_dilated(h, raw["conv2_w"], (1, 1), "VALID",
                                     dimension_numbers=("NCHW", "OIHW", "NCHW"),
                                     precision=prec)
    h = jax.nn.relu(h + raw["conv2_b"][None, :, None, None])
    h = jax.lax.reduce_window(h, -jnp.inf, jax.lax.max, (1, 1, 2, 2), (1, 1, 2, 2), "VALID")
    B = x.shape[0]
    h = h.reshape(B, -1)
    h = jax.nn.relu(jnp.dot(h, raw["fc1_w"].T, precision=prec) + raw["fc1_b"])
    feats = jnp.dot(h, raw["fc2_w"].T, precision=prec) + raw["fc2_b"]
    angles = jnp.pi * jax.nn.sigmoid(feats)
    c = jnp.cos(angles / 2).astype(jnp.complex64)
    s = jnp.sin(angles / 2).astype(jnp.complex64)
    psi = jnp.ones((B, 1), jnp.complex64)
    for i in range(N_QUBITS):
        pair = jnp.stack([c[:, i], -1j * s[:, i]], axis=1)
        psi = (psi[:, :, None] * pair[:, None, :]).reshape(B, -1)
    psi2 = jnp.dot(psi, jnp.asarray(U.T, jnp.complex64), precision=prec)
    prob = jnp.abs(psi2) ** 2
    z = jnp.asarray(build_zsign(N_QUBITS))
    return jnp.dot(prob, z, precision=prec).astype(jnp.float32)


# ----------------------------------------------------------------------------
# Main
# ----------------------------------------------------------------------------
if __name__ == "__main__":
    key = jax.random.PRNGKey(0)
    pkey, xkey = jax.random.split(key)
    raw = init_raw_params(pkey)
    params, U = prepare_params(raw)
    x = jax.random.normal(xkey, (2, 1, 28, 28), jnp.float32)     # MNIST-sized, batch=2

    out = jax.block_until_ready(jax.jit(hybrid_forward)(params, x))

    assert out.shape == (2, N_QUBITS)
    assert bool(jnp.all(jnp.isfinite(out)))
    assert bool(jnp.all(jnp.abs(out) <= 1.0 + 1e-4))             # <Z> expectations in [-1, 1]

    ref = reference_forward(raw, U, x)
    err = float(jnp.max(jnp.abs(out - ref)))
    assert err < 1e-2, f"mismatch vs pure-JAX reference: {err}"
    print("KERNEL_OK")
</pallas_src>

<mosaic_0001>
module attributes {stable_mosaic.version = 11 : i64} {
  func.func @_conv_pool_kernel(%arg0: memref<6x25xf32, #tpu.memory_space<vmem>>, %arg1: memref<4x25x288xf32, #tpu.memory_space<vmem>>, %arg2: memref<6x1xf32, #tpu.memory_space<vmem>>, %arg3: memref<6x288xf32, #tpu.memory_space<vmem>>) attributes {dimension_semantics = [], scalar_prefetch = 0 : i64, scratch_operands = 0 : i64, tpu.core_type = #tpu.core_type<tc>} {
    %c0 = arith.constant 0 : index
    %c0_0 = arith.constant 0 : index
    %0 = vector.load %arg0[%c0, %c0_0] : memref<6x25xf32, #tpu.memory_space<vmem>>, vector<6x25xf32>
    %c0_1 = arith.constant 0 : index
    %c0_2 = arith.constant 0 : index
    %c0_3 = arith.constant 0 : index
    %1 = vector.load %arg1[%c0_1, %c0_2, %c0_3] : memref<4x25x288xf32, #tpu.memory_space<vmem>>, vector<1x25x288xf32>
    %2 = vector.shape_cast %1 : vector<1x25x288xf32> to vector<25x288xf32>
    %cst = arith.constant dense<0.000000e+00> : vector<6x288xf32>
    %3 = tpu.matmul %0, %2, %cst {dimension_numbers = #tpu.dot_dimension_numbers<[1], [0], [0], [1], [0, 0, 1, 1], [], []>} : vector<6x25xf32>, vector<25x288xf32>, vector<6x288xf32> -> vector<6x288xf32>
    %c1 = arith.constant 1 : index
    %c0_4 = arith.constant 0 : index
    %c0_5 = arith.constant 0 : index
    %4 = vector.load %arg1[%c1, %c0_4, %c0_5] : memref<4x25x288xf32, #tpu.memory_space<vmem>>, vector<1x25x288xf32>
    %5 = vector.shape_cast %4 : vector<1x25x288xf32> to vector<25x288xf32>
    %cst_6 = arith.constant dense<0.000000e+00> : vector<6x288xf32>
    %6 = tpu.matmul %0, %5, %cst_6 {dimension_numbers = #tpu.dot_dimension_numbers<[1], [0], [0], [1], [0, 0, 1, 1], [], []>} : vector<6x25xf32>, vector<25x288xf32>, vector<6x288xf32> -> vector<6x288xf32>
    %7 = arith.maximumf %3, %6 : vector<6x288xf32>
    %c2 = arith.constant 2 : index
    %c0_7 = arith.constant 0 : index
    %c0_8 = arith.constant 0 : index
    %8 = vector.load %arg1[%c2, %c0_7, %c0_8] : memref<4x25x288xf32, #tpu.memory_space<vmem>>, vector<1x25x288xf32>
    %9 = vector.shape_cast %8 : vector<1x25x288xf32> to vector<25x288xf32>
    %cst_9 = arith.constant dense<0.000000e+00> : vector<6x288xf32>
    %10 = tpu.matmul %0, %9, %cst_9 {dimension_numbers = #tpu.dot_dimension_numbers<[1], [0], [0], [1], [0, 0, 1, 1], [], []>} : vector<6x25xf32>, vector<25x288xf32>, vector<6x288xf32> -> vector<6x288xf32>
    %11 = arith.maximumf %7, %10 : vector<6x288xf32>
    %c3 = arith.constant 3 : index
    %c0_10 = arith.constant 0 : index
    %c0_11 = arith.constant 0 : index
    %12 = vector.load %arg1[%c3, %c0_10, %c0_11] : memref<4x25x288xf32, #tpu.memory_space<vmem>>, vector<1x25x288xf32>
    %13 = vector.shape_cast %12 : vector<1x25x288xf32> to vector<25x288xf32>
    %cst_12 = arith.constant dense<0.000000e+00> : vector<6x288xf32>
    %14 = tpu.matmul %0, %13, %cst_12 {dimension_numbers = #tpu.dot_dimension_numbers<[1], [0], [0], [1], [0, 0, 1, 1], [], []>} : vector<6x25xf32>, vector<25x288xf32>, vector<6x288xf32> -> vector<6x288xf32>
    %15 = arith.maximumf %11, %14 : vector<6x288xf32>
    %c0_13 = arith.constant 0 : index
    %c0_14 = arith.constant 0 : index
    %16 = vector.load %arg2[%c0_13, %c0_14] : memref<6x1xf32, #tpu.memory_space<vmem>>, vector<6x1xf32>
    %17 = vector.broadcast %16 : vector<6x1xf32> to vector<6x288xf32>
    %18 = arith.addf %15, %17 : vector<6x288xf32>
    %cst_15 = arith.constant 0.000000e+00 : f32
    %19 = vector.broadcast %cst_15 : f32 to vector<6x288xf32>
    %20 = arith.maximumf %18, %19 : vector<6x288xf32>
    %c0_16 = arith.constant 0 : index
    %c0_17 = arith.constant 0 : index
    %21 = vector.load %arg3[%c0_16, %c0_17] : memref<6x288xf32, #tpu.memory_space<vmem>>, vector<6x288xf32>
    tpu.vector_store %arg3[%c0_16, %c0_17], %20 {strides = array<i32>} : memref<6x288xf32, #tpu.memory_space<vmem>>, vector<6x288xf32>,
    return
  }
}

module attributes {stable_mosaic.version = 11 : i64} {
  func.func @_conv_pool_kernel(%arg0: memref<16x150xf32, #tpu.memory_space<vmem>>, %arg1: memref<4x150x32xf32, #tpu.memory_space<vmem>>, %arg2: memref<16x1xf32, #tpu.memory_space<vmem>>, %arg3: memref<16x32xf32, #tpu.memory_space<vmem>>) attributes {dimension_semantics = [], scalar_prefetch = 0 : i64, scratch_operands = 0 : i64, tpu.core_type = #tpu.core_type<tc>} {
    %c0 = arith.constant 0 : index
    %c0_0 = arith.constant 0 : index
    %0 = vector.load %arg0[%c0, %c0_0] : memref<16x150xf32, #tpu.memory_space<vmem>>, vector<16x150xf32>
    %c0_1 = arith.constant 0 : index
    %c0_2 = arith.constant 0 : index
    %c0_3 = arith.constant 0 : index
    %1 = vector.load %arg1[%c0_1, %c0_2, %c0_3] : memref<4x150x32xf32, #tpu.memory_space<vmem>>, vector<1x150x32xf32>
    %2 = vector.shape_cast %1 : vector<1x150x32xf32> to vector<150x32xf32>
    %cst = arith.constant dense<0.000000e+00> : vector<16x32xf32>
    %3 = tpu.matmul %0, %2, %cst {dimension_numbers = #tpu.dot_dimension_numbers<[1], [0], [0], [1], [0, 0, 1, 1], [], []>} : vector<16x150xf32>, vector<150x32xf32>, vector<16x32xf32> -> vector<16x32xf32>
    %c1 = arith.constant 1 : index
    %c0_4 = arith.constant 0 : index
    %c0_5 = arith.constant 0 : index
    %4 = vector.load %arg1[%c1, %c0_4, %c0_5] : memref<4x150x32xf32, #tpu.memory_space<vmem>>, vector<1x150x32xf32>
    %5 = vector.shape_cast %4 : vector<1x150x32xf32> to vector<150x32xf32>
    %cst_6 = arith.constant dense<0.000000e+00> : vector<16x32xf32>
    %6 = tpu.matmul %0, %5, %cst_6 {dimension_numbers = #tpu.dot_dimension_numbers<[1], [0], [0], [1], [0, 0, 1, 1], [], []>} : vector<16x150xf32>, vector<150x32xf32>, vector<16x32xf32> -> vector<16x32xf32>
    %7 = arith.maximumf %3, %6 : vector<16x32xf32>
    %c2 = arith.constant 2 : index
    %c0_7 = arith.constant 0 : index
    %c0_8 = arith.constant 0 : index
    %8 = vector.load %arg1[%c2, %c0_7, %c0_8] : memref<4x150x32xf32, #tpu.memory_space<vmem>>, vector<1x150x32xf32>
    %9 = vector.shape_cast %8 : vector<1x150x32xf32> to vector<150x32xf32>
    %cst_9 = arith.constant dense<0.000000e+00> : vector<16x32xf32>
    %10 = tpu.matmul %0, %9, %cst_9 {dimension_numbers = #tpu.dot_dimension_numbers<[1], [0], [0], [1], [0, 0, 1, 1], [], []>} : vector<16x150xf32>, vector<150x32xf32>, vector<16x32xf32> -> vector<16x32xf32>
    %11 = arith.maximumf %7, %10 : vector<16x32xf32>
    %c3 = arith.constant 3 : index
    %c0_10 = arith.constant 0 : index
    %c0_11 = arith.constant 0 : index
    %12 = vector.load %arg1[%c3, %c0_10, %c0_11] : memref<4x150x32xf32, #tpu.memory_space<vmem>>, vector<1x150x32xf32>
    %13 = vector.shape_cast %12 : vector<1x150x32xf32> to vector<150x32xf32>
    %cst_12 = arith.constant dense<0.000000e+00> : vector<16x32xf32>
    %14 = tpu.matmul %0, %13, %cst_12 {dimension_numbers = #tpu.dot_dimension_numbers<[1], [0], [0], [1], [0, 0, 1, 1], [], []>} : vector<16x150xf32>, vector<150x32xf32>, vector<16x32xf32> -> vector<16x32xf32>
    %15 = arith.maximumf %11, %14 : vector<16x32xf32>
    %c0_13 = arith.constant 0 : index
    %c0_14 = arith.constant 0 : index
    %16 = vector.load %arg2[%c0_13, %c0_14] : memref<16x1xf32, #tpu.memory_space<vmem>>, vector<16x1xf32>
    %17 = vector.broadcast %16 : vector<16x1xf32> to vector<16x32xf32>
    %18 = arith.addf %15, %17 : vector<16x32xf32>
    %cst_15 = arith.constant 0.000000e+00 : f32
    %19 = vector.broadcast %cst_15 : f32 to vector<16x32xf32>
    %20 = arith.maximumf %18, %19 : vector<16x32xf32>
    %c0_16 = arith.constant 0 : index
    %c0_17 = arith.constant 0 : index
    %21 = vector.load %arg3[%c0_16, %c0_17] : memref<16x32xf32, #tpu.memory_space<vmem>>, vector<16x32xf32>
    tpu.vector_store %arg3[%c0_16, %c0_17], %20 {strides = array<i32>} : memref<16x32xf32, #tpu.memory_space<vmem>>, vector<16x32xf32>,
    return
  }
}

module attributes {stable_mosaic.version = 11 : i64} {
  func.func @_tail_kernel(%arg0: i32, %arg1: memref<2x256xf32, #tpu.memory_space<vmem>>, %arg2: memref<256x120xf32, #tpu.memory_space<vmem>>, %arg3: memref<1x120xf32, #tpu.memory_space<vmem>>, %arg4: memref<120x10xf32, #tpu.memory_space<vmem>>, %arg5: memref<1x10xf32, #tpu.memory_space<vmem>>, %arg6: memref<1024x256xf32, #tpu.memory_space<vmem>>, %arg7: memref<1024x256xf32, #tpu.memory_space<vmem>>, %arg8: memref<256x128xf32, #tpu.memory_space<vmem>>, %arg9: memref<1x2x128xf32, #tpu.memory_space<vmem>>) attributes {dimension_semantics = [#tpu.dimension_semantics<parallel>], iteration_bounds = array<i64: 4>, scalar_prefetch = 0 : i64, scratch_operands = 0 : i64, tpu.core_type = #tpu.core_type<tc>, window_params = [{pipeline_mode = #tpu.pipeline_mode<synchronous>, transform_indices = @transform_0, window_bounds = array<i64: 2, 256>}, {pipeline_mode = #tpu.pipeline_mode<synchronous>, transform_indices = @transform_1, window_bounds = array<i64: 256, 120>}, {pipeline_mode = #tpu.pipeline_mode<synchronous>, transform_indices = @transform_2, window_bounds = array<i64: 1, 120>}, {pipeline_mode = #tpu.pipeline_mode<synchronous>, transform_indices = @transform_3, window_bounds = array<i64: 120, 10>}, {pipeline_mode = #tpu.pipeline_mode<synchronous>, transform_indices = @transform_4, window_bounds = array<i64: 1, 10>}, {transform_indices = @transform_5, window_bounds = array<i64: 1024, 256>}, {transform_indices = @transform_6, window_bounds = array<i64: 1024, 256>}, {transform_indices = @transform_7, window_bounds = array<i64: 256, 128>}, {transform_indices = @transform_8, window_bounds = array<i64: 1, 2, 128>}]} {
    %c0 = arith.constant 0 : index
    %c0_0 = arith.constant 0 : index
    %0 = vector.load %arg1[%c0, %c0_0] : memref<2x256xf32, #tpu.memory_space<vmem>>, vector<2x256xf32>
    %c0_1 = arith.constant 0 : index
    %c0_2 = arith.constant 0 : index
    %1 = vector.load %arg2[%c0_1, %c0_2] : memref<256x120xf32, #tpu.memory_space<vmem>>, vector<256x120xf32>
    %cst = arith.constant dense<0.000000e+00> : vector<2x120xf32>
    %2 = tpu.matmul %0, %1, %cst {dimension_numbers = #tpu.dot_dimension_numbers<[1], [0], [0], [1], [0, 0, 1, 1], [], []>} : vector<2x256xf32>, vector<256x120xf32>, vector<2x120xf32> -> vector<2x120xf32>
    %c0_3 = arith.constant 0 : index
    %c0_4 = arith.constant 0 : index
    %3 = vector.load %arg3[%c0_3, %c0_4] : memref<1x120xf32, #tpu.memory_space<vmem>>, vector<1x120xf32>
    %4 = vector.broadcast %3 : vector<1x120xf32> to vector<2x120xf32>
    %5 = arith.addf %2, %4 : vector<2x120xf32>
    %cst_5 = arith.constant 0.000000e+00 : f32
    %6 = vector.broadcast %cst_5 : f32 to vector<2x120xf32>
    %7 = arith.maximumf %5, %6 : vector<2x120xf32>
    %c0_6 = arith.constant 0 : index
    %c0_7 = arith.constant 0 : index
    %8 = vector.load %arg4[%c0_6, %c0_7] : memref<120x10xf32, #tpu.memory_space<vmem>>, vector<120x10xf32>
    %cst_8 = arith.constant dense<0.000000e+00> : vector<2x10xf32>
    %9 = tpu.matmul %7, %8, %cst_8 {dimension_numbers = #tpu.dot_dimension_numbers<[1], [0], [0], [1], [0, 0, 1, 1], [], []>} : vector<2x120xf32>, vector<120x10xf32>, vector<2x10xf32> -> vector<2x10xf32>
    %c0_9 = arith.constant 0 : index
    %c0_10 = arith.constant 0 : index
    %10 = vector.load %arg5[%c0_9, %c0_10] : memref<1x10xf32, #tpu.memory_space<vmem>>, vector<1x10xf32>
    %11 = vector.broadcast %10 : vector<1x10xf32> to vector<2x10xf32>
    %12 = arith.addf %9, %11 : vector<2x10xf32>
    %cst_11 = arith.constant 0.000000e+00 : f32
    %13 = vector.broadcast %cst_11 : f32 to vector<2x10xf32>
    %14 = arith.subf %13, %12 : vector<2x10xf32>
    %15 = math.exp %14 : vector<2x10xf32>
    %cst_12 = arith.constant 1.000000e+00 : f32
    %16 = vector.broadcast %cst_12 : f32 to vector<2x10xf32>
    %17 = arith.addf %16, %15 : vector<2x10xf32>
    %cst_13 = arith.constant 3.14159274 : f32
    %18 = vector.broadcast %cst_13 : f32 to vector<2x10xf32>
    %19 = arith.divf %18, %17 : vector<2x10xf32>
    %cst_14 = arith.constant 5.000000e-01 : f32
    %20 = vector.broadcast %cst_14 : f32 to vector<2x10xf32>
    %21 = arith.mulf %20, %19 : vector<2x10xf32>
    %22 = math.cos %21 : vector<2x10xf32>
    %23 = math.sin %21 : vector<2x10xf32>
    %24 = tpu.iota {dimensions = array<i32: 1>} : vector<1x1024xi32>
    %cst_15 = arith.constant 1.000000e+00 : f32
    %25 = vector.broadcast %cst_15 : f32 to vector<2x1024xf32>
    %c0_i32 = arith.constant 0 : i32
    %26 = vector.broadcast %c0_i32 : i32 to vector<1x1024xi32>
    %c9_i32 = arith.constant 9 : i32
    %27 = vector.broadcast %c9_i32 : i32 to vector<1x1024xi32>
    %28 = arith.shrsi %24, %27 : vector<1x1024xi32>
    %c1_i32 = arith.constant 1 : i32
    %29 = vector.broadcast %c1_i32 : i32 to vector<1x1024xi32>
    %30 = arith.andi %28, %29 : vector<1x1024xi32>
    %c1_i32_16 = arith.constant 1 : i32
    %31 = vector.broadcast %c1_i32_16 : i32 to vector<1x1024xi32>
    %32 = arith.cmpi eq, %30, %31 : vector<1x1024xi32>
    %33 = vector.extract_strided_slice %23 {offsets = [0, 0], sizes = [2, 1], strides = [1, 1]} : vector<2x10xf32> to vector<2x1xf32>
    %34 = vector.extract_strided_slice %22 {offsets = [0, 0], sizes = [2, 1], strides = [1, 1]} : vector<2x10xf32> to vector<2x1xf32>
    %35 = vector.shape_cast %32 : vector<1x1024xi1> to vector<1x1024xi1>
    %36 = vector.broadcast %35 : vector<1x1024xi1> to vector<2x1024xi1>
    %37 = vector.shape_cast %33 : vector<2x1xf32> to vector<2x1xf32>
    %38 = vector.broadcast %37 : vector<2x1xf32> to vector<2x1024xf32>
    %39 = vector.shape_cast %34 : vector<2x1xf32> to vector<2x1xf32>
    %40 = vector.broadcast %39 : vector<2x1xf32> to vector<2x1024xf32>
    %41 = arith.select %36, %38, %40 : vector<2x1024xi1>, vector<2x1024xf32>
    %42 = arith.mulf %25, %41 : vector<2x1024xf32>
    %43 = arith.addi %26, %30 : vector<1x1024xi32>
    %c8_i32 = arith.constant 8 : i32
    %44 = vector.broadcast %c8_i32 : i32 to vector<1x1024xi32>
    %45 = arith.shrsi %24, %44 : vector<1x1024xi32>
    %c1_i32_17 = arith.constant 1 : i32
    %46 = vector.broadcast %c1_i32_17 : i32 to vector<1x1024xi32>
    %47 = arith.andi %45, %46 : vector<1x1024xi32>
    %c1_i32_18 = arith.constant 1 : i32
    %48 = vector.broadcast %c1_i32_18 : i32 to vector<1x1024xi32>
    %49 = arith.cmpi eq, %47, %48 : vector<1x1024xi32>
    %50 = vector.extract_strided_slice %23 {offsets = [0, 1], sizes = [2, 1], strides = [1, 1]} : vector<2x10xf32> to vector<2x1xf32>
    %51 = vector.extract_strided_slice %22 {offsets = [0, 1], sizes = [2, 1], strides = [1, 1]} : vector<2x10xf32> to vector<2x1xf32>
    %52 = vector.shape_cast %49 : vector<1x1024xi1> to vector<1x1024xi1>
    %53 = vector.broadcast %52 : vector<1x1024xi1> to vector<2x1024xi1>
    %54 = vector.shape_cast %50 : vector<2x1xf32> to vector<2x1xf32>
    %55 = vector.broadcast %54 : vector<2x1xf32> to vector<2x1024xf32>
    %56 = vector.shape_cast %51 : vector<2x1xf32> to vector<2x1xf32>
    %57 = vector.broadcast %56 : vector<2x1xf32> to vector<2x1024xf32>
    %58 = arith.select %53, %55, %57 : vector<2x1024xi1>, vector<2x1024xf32>
    %59 = arith.mulf %42, %58 : vector<2x1024xf32>
    %60 = arith.addi %43, %47 : vector<1x1024xi32>
    %c7_i32 = arith.constant 7 : i32
    %61 = vector.broadcast %c7_i32 : i32 to vector<1x1024xi32>
    %62 = arith.shrsi %24, %61 : vector<1x1024xi32>
    %c1_i32_19 = arith.constant 1 : i32
    %63 = vector.broadcast %c1_i32_19 : i32 to vector<1x1024xi32>
    %64 = arith.andi %62, %63 : vector<1x1024xi32>
    %c1_i32_20 = arith.constant 1 : i32
    %65 = vector.broadcast %c1_i32_20 : i32 to vector<1x1024xi32>
    %66 = arith.cmpi eq, %64, %65 : vector<1x1024xi32>
    %67 = vector.extract_strided_slice %23 {offsets = [0, 2], sizes = [2, 1], strides = [1, 1]} : vector<2x10xf32> to vector<2x1xf32>
    %68 = vector.extract_strided_slice %22 {offsets = [0, 2], sizes = [2, 1], strides = [1, 1]} : vector<2x10xf32> to vector<2x1xf32>
    %69 = vector.shape_cast %66 : vector<1x1024xi1> to vector<1x1024xi1>
    %70 = vector.broadcast %69 : vector<1x1024xi1> to vector<2x1024xi1>
    %71 = vector.shape_cast %67 : vector<2x1xf32> to vector<2x1xf32>
    %72 = vector.broadcast %71 : vector<2x1xf32> to vector<2x1024xf32>
    %73 = vector.shape_cast %68 : vector<2x1xf32> to vector<2x1xf32>
    %74 = vector.broadcast %73 : vector<2x1xf32> to vector<2x1024xf32>
    %75 = arith.select %70, %72, %74 : vector<2x1024xi1>, vector<2x1024xf32>
    %76 = arith.mulf %59, %75 : vector<2x1024xf32>
    %77 = arith.addi %60, %64 : vector<1x1024xi32>
    %c6_i32 = arith.constant 6 : i32
    %78 = vector.broadcast %c6_i32 : i32 to vector<1x1024xi32>
    %79 = arith.shrsi %24, %78 : vector<1x1024xi32>
    %c1_i32_21 = arith.constant 1 : i32
    %80 = vector.broadcast %c1_i32_21 : i32 to vector<1x1024xi32>
    %81 = arith.andi %79, %80 : vector<1x1024xi32>
    %c1_i32_22 = arith.constant 1 : i32
    %82 = vector.broadcast %c1_i32_22 : i32 to vector<1x1024xi32>
    %83 = arith.cmpi eq, %81, %82 : vector<1x1024xi32>
    %84 = vector.extract_strided_slice %23 {offsets = [0, 3], sizes = [2, 1], strides = [1, 1]} : vector<2x10xf32> to vector<2x1xf32>
    %85 = vector.extract_strided_slice %22 {offsets = [0, 3], sizes = [2, 1], strides = [1, 1]} : vector<2x10xf32> to vector<2x1xf32>
    %86 = vector.shape_cast %83 : vector<1x1024xi1> to vector<1x1024xi1>
    %87 = vector.broadcast %86 : vector<1x1024xi1> to vector<2x1024xi1>
    %88 = vector.shape_cast %84 : vector<2x1xf32> to vector<2x1xf32>
    %89 = vector.broadcast %88 : vector<2x1xf32> to vector<2x1024xf32>
    %90 = vector.shape_cast %85 : vector<2x1xf32> to vector<2x1xf32>
    %91 = vector.broadcast %90 : vector<2x1xf32> to vector<2x1024xf32>
    %92 = arith.select %87, %89, %91 : vector<2x1024xi1>, vector<2x1024xf32>
    %93 = arith.mulf %76, %92 : vector<2x1024xf32>
    %94 = arith.addi %77, %81 : vector<1x1024xi32>
    %c5_i32 = arith.constant 5 : i32
    %95 = vector.broadcast %c5_i32 : i32 to vector<1x1024xi32>
    %96 = arith.shrsi %24, %95 : vector<1x1024xi32>
    %c1_i32_23 = arith.constant 1 : i32
    %97 = vector.broadcast %c1_i32_23 : i32 to vector<1x1024xi32>
    %98 = arith.andi %96, %97 : vector<1x1024xi32>
    %c1_i32_24 = arith.constant 1 : i32
    %99 = vector.broadcast %c1_i32_24 : i32 to vector<1x1024xi32>
    %100 = arith.cmpi eq, %98, %99 : vector<1x1024xi32>
    %101 = vector.extract_strided_slice %23 {offsets = [0, 4], sizes = [2, 1], strides = [1, 1]} : vector<2x10xf32> to vector<2x1xf32>
    %102 = vector.extract_strided_slice %22 {offsets = [0, 4], sizes = [2, 1], strides = [1, 1]} : vector<2x10xf32> to vector<2x1xf32>
    %103 = vector.shape_cast %100 : vector<1x1024xi1> to vector<1x1024xi1>
    %104 = vector.broadcast %103 : vector<1x1024xi1> to vector<2x1024xi1>
    %105 = vector.shape_cast %101 : vector<2x1xf32> to vector<2x1xf32>
    %106 = vector.broadcast %105 : vector<2x1xf32> to vector<2x1024xf32>
    %107 = vector.shape_cast %102 : vector<2x1xf32> to vector<2x1xf32>
    %108 = vector.broadcast %107 : vector<2x1xf32> to vector<2x1024xf32>
    %109 = arith.select %104, %106, %108 : vector<2x1024xi1>, vector<2x1024xf32>
    %110 = arith.mulf %93, %109 : vector<2x1024xf32>
    %111 = arith.addi %94, %98 : vector<1x1024xi32>
    %c4_i32 = arith.constant 4 : i32
    %112 = vector.broadcast %c4_i32 : i32 to vector<1x1024xi32>
    %113 = arith.shrsi %24, %112 : vector<1x1024xi32>
    %c1_i32_25 = arith.constant 1 : i32
    %114 = vector.broadcast %c1_i32_25 : i32 to vector<1x1024xi32>
    %115 = arith.andi %113, %114 : vector<1x1024xi32>
    %c1_i32_26 = arith.constant 1 : i32
    %116 = vector.broadcast %c1_i32_26 : i32 to vector<1x1024xi32>
    %117 = arith.cmpi eq, %115, %116 : vector<1x1024xi32>
    %118 = vector.extract_strided_slice %23 {offsets = [0, 5], sizes = [2, 1], strides = [1, 1]} : vector<2x10xf32> to vector<2x1xf32>
    %119 = vector.extract_strided_slice %22 {offsets = [0, 5], sizes = [2, 1], strides = [1, 1]} : vector<2x10xf32> to vector<2x1xf32>
    %120 = vector.shape_cast %117 : vector<1x1024xi1> to vector<1x1024xi1>
    %121 = vector.broadcast %120 : vector<1x1024xi1> to vector<2x1024xi1>
    %122 = vector.shape_cast %118 : vector<2x1xf32> to vector<2x1xf32>
    %123 = vector.broadcast %122 : vector<2x1xf32> to vector<2x1024xf32>
    %124 = vector.shape_cast %119 : vector<2x1xf32> to vector<2x1xf32>
    %125 = vector.broadcast %124 : vector<2x1xf32> to vector<2x1024xf32>
    %126 = arith.select %121, %123, %125 : vector<2x1024xi1>, vector<2x1024xf32>
    %127 = arith.mulf %110, %126 : vector<2x1024xf32>
    %128 = arith.addi %111, %115 : vector<1x1024xi32>
    %c3_i32 = arith.constant 3 : i32
    %129 = vector.broadcast %c3_i32 : i32 to vector<1x1024xi32>
    %130 = arith.shrsi %24, %129 : vector<1x1024xi32>
    %c1_i32_27 = arith.constant 1 : i32
    %131 = vector.broadcast %c1_i32_27 : i32 to vector<1x1024xi32>
    %132 = arith.andi %130, %131 : vector<1x1024xi32>
    %c1_i32_28 = arith.constant 1 : i32
    %133 = vector.broadcast %c1_i32_28 : i32 to vector<1x1024xi32>
    %134 = arith.cmpi eq, %132, %133 : vector<1x1024xi32>
    %135 = vector.extract_strided_slice %23 {offsets = [0, 6], sizes = [2, 1], strides = [1, 1]} : vector<2x10xf32> to vector<2x1xf32>
    %136 = vector.extract_strided_slice %22 {offsets = [0, 6], sizes = [2, 1], strides = [1, 1]} : vector<2x10xf32> to vector<2x1xf32>
    %137 = vector.shape_cast %134 : vector<1x1024xi1> to vector<1x1024xi1>
    %138 = vector.broadcast %137 : vector<1x1024xi1> to vector<2x1024xi1>
    %139 = vector.shape_cast %135 : vector<2x1xf32> to vector<2x1xf32>
    %140 = vector.broadcast %139 : vector<2x1xf32> to vector<2x1024xf32>
    %141 = vector.shape_cast %136 : vector<2x1xf32> to vector<2x1xf32>
    %142 = vector.broadcast %141 : vector<2x1xf32> to vector<2x1024xf32>
    %143 = arith.select %138, %140, %142 : vector<2x1024xi1>, vector<2x1024xf32>
    %144 = arith.mulf %127, %143 : vector<2x1024xf32>
    %145 = arith.addi %128, %132 : vector<1x1024xi32>
    %c2_i32 = arith.constant 2 : i32
    %146 = vector.broadcast %c2_i32 : i32 to vector<1x1024xi32>
    %147 = arith.shrsi %24, %146 : vector<1x1024xi32>
    %c1_i32_29 = arith.constant 1 : i32
    %148 = vector.broadcast %c1_i32_29 : i32 to vector<1x1024xi32>
    %149 = arith.andi %147, %148 : vector<1x1024xi32>
    %c1_i32_30 = arith.constant 1 : i32
    %150 = vector.broadcast %c1_i32_30 : i32 to vector<1x1024xi32>
    %151 = arith.cmpi eq, %149, %150 : vector<1x1024xi32>
    %152 = vector.extract_strided_slice %23 {offsets = [0, 7], sizes = [2, 1], strides = [1, 1]} : vector<2x10xf32> to vector<2x1xf32>
    %153 = vector.extract_strided_slice %22 {offsets = [0, 7], sizes = [2, 1], strides = [1, 1]} : vector<2x10xf32> to vector<2x1xf32>
    %154 = vector.shape_cast %151 : vector<1x1024xi1> to vector<1x1024xi1>
    %155 = vector.broadcast %154 : vector<1x1024xi1> to vector<2x1024xi1>
    %156 = vector.shape_cast %152 : vector<2x1xf32> to vector<2x1xf32>
    %157 = vector.broadcast %156 : vector<2x1xf32> to vector<2x1024xf32>
    %158 = vector.shape_cast %153 : vector<2x1xf32> to vector<2x1xf32>
    %159 = vector.broadcast %158 : vector<2x1xf32> to vector<2x1024xf32>
    %160 = arith.select %155, %157, %159 : vector<2x1024xi1>, vector<2x1024xf32>
    %161 = arith.mulf %144, %160 : vector<2x1024xf32>
    %162 = arith.addi %145, %149 : vector<1x1024xi32>
    %c1_i32_31 = arith.constant 1 : i32
    %163 = vector.broadcast %c1_i32_31 : i32 to vector<1x1024xi32>
    %164 = arith.shrsi %24, %163 : vector<1x1024xi32>
    %c1_i32_32 = arith.constant 1 : i32
    %165 = vector.broadcast %c1_i32_32 : i32 to vector<1x1024xi32>
    %166 = arith.andi %164, %165 : vector<1x1024xi32>
    %c1_i32_33 = arith.constant 1 : i32
    %167 = vector.broadcast %c1_i32_33 : i32 to vector<1x1024xi32>
    %168 = arith.cmpi eq, %166, %167 : vector<1x1024xi32>
    %169 = vector.extract_strided_slice %23 {offsets = [0, 8], sizes = [2, 1], strides = [1, 1]} : vector<2x10xf32> to vector<2x1xf32>
    %170 = vector.extract_strided_slice %22 {offsets = [0, 8], sizes = [2, 1], strides = [1, 1]} : vector<2x10xf32> to vector<2x1xf32>
    %171 = vector.shape_cast %168 : vector<1x1024xi1> to vector<1x1024xi1>
    %172 = vector.broadcast %171 : vector<1x1024xi1> to vector<2x1024xi1>
    %173 = vector.shape_cast %169 : vector<2x1xf32> to vector<2x1xf32>
    %174 = vector.broadcast %173 : vector<2x1xf32> to vector<2x1024xf32>
    %175 = vector.shape_cast %170 : vector<2x1xf32> to vector<2x1xf32>
    %176 = vector.broadcast %175 : vector<2x1xf32> to vector<2x1024xf32>
    %177 = arith.select %172, %174, %176 : vector<2x1024xi1>, vector<2x1024xf32>
    %178 = arith.mulf %161, %177 : vector<2x1024xf32>
    %179 = arith.addi %162, %166 : vector<1x1024xi32>
    %c0_i32_34 = arith.constant 0 : i32
    %180 = vector.broadcast %c0_i32_34 : i32 to vector<1x1024xi32>
    %181 = arith.shrsi %24, %180 : vector<1x1024xi32>
    %c1_i32_35 = arith.constant 1 : i32
    %182 = vector.broadcast %c1_i32_35 : i32 to vector<1x1024xi32>
    %183 = arith.andi %181, %182 : vector<1x1024xi32>
    %c1_i32_36 = arith.constant 1 : i32
    %184 = vector.broadcast %c1_i32_36 : i32 to vector<1x1024xi32>
    %185 = arith.cmpi eq, %183, %184 : vector<1x1024xi32>
    %186 = vector.extract_strided_slice %23 {offsets = [0, 9], sizes = [2, 1], strides = [1, 1]} : vector<2x10xf32> to vector<2x1xf32>
    %187 = vector.extract_strided_slice %22 {offsets = [0, 9], sizes = [2, 1], strides = [1, 1]} : vector<2x10xf32> to vector<2x1xf32>
    %188 = vector.shape_cast %185 : vector<1x1024xi1> to vector<1x1024xi1>
    %189 = vector.broadcast %188 : vector<1x1024xi1> to vector<2x1024xi1>
    %190 = vector.shape_cast %186 : vector<2x1xf32> to vector<2x1xf32>
    %191 = vector.broadcast %190 : vector<2x1xf32> to vector<2x1024xf32>
    %192 = vector.shape_cast %187 : vector<2x1xf32> to vector<2x1xf32>
    %193 = vector.broadcast %192 : vector<2x1xf32> to vector<2x1024xf32>
    %194 = arith.select %189, %191, %193 : vector<2x1024xi1>, vector<2x1024xf32>
    %195 = arith.mulf %178, %194 : vector<2x1024xf32>
    %196 = arith.addi %179, %183 : vector<1x1024xi32>
    %c3_i32_37 = arith.constant 3 : i32
    %197 = vector.broadcast %c3_i32_37 : i32 to vector<1x1024xi32>
    %198 = arith.andi %196, %197 : vector<1x1024xi32>
    %c0_i32_38 = arith.constant 0 : i32
    %199 = vector.broadcast %c0_i32_38 : i32 to vector<1x1024xi32>
    %200 = arith.cmpi eq, %198, %199 : vector<1x1024xi32>
    %c2_i32_39 = arith.constant 2 : i32
    %201 = vector.broadcast %c2_i32_39 : i32 to vector<1x1024xi32>
    %202 = arith.cmpi eq, %198, %201 : vector<1x1024xi32>
    %cst_40 = arith.constant -1.000000e+00 : f32
    %cst_41 = arith.constant 0.000000e+00 : f32
    %203 = vector.broadcast %cst_40 : f32 to vector<1x1024xf32>
    %204 = vector.broadcast %cst_41 : f32 to vector<1x1024xf32>
    %205 = arith.select %202, %203, %204 : vector<1x1024xi1>, vector<1x1024xf32>
    %cst_42 = arith.constant 1.000000e+00 : f32
    %206 = vector.broadcast %cst_42 : f32 to vector<1x1024xf32>
    %207 = arith.select %200, %206, %205 : vector<1x1024xi1>, vector<1x1024xf32>
    %c1_i32_43 = arith.constant 1 : i32
    %208 = vector.broadcast %c1_i32_43 : i32 to vector<1x1024xi32>
    %209 = arith.cmpi eq, %198, %208 : vector<1x1024xi32>
    %c3_i32_44 = arith.constant 3 : i32
    %210 = vector.broadcast %c3_i32_44 : i32 to vector<1x1024xi32>
    %211 = arith.cmpi eq, %198, %210 : vector<1x1024xi32>
    %cst_45 = arith.constant 1.000000e+00 : f32
    %cst_46 = arith.constant 0.000000e+00 : f32
    %212 = vector.broadcast %cst_45 : f32 to vector<1x1024xf32>
    %213 = vector.broadcast %cst_46 : f32 to vector<1x1024xf32>
    %214 = arith.select %211, %212, %213 : vector<1x1024xi1>, vector<1x1024xf32>
    %cst_47 = arith.constant -1.000000e+00 : f32
    %215 = vector.broadcast %cst_47 : f32 to vector<1x1024xf32>
    %216 = arith.select %209, %215, %214 : vector<1x1024xi1>, vector<1x1024xf32>
    %217 = vector.broadcast %207 : vector<1x1024xf32> to vector<2x1024xf32>
    %218 = arith.mulf %195, %217 : vector<2x1024xf32>
    %219 = vector.broadcast %216 : vector<1x1024xf32> to vector<2x1024xf32>
    %220 = arith.mulf %195, %219 : vector<2x1024xf32>
    %c0_48 = arith.constant 0 : index
    %c0_49 = arith.constant 0 : index
    %221 = vector.load %arg6[%c0_48, %c0_49] : memref<1024x256xf32, #tpu.memory_space<vmem>>, vector<1024x256xf32>
    %c0_50 = arith.constant 0 : index
    %c0_51 = arith.constant 0 : index
    %222 = vector.load %arg7[%c0_50, %c0_51] : memref<1024x256xf32, #tpu.memory_space<vmem>>, vector<1024x256xf32>
    %cst_52 = arith.constant dense<0.000000e+00> : vector<2x256xf32>
    %223 = tpu.matmul %218, %221, %cst_52 {dimension_numbers = #tpu.dot_dimension_numbers<[1], [0], [0], [1], [0, 0, 1, 1], [], []>} : vector<2x1024xf32>, vector<1024x256xf32>, vector<2x256xf32> -> vector<2x256xf32>
    %cst_53 = arith.constant dense<0.000000e+00> : vector<2x256xf32>
    %224 = tpu.matmul %220, %222, %cst_53 {dimension_numbers = #tpu.dot_dimension_numbers<[1], [0], [0], [1], [0, 0, 1, 1], [], []>} : vector<2x1024xf32>, vector<1024x256xf32>, vector<2x256xf32> -> vector<2x256xf32>
    %225 = arith.subf %223, %224 : vector<2x256xf32>
    %cst_54 = arith.constant dense<0.000000e+00> : vector<2x256xf32>
    %226 = tpu.matmul %218, %222, %cst_54 {dimension_numbers = #tpu.dot_dimension_numbers<[1], [0], [0], [1], [0, 0, 1, 1], [], []>} : vector<2x1024xf32>, vector<1024x256xf32>, vector<2x256xf32> -> vector<2x256xf32>
    %cst_55 = arith.constant dense<0.000000e+00> : vector<2x256xf32>
    %227 = tpu.matmul %220, %221, %cst_55 {dimension_numbers = #tpu.dot_dimension_numbers<[1], [0], [0], [1], [0, 0, 1, 1], [], []>} : vector<2x1024xf32>, vector<1024x256xf32>, vector<2x256xf32> -> vector<2x256xf32>
    %228 = arith.addf %226, %227 : vector<2x256xf32>
    %229 = arith.mulf %225, %225 : vector<2x256xf32>
    %230 = arith.mulf %228, %228 : vector<2x256xf32>
    %231 = arith.addf %229, %230 : vector<2x256xf32>
    %c0_56 = arith.constant 0 : index
    %c0_57 = arith.constant 0 : index
    %232 = vector.load %arg8[%c0_56, %c0_57] : memref<256x128xf32, #tpu.memory_space<vmem>>, vector<256x128xf32>
    %cst_58 = arith.constant dense<0.000000e+00> : vector<2x128xf32>
    %233 = tpu.matmul %231, %232, %cst_58 {dimension_numbers = #tpu.dot_dimension_numbers<[1], [0], [0], [1], [0, 0, 1, 1], [], []>} : vector<2x256xf32>, vector<256x128xf32>, vector<2x128xf32> -> vector<2x128xf32>
    %c0_59 = arith.constant 0 : index
    %c0_60 = arith.constant 0 : index
    %c0_61 = arith.constant 0 : index
    %234 = vector.load %arg9[%c0_59, %c0_60, %c0_61] : memref<1x2x128xf32, #tpu.memory_space<vmem>>, vector<1x2x128xf32>
    %235 = vector.shape_cast %234 : vector<1x2x128xf32> to vector<2x128xf32>
    %236 = vector.shape_cast %233 : vector<2x128xf32> to vector<1x2x128xf32>
    tpu.vector_store %arg9[%c0_59, %c0_60, %c0_61], %236 {strides = array<i32>} : memref<1x2x128xf32, #tpu.memory_space<vmem>>, vector<1x2x128xf32>,
    return
  }
  func.func @transform_0(%arg0: i32) -> (i32, i32) {
    %c0_i32 = arith.constant 0 : i32
    %c0_i32_0 = arith.constant 0 : i32
    %c0_i32_1 = arith.constant 0 : i32
    return %c0_i32, %c0_i32_0 : i32, i32
  }
  func.func @transform_1(%arg0: i32) -> (i32, i32) {
    %c0_i32 = arith.constant 0 : i32
    %c0_i32_0 = arith.constant 0 : i32
    %c0_i32_1 = arith.constant 0 : i32
    return %c0_i32, %c0_i32_0 : i32, i32
  }
  func.func @transform_2(%arg0: i32) -> (i32, i32) {
    %c0_i32 = arith.constant 0 : i32
    %c0_i32_0 = arith.constant 0 : i32
    %c0_i32_1 = arith.constant 0 : i32
    return %c0_i32, %c0_i32_0 : i32, i32
  }
  func.func @transform_3(%arg0: i32) -> (i32, i32) {
    %c0_i32 = arith.constant 0 : i32
    %c0_i32_0 = arith.constant 0 : i32
    %c0_i32_1 = arith.constant 0 : i32
    return %c0_i32, %c0_i32_0 : i32, i32
  }
  func.func @transform_4(%arg0: i32) -> (i32, i32) {
    %c0_i32 = arith.constant 0 : i32
    %c0_i32_0 = arith.constant 0 : i32
    %c0_i32_1 = arith.constant 0 : i32
    return %c0_i32, %c0_i32_0 : i32, i32
  }
  func.func @transform_5(%arg0: i32) -> (i32, i32) {
    %c0_i32 = arith.constant 0 : i32
    %c0_i32_0 = arith.constant 0 : i32
    return %c0_i32, %arg0 : i32, i32
  }
  func.func @transform_6(%arg0: i32) -> (i32, i32) {
    %c0_i32 = arith.constant 0 : i32
    %c0_i32_0 = arith.constant 0 : i32
    return %c0_i32, %arg0 : i32, i32
  }
  func.func @transform_7(%arg0: i32) -> (i32, i32) {
    %c0_i32 = arith.constant 0 : i32
    %c0_i32_0 = arith.constant 0 : i32
    return %arg0, %c0_i32 : i32, i32
  }
  func.func @transform_8(%arg0: i32) -> (i32, i32, i32) {
    %c0_i32 = arith.constant 0 : i32
    %c0_i32_0 = arith.constant 0 : i32
    %c0_i32_1 = arith.constant 0 : i32
    return %arg0, %c0_i32, %c0_i32_0 : i32, i32, i32
  }
}

</mosaic_0001>

<bundles_post_ra>
// kernel: hybrid_forward.3
= control target key start
LH: loop header
LB: loop body
LE: loop exit
PB: predicated region body
PF: predicated region fallthrough
CT: control target
= control target key end

     0   :  { %vm31_vm0 = vcmask 1040384   ;;  %v894_v0 = vmov 0.0|0.0   ;;  %v895_v4 = vmov 0.0   ;;  %vm896_vm1 = vmmov 0   ;;  %s1145_s1 = inlined_call_operand.vmem [shape: f32[4,25,288], index: 1, kind: input, shape index: {}]   ;;  %s1146_s0 = inlined_call_operand.vmem [shape: f32[6,25], index: 0, kind: input, shape index: {}]   ;;  %s1147_s2 = inlined_call_operand.vmem [shape: f32[6,1], index: 2, kind: input, shape index: {}]   ;;  %s1148_s3 = inlined_call_operand.vmem [shape: f32[6,288], index: 3, kind: output, shape index: {}]  }
   0x1   :  { %830 = vmatprep.subr.bf16.mxu1 %v894_v0  ;;  %v16_v1 = vld [vmem:[%s1145_s1 + $0x8] sm:$0xff]  ;;  %v19_v2 = vld [vmem:[%s1145_s1 + $0x20] sm:$0xff]  ;;  %v17_v3 = vld [vmem:[%s1145_s1 + $0x10] sm:$0xff]  ;;  %105 = vmatprep.mubr.f32.mxu0 %v895_v4  ;;  %v897_v9 = vmov 0   ;;  %vm898_vm2 = vmmov 1   ;;  %vm27_vm4 = vcmask 203776  }
   0x2   :  { %v820_v5 = vpack.c.bf16 %v19_v2, %v16_v1  ;;  %v20_v6 = vld [vmem:[%s1145_s1 + $0x28] sm:$0xff]  ;;  %v15_v7 = vld [vmem:[%s1145_s1] sm:$0xff]  ;;  %v18_v8 = vld [vmem:[%s1145_s1 + $0x18] sm:$0xff]  ;;  %784 = vmatprep.mubr.msk.f32.mxu1 %vm896_vm1, %v895_v4  ;;  %893 = vset.pattern.permute.xlu0 %v897_v9  ;;  %vm694_vm5 = vcmask 259072  }
   0x3   :  { %v831_v10 = vpack.c.bf16 %v20_v6, %v17_v3  ;;  %v822_v11 = vpack.c.bf16 %v18_v8, %v15_v7  ;;  %v22_v12 = vld [vmem:[%s1145_s1 + $0x38] sm:$0xff]  ;;  %v25_v13 = vld [vmem:[%s1145_s1 + $0x50] sm:$0x1]  ;;  %vm948_vm3 = vmpackc.low %vm31_vm0, %vm898_vm2 }
   0x4   :  { %821 = vmatprep.subr.bf16.mxu0 %v820_v5  ;;  %v824_v15 = vpack.c.bf16 %v25_v13, %v22_v12  ;;  %v23_v16 = vld [vmem:[%s1145_s1 + $0x40] sm:$0xff]  ;;  %v26_v17 = vld [vmem:[%s1145_s1 + $0x58] sm:$0x1]  ;;  %v21_v18 = vld [vmem:[%s1145_s1 + $0x30] sm:$0xff] }
   0x5   :  { %832 = vmatpush3.bf16.msra.mxu1 %v831_v10  ;;  %823 = vmatpush1.bf16.msra.mxu0 %v822_v11  ;;  %v834_v19 = vpack.c.bf16 %v26_v17, %v23_v16  ;;  %v24_v20 = vld [vmem:[%s1145_s1 + $0x48] sm:$0x1]  ;;  %v709_v23 = vld [vmem:[%s1145_s1 + $0x80] sm:$0xff]  ;;  %v707_v24 = vld [vmem:[%s1145_s1 + $0x70] sm:$0xff] }
   0x6   :  { %v706_v21 = vld [vmem:[%s1145_s1 + $0x68] sm:$0xff]  ;;  %833 = vmatprep.subr.bf16.mxu1 %v894_v0  ;;  %826 = vmatprep.subr.msk.bf16.mxu0 %vm948_vm3, %v824_v15  ;;  %v827_v22 = vpack.c.bf16 %v24_v20, %v21_v18  ;;  %v705_v27 = vld [vmem:[%s1145_s1 + $0x60] sm:$0xff]  ;;  %v708_v28 = vld [vmem:[%s1145_s1 + $0x78] sm:$0xff] }
   0x7   :  { %v710_v25 = vld [vmem:[%s1145_s1 + $0x88] sm:$0xff]  ;;  %v837_v26 = vpack.c.bf16 %v709_v23, %v706_v21  ;;  %v712_v29 = vld [vmem:[%s1145_s1 + $0x98] sm:$0xff]  ;;  %v715_v30 = vld [vmem:[%s1145_s1 + $0xb0] sm:$0x1]  ;;  %v839_v33 = vpack.c.bf16 %v708_v28, %v705_v27 }
   0x8   :  { %v998_v31 = vld [vmem:[%s1146_s0] sm:$0x3f]  ;;  %v848_v32 = vpack.c.bf16 %v710_v25, %v707_v24  ;;  %v841_v35 = vpack.c.bf16 %v715_v30, %v712_v29  ;;  %v716_v36 = vld [vmem:[%s1145_s1 + $0xb8] sm:$0x1]  ;;  %v711_v37 = vld [vmem:[%s1145_s1 + $0x90] sm:$0xff] }
   0x9   :  { %836 = vmatpush3.bf16.msk.msra.mxu1 %vm948_vm3, %v834_v19  ;;  %829 = vmatpush1.bf16.msk.msra.mxu0 %vm948_vm3, %v827_v22  ;;  %v713_v34 = vld [vmem:[%s1145_s1 + $0xa0] sm:$0xff]  ;;  %v714_v38 = vld [vmem:[%s1145_s1 + $0xa8] sm:$0x1]  ;;  %v724_v43 = vld [vmem:[%s1145_s1 + $0xd0] sm:$0xff] }
   0xa   :  { %847 = vmatprep.subr.bf16.mxu1 %v894_v0  ;;  %838 = vmatprep.subr.bf16.mxu0 %v837_v26  ;;  %v723_v39 = vld [vmem:[%s1145_s1 + $0xc8] sm:$0xff]  ;;  %v726_v40 = vld [vmem:[%s1145_s1 + $0xe0] sm:$0xff]  ;;  %v851_v41 = vpack.c.bf16 %v716_v36, %v713_v34  ;;  %v844_v42 = vpack.c.bf16 %v714_v38, %v711_v37  ;;  %v725_v47 = vld [vmem:[%s1145_s1 + $0xd8] sm:$0xff] }
   0xb   :  { %v854_v44 = vpack.c.bf16 %v726_v40, %v723_v39  ;;  %v727_v45 = vld [vmem:[%s1145_s1 + $0xe8] sm:$0xff]  ;;  %v722_v46 = vld [vmem:[%s1145_s1 + $0xc0] sm:$0xff]  ;;  %v729_v48 = vld [vmem:[%s1145_s1 + $0xf8] sm:$0xff] }
   0xc   :  { %702 = vmatmul.mubr.msk.f32.vlgmr.msra.gmra.mrb[0].mxu0 %vm27_vm4, %v998_v31  ;;  %785 = vmatmul.mubr.msk.f32.vlgmr.msra.gmra.mrb[0].mxu1 %vm27_vm4, %v998_v31  ;;  %v732_v49 = vld [vmem:[%s1145_s1 + $0x110] sm:$0x1]  ;;  %v865_v50 = vpack.c.bf16 %v727_v45, %v724_v43  ;;  %v856_v51 = vpack.c.bf16 %v725_v47, %v722_v46  ;;  %v730_v52 = vld [vmem:[%s1145_s1 + $0x100] sm:$0xff]  ;;  %v733_v55 = vld [vmem:[%s1145_s1 + $0x118] sm:$0x1] }
   0xd   :  { %849 = vmatpush3.bf16.msra.mxu1 %v848_v32  ;;  %840 = vmatpush1.bf16.msra.mxu0 %v839_v33  ;;  %v680_v53 = vld [vmem:[%s1147_s2] sm:$0x3f]  ;;  %v858_v54 = vpack.c.bf16 %v732_v49, %v729_v48  ;;  %v728_v56 = vld [vmem:[%s1145_s1 + $0xf0] sm:$0xff]  ;;  %v731_v57 = vld [vmem:[%s1145_s1 + $0x108] sm:$0x1]  ;;  %v868_v60 = vpack.c.bf16 %v733_v55, %v730_v52 }
   0xe   :  { %850 = vmatprep.subr.bf16.mxu1 %v894_v0  ;;  %843 = vmatprep.subr.msk.bf16.mxu0 %vm948_vm3, %v841_v35  ;;  %v740_v58 = vld [vmem:[%s1145_s1 + $0x128] sm:$0xff]  ;;  %v743_v59 = vld [vmem:[%s1145_s1 + $0x140] sm:$0xff]  ;;  %v861_v61 = vpack.c.bf16 %v731_v57, %v728_v56  ;;  %v741_v62 = vld [vmem:[%s1145_s1 + $0x130] sm:$0xff] }
   0xf   :  { %795 = vmatprep.mubr.msk.f32.mxu1 %vm896_vm1, %v895_v4  ;;  %268 = vmatprep.mubr.f32.mxu0 %v895_v4  ;;  %v871_v63 = vpack.c.bf16 %v743_v59, %v740_v58  ;;  %v744_v1 = vld [vmem:[%s1145_s1 + $0x148] sm:$0xff]  ;;  %v739_v2 = vld [vmem:[%s1145_s1 + $0x120] sm:$0xff]  ;;  %v742_v3 = vld [vmem:[%s1145_s1 + $0x138] sm:$0xff] }
  0x10   :  { %683 = vperm.xlu0 %893, %v680_v53   ;;  %v746_v5 = vld [vmem:[%s1145_s1 + $0x158] sm:$0xff]  ;;  %v749_v6 = vld [vmem:[%s1145_s1 + $0x170] sm:$0x1]  ;;  %v882_v7 = vpack.c.bf16 %v744_v1, %v741_v62  ;;  %v873_v8 = vpack.c.bf16 %v742_v3, %v739_v2  ;;  %v747_v9 = vld [vmem:[%s1145_s1 + $0x160] sm:$0xff] }
  0x11   :  { %853 = vmatpush3.bf16.msk.msra.mxu1 %vm948_vm3, %v851_v41  ;;  %846 = vmatpush1.bf16.msk.msra.mxu0 %vm948_vm3, %v844_v42  ;;  %v875_v10 = vpack.c.bf16 %v749_v6, %v746_v5  ;;  %v750_v11 = vld [vmem:[%s1145_s1 + $0x178] sm:$0x1]  ;;  %v745_v12 = vld [vmem:[%s1145_s1 + $0x150] sm:$0xff]  ;;  %v748_v13 = vld [vmem:[%s1145_s1 + $0x168] sm:$0x1] }
  0x12   :  { %864 = vmatprep.subr.bf16.mxu1 %v894_v0  ;;  %855 = vmatprep.subr.bf16.mxu0 %v854_v44  ;;  %v885_v15 = vpack.c.bf16 %v750_v11, %v747_v9  ;;  %v878_v16 = vpack.c.bf16 %v748_v13, %v745_v12 }
  0x14   :  { %796 = vmatmul.mubr.msk.f32.vlgmr.msra.gmra.mrb[2].mxu1 %vm27_vm4, %v998_v31  ;;  %719 = vmatmul.mubr.msk.f32.vlgmr.msra.gmra.mrb[2].mxu0 %vm27_vm4, %v998_v31 }
  0x15   :  { %866 = vmatpush3.bf16.msra.mxu1 %v865_v50  ;;  %857 = vmatpush1.bf16.msra.mxu0 %v856_v51 }
  0x16   :  { %867 = vmatprep.subr.bf16.mxu1 %v894_v0  ;;  %860 = vmatprep.subr.msk.bf16.mxu0 %vm948_vm3, %v858_v54 }
  0x17   :  { %806 = vmatprep.mubr.msk.f32.mxu1 %vm896_vm1, %v895_v4  ;;  %434 = vmatprep.mubr.f32.mxu0 %v895_v4 }
  0x19   :  { %870 = vmatpush3.bf16.msk.msra.mxu1 %vm948_vm3, %v868_v60  ;;  %863 = vmatpush1.bf16.msk.msra.mxu0 %vm948_vm3, %v861_v61 }
  0x1a   :  { %881 = vmatprep.subr.bf16.mxu1 %v894_v0  ;;  %872 = vmatprep.subr.bf16.mxu0 %v871_v63 }
  0x1c   :  { %807 = vmatmul.mubr.msk.f32.vlgmr.msra.gmra.mrb[4].mxu1 %vm27_vm4, %v998_v31  ;;  %736 = vmatmul.mubr.msk.f32.vlgmr.msra.gmra.mrb[4].mxu0 %vm27_vm4, %v998_v31 }
  0x1d   :  { %883 = vmatpush3.bf16.msra.mxu1 %v882_v7  ;;  %874 = vmatpush1.bf16.msra.mxu0 %v873_v8 }
  0x1e   :  { %884 = vmatprep.subr.bf16.mxu1 %v894_v0  ;;  %877 = vmatprep.subr.msk.bf16.mxu0 %vm948_vm3, %v875_v10 }
  0x1f   :  { %817 = vmatprep.mubr.msk.f32.mxu1 %vm896_vm1, %v895_v4  ;;  %600 = vmatprep.mubr.f32.mxu0 %v895_v4 }
  0x21   :  { %887 = vmatpush3.bf16.msk.msra.mxu1 %vm948_vm3, %v885_v15  ;;  %880 = vmatpush1.bf16.msk.msra.mxu0 %vm948_vm3, %v878_v16 }
  0x24   :  { %818 = vmatmul.mubr.msk.f32.vlgmr.msra.gmra.mrb[6].mxu1 %vm27_vm4, %v998_v31  ;;  %753 = vmatmul.mubr.msk.f32.vlgmr.msra.gmra.mrb[6].mxu0 %vm27_vm4, %v998_v31 }
  0x8f   :  { %v684_v33 = vpop.permute.xlu0 %683 }
  0xdf   :  { %v107_v0 = vpop.f32.mrb[0].mxu0  ;;  %v178_v17 = vpop.f32.mrb[0].mxu1 }
  0xe0   :  { %v109_v18 = vpop.f32.mrb[1].mxu0  ;;  %v786_v19 = vpop.f32.mrb[1].mxu1 }
  0xe7   :  { %v341_v20 = vpop.f32.mrb[2].mxu1  ;;  %v270_v21 = vpop.f32.mrb[2].mxu0 }
  0xe8   :  { %v347_v22 = vmax.f32 %v178_v17, %v341_v20  ;;  %v345_v4 = vmax.f32 %v107_v0, %v270_v21  ;;  %v272_v23 = vpop.f32.mrb[3].mxu0  ;;  %v797_v24 = vpop.f32.mrb[3].mxu1 }
  0xe9   :  { %v346_v25 = vmax.f32 %v109_v18, %v272_v23 }
  0xef   :  { %v507_v26 = vpop.f32.mrb[4].mxu1  ;;  %v436_v14 = vpop.f32.mrb[4].mxu0 }
  0xf0   :  { %v513_v27 = vmax.f32 %v347_v22, %v507_v26  ;;  %v511_v28 = vmax.f32 %v345_v4, %v436_v14  ;;  %v438_v29 = vpop.f32.mrb[5].mxu0  ;;  %v808_v30 = vpop.f32.mrb[5].mxu1 }
  0xf1   :  { %v512_v32 = vmax.f32 %v346_v25, %v438_v29 }
  0xf7   :  { %v673_v31 = vpop.f32.mrb[6].mxu1  ;;  %v602_v34 = vpop.f32.mrb[6].mxu0 }
  0xf8   :  { %v679_v35 = vmax.f32 %v513_v27, %v673_v31  ;;  %v677_v36 = vmax.f32 %v511_v28, %v602_v34  ;;  %v604_v37 = vpop.f32.mrb[7].mxu0  ;;  %v819_v38 = vpop.f32.mrb[7].mxu1 }
  0xf9   :  { %v678_v39 = vmax.f32 %v512_v32, %v604_v37 }
  0xfa   :  { %v686_v40 = vadd.f32 %v684_v33, %v677_v36  ;;  %v688_v41 = vadd.f32 %v684_v33, %v679_v35 }
  0xfb   :  { %v687_v42 = vadd.f32 %v684_v33, %v678_v39 }
  0xfc   :  { %v689_v43 = vmax.f32 %v686_v40, 0.0  ;;  %v691_v44 = vmax.f32 %v688_v41, 0.0 }
  0xfd   :  { %v690_v45 = vmax.f32 %v687_v42, 0.0 }
  0xfe   :  { %692 = vst [vmem:[%s1148_s3] sm:$0x3f] %v689_v43  ;;  %695 = vst.msk [vmem:[%s1148_s3 + $0x10] sm:$0x3f] %vm694_vm5, %v691_v44 }
  0xff   :  { %693 = vst [vmem:[%s1148_s3 + $0x8] sm:$0x3f] %v690_v45 }

// kernel: hybrid_forward.4
= control target key start
LH: loop header
LB: loop body
LE: loop exit
PB: predicated region body
PF: predicated region fallthrough
CT: control target
= control target key end

     0   :  { %v627_v0 = vmov 0.0|0.0   ;;  %v628_v8 = vmov 0   ;;  %vm37_vm0 = vcmask 179200   ;;  %v629_v61 = vmov 0.0   ;;  %s978_s1 = inlined_call_operand.vmem [shape: f32[4,150,32], index: 1, kind: input, shape index: {}]   ;;  %s979_s0 = inlined_call_operand.vmem [shape: f32[16,150], index: 0, kind: input, shape index: {}]   ;;  %s980_s2 = inlined_call_operand.vmem [shape: f32[16,1], index: 2, kind: input, shape index: {}]   ;;  %s981_s3 = inlined_call_operand.vmem [shape: f32[16,32], index: 3, kind: output, shape index: {}]  }
   0x1   :  { %515 = vmatprep.subr.bf16.mxu0 %v627_v0  ;;  %v18_v1 = vld [vmem:[%s978_s1] sm:$0xff]  ;;  %v19_v2 = vld [vmem:[%s978_s1 + $0x8] sm:$0xff]  ;;  %542 = vmatprep.subr.bf16.mxu1 %v627_v0  ;;  %v449_v3 = vld [vmem:[%s978_s1 + $0x98] sm:$0xff]  ;;  %vm44_vm1 = vcmask 1045504   ;;  %vm439_vm2 = vcmask 261120  }
   0x2   :  { %v516_v4 = vpack.c.bf16 %v19_v2, %v18_v1  ;;  %v450_v5 = vld [vmem:[%s978_s1 + $0xa0] sm:$0xff]  ;;  %v20_v6 = vld [vmem:[%s978_s1 + $0x10] sm:$0xff]  ;;  %v21_v7 = vld [vmem:[%s978_s1 + $0x18] sm:$0xff]  ;;  %626 = vset.pattern.permute.xlu0 %v628_v8 }
   0x3   :  { %v543_v9 = vpack.c.bf16 %v450_v5, %v449_v3  ;;  %v451_v10 = vld [vmem:[%s978_s1 + $0xa8] sm:$0xff]  ;;  %v452_v11 = vld [vmem:[%s978_s1 + $0xb0] sm:$0xff]  ;;  %v519_v12 = vpack.c.bf16 %v21_v7, %v20_v6  ;;  %v22_v14 = vld [vmem:[%s978_s1 + $0x20] sm:$0xff] }
   0x4   :  { %517 = vmatpush1.bf16.msra.mxu0 %v516_v4  ;;  %v546_v13 = vpack.c.bf16 %v452_v11, %v451_v10  ;;  %v23_v15 = vld [vmem:[%s978_s1 + $0x28] sm:$0xff]  ;;  %v453_v16 = vld [vmem:[%s978_s1 + $0xb8] sm:$0xff]  ;;  %v454_v17 = vld [vmem:[%s978_s1 + $0xc0] sm:$0xff] }
   0x5   :  { %544 = vmatpush1.bf16.msra.mxu1 %v543_v9  ;;  %518 = vmatprep.subr.bf16.mxu0 %v627_v0  ;;  %v522_v18 = vpack.c.bf16 %v23_v15, %v22_v14  ;;  %v549_v19 = vpack.c.bf16 %v454_v17, %v453_v16  ;;  %v24_v20 = vld [vmem:[%s978_s1 + $0x30] sm:$0xff]  ;;  %v25_v21 = vld [vmem:[%s978_s1 + $0x38] sm:$0xff]  ;;  %v455_v22 = vld [vmem:[%s978_s1 + $0xc8] sm:$0xff] }
   0x6   :  { %545 = vmatprep.subr.bf16.mxu1 %v627_v0  ;;  %v456_v23 = vld [vmem:[%s978_s1 + $0xd0] sm:$0xff]  ;;  %v525_v24 = vpack.c.bf16 %v25_v21, %v24_v20  ;;  %v26_v26 = vld [vmem:[%s978_s1 + $0x40] sm:$0xff]  ;;  %v27_v27 = vld [vmem:[%s978_s1 + $0x48] sm:$0xff] }
   0x7   :  { %v552_v25 = vpack.c.bf16 %v456_v23, %v455_v22  ;;  %v714_v28 = vld [vmem:[%s979_s0 + $0x8] sm:$0xff]  ;;  %v457_v29 = vld [vmem:[%s978_s1 + $0xd8] sm:$0xff]  ;;  %v458_v30 = vld [vmem:[%s978_s1 + $0xe0] sm:$0xff]  ;;  %v528_v31 = vpack.c.bf16 %v27_v27, %v26_v26 }
   0x8   :  { %520 = vmatpush1.bf16.msra.mxu0 %v519_v12  ;;  %447 = vmatprep.mubr.msk.f32.mxu0 %vm37_vm0, %v714_v28  ;;  %v555_v32 = vpack.c.bf16 %v458_v30, %v457_v29  ;;  %v28_v33 = vld [vmem:[%s978_s1 + $0x50] sm:$0xff]  ;;  %v29_v34 = vld [vmem:[%s978_s1 + $0x58] sm:$0xff]  ;;  %v459_v35 = vld [vmem:[%s978_s1 + $0xe8] sm:$0xff] }
   0x9   :  { %547 = vmatpush1.bf16.msra.mxu1 %v546_v13  ;;  %521 = vmatprep.subr.bf16.mxu0 %v627_v0  ;;  %v460_v36 = vld [vmem:[%s978_s1 + $0xf0] sm:$0xff]  ;;  %v531_v37 = vpack.c.bf16 %v29_v34, %v28_v33  ;;  %v30_v39 = vld [vmem:[%s978_s1 + $0x60] sm:$0xff]  ;;  %v31_v40 = vld [vmem:[%s978_s1 + $0x68] sm:$0xff] }
   0xa   :  { %548 = vmatprep.subr.bf16.mxu1 %v627_v0  ;;  %469 = vmatprep.mubr.msk.f32.mxu1 %vm37_vm0, %v714_v28  ;;  %v558_v38 = vpack.c.bf16 %v460_v36, %v459_v35  ;;  %v461_v41 = vld [vmem:[%s978_s1 + $0xf8] sm:$0xff]  ;;  %v462_v42 = vld [vmem:[%s978_s1 + $0x100] sm:$0xff]  ;;  %v534_v43 = vpack.c.bf16 %v31_v40, %v30_v39  ;;  %v32_v45 = vld [vmem:[%s978_s1 + $0x70] sm:$0xff] }
   0xb   :  { %v561_v44 = vpack.c.bf16 %v462_v42, %v461_v41  ;;  %v33_v46 = vld [vmem:[%s978_s1 + $0x78] sm:$0xff]  ;;  %v463_v47 = vld [vmem:[%s978_s1 + $0x108] sm:$0xff]  ;;  %v464_v48 = vld [vmem:[%s978_s1 + $0x110] sm:$0xff] }
   0xc   :  { %523 = vmatpush1.bf16.msra.mxu0 %v522_v18  ;;  %v423_v49 = vld [vmem:[%s980_s2] sm:$0xff]  ;;  %v537_v50 = vpack.c.bf16 %v33_v46, %v32_v45  ;;  %v564_v51 = vpack.c.bf16 %v464_v48, %v463_v47  ;;  %v35_v53 = vld [vmem:[%s978_s1 + $0x88] sm:$0xff]  ;;  %v465_v55 = vld [vmem:[%s978_s1 + $0x118] sm:$0xff] }
   0xd   :  { %550 = vmatpush1.bf16.msra.mxu1 %v549_v19  ;;  %524 = vmatprep.subr.bf16.mxu0 %v627_v0  ;;  %v34_v52 = vld [vmem:[%s978_s1 + $0x80] sm:$0xff]  ;;  %v424_v54 = vld [vmem:[%s980_s2 + $0x8] sm:$0xff]  ;;  %v471_v59 = vld [vmem:[%s978_s1 + $0x130] sm:$0xff] }
   0xe   :  { %551 = vmatprep.subr.bf16.mxu1 %v627_v0  ;;  %427 = vperm.xlu0 %626, %v423_v49   ;;  %v466_v56 = vld [vmem:[%s978_s1 + $0x120] sm:$0xff]  ;;  %v540_v57 = vpack.c.bf16 %v35_v53, %v34_v52  ;;  %v472_v60 = vld [vmem:[%s978_s1 + $0x138] sm:$0xff]  ;;  %v36_v62 = vld [vmem:[%s978_s1 + $0x90] sm:$0x3f] }
   0xf   :  { %v567_v58 = vpack.c.bf16 %v466_v56, %v465_v55  ;;  %v493_v63 = vld [vmem:[%s978_s1 + $0x1c8] sm:$0xff]  ;;  %v494_v1 = vld [vmem:[%s978_s1 + $0x1d0] sm:$0xff]  ;;  %v811_v2 = vld [vmem:[%s979_s0] sm:$0xff]  ;;  %v570_v4 = vpack.c.bf16 %v472_v60, %v471_v59 }
  0x10   :  { %526 = vmatpush1.bf16.msra.mxu0 %v525_v24  ;;  %v467_v3 = vld [vmem:[%s978_s1 + $0x128] sm:$0x3f]  ;;  %v597_v5 = vpack.c.bf16 %v494_v1, %v493_v63  ;;  %v473_v6 = vld [vmem:[%s978_s1 + $0x140] sm:$0xff]  ;;  %v495_v8 = vld [vmem:[%s978_s1 + $0x1d8] sm:$0xff] }
  0x11   :  { %553 = vmatpush1.bf16.msra.mxu1 %v552_v25  ;;  %527 = vmatprep.subr.bf16.mxu0 %v627_v0  ;;  %v474_v7 = vld [vmem:[%s978_s1 + $0x148] sm:$0xff]  ;;  %v496_v9 = vld [vmem:[%s978_s1 + $0x1e0] sm:$0xff]  ;;  %v836_v10 = vld [vmem:[%s979_s0 + $0x18] sm:$0xff] }
  0x12   :  { %554 = vmatprep.subr.bf16.mxu1 %v627_v0  ;;  %432 = vperm.xlu0 %626, %v424_v54   ;;  %v573_v11 = vpack.c.bf16 %v474_v7, %v473_v6  ;;  %v842_v12 = vld [vmem:[%s979_s0 + $0x10] sm:$0xff]  ;;  %v600_v13 = vpack.c.bf16 %v496_v9, %v495_v8  ;;  %v476_v15 = vld [vmem:[%s978_s1 + $0x158] sm:$0xff]  ;;  %v497_v16 = vld [vmem:[%s978_s1 + $0x1e8] sm:$0xff] }
  0x13   :  { %v475_v14 = vld [vmem:[%s978_s1 + $0x150] sm:$0xff]  ;;  %v477_v20 = vld [vmem:[%s978_s1 + $0x160] sm:$0xff]  ;;  %v478_v21 = vld [vmem:[%s978_s1 + $0x168] sm:$0xff] }
  0x14   :  { %529 = vmatpush1.bf16.msra.mxu0 %v528_v31  ;;  %v498_v17 = vld [vmem:[%s978_s1 + $0x1f0] sm:$0xff]  ;;  %v576_v18 = vpack.c.bf16 %v476_v15, %v475_v14  ;;  %v499_v22 = vld [vmem:[%s978_s1 + $0x1f8] sm:$0xff]  ;;  %v500_v23 = vld [vmem:[%s978_s1 + $0x200] sm:$0xff]  ;;  %v579_v24 = vpack.c.bf16 %v478_v21, %v477_v20 }
  0x15   :  { %556 = vmatpush1.bf16.msra.mxu1 %v555_v32  ;;  %530 = vmatprep.subr.bf16.mxu0 %v627_v0  ;;  %v603_v19 = vpack.c.bf16 %v498_v17, %v497_v16  ;;  %v606_v25 = vpack.c.bf16 %v500_v23, %v499_v22  ;;  %v479_v26 = vld [vmem:[%s978_s1 + $0x170] sm:$0xff]  ;;  %v480_v27 = vld [vmem:[%s978_s1 + $0x178] sm:$0xff]  ;;  %v481_v32 = vld [vmem:[%s978_s1 + $0x180] sm:$0xff] }
  0x16   :  { %557 = vmatprep.subr.bf16.mxu1 %v627_v0  ;;  %v502_v29 = vld [vmem:[%s978_s1 + $0x210] sm:$0xff]  ;;  %v582_v30 = vpack.c.bf16 %v480_v27, %v479_v26  ;;  %v482_v33 = vld [vmem:[%s978_s1 + $0x188] sm:$0xff]  ;;  %v503_v34 = vld [vmem:[%s978_s1 + $0x218] sm:$0xff] }
  0x17   :  { %v504_v35 = vld [vmem:[%s978_s1 + $0x220] sm:$0xff]  ;;  %v585_v36 = vpack.c.bf16 %v482_v33, %v481_v32  ;;  %v484_v39 = vld [vmem:[%s978_s1 + $0x198] sm:$0xff]  ;;  %v505_v40 = vld [vmem:[%s978_s1 + $0x228] sm:$0xff] }
  0x18   :  { %532 = vmatpush1.bf16.msra.mxu0 %v531_v37  ;;  %v612_v37 = vpack.c.bf16 %v504_v35, %v503_v34  ;;  %v506_v41 = vld [vmem:[%s978_s1 + $0x230] sm:$0xff]  ;;  %v486_v45 = vld [vmem:[%s978_s1 + $0x1a8] sm:$0xff]  ;;  %v507_v46 = vld [vmem:[%s978_s1 + $0x238] sm:$0xff] }
  0x19   :  { %559 = vmatpush1.bf16.msra.mxu1 %v558_v38  ;;  %533 = vmatprep.subr.bf16.mxu0 %v627_v0  ;;  %v483_v38 = vld [vmem:[%s978_s1 + $0x190] sm:$0xff]  ;;  %v508_v47 = vld [vmem:[%s978_s1 + $0x240] sm:$0xff]  ;;  %v509_v52 = vld [vmem:[%s978_s1 + $0x248] sm:$0xff] }
  0x1a   :  { %560 = vmatprep.subr.bf16.mxu1 %v627_v0  ;;  %v588_v42 = vpack.c.bf16 %v484_v39, %v483_v38  ;;  %v618_v49 = vpack.c.bf16 %v508_v47, %v507_v46  ;;  %v510_v53 = vld [vmem:[%s978_s1 + $0x250] sm:$0xff]  ;;  %v489_v56 = vld [vmem:[%s978_s1 + $0x1c0] sm:$0x3f] }
  0x1b   :  { %v621_v55 = vpack.c.bf16 %v510_v53, %v509_v52 }
  0x1c   :  { %535 = vmatpush1.bf16.msra.mxu0 %v534_v43  ;;  %v615_v43 = vpack.c.bf16 %v506_v41, %v505_v40 }
  0x1d   :  { %562 = vmatpush1.bf16.msra.mxu1 %v561_v44  ;;  %536 = vmatprep.subr.bf16.mxu0 %v627_v0  ;;  %v485_v44 = vld [vmem:[%s978_s1 + $0x1a0] sm:$0xff] }
  0x1e   :  { %563 = vmatprep.subr.bf16.mxu1 %v627_v0  ;;  %v591_v48 = vpack.c.bf16 %v486_v45, %v485_v44 }
  0x20   :  { %538 = vmatpush1.bf16.msra.mxu0 %v537_v50  ;;  %v487_v50 = vld [vmem:[%s978_s1 + $0x1b0] sm:$0xff] }
  0x21   :  { %565 = vmatpush1.bf16.msra.mxu1 %v564_v51  ;;  %539 = vmatprep.subr.bf16.mxu0 %v627_v0  ;;  %v488_v51 = vld [vmem:[%s978_s1 + $0x1b8] sm:$0xff] }
  0x22   :  { %566 = vmatprep.subr.bf16.mxu1 %v627_v0  ;;  %v594_v54 = vpack.c.bf16 %v488_v51, %v487_v50 }
  0x24   :  { %541 = vmatpush1.bf16.msra.mxu0 %v540_v57  ;;  %v511_v57 = vld [vmem:[%s978_s1 + $0x258] sm:$0x3f] }
  0x25   :  { %568 = vmatpush1.bf16.msra.mxu1 %v567_v58  ;;  %84 = vmatprep.subr.mxu0 %v629_v61 }
  0x26   :  { %182 = vmatprep.subr.mxu1 %v629_v61 }
  0x28   :  { %446 = vmatpush1.msk.msra.mxu0 %vm44_vm1, %v36_v62 }
  0x29   :  { %113 = vmatmul.mubr.f32.vlgmr.msra.gmra.mrb[0].mxu0 %v811_v2  ;;  %468 = vmatpush1.msk.msra.mxu1 %vm44_vm1, %v467_v3 }
  0x2a   :  { %569 = vmatprep.subr.bf16.mxu0 %v627_v0  ;;  %211 = vmatmul.mubr.f32.vlgmr.msra.gmra.mrb[0].mxu1 %v811_v2 }
  0x2b   :  { %571 = vmatpush1.bf16.msra.mxu0 %v570_v4  ;;  %596 = vmatprep.subr.bf16.mxu1 %v627_v0 }
  0x2c   :  { %598 = vmatpush1.bf16.msra.mxu1 %v597_v5  ;;  %572 = vmatprep.subr.bf16.mxu0 %v627_v0 }
  0x2d   :  { %599 = vmatprep.subr.bf16.mxu1 %v627_v0  ;;  %448 = vmatprep.mubr.msk.f32.mxu0 %vm37_vm0, %v836_v10 }
  0x2e   :  { %118 = vmatmul.mubr.f32.gmra.mrb[2].mxu0 %v842_v12  ;;  %470 = vmatprep.mubr.msk.f32.mxu1 %vm37_vm0, %v836_v10 }
  0x2f   :  { %574 = vmatpush1.bf16.msra.mxu0 %v573_v11  ;;  %216 = vmatmul.mubr.f32.gmra.mrb[2].mxu1 %v842_v12 }
  0x30   :  { %601 = vmatpush1.bf16.msra.mxu1 %v600_v13  ;;  %575 = vmatprep.subr.bf16.mxu0 %v627_v0 }
  0x31   :  { %602 = vmatprep.subr.bf16.mxu1 %v627_v0  ;;  %491 = vmatprep.mubr.msk.f32.mxu0 %vm37_vm0, %v714_v28 }
  0x32   :  { %513 = vmatprep.mubr.msk.f32.mxu1 %vm37_vm0, %v714_v28  ;;  %v501_v28 = vld [vmem:[%s978_s1 + $0x208] sm:$0xff] }
  0x33   :  { %577 = vmatpush1.bf16.msra.mxu0 %v576_v18  ;;  %v609_v31 = vpack.c.bf16 %v502_v29, %v501_v28 }
  0x34   :  { %604 = vmatpush1.bf16.msra.mxu1 %v603_v19  ;;  %578 = vmatprep.subr.bf16.mxu0 %v627_v0 }
  0x35   :  { %605 = vmatprep.subr.bf16.mxu1 %v627_v0 }
  0x37   :  { %580 = vmatpush1.bf16.msra.mxu0 %v579_v24 }
  0x38   :  { %607 = vmatpush1.bf16.msra.mxu1 %v606_v25  ;;  %581 = vmatprep.subr.bf16.mxu0 %v627_v0 }
  0x39   :  { %608 = vmatprep.subr.bf16.mxu1 %v627_v0 }
  0x3b   :  { %583 = vmatpush1.bf16.msra.mxu0 %v582_v30 }
  0x3c   :  { %610 = vmatpush1.bf16.msra.mxu1 %v609_v31  ;;  %584 = vmatprep.subr.bf16.mxu0 %v627_v0 }
  0x3d   :  { %611 = vmatprep.subr.bf16.mxu1 %v627_v0 }
  0x3f   :  { %586 = vmatpush1.bf16.msra.mxu0 %v585_v36 }
  0x40   :  { %613 = vmatpush1.bf16.msra.mxu1 %v612_v37  ;;  %587 = vmatprep.subr.bf16.mxu0 %v627_v0 }
  0x41   :  { %614 = vmatprep.subr.bf16.mxu1 %v627_v0 }
  0x43   :  { %589 = vmatpush1.bf16.msra.mxu0 %v588_v42 }
  0x44   :  { %616 = vmatpush1.bf16.msra.mxu1 %v615_v43  ;;  %590 = vmatprep.subr.bf16.mxu0 %v627_v0 }
  0x45   :  { %617 = vmatprep.subr.bf16.mxu1 %v627_v0 }
  0x47   :  { %592 = vmatpush1.bf16.msra.mxu0 %v591_v48 }
  0x48   :  { %619 = vmatpush1.bf16.msra.mxu1 %v618_v49  ;;  %593 = vmatprep.subr.bf16.mxu0 %v627_v0 }
  0x49   :  { %620 = vmatprep.subr.bf16.mxu1 %v627_v0 }
  0x4b   :  { %595 = vmatpush1.bf16.msra.mxu0 %v594_v54 }
  0x4c   :  { %622 = vmatpush1.bf16.msra.mxu1 %v621_v55  ;;  %282 = vmatprep.subr.mxu0 %v629_v61 }
  0x4d   :  { %382 = vmatprep.subr.mxu1 %v629_v61 }
  0x4f   :  { %490 = vmatpush1.msk.msra.mxu0 %vm44_vm1, %v489_v56 }
  0x50   :  { %311 = vmatmul.mubr.f32.vlgmr.msra.gmra.mrb[4].mxu0 %v811_v2  ;;  %512 = vmatpush1.msk.msra.mxu1 %vm44_vm1, %v511_v57 }
  0x51   :  { %411 = vmatmul.mubr.f32.vlgmr.msra.gmra.mrb[4].mxu1 %v811_v2  ;;  %492 = vmatprep.mubr.msk.f32.mxu0 %vm37_vm0, %v836_v10 }
  0x52   :  { %514 = vmatprep.mubr.msk.f32.mxu1 %vm37_vm0, %v836_v10 }
  0x54   :  { %316 = vmatmul.mubr.f32.gmra.mrb[6].mxu0 %v842_v12 }
  0x55   :  { %416 = vmatmul.mubr.f32.gmra.mrb[6].mxu1 %v842_v12 }
  0x8d   :  { %v428_v8 = vpop.permute.xlu0 %427 }
  0x91   :  { %v433_v19 = vpop.permute.xlu0 %432 }
  0xfc   :  { %v114_v0 = vpop.f32.mrb[0].mxu0 }
  0xfd   :  { %v116_v58 = vpop.f32.mrb[1].mxu0  ;;  %v212_v59 = vpop.f32.mrb[0].mxu1 }
  0xfe   :  { %v221_v60 = vmax.f32 %v114_v0, %v212_v59  ;;  %v214_v61 = vpop.f32.mrb[1].mxu1 }
 0x101   :  { %v119_v62 = vpop.f32.mrb[2].mxu0 }
 0x102   :  { %v121_v63 = vpop.f32.mrb[3].mxu0  ;;  %v217_v1 = vpop.f32.mrb[2].mxu1 }
 0x103   :  { %v222_v3 = vmax.f32 %v119_v62, %v217_v1  ;;  %v219_v2 = vpop.f32.mrb[3].mxu1 }
 0x123   :  { %v312_v4 = vpop.f32.mrb[4].mxu0 }
 0x124   :  { %v321_v5 = vmax.f32 %v221_v60, %v312_v4  ;;  %v314_v6 = vpop.f32.mrb[5].mxu0  ;;  %v412_v7 = vpop.f32.mrb[4].mxu1 }
 0x125   :  { %v414_v9 = vpop.f32.mrb[5].mxu1 }
 0x126   :  { %v421_v10 = vmax.f32 %v321_v5, %v412_v7 }
 0x127   :  { %v317_v11 = vpop.f32.mrb[6].mxu0 }
 0x128   :  { %v435_v13 = vadd.f32 %v428_v8, %v421_v10  ;;  %v322_v12 = vmax.f32 %v222_v3, %v317_v11  ;;  %v319_v14 = vpop.f32.mrb[7].mxu0  ;;  %v417_v15 = vpop.f32.mrb[6].mxu1 }
 0x129   :  { %v419_v16 = vpop.f32.mrb[7].mxu1 }
 0x12a   :  { %v437_v17 = vmax.f32 %v435_v13, 0.0  ;;  %v422_v18 = vmax.f32 %v322_v12, %v417_v15 }
 0x12c   :  { %440 = vst.msk [vmem:[%s981_s3] sm:$0xff] %vm439_vm2, %v437_v17  ;;  %v436_v20 = vadd.f32 %v433_v19, %v422_v18 }
 0x12e   :  { %v438_v21 = vmax.f32 %v436_v20, 0.0 }
 0x130   :  { %441 = vst.msk [vmem:[%s981_s3 + $0x8] sm:$0xff] %vm439_vm2, %v438_v21 }

// kernel: hybrid_forward.5
= control target key start
LH: loop header
LB: loop body
LE: loop exit
PB: predicated region body
PF: predicated region fallthrough
CT: control target
= control target key end

     0   :  { %s5928_s27 = smov 0   ;;  %s5930_s28 = smov 0   ;;  %s9831_s0 = inlined_call_operand.vmem [shape: f32[2,256], index: 0, kind: input, shape index: {}]   ;;  %s9832_s1 = inlined_call_operand.vmem [shape: f32[256,120], index: 1, kind: input, shape index: {}]   ;;  %s9833_s2 = inlined_call_operand.vmem [shape: f32[1,120], index: 2, kind: input, shape index: {}]   ;;  %s9834_s3 = inlined_call_operand.vmem [shape: f32[120,10], index: 3, kind: input, shape index: {}]   ;;  %s9835_s4 = inlined_call_operand.vmem [shape: f32[1,10], index: 4, kind: input, shape index: {}]   ;;  %s9836_s5 = inlined_call_operand.vmem [shape: f32[1024,1024], index: 5, kind: input, shape index: {}]   ;;  %s9837_s6 = inlined_call_operand.vmem [shape: f32[1024,1024], index: 6, kind: input, shape index: {}]   ;;  %s9838_s7 = inlined_call_operand.vmem [shape: f32[1024,128], index: 7, kind: input, shape index: {}]   ;;  %s9839_s8 = inlined_call_operand.vmem [shape: f32[4,2,128], index: 8, kind: output, shape index: {}]  }
   0x1   :  { %s5932_s29 = smov 0  }
   0x2 LB: > { %s5944_s30 = sadd.s32 4294967295, %s5862_s29   ;;  %s5947_s9 = sadd.s32 1, %s5862_s29   ;;  %s5862_s29 = sphi %s5932_s29, %s10423_s29   ;;  %s5858_s28 = sphi %s5930_s28, %s10422_s28   ;;  %s5854_s27 = sphi %s5928_s27, %s10421_s27  }
   0x3   : > { %s127_s10 = ssub.s32 %s5862_s29, %s5947_s9  ;;  %s130_s11 = sadd.s32 1, %s5858_s28 }
   0x4   : > { %p128_p0 = scmp.eq.s32.totalorder %s127_s10, 0  ;;  %p137_p1 = scmp.ne.s32.totalorder %s5858_s28, %s5854_s27 }
   0x5   : > { %p138_p2 = scmp.eq.s32.totalorder %s5862_s29, 0  ;;  %p4486_p4 = scmp.ge.s32.totalorder %s5862_s29, 4 }
   0x6   : > { %s5956_s12 = scalar_select %p128_p0, %s5858_s28, %s130_s11  }
   0x7   : > { %p5958_p3 = por %p138_p2, %p137_p1  ;;  %256 = sbr.rel (%p4486_p4) target bundleno = 278 (0x116), region = 36 }
   0xe   : > { %259 = sbr.rel (!%p5958_p3) target bundleno = 146 (0x92), region = 40  ;;  %s261_s14 = sand.u32 (%p5958_p3), 1, %s5858_s28  }
   0xf   : > { %s4513_s15 = sshll.u32 (%p5958_p3), %s5862_s29, 4  ;;  %s4487_s16 = sshll.u32 (%p5958_p3), %s261_s14, 11 }
  0x10   : > { %s5970_s19 = scalar_lea.vmem (%p5958_p3), %s9836_s5, %s4513_s15  ;;  %s5975_s20 = scalar_lea.vmem (%p5958_p3), [#allocation2], %s4487_s16 }
  0x11   : > { %v279_v0 = vld [vmem:[%s5970_s19] sm:$0xff] (%p5958_p3)  ;;  %v281_v1 = vld [vmem:[%s5970_s19 + $0x8] sm:$0xff] (%p5958_p3) }
  0x12   : > { %v283_v2 = vld [vmem:[%s5970_s19 + $0x40] sm:$0xff] (%p5958_p3)  ;;  %280 = vst [vmem:[%s5975_s20] sm:$0xff] (%p5958_p3), %v279_v0  ;;  %282 = vst [vmem:[%s5975_s20 + $0x8] sm:$0xff] (%p5958_p3), %v281_v1  ;;  %v285_v3 = vld [vmem:[%s5970_s19 + $0x48] sm:$0xff] (%p5958_p3) }
  0x13   : > { %284 = vst [vmem:[%s5975_s20 + $0x10] sm:$0xff] (%p5958_p3), %v283_v2  ;;  %v287_v4 = vld [vmem:[%s5970_s19 + $0x80] sm:$0xff] (%p5958_p3)  ;;  %v289_v5 = vld [vmem:[%s5970_s19 + $0x88] sm:$0xff] (%p5958_p3)  ;;  %286 = vst [vmem:[%s5975_s20 + $0x18] sm:$0xff] (%p5958_p3), %v285_v3 }
  0x14   : > { %288 = vst [vmem:[%s5975_s20 + $0x20] sm:$0xff] (%p5958_p3), %v287_v4  ;;  %290 = vst [vmem:[%s5975_s20 + $0x28] sm:$0xff] (%p5958_p3), %v289_v5  ;;  %v291_v6 = vld [vmem:[%s5970_s19 + $0xc0] sm:$0xff] (%p5958_p3)  ;;  %v293_v7 = vld [vmem:[%s5970_s19 + $0xc8] sm:$0xff] (%p5958_p3) }
  0x15   : > { %v295_v8 = vld [vmem:[%s5970_s19 + $0x100] sm:$0xff]  ;;  %292 = vst [vmem:[%s5975_s20 + $0x30] sm:$0xff] %v291_v6  ;;  %294 = vst [vmem:[%s5975_s20 + $0x38] sm:$0xff] %v293_v7  ;;  %v297_v9 = vld [vmem:[%s5970_s19 + $0x108] sm:$0xff] }
  0x16   : > { %296 = vst [vmem:[%s5975_s20 + $0x40] sm:$0xff] %v295_v8  ;;  %v299_v10 = vld [vmem:[%s5970_s19 + $0x140] sm:$0xff]  ;;  %v301_v11 = vld [vmem:[%s5970_s19 + $0x148] sm:$0xff]  ;;  %298 = vst [vmem:[%s5975_s20 + $0x48] sm:$0xff] %v297_v9 }
  0x17   : > { %300 = vst [vmem:[%s5975_s20 + $0x50] sm:$0xff] %v299_v10  ;;  %302 = vst [vmem:[%s5975_s20 + $0x58] sm:$0xff] %v301_v11  ;;  %v303_v12 = vld [vmem:[%s5970_s19 + $0x180] sm:$0xff]  ;;  %v305_v13 = vld [vmem:[%s5970_s19 + $0x188] sm:$0xff] }
  0x18   : > { %v307_v14 = vld [vmem:[%s5970_s19 + $0x1c0] sm:$0xff]  ;;  %304 = vst [vmem:[%s5975_s20 + $0x60] sm:$0xff] %v303_v12  ;;  %306 = vst [vmem:[%s5975_s20 + $0x68] sm:$0xff] %v305_v13  ;;  %v309_v15 = vld [vmem:[%s5970_s19 + $0x1c8] sm:$0xff] }
  0x19   : > { %308 = vst [vmem:[%s5975_s20 + $0x70] sm:$0xff] %v307_v14  ;;  %v311_v16 = vld [vmem:[%s5970_s19 + $0x200] sm:$0xff]  ;;  %v313_v17 = vld [vmem:[%s5970_s19 + $0x208] sm:$0xff]  ;;  %310 = vst [vmem:[%s5975_s20 + $0x78] sm:$0xff] %v309_v15 }
  0x1a   : > { %312 = vst [vmem:[%s5975_s20 + $0x80] sm:$0xff] %v311_v16  ;;  %314 = vst [vmem:[%s5975_s20 + $0x88] sm:$0xff] %v313_v17  ;;  %v315_v18 = vld [vmem:[%s5970_s19 + $0x240] sm:$0xff]  ;;  %v317_v19 = vld [vmem:[%s5970_s19 + $0x248] sm:$0xff] }
  0x1b   : > { %v319_v20 = vld [vmem:[%s5970_s19 + $0x280] sm:$0xff]  ;;  %316 = vst [vmem:[%s5975_s20 + $0x90] sm:$0xff] %v315_v18  ;;  %318 = vst [vmem:[%s5975_s20 + $0x98] sm:$0xff] %v317_v19  ;;  %v321_v21 = vld [vmem:[%s5970_s19 + $0x288] sm:$0xff] }
  0x1c   : > { %320 = vst [vmem:[%s5975_s20 + $0xa0] sm:$0xff] %v319_v20  ;;  %v323_v22 = vld [vmem:[%s5970_s19 + $0x2c0] sm:$0xff]  ;;  %v325_v23 = vld [vmem:[%s5970_s19 + $0x2c8] sm:$0xff]  ;;  %322 = vst [vmem:[%s5975_s20 + $0xa8] sm:$0xff] %v321_v21 }
  0x1d   : > { %324 = vst [vmem:[%s5975_s20 + $0xb0] sm:$0xff] %v323_v22  ;;  %326 = vst [vmem:[%s5975_s20 + $0xb8] sm:$0xff] %v325_v23  ;;  %v327_v24 = vld [vmem:[%s5970_s19 + $0x300] sm:$0xff]  ;;  %v329_v25 = vld [vmem:[%s5970_s19 + $0x308] sm:$0xff] }
  0x1e   : > { %v331_v26 = vld [vmem:[%s5970_s19 + $0x340] sm:$0xff]  ;;  %328 = vst [vmem:[%s5975_s20 + $0xc0] sm:$0xff] %v327_v24  ;;  %330 = vst [vmem:[%s5975_s20 + $0xc8] sm:$0xff] %v329_v25  ;;  %v333_v27 = vld [vmem:[%s5970_s19 + $0x348] sm:$0xff] }
  0x1f   : > { %332 = vst [vmem:[%s5975_s20 + $0xd0] sm:$0xff] %v331_v26  ;;  %v335_v28 = vld [vmem:[%s5970_s19 + $0x380] sm:$0xff]  ;;  %v337_v29 = vld [vmem:[%s5970_s19 + $0x388] sm:$0xff]  ;;  %334 = vst [vmem:[%s5975_s20 + $0xd8] sm:$0xff] %v333_v27 }
  0x20   : > { %336 = vst [vmem:[%s5975_s20 + $0xe0] sm:$0xff] %v335_v28  ;;  %338 = vst [vmem:[%s5975_s20 + $0xe8] sm:$0xff] %v337_v29  ;;  %v339_v30 = vld [vmem:[%s5970_s19 + $0x3c0] sm:$0xff]  ;;  %v341_v31 = vld [vmem:[%s5970_s19 + $0x3c8] sm:$0xff] }
  0x21   : > { %v343_v32 = vld [vmem:[%s5970_s19 + $0x400] sm:$0xff]  ;;  %340 = vst [vmem:[%s5975_s20 + $0xf0] sm:$0xff] %v339_v30  ;;  %342 = vst [vmem:[%s5975_s20 + $0xf8] sm:$0xff] %v341_v31  ;;  %v345_v33 = vld [vmem:[%s5970_s19 + $0x408] sm:$0xff] }
  0x22   : > { %344 = vst [vmem:[%s5975_s20 + $0x100] sm:$0xff] %v343_v32  ;;  %v347_v34 = vld [vmem:[%s5970_s19 + $0x440] sm:$0xff]  ;;  %v349_v35 = vld [vmem:[%s5970_s19 + $0x448] sm:$0xff]  ;;  %346 = vst [vmem:[%s5975_s20 + $0x108] sm:$0xff] %v345_v33 }
  0x23   : > { %348 = vst [vmem:[%s5975_s20 + $0x110] sm:$0xff] %v347_v34  ;;  %350 = vst [vmem:[%s5975_s20 + $0x118] sm:$0xff] %v349_v35  ;;  %v351_v36 = vld [vmem:[%s5970_s19 + $0x480] sm:$0xff]  ;;  %v353_v37 = vld [vmem:[%s5970_s19 + $0x488] sm:$0xff] }
  0x24   : > { %v355_v38 = vld [vmem:[%s5970_s19 + $0x4c0] sm:$0xff]  ;;  %352 = vst [vmem:[%s5975_s20 + $0x120] sm:$0xff] %v351_v36  ;;  %354 = vst [vmem:[%s5975_s20 + $0x128] sm:$0xff] %v353_v37  ;;  %v357_v39 = vld [vmem:[%s5970_s19 + $0x4c8] sm:$0xff] }
  0x25   : > { %356 = vst [vmem:[%s5975_s20 + $0x130] sm:$0xff] %v355_v38  ;;  %v359_v40 = vld [vmem:[%s5970_s19 + $0x500] sm:$0xff]  ;;  %v361_v41 = vld [vmem:[%s5970_s19 + $0x508] sm:$0xff]  ;;  %358 = vst [vmem:[%s5975_s20 + $0x138] sm:$0xff] %v357_v39 }
  0x26   : > { %360 = vst [vmem:[%s5975_s20 + $0x140] sm:$0xff] %v359_v40  ;;  %362 = vst [vmem:[%s5975_s20 + $0x148] sm:$0xff] %v361_v41  ;;  %v363_v42 = vld [vmem:[%s5970_s19 + $0x540] sm:$0xff]  ;;  %v365_v43 = vld [vmem:[%s5970_s19 + $0x548] sm:$0xff] }
  0x27   : > { %v367_v44 = vld [vmem:[%s5970_s19 + $0x580] sm:$0xff]  ;;  %364 = vst [vmem:[%s5975_s20 + $0x150] sm:$0xff] %v363_v42  ;;  %366 = vst [vmem:[%s5975_s20 + $0x158] sm:$0xff] %v365_v43  ;;  %v369_v45 = vld [vmem:[%s5970_s19 + $0x588] sm:$0xff] }
  0x28   : > { %368 = vst [vmem:[%s5975_s20 + $0x160] sm:$0xff] %v367_v44  ;;  %v371_v46 = vld [vmem:[%s5970_s19 + $0x5c0] sm:$0xff]  ;;  %v373_v47 = vld [vmem:[%s5970_s19 + $0x5c8] sm:$0xff]  ;;  %370 = vst [vmem:[%s5975_s20 + $0x168] sm:$0xff] %v369_v45 }
  0x29   : > { %372 = vst [vmem:[%s5975_s20 + $0x170] sm:$0xff] %v371_v46  ;;  %374 = vst [vmem:[%s5975_s20 + $0x178] sm:$0xff] %v373_v47  ;;  %v375_v48 = vld [vmem:[%s5970_s19 + $0x600] sm:$0xff]  ;;  %v377_v49 = vld [vmem:[%s5970_s19 + $0x608] sm:$0xff] }
  0x2a   : > { %v379_v50 = vld [vmem:[%s5970_s19 + $0x640] sm:$0xff]  ;;  %376 = vst [vmem:[%s5975_s20 + $0x180] sm:$0xff] %v375_v48  ;;  %378 = vst [vmem:[%s5975_s20 + $0x188] sm:$0xff] %v377_v49  ;;  %v381_v51 = vld [vmem:[%s5970_s19 + $0x648] sm:$0xff] }
  0x2b   : > { %380 = vst [vmem:[%s5975_s20 + $0x190] sm:$0xff] %v379_v50  ;;  %v383_v52 = vld [vmem:[%s5970_s19 + $0x680] sm:$0xff]  ;;  %v385_v53 = vld [vmem:[%s5970_s19 + $0x688] sm:$0xff]  ;;  %382 = vst [vmem:[%s5975_s20 + $0x198] sm:$0xff] %v381_v51 }
  0x2c   : > { %384 = vst [vmem:[%s5975_s20 + $0x1a0] sm:$0xff] %v383_v52  ;;  %386 = vst [vmem:[%s5975_s20 + $0x1a8] sm:$0xff] %v385_v53  ;;  %v387_v54 = vld [vmem:[%s5970_s19 + $0x6c0] sm:$0xff]  ;;  %v389_v55 = vld [vmem:[%s5970_s19 + $0x6c8] sm:$0xff] }
  0x2d   : > { %v391_v56 = vld [vmem:[%s5970_s19 + $0x700] sm:$0xff]  ;;  %388 = vst [vmem:[%s5975_s20 + $0x1b0] sm:$0xff] %v387_v54  ;;  %390 = vst [vmem:[%s5975_s20 + $0x1b8] sm:$0xff] %v389_v55  ;;  %v393_v57 = vld [vmem:[%s5970_s19 + $0x708] sm:$0xff] }
  0x2e   : > { %392 = vst [vmem:[%s5975_s20 + $0x1c0] sm:$0xff] %v391_v56  ;;  %v395_v58 = vld [vmem:[%s5970_s19 + $0x740] sm:$0xff]  ;;  %v397_v59 = vld [vmem:[%s5970_s19 + $0x748] sm:$0xff]  ;;  %394 = vst [vmem:[%s5975_s20 + $0x1c8] sm:$0xff] %v393_v57 }
  0x2f   : > { %396 = vst [vmem:[%s5975_s20 + $0x1d0] sm:$0xff] %v395_v58  ;;  %398 = vst [vmem:[%s5975_s20 + $0x1d8] sm:$0xff] %v397_v59  ;;  %v399_v60 = vld [vmem:[%s5970_s19 + $0x780] sm:$0xff]  ;;  %v401_v61 = vld [vmem:[%s5970_s19 + $0x788] sm:$0xff] }
  0x30   : > { %v403_v62 = vld [vmem:[%s5970_s19 + $0x7c0] sm:$0xff]  ;;  %400 = vst [vmem:[%s5975_s20 + $0x1e0] sm:$0xff] %v399_v60  ;;  %402 = vst [vmem:[%s5975_s20 + $0x1e8] sm:$0xff] %v401_v61  ;;  %v405_v63 = vld [vmem:[%s5970_s19 + $0x7c8] sm:$0xff] }
  0x31   : > { %404 = vst [vmem:[%s5975_s20 + $0x1f0] sm:$0xff] %v403_v62  ;;  %v407_v0 = vld [vmem:[%s5970_s19 + $0x800] sm:$0xff]  ;;  %v409_v1 = vld [vmem:[%s5970_s19 + $0x808] sm:$0xff]  ;;  %406 = vst [vmem:[%s5975_s20 + $0x1f8] sm:$0xff] %v405_v63 }
  0x32   : > { %408 = vst [vmem:[%s5975_s20 + $0x200] sm:$0xff] %v407_v0  ;;  %410 = vst [vmem:[%s5975_s20 + $0x208] sm:$0xff] %v409_v1  ;;  %v411_v2 = vld [vmem:[%s5970_s19 + $0x840] sm:$0xff]  ;;  %v413_v3 = vld [vmem:[%s5970_s19 + $0x848] sm:$0xff] }
  0x33   : > { %v415_v4 = vld [vmem:[%s5970_s19 + $0x880] sm:$0xff]  ;;  %412 = vst [vmem:[%s5975_s20 + $0x210] sm:$0xff] %v411_v2  ;;  %414 = vst [vmem:[%s5975_s20 + $0x218] sm:$0xff] %v413_v3  ;;  %v417_v5 = vld [vmem:[%s5970_s19 + $0x888] sm:$0xff] }
  0x34   : > { %416 = vst [vmem:[%s5975_s20 + $0x220] sm:$0xff] %v415_v4  ;;  %v419_v6 = vld [vmem:[%s5970_s19 + $0x8c0] sm:$0xff]  ;;  %v421_v7 = vld [vmem:[%s5970_s19 + $0x8c8] sm:$0xff]  ;;  %418 = vst [vmem:[%s5975_s20 + $0x228] sm:$0xff] %v417_v5 }
  0x35   : > { %420 = vst [vmem:[%s5975_s20 + $0x230] sm:$0xff] %v419_v6  ;;  %422 = vst [vmem:[%s5975_s20 + $0x238] sm:$0xff] %v421_v7  ;;  %v423_v8 = vld [vmem:[%s5970_s19 + $0x900] sm:$0xff]  ;;  %v425_v9 = vld [vmem:[%s5970_s19 + $0x908] sm:$0xff] }
  0x36   : > { %v427_v10 = vld [vmem:[%s5970_s19 + $0x940] sm:$0xff]  ;;  %424 = vst [vmem:[%s5975_s20 + $0x240] sm:$0xff] %v423_v8  ;;  %426 = vst [vmem:[%s5975_s20 + $0x248] sm:$0xff] %v425_v9  ;;  %v429_v11 = vld [vmem:[%s5970_s19 + $0x948] sm:$0xff] }
  0x37   : > { %428 = vst [vmem:[%s5975_s20 + $0x250] sm:$0xff] %v427_v10  ;;  %v431_v12 = vld [vmem:[%s5970_s19 + $0x980] sm:$0xff]  ;;  %v433_v13 = vld [vmem:[%s5970_s19 + $0x988] sm:$0xff]  ;;  %430 = vst [vmem:[%s5975_s20 + $0x258] sm:$0xff] %v429_v11 }
  0x38   : > { %432 = vst [vmem:[%s5975_s20 + $0x260] sm:$0xff] %v431_v12  ;;  %434 = vst [vmem:[%s5975_s20 + $0x268] sm:$0xff] %v433_v13  ;;  %v435_v14 = vld [vmem:[%s5970_s19 + $0x9c0] sm:$0xff]  ;;  %v437_v15 = vld [vmem:[%s5970_s19 + $0x9c8] sm:$0xff] }
  0x39   : > { %v439_v16 = vld [vmem:[%s5970_s19 + $0xa00] sm:$0xff]  ;;  %436 = vst [vmem:[%s5975_s20 + $0x270] sm:$0xff] %v435_v14  ;;  %438 = vst [vmem:[%s5975_s20 + $0x278] sm:$0xff] %v437_v15  ;;  %v441_v17 = vld [vmem:[%s5970_s19 + $0xa08] sm:$0xff] }
  0x3a   : > { %440 = vst [vmem:[%s5975_s20 + $0x280] sm:$0xff] %v439_v16  ;;  %v443_v18 = vld [vmem:[%s5970_s19 + $0xa40] sm:$0xff]  ;;  %v445_v19 = vld [vmem:[%s5970_s19 + $0xa48] sm:$0xff]  ;;  %442 = vst [vmem:[%s5975_s20 + $0x288] sm:$0xff] %v441_v17 }
  0x3b   : > { %444 = vst [vmem:[%s5975_s20 + $0x290] sm:$0xff] %v443_v18  ;;  %446 = vst [vmem:[%s5975_s20 + $0x298] sm:$0xff] %v445_v19  ;;  %v447_v20 = vld [vmem:[%s5970_s19 + $0xa80] sm:$0xff]  ;;  %v449_v21 = vld [vmem:[%s5970_s19 + $0xa88] sm:$0xff] }
  0x3c   : > { %v451_v22 = vld [vmem:[%s5970_s19 + $0xac0] sm:$0xff]  ;;  %448 = vst [vmem:[%s5975_s20 + $0x2a0] sm:$0xff] %v447_v20  ;;  %450 = vst [vmem:[%s5975_s20 + $0x2a8] sm:$0xff] %v449_v21  ;;  %v453_v23 = vld [vmem:[%s5970_s19 + $0xac8] sm:$0xff] }
  0x3d   : > { %452 = vst [vmem:[%s5975_s20 + $0x2b0] sm:$0xff] %v451_v22  ;;  %v455_v24 = vld [vmem:[%s5970_s19 + $0xb00] sm:$0xff]  ;;  %v457_v25 = vld [vmem:[%s5970_s19 + $0xb08] sm:$0xff]  ;;  %454 = vst [vmem:[%s5975_s20 + $0x2b8] sm:$0xff] %v453_v23 }
  0x3e   : > { %456 = vst [vmem:[%s5975_s20 + $0x2c0] sm:$0xff] %v455_v24  ;;  %458 = vst [vmem:[%s5975_s20 + $0x2c8] sm:$0xff] %v457_v25  ;;  %v459_v26 = vld [vmem:[%s5970_s19 + $0xb40] sm:$0xff]  ;;  %v461_v27 = vld [vmem:[%s5970_s19 + $0xb48] sm:$0xff] }
  0x3f   : > { %v463_v28 = vld [vmem:[%s5970_s19 + $0xb80] sm:$0xff]  ;;  %460 = vst [vmem:[%s5975_s20 + $0x2d0] sm:$0xff] %v459_v26  ;;  %462 = vst [vmem:[%s5975_s20 + $0x2d8] sm:$0xff] %v461_v27  ;;  %v465_v29 = vld [vmem:[%s5970_s19 + $0xb88] sm:$0xff] }
  0x40   : > { %464 = vst [vmem:[%s5975_s20 + $0x2e0] sm:$0xff] %v463_v28  ;;  %v467_v30 = vld [vmem:[%s5970_s19 + $0xbc0] sm:$0xff]  ;;  %v469_v31 = vld [vmem:[%s5970_s19 + $0xbc8] sm:$0xff]  ;;  %466 = vst [vmem:[%s5975_s20 + $0x2e8] sm:$0xff] %v465_v29 }
  0x41   : > { %468 = vst [vmem:[%s5975_s20 + $0x2f0] sm:$0xff] %v467_v30  ;;  %470 = vst [vmem:[%s5975_s20 + $0x2f8] sm:$0xff] %v469_v31  ;;  %v471_v32 = vld [vmem:[%s5970_s19 + $0xc00] sm:$0xff]  ;;  %v473_v33 = vld [vmem:[%s5970_s19 + $0xc08] sm:$0xff] }
  0x42   : > { %v475_v34 = vld [vmem:[%s5970_s19 + $0xc40] sm:$0xff]  ;;  %472 = vst [vmem:[%s5975_s20 + $0x300] sm:$0xff] %v471_v32  ;;  %474 = vst [vmem:[%s5975_s20 + $0x308] sm:$0xff] %v473_v33  ;;  %v477_v35 = vld [vmem:[%s5970_s19 + $0xc48] sm:$0xff] }
  0x43   : > { %476 = vst [vmem:[%s5975_s20 + $0x310] sm:$0xff] %v475_v34  ;;  %v479_v36 = vld [vmem:[%s5970_s19 + $0xc80] sm:$0xff]  ;;  %v481_v37 = vld [vmem:[%s5970_s19 + $0xc88] sm:$0xff]  ;;  %478 = vst [vmem:[%s5975_s20 + $0x318] sm:$0xff] %v477_v35 }
  0x44   : > { %480 = vst [vmem:[%s5975_s20 + $0x320] sm:$0xff] %v479_v36  ;;  %482 = vst [vmem:[%s5975_s20 + $0x328] sm:$0xff] %v481_v37  ;;  %v483_v38 = vld [vmem:[%s5970_s19 + $0xcc0] sm:$0xff]  ;;  %v485_v39 = vld [vmem:[%s5970_s19 + $0xcc8] sm:$0xff] }
  0x45   : > { %v487_v40 = vld [vmem:[%s5970_s19 + $0xd00] sm:$0xff]  ;;  %484 = vst [vmem:[%s5975_s20 + $0x330] sm:$0xff] %v483_v38  ;;  %486 = vst [vmem:[%s5975_s20 + $0x338] sm:$0xff] %v485_v39  ;;  %v489_v41 = vld [vmem:[%s5970_s19 + $0xd08] sm:$0xff] }
  0x46   : > { %488 = vst [vmem:[%s5975_s20 + $0x340] sm:$0xff] %v487_v40  ;;  %v491_v42 = vld [vmem:[%s5970_s19 + $0xd40] sm:$0xff]  ;;  %v493_v43 = vld [vmem:[%s5970_s19 + $0xd48] sm:$0xff]  ;;  %490 = vst [vmem:[%s5975_s20 + $0x348] sm:$0xff] %v489_v41 }
  0x47   : > { %492 = vst [vmem:[%s5975_s20 + $0x350] sm:$0xff] %v491_v42  ;;  %494 = vst [vmem:[%s5975_s20 + $0x358] sm:$0xff] %v493_v43  ;;  %v495_v44 = vld [vmem:[%s5970_s19 + $0xd80] sm:$0xff]  ;;  %v497_v45 = vld [vmem:[%s5970_s19 + $0xd88] sm:$0xff] }
  0x48   : > { %v499_v46 = vld [vmem:[%s5970_s19 + $0xdc0] sm:$0xff]  ;;  %496 = vst [vmem:[%s5975_s20 + $0x360] sm:$0xff] %v495_v44  ;;  %498 = vst [vmem:[%s5975_s20 + $0x368] sm:$0xff] %v497_v45  ;;  %v501_v47 = vld [vmem:[%s5970_s19 + $0xdc8] sm:$0xff] }
  0x49   : > { %500 = vst [vmem:[%s5975_s20 + $0x370] sm:$0xff] %v499_v46  ;;  %v503_v48 = vld [vmem:[%s5970_s19 + $0xe00] sm:$0xff]  ;;  %v505_v49 = vld [vmem:[%s5970_s19 + $0xe08] sm:$0xff]  ;;  %502 = vst [vmem:[%s5975_s20 + $0x378] sm:$0xff] %v501_v47 }
  0x4a   : > { %504 = vst [vmem:[%s5975_s20 + $0x380] sm:$0xff] %v503_v48  ;;  %506 = vst [vmem:[%s5975_s20 + $0x388] sm:$0xff] %v505_v49  ;;  %v507_v50 = vld [vmem:[%s5970_s19 + $0xe40] sm:$0xff]  ;;  %v509_v51 = vld [vmem:[%s5970_s19 + $0xe48] sm:$0xff] }
  0x4b   : > { %v511_v52 = vld [vmem:[%s5970_s19 + $0xe80] sm:$0xff]  ;;  %508 = vst [vmem:[%s5975_s20 + $0x390] sm:$0xff] %v507_v50  ;;  %510 = vst [vmem:[%s5975_s20 + $0x398] sm:$0xff] %v509_v51  ;;  %v513_v53 = vld [vmem:[%s5970_s19 + $0xe88] sm:$0xff] }
  0x4c   : > { %512 = vst [vmem:[%s5975_s20 + $0x3a0] sm:$0xff] %v511_v52  ;;  %v515_v54 = vld [vmem:[%s5970_s19 + $0xec0] sm:$0xff]  ;;  %v517_v55 = vld [vmem:[%s5970_s19 + $0xec8] sm:$0xff]  ;;  %514 = vst [vmem:[%s5975_s20 + $0x3a8] sm:$0xff] %v513_v53 }
  0x4d   : > { %516 = vst [vmem:[%s5975_s20 + $0x3b0] sm:$0xff] %v515_v54  ;;  %518 = vst [vmem:[%s5975_s20 + $0x3b8] sm:$0xff] %v517_v55  ;;  %v519_v56 = vld [vmem:[%s5970_s19 + $0xf00] sm:$0xff]  ;;  %v521_v57 = vld [vmem:[%s5970_s19 + $0xf08] sm:$0xff] }
  0x4e   : > { %v523_v58 = vld [vmem:[%s5970_s19 + $0xf40] sm:$0xff]  ;;  %520 = vst [vmem:[%s5975_s20 + $0x3c0] sm:$0xff] %v519_v56  ;;  %522 = vst [vmem:[%s5975_s20 + $0x3c8] sm:$0xff] %v521_v57  ;;  %v525_v59 = vld [vmem:[%s5970_s19 + $0xf48] sm:$0xff] }
  0x4f   : > { %524 = vst [vmem:[%s5975_s20 + $0x3d0] sm:$0xff] %v523_v58  ;;  %v527_v60 = vld [vmem:[%s5970_s19 + $0xf80] sm:$0xff]  ;;  %v529_v61 = vld [vmem:[%s5970_s19 + $0xf88] sm:$0xff]  ;;  %526 = vst [vmem:[%s5975_s20 + $0x3d8] sm:$0xff] %v525_v59 }
  0x50   : > { %528 = vst [vmem:[%s5975_s20 + $0x3e0] sm:$0xff] %v527_v60  ;;  %530 = vst [vmem:[%s5975_s20 + $0x3e8] sm:$0xff] %v529_v61  ;;  %v531_v62 = vld [vmem:[%s5970_s19 + $0xfc0] sm:$0xff]  ;;  %v533_v63 = vld [vmem:[%s5970_s19 + $0xfc8] sm:$0xff] }
  0x51   : > { %v535_v0 = vld [vmem:[%s5970_s19 + $0x1000] sm:$0xff]  ;;  %532 = vst [vmem:[%s5975_s20 + $0x3f0] sm:$0xff] %v531_v62  ;;  %534 = vst [vmem:[%s5975_s20 + $0x3f8] sm:$0xff] %v533_v63  ;;  %v537_v1 = vld [vmem:[%s5970_s19 + $0x1008] sm:$0xff] }
  0x52   : > { %536 = vst [vmem:[%s5975_s20 + $0x400] sm:$0xff] %v535_v0  ;;  %v539_v2 = vld [vmem:[%s5970_s19 + $0x1040] sm:$0xff]  ;;  %v541_v3 = vld [vmem:[%s5970_s19 + $0x1048] sm:$0xff]  ;;  %538 = vst [vmem:[%s5975_s20 + $0x408] sm:$0xff] %v537_v1 }
  0x53   : > { %540 = vst [vmem:[%s5975_s20 + $0x410] sm:$0xff] %v539_v2  ;;  %542 = vst [vmem:[%s5975_s20 + $0x418] sm:$0xff] %v541_v3  ;;  %v543_v4 = vld [vmem:[%s5970_s19 + $0x1080] sm:$0xff]  ;;  %v545_v5 = vld [vmem:[%s5970_s19 + $0x1088] sm:$0xff] }
  0x54   : > { %v547_v6 = vld [vmem:[%s5970_s19 + $0x10c0] sm:$0xff]  ;;  %544 = vst [vmem:[%s5975_s20 + $0x420] sm:$0xff] %v543_v4  ;;  %546 = vst [vmem:[%s5975_s20 + $0x428] sm:$0xff] %v545_v5  ;;  %v549_v7 = vld [vmem:[%s5970_s19 + $0x10c8] sm:$0xff] }
  0x55   : > { %548 = vst [vmem:[%s5975_s20 + $0x430] sm:$0xff] %v547_v6  ;;  %v551_v8 = vld [vmem:[%s5970_s19 + $0x1100] sm:$0xff]  ;;  %v553_v9 = vld [vmem:[%s5970_s19 + $0x1108] sm:$0xff]  ;;  %550 = vst [vmem:[%s5975_s20 + $0x438] sm:$0xff] %v549_v7 }
  0x56   : > { %552 = vst [vmem:[%s5975_s20 + $0x440] sm:$0xff] %v551_v8  ;;  %554 = vst [vmem:[%s5975_s20 + $0x448] sm:$0xff] %v553_v9  ;;  %v555_v10 = vld [vmem:[%s5970_s19 + $0x1140] sm:$0xff]  ;;  %v557_v11 = vld [vmem:[%s5970_s19 + $0x1148] sm:$0xff] }
  0x57   : > { %v559_v12 = vld [vmem:[%s5970_s19 + $0x1180] sm:$0xff]  ;;  %556 = vst [vmem:[%s5975_s20 + $0x450] sm:$0xff] %v555_v10  ;;  %558 = vst [vmem:[%s5975_s20 + $0x458] sm:$0xff] %v557_v11  ;;  %v561_v13 = vld [vmem:[%s5970_s19 + $0x1188] sm:$0xff] }
  0x58   : > { %560 = vst [vmem:[%s5975_s20 + $0x460] sm:$0xff] %v559_v12  ;;  %v563_v14 = vld [vmem:[%s5970_s19 + $0x11c0] sm:$0xff]  ;;  %v565_v15 = vld [vmem:[%s5970_s19 + $0x11c8] sm:$0xff]  ;;  %562 = vst [vmem:[%s5975_s20 + $0x468] sm:$0xff] %v561_v13 }
  0x59   : > { %564 = vst [vmem:[%s5975_s20 + $0x470] sm:$0xff] %v563_v14  ;;  %566 = vst [vmem:[%s5975_s20 + $0x478] sm:$0xff] %v565_v15  ;;  %v567_v16 = vld [vmem:[%s5970_s19 + $0x1200] sm:$0xff]  ;;  %v569_v17 = vld [vmem:[%s5970_s19 + $0x1208] sm:$0xff] }
  0x5a   : > { %v571_v18 = vld [vmem:[%s5970_s19 + $0x1240] sm:$0xff]  ;;  %568 = vst [vmem:[%s5975_s20 + $0x480] sm:$0xff] %v567_v16  ;;  %570 = vst [vmem:[%s5975_s20 + $0x488] sm:$0xff] %v569_v17  ;;  %v573_v19 = vld [vmem:[%s5970_s19 + $0x1248] sm:$0xff] }
  0x5b   : > { %572 = vst [vmem:[%s5975_s20 + $0x490] sm:$0xff] %v571_v18  ;;  %v575_v20 = vld [vmem:[%s5970_s19 + $0x1280] sm:$0xff]  ;;  %v577_v21 = vld [vmem:[%s5970_s19 + $0x1288] sm:$0xff]  ;;  %574 = vst [vmem:[%s5975_s20 + $0x498] sm:$0xff] %v573_v19 }
  0x5c   : > { %576 = vst [vmem:[%s5975_s20 + $0x4a0] sm:$0xff] %v575_v20  ;;  %578 = vst [vmem:[%s5975_s20 + $0x4a8] sm:$0xff] %v577_v21  ;;  %v579_v22 = vld [vmem:[%s5970_s19 + $0x12c0] sm:$0xff]  ;;  %v581_v23 = vld [vmem:[%s5970_s19 + $0x12c8] sm:$0xff] }
  0x5d   : > { %v583_v24 = vld [vmem:[%s5970_s19 + $0x1300] sm:$0xff]  ;;  %580 = vst [vmem:[%s5975_s20 + $0x4b0] sm:$0xff] %v579_v22  ;;  %582 = vst [vmem:[%s5975_s20 + $0x4b8] sm:$0xff] %v581_v23  ;;  %v585_v25 = vld [vmem:[%s5970_s19 + $0x1308] sm:$0xff] }
  0x5e   : > { %584 = vst [vmem:[%s5975_s20 + $0x4c0] sm:$0xff] %v583_v24  ;;  %v587_v26 = vld [vmem:[%s5970_s19 + $0x1340] sm:$0xff]  ;;  %v589_v27 = vld [vmem:[%s5970_s19 + $0x1348] sm:$0xff]  ;;  %586 = vst [vmem:[%s5975_s20 + $0x4c8] sm:$0xff] %v585_v25 }
  0x5f   : > { %588 = vst [vmem:[%s5975_s20 + $0x4d0] sm:$0xff] %v587_v26  ;;  %590 = vst [vmem:[%s5975_s20 + $0x4d8] sm:$0xff] %v589_v27  ;;  %v591_v28 = vld [vmem:[%s5970_s19 + $0x1380] sm:$0xff]  ;;  %v593_v29 = vld [vmem:[%s5970_s19 + $0x1388] sm:$0xff] }
  0x60   : > { %v595_v30 = vld [vmem:[%s5970_s19 + $0x13c0] sm:$0xff]  ;;  %592 = vst [vmem:[%s5975_s20 + $0x4e0] sm:$0xff] %v591_v28  ;;  %594 = vst [vmem:[%s5975_s20 + $0x4e8] sm:$0xff] %v593_v29  ;;  %v597_v31 = vld [vmem:[%s5970_s19 + $0x13c8] sm:$0xff] }
  0x61   : > { %596 = vst [vmem:[%s5975_s20 + $0x4f0] sm:$0xff] %v595_v30  ;;  %v599_v32 = vld [vmem:[%s5970_s19 + $0x1400] sm:$0xff]  ;;  %v601_v33 = vld [vmem:[%s5970_s19 + $0x1408] sm:$0xff]  ;;  %598 = vst [vmem:[%s5975_s20 + $0x4f8] sm:$0xff] %v597_v31 }
  0x62   : > { %600 = vst [vmem:[%s5975_s20 + $0x500] sm:$0xff] %v599_v32  ;;  %602 = vst [vmem:[%s5975_s20 + $0x508] sm:$0xff] %v601_v33  ;;  %v603_v34 = vld [vmem:[%s5970_s19 + $0x1440] sm:$0xff]  ;;  %v605_v35 = vld [vmem:[%s5970_s19 + $0x1448] sm:$0xff] }
  0x63   : > { %v607_v36 = vld [vmem:[%s5970_s19 + $0x1480] sm:$0xff]  ;;  %604 = vst [vmem:[%s5975_s20 + $0x510] sm:$0xff] %v603_v34  ;;  %606 = vst [vmem:[%s5975_s20 + $0x518] sm:$0xff] %v605_v35  ;;  %v609_v37 = vld [vmem:[%s5970_s19 + $0x1488] sm:$0xff] }
  0x64   : > { %608 = vst [vmem:[%s5975_s20 + $0x520] sm:$0xff] %v607_v36  ;;  %v611_v38 = vld [vmem:[%s5970_s19 + $0x14c0] sm:$0xff]  ;;  %v613_v39 = vld [vmem:[%s5970_s19 + $0x14c8] sm:$0xff]  ;;  %610 = vst [vmem:[%s5975_s20 + $0x528] sm:$0xff] %v609_v37 }
  0x65   : > { %612 = vst [vmem:[%s5975_s20 + $0x530] sm:$0xff] %v611_v38  ;;  %614 = vst [vmem:[%s5975_s20 + $0x538] sm:$0xff] %v613_v39  ;;  %v615_v40 = vld [vmem:[%s5970_s19 + $0x1500] sm:$0xff]  ;;  %v617_v41 = vld [vmem:[%s5970_s19 + $0x1508] sm:$0xff] }
  0x66   : > { %v619_v42 = vld [vmem:[%s5970_s19 + $0x1540] sm:$0xff]  ;;  %616 = vst [vmem:[%s5975_s20 + $0x540] sm:$0xff] %v615_v40  ;;  %618 = vst [vmem:[%s5975_s20 + $0x548] sm:$0xff] %v617_v41  ;;  %v621_v43 = vld [vmem:[%s5970_s19 + $0x1548] sm:$0xff] }
  0x67   : > { %620 = vst [vmem:[%s5975_s20 + $0x550] sm:$0xff] %v619_v42  ;;  %v623_v44 = vld [vmem:[%s5970_s19 + $0x1580] sm:$0xff]  ;;  %v625_v45 = vld [vmem:[%s5970_s19 + $0x1588] sm:$0xff]  ;;  %622 = vst [vmem:[%s5975_s20 + $0x558] sm:$0xff] %v621_v43 }
  0x68   : > { %624 = vst [vmem:[%s5975_s20 + $0x560] sm:$0xff] %v623_v44  ;;  %626 = vst [vmem:[%s5975_s20 + $0x568] sm:$0xff] %v625_v45  ;;  %v627_v46 = vld [vmem:[%s5970_s19 + $0x15c0] sm:$0xff]  ;;  %v629_v47 = vld [vmem:[%s5970_s19 + $0x15c8] sm:$0xff] }
  0x69   : > { %v631_v48 = vld [vmem:[%s5970_s19 + $0x1600] sm:$0xff]  ;;  %628 = vst [vmem:[%s5975_s20 + $0x570] sm:$0xff] %v627_v46  ;;  %630 = vst [vmem:[%s5975_s20 + $0x578] sm:$0xff] %v629_v47  ;;  %v633_v49 = vld [vmem:[%s5970_s19 + $0x1608] sm:$0xff] }
  0x6a   : > { %632 = vst [vmem:[%s5975_s20 + $0x580] sm:$0xff] %v631_v48  ;;  %v635_v50 = vld [vmem:[%s5970_s19 + $0x1640] sm:$0xff]  ;;  %v637_v51 = vld [vmem:[%s5970_s19 + $0x1648] sm:$0xff]  ;;  %634 = vst [vmem:[%s5975_s20 + $0x588] sm:$0xff] %v633_v49 }
  0x6b   : > { %636 = vst [vmem:[%s5975_s20 + $0x590] sm:$0xff] %v635_v50  ;;  %638 = vst [vmem:[%s5975_s20 + $0x598] sm:$0xff] %v637_v51  ;;  %v639_v52 = vld [vmem:[%s5970_s19 + $0x1680] sm:$0xff]  ;;  %v641_v53 = vld [vmem:[%s5970_s19 + $0x1688] sm:$0xff] }
  0x6c   : > { %v643_v54 = vld [vmem:[%s5970_s19 + $0x16c0] sm:$0xff]  ;;  %640 = vst [vmem:[%s5975_s20 + $0x5a0] sm:$0xff] %v639_v52  ;;  %642 = vst [vmem:[%s5975_s20 + $0x5a8] sm:$0xff] %v641_v53  ;;  %v645_v55 = vld [vmem:[%s5970_s19 + $0x16c8] sm:$0xff] }
  0x6d   : > { %644 = vst [vmem:[%s5975_s20 + $0x5b0] sm:$0xff] %v643_v54  ;;  %v647_v56 = vld [vmem:[%s5970_s19 + $0x1700] sm:$0xff]  ;;  %v649_v57 = vld [vmem:[%s5970_s19 + $0x1708] sm:$0xff]  ;;  %646 = vst [vmem:[%s5975_s20 + $0x5b8] sm:$0xff] %v645_v55 }
  0x6e   : > { %648 = vst [vmem:[%s5975_s20 + $0x5c0] sm:$0xff] %v647_v56  ;;  %650 = vst [vmem:[%s5975_s20 + $0x5c8] sm:$0xff] %v649_v57  ;;  %v651_v58 = vld [vmem:[%s5970_s19 + $0x1740] sm:$0xff]  ;;  %v653_v59 = vld [vmem:[%s5970_s19 + $0x1748] sm:$0xff] }
  0x6f   : > { %v655_v60 = vld [vmem:[%s5970_s19 + $0x1780] sm:$0xff]  ;;  %652 = vst [vmem:[%s5975_s20 + $0x5d0] sm:$0xff] %v651_v58  ;;  %654 = vst [vmem:[%s5975_s20 + $0x5d8] sm:$0xff] %v653_v59  ;;  %v657_v61 = vld [vmem:[%s5970_s19 + $0x1788] sm:$0xff] }
  0x70   : > { %656 = vst [vmem:[%s5975_s20 + $0x5e0] sm:$0xff] %v655_v60  ;;  %v659_v62 = vld [vmem:[%s5970_s19 + $0x17c0] sm:$0xff]  ;;  %v661_v63 = vld [vmem:[%s5970_s19 + $0x17c8] sm:$0xff]  ;;  %658 = vst [vmem:[%s5975_s20 + $0x5e8] sm:$0xff] %v657_v61 }
  0x71   : > { %660 = vst [vmem:[%s5975_s20 + $0x5f0] sm:$0xff] %v659_v62  ;;  %662 = vst [vmem:[%s5975_s20 + $0x5f8] sm:$0xff] %v661_v63  ;;  %v663_v0 = vld [vmem:[%s5970_s19 + $0x1800] sm:$0xff]  ;;  %v665_v1 = vld [vmem:[%s5970_s19 + $0x1808] sm:$0xff] }
  0x72   : > { %v667_v2 = vld [vmem:[%s5970_s19 + $0x1840] sm:$0xff]  ;;  %664 = vst [vmem:[%s5975_s20 + $0x600] sm:$0xff] %v663_v0  ;;  %666 = vst [vmem:[%s5975_s20 + $0x608] sm:$0xff] %v665_v1  ;;  %v669_v3 = vld [vmem:[%s5970_s19 + $0x1848] sm:$0xff] }
  0x73   : > { %668 = vst [vmem:[%s5975_s20 + $0x610] sm:$0xff] %v667_v2  ;;  %v671_v4 = vld [vmem:[%s5970_s19 + $0x1880] sm:$0xff]  ;;  %v673_v5 = vld [vmem:[%s5970_s19 + $0x1888] sm:$0xff]  ;;  %670 = vst [vmem:[%s5975_s20 + $0x618] sm:$0xff] %v669_v3 }
  0x74   : > { %672 = vst [vmem:[%s5975_s20 + $0x620] sm:$0xff] %v671_v4  ;;  %674 = vst [vmem:[%s5975_s20 + $0x628] sm:$0xff] %v673_v5  ;;  %v675_v6 = vld [vmem:[%s5970_s19 + $0x18c0] sm:$0xff]  ;;  %v677_v7 = vld [vmem:[%s5970_s19 + $0x18c8] sm:$0xff] }
  0x75   : > { %v679_v8 = vld [vmem:[%s5970_s19 + $0x1900] sm:$0xff]  ;;  %676 = vst [vmem:[%s5975_s20 + $0x630] sm:$0xff] %v675_v6  ;;  %678 = vst [vmem:[%s5975_s20 + $0x638] sm:$0xff] %v677_v7  ;;  %v681_v9 = vld [vmem:[%s5970_s19 + $0x1908] sm:$0xff] }
  0x76   : > { %680 = vst [vmem:[%s5975_s20 + $0x640] sm:$0xff] %v679_v8  ;;  %v683_v10 = vld [vmem:[%s5970_s19 + $0x1940] sm:$0xff]  ;;  %v685_v11 = vld [vmem:[%s5970_s19 + $0x1948] sm:$0xff]  ;;  %682 = vst [vmem:[%s5975_s20 + $0x648] sm:$0xff] %v681_v9 }
  0x77   : > { %684 = vst [vmem:[%s5975_s20 + $0x650] sm:$0xff] %v683_v10  ;;  %686 = vst [vmem:[%s5975_s20 + $0x658] sm:$0xff] %v685_v11  ;;  %v687_v12 = vld [vmem:[%s5970_s19 + $0x1980] sm:$0xff]  ;;  %v689_v13 = vld [vmem:[%s5970_s19 + $0x1988] sm:$0xff] }
  0x78   : > { %v691_v14 = vld [vmem:[%s5970_s19 + $0x19c0] sm:$0xff]  ;;  %688 = vst [vmem:[%s5975_s20 + $0x660] sm:$0xff] %v687_v12  ;;  %690 = vst [vmem:[%s5975_s20 + $0x668] sm:$0xff] %v689_v13  ;;  %v693_v15 = vld [vmem:[%s5970_s19 + $0x19c8] sm:$0xff] }
  0x79   : > { %692 = vst [vmem:[%s5975_s20 + $0x670] sm:$0xff] %v691_v14  ;;  %v695_v16 = vld [vmem:[%s5970_s19 + $0x1a00] sm:$0xff]  ;;  %v697_v17 = vld [vmem:[%s5970_s19 + $0x1a08] sm:$0xff]  ;;  %694 = vst [vmem:[%s5975_s20 + $0x678] sm:$0xff] %v693_v15 }
  0x7a   : > { %696 = vst [vmem:[%s5975_s20 + $0x680] sm:$0xff] %v695_v16  ;;  %698 = vst [vmem:[%s5975_s20 + $0x688] sm:$0xff] %v697_v17  ;;  %v699_v18 = vld [vmem:[%s5970_s19 + $0x1a40] sm:$0xff]  ;;  %v701_v19 = vld [vmem:[%s5970_s19 + $0x1a48] sm:$0xff] }
  0x7b   : > { %v703_v20 = vld [vmem:[%s5970_s19 + $0x1a80] sm:$0xff]  ;;  %700 = vst [vmem:[%s5975_s20 + $0x690] sm:$0xff] %v699_v18  ;;  %702 = vst [vmem:[%s5975_s20 + $0x698] sm:$0xff] %v701_v19  ;;  %v705_v21 = vld [vmem:[%s5970_s19 + $0x1a88] sm:$0xff] }
  0x7c   : > { %704 = vst [vmem:[%s5975_s20 + $0x6a0] sm:$0xff] %v703_v20  ;;  %v707_v22 = vld [vmem:[%s5970_s19 + $0x1ac0] sm:$0xff]  ;;  %v709_v23 = vld [vmem:[%s5970_s19 + $0x1ac8] sm:$0xff]  ;;  %706 = vst [vmem:[%s5975_s20 + $0x6a8] sm:$0xff] %v705_v21 }
  0x7d   : > { %708 = vst [vmem:[%s5975_s20 + $0x6b0] sm:$0xff] %v707_v22  ;;  %710 = vst [vmem:[%s5975_s20 + $0x6b8] sm:$0xff] %v709_v23  ;;  %v711_v24 = vld [vmem:[%s5970_s19 + $0x1b00] sm:$0xff]  ;;  %v713_v25 = vld [vmem:[%s5970_s19 + $0x1b08] sm:$0xff] }
  0x7e   : > { %v715_v26 = vld [vmem:[%s5970_s19 + $0x1b40] sm:$0xff]  ;;  %712 = vst [vmem:[%s5975_s20 + $0x6c0] sm:$0xff] %v711_v24  ;;  %714 = vst [vmem:[%s5975_s20 + $0x6c8] sm:$0xff] %v713_v25  ;;  %v717_v27 = vld [vmem:[%s5970_s19 + $0x1b48] sm:$0xff] }
  0x7f   : > { %716 = vst [vmem:[%s5975_s20 + $0x6d0] sm:$0xff] %v715_v26  ;;  %v719_v28 = vld [vmem:[%s5970_s19 + $0x1b80] sm:$0xff]  ;;  %v721_v29 = vld [vmem:[%s5970_s19 + $0x1b88] sm:$0xff]  ;;  %718 = vst [vmem:[%s5975_s20 + $0x6d8] sm:$0xff] %v717_v27 }
  0x80   : > { %720 = vst [vmem:[%s5975_s20 + $0x6e0] sm:$0xff] %v719_v28  ;;  %722 = vst [vmem:[%s5975_s20 + $0x6e8] sm:$0xff] %v721_v29  ;;  %v723_v30 = vld [vmem:[%s5970_s19 + $0x1bc0] sm:$0xff]  ;;  %v725_v31 = vld [vmem:[%s5970_s19 + $0x1bc8] sm:$0xff] }
  0x81   : > { %v727_v32 = vld [vmem:[%s5970_s19 + $0x1c00] sm:$0xff]  ;;  %724 = vst [vmem:[%s5975_s20 + $0x6f0] sm:$0xff] %v723_v30  ;;  %726 = vst [vmem:[%s5975_s20 + $0x6f8] sm:$0xff] %v725_v31  ;;  %v729_v33 = vld [vmem:[%s5970_s19 + $0x1c08] sm:$0xff] }
  0x82   : > { %728 = vst [vmem:[%s5975_s20 + $0x700] sm:$0xff] %v727_v32  ;;  %v731_v34 = vld [vmem:[%s5970_s19 + $0x1c40] sm:$0xff]  ;;  %v733_v35 = vld [vmem:[%s5970_s19 + $0x1c48] sm:$0xff]  ;;  %730 = vst [vmem:[%s5975_s20 + $0x708] sm:$0xff] %v729_v33 }
  0x83   : > { %732 = vst [vmem:[%s5975_s20 + $0x710] sm:$0xff] %v731_v34  ;;  %734 = vst [vmem:[%s5975_s20 + $0x718] sm:$0xff] %v733_v35  ;;  %v735_v36 = vld [vmem:[%s5970_s19 + $0x1c80] sm:$0xff]  ;;  %v737_v37 = vld [vmem:[%s5970_s19 + $0x1c88] sm:$0xff] }
  0x84   : > { %v739_v38 = vld [vmem:[%s5970_s19 + $0x1cc0] sm:$0xff]  ;;  %736 = vst [vmem:[%s5975_s20 + $0x720] sm:$0xff] %v735_v36  ;;  %738 = vst [vmem:[%s5975_s20 + $0x728] sm:$0xff] %v737_v37  ;;  %v741_v39 = vld [vmem:[%s5970_s19 + $0x1cc8] sm:$0xff] }
  0x85   : > { %740 = vst [vmem:[%s5975_s20 + $0x730] sm:$0xff] %v739_v38  ;;  %v743_v40 = vld [vmem:[%s5970_s19 + $0x1d00] sm:$0xff]  ;;  %v745_v41 = vld [vmem:[%s5970_s19 + $0x1d08] sm:$0xff]  ;;  %742 = vst [vmem:[%s5975_s20 + $0x738] sm:$0xff] %v741_v39 }
  0x86   : > { %744 = vst [vmem:[%s5975_s20 + $0x740] sm:$0xff] %v743_v40  ;;  %746 = vst [vmem:[%s5975_s20 + $0x748] sm:$0xff] %v745_v41  ;;  %v747_v42 = vld [vmem:[%s5970_s19 + $0x1d40] sm:$0xff]  ;;  %v749_v43 = vld [vmem:[%s5970_s19 + $0x1d48] sm:$0xff] }
  0x87   : > { %v751_v44 = vld [vmem:[%s5970_s19 + $0x1d80] sm:$0xff]  ;;  %748 = vst [vmem:[%s5975_s20 + $0x750] sm:$0xff] %v747_v42  ;;  %750 = vst [vmem:[%s5975_s20 + $0x758] sm:$0xff] %v749_v43  ;;  %v753_v45 = vld [vmem:[%s5970_s19 + $0x1d88] sm:$0xff] }
  0x88   : > { %752 = vst [vmem:[%s5975_s20 + $0x760] sm:$0xff] %v751_v44  ;;  %v755_v46 = vld [vmem:[%s5970_s19 + $0x1dc0] sm:$0xff]  ;;  %v757_v47 = vld [vmem:[%s5970_s19 + $0x1dc8] sm:$0xff]  ;;  %754 = vst [vmem:[%s5975_s20 + $0x768] sm:$0xff] %v753_v45 }
  0x89   : > { %756 = vst [vmem:[%s5975_s20 + $0x770] sm:$0xff] %v755_v46  ;;  %758 = vst [vmem:[%s5975_s20 + $0x778] sm:$0xff] %v757_v47  ;;  %v759_v48 = vld [vmem:[%s5970_s19 + $0x1e00] sm:$0xff]  ;;  %v761_v49 = vld [vmem:[%s5970_s19 + $0x1e08] sm:$0xff] }
  0x8a   : > { %v763_v50 = vld [vmem:[%s5970_s19 + $0x1e40] sm:$0xff]  ;;  %760 = vst [vmem:[%s5975_s20 + $0x780] sm:$0xff] %v759_v48  ;;  %762 = vst [vmem:[%s5975_s20 + $0x788] sm:$0xff] %v761_v49  ;;  %v765_v51 = vld [vmem:[%s5970_s19 + $0x1e48] sm:$0xff] }
  0x8b   : > { %764 = vst [vmem:[%s5975_s20 + $0x790] sm:$0xff] %v763_v50  ;;  %v767_v52 = vld [vmem:[%s5970_s19 + $0x1e80] sm:$0xff]  ;;  %v769_v53 = vld [vmem:[%s5970_s19 + $0x1e88] sm:$0xff]  ;;  %766 = vst [vmem:[%s5975_s20 + $0x798] sm:$0xff] %v765_v51 }
  0x8c   : > { %768 = vst [vmem:[%s5975_s20 + $0x7a0] sm:$0xff] %v767_v52  ;;  %770 = vst [vmem:[%s5975_s20 + $0x7a8] sm:$0xff] %v769_v53  ;;  %v771_v54 = vld [vmem:[%s5970_s19 + $0x1ec0] sm:$0xff]  ;;  %v773_v55 = vld [vmem:[%s5970_s19 + $0x1ec8] sm:$0xff] }
  0x8d   : > { %v775_v56 = vld [vmem:[%s5970_s19 + $0x1f00] sm:$0xff]  ;;  %772 = vst [vmem:[%s5975_s20 + $0x7b0] sm:$0xff] %v771_v54  ;;  %774 = vst [vmem:[%s5975_s20 + $0x7b8] sm:$0xff] %v773_v55  ;;  %v777_v57 = vld [vmem:[%s5970_s19 + $0x1f08] sm:$0xff] }
  0x8e   : > { %776 = vst [vmem:[%s5975_s20 + $0x7c0] sm:$0xff] %v775_v56  ;;  %v779_v58 = vld [vmem:[%s5970_s19 + $0x1f40] sm:$0xff]  ;;  %v781_v59 = vld [vmem:[%s5970_s19 + $0x1f48] sm:$0xff]  ;;  %778 = vst [vmem:[%s5975_s20 + $0x7c8] sm:$0xff] %v777_v57 }
  0x8f   : > { %780 = vst [vmem:[%s5975_s20 + $0x7d0] sm:$0xff] %v779_v58  ;;  %782 = vst [vmem:[%s5975_s20 + $0x7d8] sm:$0xff] %v781_v59  ;;  %v783_v60 = vld [vmem:[%s5970_s19 + $0x1f80] sm:$0xff]  ;;  %v785_v61 = vld [vmem:[%s5970_s19 + $0x1f88] sm:$0xff] }
  0x90   : > { %v787_v62 = vld [vmem:[%s5970_s19 + $0x1fc0] sm:$0xff]  ;;  %784 = vst [vmem:[%s5975_s20 + $0x7e0] sm:$0xff] %v783_v60  ;;  %786 = vst [vmem:[%s5975_s20 + $0x7e8] sm:$0xff] %v785_v61  ;;  %v789_v63 = vld [vmem:[%s5970_s19 + $0x1fc8] sm:$0xff] }
  0x91   : > { %788 = vst [vmem:[%s5975_s20 + $0x7f0] sm:$0xff] %v787_v62  ;;  %790 = vst [vmem:[%s5975_s20 + $0x7f8] sm:$0xff] %v789_v63 }
  0x92 PF: > { %796 = sbr.rel (!%p5958_p3) target bundleno = 278 (0x116), region = 63  ;;  %s798_s21 = sand.u32 (%p5958_p3), 1, %s5858_s28  }
  0x93   : > { %s4514_s22 = sshll.u32 (%p5958_p3), %s5862_s29, 4  ;;  %s4490_s23 = sshll.u32 (%p5958_p3), %s798_s21, 11 }
  0x94   : > { %s6493_s26 = scalar_lea.vmem (%p5958_p3), %s9837_s6, %s4514_s22  ;;  %s6498_s10 = scalar_lea.vmem (%p5958_p3), [#allocation3], %s4490_s23 }
  0x95   : > { %v816_v0 = vld [vmem:[%s6493_s26] sm:$0xff] (%p5958_p3)  ;;  %v818_v1 = vld [vmem:[%s6493_s26 + $0x8] sm:$0xff] (%p5958_p3) }
  0x96   : > { %v820_v2 = vld [vmem:[%s6493_s26 + $0x40] sm:$0xff] (%p5958_p3)  ;;  %817 = vst [vmem:[%s6498_s10] sm:$0xff] (%p5958_p3), %v816_v0  ;;  %819 = vst [vmem:[%s6498_s10 + $0x8] sm:$0xff] (%p5958_p3), %v818_v1  ;;  %v822_v3 = vld [vmem:[%s6493_s26 + $0x48] sm:$0xff] (%p5958_p3) }
  0x97   : > { %821 = vst [vmem:[%s6498_s10 + $0x10] sm:$0xff] (%p5958_p3), %v820_v2  ;;  %v824_v4 = vld [vmem:[%s6493_s26 + $0x80] sm:$0xff] (%p5958_p3)  ;;  %v826_v5 = vld [vmem:[%s6493_s26 + $0x88] sm:$0xff] (%p5958_p3)  ;;  %823 = vst [vmem:[%s6498_s10 + $0x18] sm:$0xff] (%p5958_p3), %v822_v3 }
  0x98   : > { %825 = vst [vmem:[%s6498_s10 + $0x20] sm:$0xff] (%p5958_p3), %v824_v4  ;;  %827 = vst [vmem:[%s6498_s10 + $0x28] sm:$0xff] (%p5958_p3), %v826_v5  ;;  %v828_v6 = vld [vmem:[%s6493_s26 + $0xc0] sm:$0xff] (%p5958_p3)  ;;  %v830_v7 = vld [vmem:[%s6493_s26 + $0xc8] sm:$0xff] (%p5958_p3) }
  0x99   : > { %v832_v8 = vld [vmem:[%s6493_s26 + $0x100] sm:$0xff]  ;;  %829 = vst [vmem:[%s6498_s10 + $0x30] sm:$0xff] %v828_v6  ;;  %831 = vst [vmem:[%s6498_s10 + $0x38] sm:$0xff] %v830_v7  ;;  %v834_v9 = vld [vmem:[%s6493_s26 + $0x108] sm:$0xff] }
  0x9a   : > { %833 = vst [vmem:[%s6498_s10 + $0x40] sm:$0xff] %v832_v8  ;;  %v836_v10 = vld [vmem:[%s6493_s26 + $0x140] sm:$0xff]  ;;  %v838_v11 = vld [vmem:[%s6493_s26 + $0x148] sm:$0xff]  ;;  %835 = vst [vmem:[%s6498_s10 + $0x48] sm:$0xff] %v834_v9 }
  0x9b   : > { %837 = vst [vmem:[%s6498_s10 + $0x50] sm:$0xff] %v836_v10  ;;  %839 = vst [vmem:[%s6498_s10 + $0x58] sm:$0xff] %v838_v11  ;;  %v840_v12 = vld [vmem:[%s6493_s26 + $0x180] sm:$0xff]  ;;  %v842_v13 = vld [vmem:[%s6493_s26 + $0x188] sm:$0xff] }
  0x9c   : > { %v844_v14 = vld [vmem:[%s6493_s26 + $0x1c0] sm:$0xff]  ;;  %841 = vst [vmem:[%s6498_s10 + $0x60] sm:$0xff] %v840_v12  ;;  %843 = vst [vmem:[%s6498_s10 + $0x68] sm:$0xff] %v842_v13  ;;  %v846_v15 = vld [vmem:[%s6493_s26 + $0x1c8] sm:$0xff] }
  0x9d   : > { %845 = vst [vmem:[%s6498_s10 + $0x70] sm:$0xff] %v844_v14  ;;  %v848_v16 = vld [vmem:[%s6493_s26 + $0x200] sm:$0xff]  ;;  %v850_v17 = vld [vmem:[%s6493_s26 + $0x208] sm:$0xff]  ;;  %847 = vst [vmem:[%s6498_s10 + $0x78] sm:$0xff] %v846_v15 }
  0x9e   : > { %849 = vst [vmem:[%s6498_s10 + $0x80] sm:$0xff] %v848_v16  ;;  %851 = vst [vmem:[%s6498_s10 + $0x88] sm:$0xff] %v850_v17  ;;  %v852_v18 = vld [vmem:[%s6493_s26 + $0x240] sm:$0xff]  ;;  %v854_v19 = vld [vmem:[%s6493_s26 + $0x248] sm:$0xff] }
  0x9f   : > { %v856_v20 = vld [vmem:[%s6493_s26 + $0x280] sm:$0xff]  ;;  %853 = vst [vmem:[%s6498_s10 + $0x90] sm:$0xff] %v852_v18  ;;  %855 = vst [vmem:[%s6498_s10 + $0x98] sm:$0xff] %v854_v19  ;;  %v858_v21 = vld [vmem:[%s6493_s26 + $0x288] sm:$0xff] }
  0xa0   : > { %857 = vst [vmem:[%s6498_s10 + $0xa0] sm:$0xff] %v856_v20  ;;  %v860_v22 = vld [vmem:[%s6493_s26 + $0x2c0] sm:$0xff]  ;;  %v862_v23 = vld [vmem:[%s6493_s26 + $0x2c8] sm:$0xff]  ;;  %859 = vst [vmem:[%s6498_s10 + $0xa8] sm:$0xff] %v858_v21 }
  0xa1   : > { %861 = vst [vmem:[%s6498_s10 + $0xb0] sm:$0xff] %v860_v22  ;;  %863 = vst [vmem:[%s6498_s10 + $0xb8] sm:$0xff] %v862_v23  ;;  %v864_v24 = vld [vmem:[%s6493_s26 + $0x300] sm:$0xff]  ;;  %v866_v25 = vld [vmem:[%s6493_s26 + $0x308] sm:$0xff] }
  0xa2   : > { %v868_v26 = vld [vmem:[%s6493_s26 + $0x340] sm:$0xff]  ;;  %865 = vst [vmem:[%s6498_s10 + $0xc0] sm:$0xff] %v864_v24  ;;  %867 = vst [vmem:[%s6498_s10 + $0xc8] sm:$0xff] %v866_v25  ;;  %v870_v27 = vld [vmem:[%s6493_s26 + $0x348] sm:$0xff] }
  0xa3   : > { %869 = vst [vmem:[%s6498_s10 + $0xd0] sm:$0xff] %v868_v26  ;;  %v872_v28 = vld [vmem:[%s6493_s26 + $0x380] sm:$0xff]  ;;  %v874_v29 = vld [vmem:[%s6493_s26 + $0x388] sm:$0xff]  ;;  %871 = vst [vmem:[%s6498_s10 + $0xd8] sm:$0xff] %v870_v27 }
  0xa4   : > { %873 = vst [vmem:[%s6498_s10 + $0xe0] sm:$0xff] %v872_v28  ;;  %875 = vst [vmem:[%s6498_s10 + $0xe8] sm:$0xff] %v874_v29  ;;  %v876_v30 = vld [vmem:[%s6493_s26 + $0x3c0] sm:$0xff]  ;;  %v878_v31 = vld [vmem:[%s6493_s26 + $0x3c8] sm:$0xff] }
  0xa5   : > { %v880_v32 = vld [vmem:[%s6493_s26 + $0x400] sm:$0xff]  ;;  %877 = vst [vmem:[%s6498_s10 + $0xf0] sm:$0xff] %v876_v30  ;;  %879 = vst [vmem:[%s6498_s10 + $0xf8] sm:$0xff] %v878_v31  ;;  %v882_v33 = vld [vmem:[%s6493_s26 + $0x408] sm:$0xff] }
  0xa6   : > { %881 = vst [vmem:[%s6498_s10 + $0x100] sm:$0xff] %v880_v32  ;;  %v884_v34 = vld [vmem:[%s6493_s26 + $0x440] sm:$0xff]  ;;  %v886_v35 = vld [vmem:[%s6493_s26 + $0x448] sm:$0xff]  ;;  %883 = vst [vmem:[%s6498_s10 + $0x108] sm:$0xff] %v882_v33 }
  0xa7   : > { %885 = vst [vmem:[%s6498_s10 + $0x110] sm:$0xff] %v884_v34  ;;  %887 = vst [vmem:[%s6498_s10 + $0x118] sm:$0xff] %v886_v35  ;;  %v888_v36 = vld [vmem:[%s6493_s26 + $0x480] sm:$0xff]  ;;  %v890_v37 = vld [vmem:[%s6493_s26 + $0x488] sm:$0xff] }
  0xa8   : > { %v892_v38 = vld [vmem:[%s6493_s26 + $0x4c0] sm:$0xff]  ;;  %889 = vst [vmem:[%s6498_s10 + $0x120] sm:$0xff] %v888_v36  ;;  %891 = vst [vmem:[%s6498_s10 + $0x128] sm:$0xff] %v890_v37  ;;  %v894_v39 = vld [vmem:[%s6493_s26 + $0x4c8] sm:$0xff] }
  0xa9   : > { %893 = vst [vmem:[%s6498_s10 + $0x130] sm:$0xff] %v892_v38  ;;  %v896_v40 = vld [vmem:[%s6493_s26 + $0x500] sm:$0xff]  ;;  %v898_v41 = vld [vmem:[%s6493_s26 + $0x508] sm:$0xff]  ;;  %895 = vst [vmem:[%s6498_s10 + $0x138] sm:$0xff] %v894_v39 }
  0xaa   : > { %897 = vst [vmem:[%s6498_s10 + $0x140] sm:$0xff] %v896_v40  ;;  %899 = vst [vmem:[%s6498_s10 + $0x148] sm:$0xff] %v898_v41  ;;  %v900_v42 = vld [vmem:[%s6493_s26 + $0x540] sm:$0xff]  ;;  %v902_v43 = vld [vmem:[%s6493_s26 + $0x548] sm:$0xff] }
  0xab   : > { %v904_v44 = vld [vmem:[%s6493_s26 + $0x580] sm:$0xff]  ;;  %901 = vst [vmem:[%s6498_s10 + $0x150] sm:$0xff] %v900_v42  ;;  %903 = vst [vmem:[%s6498_s10 + $0x158] sm:$0xff] %v902_v43  ;;  %v906_v45 = vld [vmem:[%s6493_s26 + $0x588] sm:$0xff] }
  0xac   : > { %905 = vst [vmem:[%s6498_s10 + $0x160] sm:$0xff] %v904_v44  ;;  %v908_v46 = vld [vmem:[%s6493_s26 + $0x5c0] sm:$0xff]  ;;  %v910_v47 = vld [vmem:[%s6493_s26 + $0x5c8] sm:$0xff]  ;;  %907 = vst [vmem:[%s6498_s10 + $0x168] sm:$0xff] %v906_v45 }
  0xad   : > { %909 = vst [vmem:[%s6498_s10 + $0x170] sm:$0xff] %v908_v46  ;;  %911 = vst [vmem:[%s6498_s10 + $0x178] sm:$0xff] %v910_v47  ;;  %v912_v48 = vld [vmem:[%s6493_s26 + $0x600] sm:$0xff]  ;;  %v914_v49 = vld [vmem:[%s6493_s26 + $0x608] sm:$0xff] }
  0xae   : > { %v916_v50 = vld [vmem:[%s6493_s26 + $0x640] sm:$0xff]  ;;  %913 = vst [vmem:[%s6498_s10 + $0x180] sm:$0xff] %v912_v48  ;;  %915 = vst [vmem:[%s6498_s10 + $0x188] sm:$0xff] %v914_v49  ;;  %v918_v51 = vld [vmem:[%s6493_s26 + $0x648] sm:$0xff] }
  0xaf   : > { %917 = vst [vmem:[%s6498_s10 + $0x190] sm:$0xff] %v916_v50  ;;  %v920_v52 = vld [vmem:[%s6493_s26 + $0x680] sm:$0xff]  ;;  %v922_v53 = vld [vmem:[%s6493_s26 + $0x688] sm:$0xff]  ;;  %919 = vst [vmem:[%s6498_s10 + $0x198] sm:$0xff] %v918_v51 }
  0xb0   : > { %921 = vst [vmem:[%s6498_s10 + $0x1a0] sm:$0xff] %v920_v52  ;;  %923 = vst [vmem:[%s6498_s10 + $0x1a8] sm:$0xff] %v922_v53  ;;  %v924_v54 = vld [vmem:[%s6493_s26 + $0x6c0] sm:$0xff]  ;;  %v926_v55 = vld [vmem:[%s6493_s26 + $0x6c8] sm:$0xff] }
  0xb1   : > { %v928_v56 = vld [vmem:[%s6493_s26 + $0x700] sm:$0xff]  ;;  %925 = vst [vmem:[%s6498_s10 + $0x1b0] sm:$0xff] %v924_v54  ;;  %927 = vst [vmem:[%s6498_s10 + $0x1b8] sm:$0xff] %v926_v55  ;;  %v930_v57 = vld [vmem:[%s6493_s26 + $0x708] sm:$0xff] }
  0xb2   : > { %929 = vst [vmem:[%s6498_s10 + $0x1c0] sm:$0xff] %v928_v56  ;;  %v932_v58 = vld [vmem:[%s6493_s26 + $0x740] sm:$0xff]  ;;  %v934_v59 = vld [vmem:[%s6493_s26 + $0x748] sm:$0xff]  ;;  %931 = vst [vmem:[%s6498_s10 + $0x1c8] sm:$0xff] %v930_v57 }
  0xb3   : > { %933 = vst [vmem:[%s6498_s10 + $0x1d0] sm:$0xff] %v932_v58  ;;  %935 = vst [vmem:[%s6498_s10 + $0x1d8] sm:$0xff] %v934_v59  ;;  %v936_v60 = vld [vmem:[%s6493_s26 + $0x780] sm:$0xff]  ;;  %v938_v61 = vld [vmem:[%s6493_s26 + $0x788] sm:$0xff] }
  0xb4   : > { %v940_v62 = vld [vmem:[%s6493_s26 + $0x7c0] sm:$0xff]  ;;  %937 = vst [vmem:[%s6498_s10 + $0x1e0] sm:$0xff] %v936_v60  ;;  %939 = vst [vmem:[%s6498_s10 + $0x1e8] sm:$0xff] %v938_v61  ;;  %v942_v63 = vld [vmem:[%s6493_s26 + $0x7c8] sm:$0xff] }
  0xb5   : > { %941 = vst [vmem:[%s6498_s10 + $0x1f0] sm:$0xff] %v940_v62  ;;  %v944_v0 = vld [vmem:[%s6493_s26 + $0x800] sm:$0xff]  ;;  %v946_v1 = vld [vmem:[%s6493_s26 + $0x808] sm:$0xff]  ;;  %943 = vst [vmem:[%s6498_s10 + $0x1f8] sm:$0xff] %v942_v63 }
  0xb6   : > { %945 = vst [vmem:[%s6498_s10 + $0x200] sm:$0xff] %v944_v0  ;;  %947 = vst [vmem:[%s6498_s10 + $0x208] sm:$0xff] %v946_v1  ;;  %v948_v2 = vld [vmem:[%s6493_s26 + $0x840] sm:$0xff]  ;;  %v950_v3 = vld [vmem:[%s6493_s26 + $0x848] sm:$0xff] }
  0xb7   : > { %v952_v4 = vld [vmem:[%s6493_s26 + $0x880] sm:$0xff]  ;;  %949 = vst [vmem:[%s6498_s10 + $0x210] sm:$0xff] %v948_v2  ;;  %951 = vst [vmem:[%s6498_s10 + $0x218] sm:$0xff] %v950_v3  ;;  %v954_v5 = vld [vmem:[%s6493_s26 + $0x888] sm:$0xff] }
  0xb8   : > { %953 = vst [vmem:[%s6498_s10 + $0x220] sm:$0xff] %v952_v4  ;;  %v956_v6 = vld [vmem:[%s6493_s26 + $0x8c0] sm:$0xff]  ;;  %v958_v7 = vld [vmem:[%s6493_s26 + $0x8c8] sm:$0xff]  ;;  %955 = vst [vmem:[%s6498_s10 + $0x228] sm:$0xff] %v954_v5 }
  0xb9   : > { %957 = vst [vmem:[%s6498_s10 + $0x230] sm:$0xff] %v956_v6  ;;  %959 = vst [vmem:[%s6498_s10 + $0x238] sm:$0xff] %v958_v7  ;;  %v960_v8 = vld [vmem:[%s6493_s26 + $0x900] sm:$0xff]  ;;  %v962_v9 = vld [vmem:[%s6493_s26 + $0x908] sm:$0xff] }
  0xba   : > { %v964_v10 = vld [vmem:[%s6493_s26 + $0x940] sm:$0xff]  ;;  %961 = vst [vmem:[%s6498_s10 + $0x240] sm:$0xff] %v960_v8  ;;  %963 = vst [vmem:[%s6498_s10 + $0x248] sm:$0xff] %v962_v9  ;;  %v966_v11 = vld [vmem:[%s6493_s26 + $0x948] sm:$0xff] }
  0xbb   : > { %965 = vst [vmem:[%s6498_s10 + $0x250] sm:$0xff] %v964_v10  ;;  %v968_v12 = vld [vmem:[%s6493_s26 + $0x980] sm:$0xff]  ;;  %v970_v13 = vld [vmem:[%s6493_s26 + $0x988] sm:$0xff]  ;;  %967 = vst [vmem:[%s6498_s10 + $0x258] sm:$0xff] %v966_v11 }
  0xbc   : > { %969 = vst [vmem:[%s6498_s10 + $0x260] sm:$0xff] %v968_v12  ;;  %971 = vst [vmem:[%s6498_s10 + $0x268] sm:$0xff] %v970_v13  ;;  %v972_v14 = vld [vmem:[%s6493_s26 + $0x9c0] sm:$0xff]  ;;  %v974_v15 = vld [vmem:[%s6493_s26 + $0x9c8] sm:$0xff] }
  0xbd   : > { %v976_v16 = vld [vmem:[%s6493_s26 + $0xa00] sm:$0xff]  ;;  %973 = vst [vmem:[%s6498_s10 + $0x270] sm:$0xff] %v972_v14  ;;  %975 = vst [vmem:[%s6498_s10 + $0x278] sm:$0xff] %v974_v15  ;;  %v978_v17 = vld [vmem:[%s6493_s26 + $0xa08] sm:$0xff] }
  0xbe   : > { %977 = vst [vmem:[%s6498_s10 + $0x280] sm:$0xff] %v976_v16  ;;  %v980_v18 = vld [vmem:[%s6493_s26 + $0xa40] sm:$0xff]  ;;  %v982_v19 = vld [vmem:[%s6493_s26 + $0xa48] sm:$0xff]  ;;  %979 = vst [vmem:[%s6498_s10 + $0x288] sm:$0xff] %v978_v17 }
  0xbf   : > { %981 = vst [vmem:[%s6498_s10 + $0x290] sm:$0xff] %v980_v18  ;;  %983 = vst [vmem:[%s6498_s10 + $0x298] sm:$0xff] %v982_v19  ;;  %v984_v20 = vld [vmem:[%s6493_s26 + $0xa80] sm:$0xff]  ;;  %v986_v21 = vld [vmem:[%s6493_s26 + $0xa88] sm:$0xff] }
  0xc0   : > { %v988_v22 = vld [vmem:[%s6493_s26 + $0xac0] sm:$0xff]  ;;  %985 = vst [vmem:[%s6498_s10 + $0x2a0] sm:$0xff] %v984_v20  ;;  %987 = vst [vmem:[%s6498_s10 + $0x2a8] sm:$0xff] %v986_v21  ;;  %v990_v23 = vld [vmem:[%s6493_s26 + $0xac8] sm:$0xff] }
  0xc1   : > { %989 = vst [vmem:[%s6498_s10 + $0x2b0] sm:$0xff] %v988_v22  ;;  %v992_v24 = vld [vmem:[%s6493_s26 + $0xb00] sm:$0xff]  ;;  %v994_v25 = vld [vmem:[%s6493_s26 + $0xb08] sm:$0xff]  ;;  %991 = vst [vmem:[%s6498_s10 + $0x2b8] sm:$0xff] %v990_v23 }
  0xc2   : > { %993 = vst [vmem:[%s6498_s10 + $0x2c0] sm:$0xff] %v992_v24  ;;  %995 = vst [vmem:[%s6498_s10 + $0x2c8] sm:$0xff] %v994_v25  ;;  %v996_v26 = vld [vmem:[%s6493_s26 + $0xb40] sm:$0xff]  ;;  %v998_v27 = vld [vmem:[%s6493_s26 + $0xb48] sm:$0xff] }
  0xc3   : > { %v1000_v28 = vld [vmem:[%s6493_s26 + $0xb80] sm:$0xff]  ;;  %997 = vst [vmem:[%s6498_s10 + $0x2d0] sm:$0xff] %v996_v26  ;;  %999 = vst [vmem:[%s6498_s10 + $0x2d8] sm:$0xff] %v998_v27  ;;  %v1002_v29 = vld [vmem:[%s6493_s26 + $0xb88] sm:$0xff] }
  0xc4   : > { %1001 = vst [vmem:[%s6498_s10 + $0x2e0] sm:$0xff] %v1000_v28  ;;  %v1004_v30 = vld [vmem:[%s6493_s26 + $0xbc0] sm:$0xff]  ;;  %v1006_v31 = vld [vmem:[%s6493_s26 + $0xbc8] sm:$0xff]  ;;  %1003 = vst [vmem:[%s6498_s10 + $0x2e8] sm:$0xff] %v1002_v29 }
  0xc5   : > { %1005 = vst [vmem:[%s6498_s10 + $0x2f0] sm:$0xff] %v1004_v30  ;;  %1007 = vst [vmem:[%s6498_s10 + $0x2f8] sm:$0xff] %v1006_v31  ;;  %v1008_v32 = vld [vmem:[%s6493_s26 + $0xc00] sm:$0xff]  ;;  %v1010_v33 = vld [vmem:[%s6493_s26 + $0xc08] sm:$0xff] }
  0xc6   : > { %v1012_v34 = vld [vmem:[%s6493_s26 + $0xc40] sm:$0xff]  ;;  %1009 = vst [vmem:[%s6498_s10 + $0x300] sm:$0xff] %v1008_v32  ;;  %1011 = vst [vmem:[%s6498_s10 + $0x308] sm:$0xff] %v1010_v33  ;;  %v1014_v35 = vld [vmem:[%s6493_s26 + $0xc48] sm:$0xff] }
  0xc7   : > { %1013 = vst [vmem:[%s6498_s10 + $0x310] sm:$0xff] %v1012_v34  ;;  %v1016_v36 = vld [vmem:[%s6493_s26 + $0xc80] sm:$0xff]  ;;  %v1018_v37 = vld [vmem:[%s6493_s26 + $0xc88] sm:$0xff]  ;;  %1015 = vst [vmem:[%s6498_s10 + $0x318] sm:$0xff] %v1014_v35 }
  0xc8   : > { %1017 = vst [vmem:[%s6498_s10 + $0x320] sm:$0xff] %v1016_v36  ;;  %1019 = vst [vmem:[%s6498_s10 + $0x328] sm:$0xff] %v1018_v37  ;;  %v1020_v38 = vld [vmem:[%s6493_s26 + $0xcc0] sm:$0xff]  ;;  %v1022_v39 = vld [vmem:[%s6493_s26 + $0xcc8] sm:$0xff] }
  0xc9   : > { %v1024_v40 = vld [vmem:[%s6493_s26 + $0xd00] sm:$0xff]  ;;  %1021 = vst [vmem:[%s6498_s10 + $0x330] sm:$0xff] %v1020_v38  ;;  %1023 = vst [vmem:[%s6498_s10 + $0x338] sm:$0xff] %v1022_v39  ;;  %v1026_v41 = vld [vmem:[%s6493_s26 + $0xd08] sm:$0xff] }
  0xca   : > { %1025 = vst [vmem:[%s6498_s10 + $0x340] sm:$0xff] %v1024_v40  ;;  %v1028_v42 = vld [vmem:[%s6493_s26 + $0xd40] sm:$0xff]  ;;  %v1030_v43 = vld [vmem:[%s6493_s26 + $0xd48] sm:$0xff]  ;;  %1027 = vst [vmem:[%s6498_s10 + $0x348] sm:$0xff] %v1026_v41 }
  0xcb   : > { %1029 = vst [vmem:[%s6498_s10 + $0x350] sm:$0xff] %v1028_v42  ;;  %1031 = vst [vmem:[%s6498_s10 + $0x358] sm:$0xff] %v1030_v43  ;;  %v1032_v44 = vld [vmem:[%s6493_s26 + $0xd80] sm:$0xff]  ;;  %v1034_v45 = vld [vmem:[%s6493_s26 + $0xd88] sm:$0xff] }
  0xcc   : > { %v1036_v46 = vld [vmem:[%s6493_s26 + $0xdc0] sm:$0xff]  ;;  %1033 = vst [vmem:[%s6498_s10 + $0x360] sm:$0xff] %v1032_v44  ;;  %1035 = vst [vmem:[%s6498_s10 + $0x368] sm:$0xff] %v1034_v45  ;;  %v1038_v47 = vld [vmem:[%s6493_s26 + $0xdc8] sm:$0xff] }
  0xcd   : > { %1037 = vst [vmem:[%s6498_s10 + $0x370] sm:$0xff] %v1036_v46  ;;  %v1040_v48 = vld [vmem:[%s6493_s26 + $0xe00] sm:$0xff]  ;;  %v1042_v49 = vld [vmem:[%s6493_s26 + $0xe08] sm:$0xff]  ;;  %1039 = vst [vmem:[%s6498_s10 + $0x378] sm:$0xff] %v1038_v47 }
  0xce   : > { %1041 = vst [vmem:[%s6498_s10 + $0x380] sm:$0xff] %v1040_v48  ;;  %1043 = vst [vmem:[%s6498_s10 + $0x388] sm:$0xff] %v1042_v49  ;;  %v1044_v50 = vld [vmem:[%s6493_s26 + $0xe40] sm:$0xff]  ;;  %v1046_v51 = vld [vmem:[%s6493_s26 + $0xe48] sm:$0xff] }
  0xcf   : > { %v1048_v52 = vld [vmem:[%s6493_s26 + $0xe80] sm:$0xff]  ;;  %1045 = vst [vmem:[%s6498_s10 + $0x390] sm:$0xff] %v1044_v50  ;;  %1047 = vst [vmem:[%s6498_s10 + $0x398] sm:$0xff] %v1046_v51  ;;  %v1050_v53 = vld [vmem:[%s6493_s26 + $0xe88] sm:$0xff] }
  0xd0   : > { %1049 = vst [vmem:[%s6498_s10 + $0x3a0] sm:$0xff] %v1048_v52  ;;  %v1052_v54 = vld [vmem:[%s6493_s26 + $0xec0] sm:$0xff]  ;;  %v1054_v55 = vld [vmem:[%s6493_s26 + $0xec8] sm:$0xff]  ;;  %1051 = vst [vmem:[%s6498_s10 + $0x3a8] sm:$0xff] %v1050_v53 }
  0xd1   : > { %1053 = vst [vmem:[%s6498_s10 + $0x3b0] sm:$0xff] %v1052_v54  ;;  %1055 = vst [vmem:[%s6498_s10 + $0x3b8] sm:$0xff] %v1054_v55  ;;  %v1056_v56 = vld [vmem:[%s6493_s26 + $0xf00] sm:$0xff]  ;;  %v1058_v57 = vld [vmem:[%s6493_s26 + $0xf08] sm:$0xff] }
  0xd2   : > { %v1060_v58 = vld [vmem:[%s6493_s26 + $0xf40] sm:$0xff]  ;;  %1057 = vst [vmem:[%s6498_s10 + $0x3c0] sm:$0xff] %v1056_v56  ;;  %1059 = vst [vmem:[%s6498_s10 + $0x3c8] sm:$0xff] %v1058_v57  ;;  %v1062_v59 = vld [vmem:[%s6493_s26 + $0xf48] sm:$0xff] }
  0xd3   : > { %1061 = vst [vmem:[%s6498_s10 + $0x3d0] sm:$0xff] %v1060_v58  ;;  %v1064_v60 = vld [vmem:[%s6493_s26 + $0xf80] sm:$0xff]  ;;  %v1066_v61 = vld [vmem:[%s6493_s26 + $0xf88] sm:$0xff]  ;;  %1063 = vst [vmem:[%s6498_s10 + $0x3d8] sm:$0xff] %v1062_v59 }
  0xd4   : > { %1065 = vst [vmem:[%s6498_s10 + $0x3e0] sm:$0xff] %v1064_v60  ;;  %1067 = vst [vmem:[%s6498_s10 + $0x3e8] sm:$0xff] %v1066_v61  ;;  %v1068_v62 = vld [vmem:[%s6493_s26 + $0xfc0] sm:$0xff]  ;;  %v1070_v63 = vld [vmem:[%s6493_s26 + $0xfc8] sm:$0xff] }
  0xd5   : > { %v1072_v0 = vld [vmem:[%s6493_s26 + $0x1000] sm:$0xff]  ;;  %1069 = vst [vmem:[%s6498_s10 + $0x3f0] sm:$0xff] %v1068_v62  ;;  %1071 = vst [vmem:[%s6498_s10 + $0x3f8] sm:$0xff] %v1070_v63  ;;  %v1074_v1 = vld [vmem:[%s6493_s26 + $0x1008] sm:$0xff] }
  0xd6   : > { %1073 = vst [vmem:[%s6498_s10 + $0x400] sm:$0xff] %v1072_v0  ;;  %v1076_v2 = vld [vmem:[%s6493_s26 + $0x1040] sm:$0xff]  ;;  %v1078_v3 = vld [vmem:[%s6493_s26 + $0x1048] sm:$0xff]  ;;  %1075 = vst [vmem:[%s6498_s10 + $0x408] sm:$0xff] %v1074_v1 }
  0xd7   : > { %1077 = vst [vmem:[%s6498_s10 + $0x410] sm:$0xff] %v1076_v2  ;;  %1079 = vst [vmem:[%s6498_s10 + $0x418] sm:$0xff] %v1078_v3  ;;  %v1080_v4 = vld [vmem:[%s6493_s26 + $0x1080] sm:$0xff]  ;;  %v1082_v5 = vld [vmem:[%s6493_s26 + $0x1088] sm:$0xff] }
  0xd8   : > { %v1084_v6 = vld [vmem:[%s6493_s26 + $0x10c0] sm:$0xff]  ;;  %1081 = vst [vmem:[%s6498_s10 + $0x420] sm:$0xff] %v1080_v4  ;;  %1083 = vst [vmem:[%s6498_s10 + $0x428] sm:$0xff] %v1082_v5  ;;  %v1086_v7 = vld [vmem:[%s6493_s26 + $0x10c8] sm:$0xff] }
  0xd9   : > { %1085 = vst [vmem:[%s6498_s10 + $0x430] sm:$0xff] %v1084_v6  ;;  %v1088_v8 = vld [vmem:[%s6493_s26 + $0x1100] sm:$0xff]  ;;  %v1090_v9 = vld [vmem:[%s6493_s26 + $0x1108] sm:$0xff]  ;;  %1087 = vst [vmem:[%s6498_s10 + $0x438] sm:$0xff] %v1086_v7 }
  0xda   : > { %1089 = vst [vmem:[%s6498_s10 + $0x440] sm:$0xff] %v1088_v8  ;;  %1091 = vst [vmem:[%s6498_s10 + $0x448] sm:$0xff] %v1090_v9  ;;  %v1092_v10 = vld [vmem:[%s6493_s26 + $0x1140] sm:$0xff]  ;;  %v1094_v11 = vld [vmem:[%s6493_s26 + $0x1148] sm:$0xff] }
  0xdb   : > { %v1096_v12 = vld [vmem:[%s6493_s26 + $0x1180] sm:$0xff]  ;;  %1093 = vst [vmem:[%s6498_s10 + $0x450] sm:$0xff] %v1092_v10  ;;  %1095 = vst [vmem:[%s6498_s10 + $0x458] sm:$0xff] %v1094_v11  ;;  %v1098_v13 = vld [vmem:[%s6493_s26 + $0x1188] sm:$0xff] }
  0xdc   : > { %1097 = vst [vmem:[%s6498_s10 + $0x460] sm:$0xff] %v1096_v12  ;;  %v1100_v14 = vld [vmem:[%s6493_s26 + $0x11c0] sm:$0xff]  ;;  %v1102_v15 = vld [vmem:[%s6493_s26 + $0x11c8] sm:$0xff]  ;;  %1099 = vst [vmem:[%s6498_s10 + $0x468] sm:$0xff] %v1098_v13 }
  0xdd   : > { %1101 = vst [vmem:[%s6498_s10 + $0x470] sm:$0xff] %v1100_v14  ;;  %1103 = vst [vmem:[%s6498_s10 + $0x478] sm:$0xff] %v1102_v15  ;;  %v1104_v16 = vld [vmem:[%s6493_s26 + $0x1200] sm:$0xff]  ;;  %v1106_v17 = vld [vmem:[%s6493_s26 + $0x1208] sm:$0xff] }
  0xde   : > { %v1108_v18 = vld [vmem:[%s6493_s26 + $0x1240] sm:$0xff]  ;;  %1105 = vst [vmem:[%s6498_s10 + $0x480] sm:$0xff] %v1104_v16  ;;  %1107 = vst [vmem:[%s6498_s10 + $0x488] sm:$0xff] %v1106_v17  ;;  %v1110_v19 = vld [vmem:[%s6493_s26 + $0x1248] sm:$0xff] }
  0xdf   : > { %1109 = vst [vmem:[%s6498_s10 + $0x490] sm:$0xff] %v1108_v18  ;;  %v1112_v20 = vld [vmem:[%s6493_s26 + $0x1280] sm:$0xff]  ;;  %v1114_v21 = vld [vmem:[%s6493_s26 + $0x1288] sm:$0xff]  ;;  %1111 = vst [vmem:[%s6498_s10 + $0x498] sm:$0xff] %v1110_v19 }
  0xe0   : > { %1113 = vst [vmem:[%s6498_s10 + $0x4a0] sm:$0xff] %v1112_v20  ;;  %1115 = vst [vmem:[%s6498_s10 + $0x4a8] sm:$0xff] %v1114_v21  ;;  %v1116_v22 = vld [vmem:[%s6493_s26 + $0x12c0] sm:$0xff]  ;;  %v1118_v23 = vld [vmem:[%s6493_s26 + $0x12c8] sm:$0xff] }
  0xe1   : > { %v1120_v24 = vld [vmem:[%s6493_s26 + $0x1300] sm:$0xff]  ;;  %1117 = vst [vmem:[%s6498_s10 + $0x4b0] sm:$0xff] %v1116_v22  ;;  %1119 = vst [vmem:[%s6498_s10 + $0x4b8] sm:$0xff] %v1118_v23  ;;  %v1122_v25 = vld [vmem:[%s6493_s26 + $0x1308] sm:$0xff] }
  0xe2   : > { %1121 = vst [vmem:[%s6498_s10 + $0x4c0] sm:$0xff] %v1120_v24  ;;  %v1124_v26 = vld [vmem:[%s6493_s26 + $0x1340] sm:$0xff]  ;;  %v1126_v27 = vld [vmem:[%s6493_s26 + $0x1348] sm:$0xff]  ;;  %1123 = vst [vmem:[%s6498_s10 + $0x4c8] sm:$0xff] %v1122_v25 }
  0xe3   : > { %1125 = vst [vmem:[%s6498_s10 + $0x4d0] sm:$0xff] %v1124_v26  ;;  %1127 = vst [vmem:[%s6498_s10 + $0x4d8] sm:$0xff] %v1126_v27  ;;  %v1128_v28 = vld [vmem:[%s6493_s26 + $0x1380] sm:$0xff]  ;;  %v1130_v29 = vld [vmem:[%s6493_s26 + $0x1388] sm:$0xff] }
  0xe4   : > { %v1132_v30 = vld [vmem:[%s6493_s26 + $0x13c0] sm:$0xff]  ;;  %1129 = vst [vmem:[%s6498_s10 + $0x4e0] sm:$0xff] %v1128_v28  ;;  %1131 = vst [vmem:[%s6498_s10 + $0x4e8] sm:$0xff] %v1130_v29  ;;  %v1134_v31 = vld [vmem:[%s6493_s26 + $0x13c8] sm:$0xff] }
  0xe5   : > { %1133 = vst [vmem:[%s6498_s10 + $0x4f0] sm:$0xff] %v1132_v30  ;;  %v1136_v32 = vld [vmem:[%s6493_s26 + $0x1400] sm:$0xff]  ;;  %v1138_v33 = vld [vmem:[%s6493_s26 + $0x1408] sm:$0xff]  ;;  %1135 = vst [vmem:[%s6498_s10 + $0x4f8] sm:$0xff] %v1134_v31 }
  0xe6   : > { %1137 = vst [vmem:[%s6498_s10 + $0x500] sm:$0xff] %v1136_v32  ;;  %1139 = vst [vmem:[%s6498_s10 + $0x508] sm:$0xff] %v1138_v33  ;;  %v1140_v34 = vld [vmem:[%s6493_s26 + $0x1440] sm:$0xff]  ;;  %v1142_v35 = vld [vmem:[%s6493_s26 + $0x1448] sm:$0xff] }
  0xe7   : > { %v1144_v36 = vld [vmem:[%s6493_s26 + $0x1480] sm:$0xff]  ;;  %1141 = vst [vmem:[%s6498_s10 + $0x510] sm:$0xff] %v1140_v34  ;;  %1143 = vst [vmem:[%s6498_s10 + $0x518] sm:$0xff] %v1142_v35  ;;  %v1146_v37 = vld [vmem:[%s6493_s26 + $0x1488] sm:$0xff] }
  0xe8   : > { %1145 = vst [vmem:[%s6498_s10 + $0x520] sm:$0xff] %v1144_v36  ;;  %v1148_v38 = vld [vmem:[%s6493_s26 + $0x14c0] sm:$0xff]  ;;  %v1150_v39 = vld [vmem:[%s6493_s26 + $0x14c8] sm:$0xff]  ;;  %1147 = vst [vmem:[%s6498_s10 + $0x528] sm:$0xff] %v1146_v37 }
  0xe9   : > { %1149 = vst [vmem:[%s6498_s10 + $0x530] sm:$0xff] %v1148_v38  ;;  %1151 = vst [vmem:[%s6498_s10 + $0x538] sm:$0xff] %v1150_v39  ;;  %v1152_v40 = vld [vmem:[%s6493_s26 + $0x1500] sm:$0xff]  ;;  %v1154_v41 = vld [vmem:[%s6493_s26 + $0x1508] sm:$0xff] }
  0xea   : > { %v1156_v42 = vld [vmem:[%s6493_s26 + $0x1540] sm:$0xff]  ;;  %1153 = vst [vmem:[%s6498_s10 + $0x540] sm:$0xff] %v1152_v40  ;;  %1155 = vst [vmem:[%s6498_s10 + $0x548] sm:$0xff] %v1154_v41  ;;  %v1158_v43 = vld [vmem:[%s6493_s26 + $0x1548] sm:$0xff] }
  0xeb   : > { %1157 = vst [vmem:[%s6498_s10 + $0x550] sm:$0xff] %v1156_v42  ;;  %v1160_v44 = vld [vmem:[%s6493_s26 + $0x1580] sm:$0xff]  ;;  %v1162_v45 = vld [vmem:[%s6493_s26 + $0x1588] sm:$0xff]  ;;  %1159 = vst [vmem:[%s6498_s10 + $0x558] sm:$0xff] %v1158_v43 }
  0xec   : > { %1161 = vst [vmem:[%s6498_s10 + $0x560] sm:$0xff] %v1160_v44  ;;  %1163 = vst [vmem:[%s6498_s10 + $0x568] sm:$0xff] %v1162_v45  ;;  %v1164_v46 = vld [vmem:[%s6493_s26 + $0x15c0] sm:$0xff]  ;;  %v1166_v47 = vld [vmem:[%s6493_s26 + $0x15c8] sm:$0xff] }
  0xed   : > { %v1168_v48 = vld [vmem:[%s6493_s26 + $0x1600] sm:$0xff]  ;;  %1165 = vst [vmem:[%s6498_s10 + $0x570] sm:$0xff] %v1164_v46  ;;  %1167 = vst [vmem:[%s6498_s10 + $0x578] sm:$0xff] %v1166_v47  ;;  %v1170_v49 = vld [vmem:[%s6493_s26 + $0x1608] sm:$0xff] }
  0xee   : > { %1169 = vst [vmem:[%s6498_s10 + $0x580] sm:$0xff] %v1168_v48  ;;  %v1172_v50 = vld [vmem:[%s6493_s26 + $0x1640] sm:$0xff]  ;;  %v1174_v51 = vld [vmem:[%s6493_s26 + $0x1648] sm:$0xff]  ;;  %1171 = vst [vmem:[%s6498_s10 + $0x588] sm:$0xff] %v1170_v49 }
  0xef   : > { %1173 = vst [vmem:[%s6498_s10 + $0x590] sm:$0xff] %v1172_v50  ;;  %1175 = vst [vmem:[%s6498_s10 + $0x598] sm:$0xff] %v1174_v51  ;;  %v1176_v52 = vld [vmem:[%s6493_s26 + $0x1680] sm:$0xff]  ;;  %v1178_v53 = vld [vmem:[%s6493_s26 + $0x1688] sm:$0xff] }
  0xf0   : > { %v1180_v54 = vld [vmem:[%s6493_s26 + $0x16c0] sm:$0xff]  ;;  %1177 = vst [vmem:[%s6498_s10 + $0x5a0] sm:$0xff] %v1176_v52  ;;  %1179 = vst [vmem:[%s6498_s10 + $0x5a8] sm:$0xff] %v1178_v53  ;;  %v1182_v55 = vld [vmem:[%s6493_s26 + $0x16c8] sm:$0xff] }
  0xf1   : > { %1181 = vst [vmem:[%s6498_s10 + $0x5b0] sm:$0xff] %v1180_v54  ;;  %v1184_v56 = vld [vmem:[%s6493_s26 + $0x1700] sm:$0xff]  ;;  %v1186_v57 = vld [vmem:[%s6493_s26 + $0x1708] sm:$0xff]  ;;  %1183 = vst [vmem:[%s6498_s10 + $0x5b8] sm:$0xff] %v1182_v55 }
  0xf2   : > { %1185 = vst [vmem:[%s6498_s10 + $0x5c0] sm:$0xff] %v1184_v56  ;;  %1187 = vst [vmem:[%s6498_s10 + $0x5c8] sm:$0xff] %v1186_v57  ;;  %v1188_v58 = vld [vmem:[%s6493_s26 + $0x1740] sm:$0xff]  ;;  %v1190_v59 = vld [vmem:[%s6493_s26 + $0x1748] sm:$0xff] }
  0xf3   : > { %v1192_v60 = vld [vmem:[%s6493_s26 + $0x1780] sm:$0xff]  ;;  %1189 = vst [vmem:[%s6498_s10 + $0x5d0] sm:$0xff] %v1188_v58  ;;  %1191 = vst [vmem:[%s6498_s10 + $0x5d8] sm:$0xff] %v1190_v59  ;;  %v1194_v61 = vld [vmem:[%s6493_s26 + $0x1788] sm:$0xff] }
  0xf4   : > { %1193 = vst [vmem:[%s6498_s10 + $0x5e0] sm:$0xff] %v1192_v60  ;;  %v1196_v62 = vld [vmem:[%s6493_s26 + $0x17c0] sm:$0xff]  ;;  %v1198_v63 = vld [vmem:[%s6493_s26 + $0x17c8] sm:$0xff]  ;;  %1195 = vst [vmem:[%s6498_s10 + $0x5e8] sm:$0xff] %v1194_v61 }
  0xf5   : > { %1197 = vst [vmem:[%s6498_s10 + $0x5f0] sm:$0xff] %v1196_v62  ;;  %1199 = vst [vmem:[%s6498_s10 + $0x5f8] sm:$0xff] %v1198_v63  ;;  %v1200_v0 = vld [vmem:[%s6493_s26 + $0x1800] sm:$0xff]  ;;  %v1202_v1 = vld [vmem:[%s6493_s26 + $0x1808] sm:$0xff] }
  0xf6   : > { %v1204_v2 = vld [vmem:[%s6493_s26 + $0x1840] sm:$0xff]  ;;  %1201 = vst [vmem:[%s6498_s10 + $0x600] sm:$0xff] %v1200_v0  ;;  %1203 = vst [vmem:[%s6498_s10 + $0x608] sm:$0xff] %v1202_v1  ;;  %v1206_v3 = vld [vmem:[%s6493_s26 + $0x1848] sm:$0xff] }
  0xf7   : > { %1205 = vst [vmem:[%s6498_s10 + $0x610] sm:$0xff] %v1204_v2  ;;  %v1208_v4 = vld [vmem:[%s6493_s26 + $0x1880] sm:$0xff]  ;;  %v1210_v5 = vld [vmem:[%s6493_s26 + $0x1888] sm:$0xff]  ;;  %1207 = vst [vmem:[%s6498_s10 + $0x618] sm:$0xff] %v1206_v3 }
  0xf8   : > { %1209 = vst [vmem:[%s6498_s10 + $0x620] sm:$0xff] %v1208_v4  ;;  %1211 = vst [vmem:[%s6498_s10 + $0x628] sm:$0xff] %v1210_v5  ;;  %v1212_v6 = vld [vmem:[%s6493_s26 + $0x18c0] sm:$0xff]  ;;  %v1214_v7 = vld [vmem:[%s6493_s26 + $0x18c8] sm:$0xff] }
  0xf9   : > { %v1216_v8 = vld [vmem:[%s6493_s26 + $0x1900] sm:$0xff]  ;;  %1213 = vst [vmem:[%s6498_s10 + $0x630] sm:$0xff] %v1212_v6  ;;  %1215 = vst [vmem:[%s6498_s10 + $0x638] sm:$0xff] %v1214_v7  ;;  %v1218_v9 = vld [vmem:[%s6493_s26 + $0x1908] sm:$0xff] }
  0xfa   : > { %1217 = vst [vmem:[%s6498_s10 + $0x640] sm:$0xff] %v1216_v8  ;;  %v1220_v10 = vld [vmem:[%s6493_s26 + $0x1940] sm:$0xff]  ;;  %v1222_v11 = vld [vmem:[%s6493_s26 + $0x1948] sm:$0xff]  ;;  %1219 = vst [vmem:[%s6498_s10 + $0x648] sm:$0xff] %v1218_v9 }
  0xfb   : > { %1221 = vst [vmem:[%s6498_s10 + $0x650] sm:$0xff] %v1220_v10  ;;  %1223 = vst [vmem:[%s6498_s10 + $0x658] sm:$0xff] %v1222_v11  ;;  %v1224_v12 = vld [vmem:[%s6493_s26 + $0x1980] sm:$0xff]  ;;  %v1226_v13 = vld [vmem:[%s6493_s26 + $0x1988] sm:$0xff] }
  0xfc   : > { %v1228_v14 = vld [vmem:[%s6493_s26 + $0x19c0] sm:$0xff]  ;;  %1225 = vst [vmem:[%s6498_s10 + $0x660] sm:$0xff] %v1224_v12  ;;  %1227 = vst [vmem:[%s6498_s10 + $0x668] sm:$0xff] %v1226_v13  ;;  %v1230_v15 = vld [vmem:[%s6493_s26 + $0x19c8] sm:$0xff] }
  0xfd   : > { %1229 = vst [vmem:[%s6498_s10 + $0x670] sm:$0xff] %v1228_v14  ;;  %v1232_v16 = vld [vmem:[%s6493_s26 + $0x1a00] sm:$0xff]  ;;  %v1234_v17 = vld [vmem:[%s6493_s26 + $0x1a08] sm:$0xff]  ;;  %1231 = vst [vmem:[%s6498_s10 + $0x678] sm:$0xff] %v1230_v15 }
  0xfe   : > { %1233 = vst [vmem:[%s6498_s10 + $0x680] sm:$0xff] %v1232_v16  ;;  %1235 = vst [vmem:[%s6498_s10 + $0x688] sm:$0xff] %v1234_v17  ;;  %v1236_v18 = vld [vmem:[%s6493_s26 + $0x1a40] sm:$0xff]  ;;  %v1238_v19 = vld [vmem:[%s6493_s26 + $0x1a48] sm:$0xff] }
  0xff   : > { %v1240_v20 = vld [vmem:[%s6493_s26 + $0x1a80] sm:$0xff]  ;;  %1237 = vst [vmem:[%s6498_s10 + $0x690] sm:$0xff] %v1236_v18  ;;  %1239 = vst [vmem:[%s6498_s10 + $0x698] sm:$0xff] %v1238_v19  ;;  %v1242_v21 = vld [vmem:[%s6493_s26 + $0x1a88] sm:$0xff] }
 0x100   : > { %1241 = vst [vmem:[%s6498_s10 + $0x6a0] sm:$0xff] %v1240_v20  ;;  %v1244_v22 = vld [vmem:[%s6493_s26 + $0x1ac0] sm:$0xff]  ;;  %v1246_v23 = vld [vmem:[%s6493_s26 + $0x1ac8] sm:$0xff]  ;;  %1243 = vst [vmem:[%s6498_s10 + $0x6a8] sm:$0xff] %v1242_v21 }
 0x101   : > { %1245 = vst [vmem:[%s6498_s10 + $0x6b0] sm:$0xff] %v1244_v22  ;;  %1247 = vst [vmem:[%s6498_s10 + $0x6b8] sm:$0xff] %v1246_v23  ;;  %v1248_v24 = vld [vmem:[%s6493_s26 + $0x1b00] sm:$0xff]  ;;  %v1250_v25 = vld [vmem:[%s6493_s26 + $0x1b08] sm:$0xff] }
 0x102   : > { %v1252_v26 = vld [vmem:[%s6493_s26 + $0x1b40] sm:$0xff]  ;;  %1249 = vst [vmem:[%s6498_s10 + $0x6c0] sm:$0xff] %v1248_v24  ;;  %1251 = vst [vmem:[%s6498_s10 + $0x6c8] sm:$0xff] %v1250_v25  ;;  %v1254_v27 = vld [vmem:[%s6493_s26 + $0x1b48] sm:$0xff] }
 0x103   : > { %1253 = vst [vmem:[%s6498_s10 + $0x6d0] sm:$0xff] %v1252_v26  ;;  %v1256_v28 = vld [vmem:[%s6493_s26 + $0x1b80] sm:$0xff]  ;;  %v1258_v29 = vld [vmem:[%s6493_s26 + $0x1b88] sm:$0xff]  ;;  %1255 = vst [vmem:[%s6498_s10 + $0x6d8] sm:$0xff] %v1254_v27 }
 0x104   : > { %1257 = vst [vmem:[%s6498_s10 + $0x6e0] sm:$0xff] %v1256_v28  ;;  %1259 = vst [vmem:[%s6498_s10 + $0x6e8] sm:$0xff] %v1258_v29  ;;  %v1260_v30 = vld [vmem:[%s6493_s26 + $0x1bc0] sm:$0xff]  ;;  %v1262_v31 = vld [vmem:[%s6493_s26 + $0x1bc8] sm:$0xff] }
 0x105   : > { %v1264_v32 = vld [vmem:[%s6493_s26 + $0x1c00] sm:$0xff]  ;;  %1261 = vst [vmem:[%s6498_s10 + $0x6f0] sm:$0xff] %v1260_v30  ;;  %1263 = vst [vmem:[%s6498_s10 + $0x6f8] sm:$0xff] %v1262_v31  ;;  %v1266_v33 = vld [vmem:[%s6493_s26 + $0x1c08] sm:$0xff] }
 0x106   : > { %1265 = vst [vmem:[%s6498_s10 + $0x700] sm:$0xff] %v1264_v32  ;;  %v1268_v34 = vld [vmem:[%s6493_s26 + $0x1c40] sm:$0xff]  ;;  %v1270_v35 = vld [vmem:[%s6493_s26 + $0x1c48] sm:$0xff]  ;;  %1267 = vst [vmem:[%s6498_s10 + $0x708] sm:$0xff] %v1266_v33 }
 0x107   : > { %1269 = vst [vmem:[%s6498_s10 + $0x710] sm:$0xff] %v1268_v34  ;;  %1271 = vst [vmem:[%s6498_s10 + $0x718] sm:$0xff] %v1270_v35  ;;  %v1272_v36 = vld [vmem:[%s6493_s26 + $0x1c80] sm:$0xff]  ;;  %v1274_v37 = vld [vmem:[%s6493_s26 + $0x1c88] sm:$0xff] }
 0x108   : > { %v1276_v38 = vld [vmem:[%s6493_s26 + $0x1cc0] sm:$0xff]  ;;  %1273 = vst [vmem:[%s6498_s10 + $0x720] sm:$0xff] %v1272_v36  ;;  %1275 = vst [vmem:[%s6498_s10 + $0x728] sm:$0xff] %v1274_v37  ;;  %v1278_v39 = vld [vmem:[%s6493_s26 + $0x1cc8] sm:$0xff] }
 0x109   : > { %1277 = vst [vmem:[%s6498_s10 + $0x730] sm:$0xff] %v1276_v38  ;;  %v1280_v40 = vld [vmem:[%s6493_s26 + $0x1d00] sm:$0xff]  ;;  %v1282_v41 = vld [vmem:[%s6493_s26 + $0x1d08] sm:$0xff]  ;;  %1279 = vst [vmem:[%s6498_s10 + $0x738] sm:$0xff] %v1278_v39 }
 0x10a   : > { %1281 = vst [vmem:[%s6498_s10 + $0x740] sm:$0xff] %v1280_v40  ;;  %1283 = vst [vmem:[%s6498_s10 + $0x748] sm:$0xff] %v1282_v41  ;;  %v1284_v42 = vld [vmem:[%s6493_s26 + $0x1d40] sm:$0xff]  ;;  %v1286_v43 = vld [vmem:[%s6493_s26 + $0x1d48] sm:$0xff] }
 0x10b   : > { %v1288_v44 = vld [vmem:[%s6493_s26 + $0x1d80] sm:$0xff]  ;;  %1285 = vst [vmem:[%s6498_s10 + $0x750] sm:$0xff] %v1284_v42  ;;  %1287 = vst [vmem:[%s6498_s10 + $0x758] sm:$0xff] %v1286_v43  ;;  %v1290_v45 = vld [vmem:[%s6493_s26 + $0x1d88] sm:$0xff] }
 0x10c   : > { %1289 = vst [vmem:[%s6498_s10 + $0x760] sm:$0xff] %v1288_v44  ;;  %v1292_v46 = vld [vmem:[%s6493_s26 + $0x1dc0] sm:$0xff]  ;;  %v1294_v47 = vld [vmem:[%s6493_s26 + $0x1dc8] sm:$0xff]  ;;  %1291 = vst [vmem:[%s6498_s10 + $0x768] sm:$0xff] %v1290_v45 }
 0x10d   : > { %1293 = vst [vmem:[%s6498_s10 + $0x770] sm:$0xff] %v1292_v46  ;;  %1295 = vst [vmem:[%s6498_s10 + $0x778] sm:$0xff] %v1294_v47  ;;  %v1296_v48 = vld [vmem:[%s6493_s26 + $0x1e00] sm:$0xff]  ;;  %v1298_v49 = vld [vmem:[%s6493_s26 + $0x1e08] sm:$0xff] }
 0x10e   : > { %v1300_v50 = vld [vmem:[%s6493_s26 + $0x1e40] sm:$0xff]  ;;  %1297 = vst [vmem:[%s6498_s10 + $0x780] sm:$0xff] %v1296_v48  ;;  %1299 = vst [vmem:[%s6498_s10 + $0x788] sm:$0xff] %v1298_v49  ;;  %v1302_v51 = vld [vmem:[%s6493_s26 + $0x1e48] sm:$0xff] }
 0x10f   : > { %1301 = vst [vmem:[%s6498_s10 + $0x790] sm:$0xff] %v1300_v50  ;;  %v1304_v52 = vld [vmem:[%s6493_s26 + $0x1e80] sm:$0xff]  ;;  %v1306_v53 = vld [vmem:[%s6493_s26 + $0x1e88] sm:$0xff]  ;;  %1303 = vst [vmem:[%s6498_s10 + $0x798] sm:$0xff] %v1302_v51 }
 0x110   : > { %1305 = vst [vmem:[%s6498_s10 + $0x7a0] sm:$0xff] %v1304_v52  ;;  %1307 = vst [vmem:[%s6498_s10 + $0x7a8] sm:$0xff] %v1306_v53  ;;  %v1308_v54 = vld [vmem:[%s6493_s26 + $0x1ec0] sm:$0xff]  ;;  %v1310_v55 = vld [vmem:[%s6493_s26 + $0x1ec8] sm:$0xff] }
 0x111   : > { %v1312_v56 = vld [vmem:[%s6493_s26 + $0x1f00] sm:$0xff]  ;;  %1309 = vst [vmem:[%s6498_s10 + $0x7b0] sm:$0xff] %v1308_v54  ;;  %1311 = vst [vmem:[%s6498_s10 + $0x7b8] sm:$0xff] %v1310_v55  ;;  %v1314_v57 = vld [vmem:[%s6493_s26 + $0x1f08] sm:$0xff] }
 0x112   : > { %1313 = vst [vmem:[%s6498_s10 + $0x7c0] sm:$0xff] %v1312_v56  ;;  %v1316_v58 = vld [vmem:[%s6493_s26 + $0x1f40] sm:$0xff]  ;;  %v1318_v59 = vld [vmem:[%s6493_s26 + $0x1f48] sm:$0xff]  ;;  %1315 = vst [vmem:[%s6498_s10 + $0x7c8] sm:$0xff] %v1314_v57 }
 0x113   : > { %1317 = vst [vmem:[%s6498_s10 + $0x7d0] sm:$0xff] %v1316_v58  ;;  %1319 = vst [vmem:[%s6498_s10 + $0x7d8] sm:$0xff] %v1318_v59  ;;  %v1320_v60 = vld [vmem:[%s6493_s26 + $0x1f80] sm:$0xff]  ;;  %v1322_v61 = vld [vmem:[%s6493_s26 + $0x1f88] sm:$0xff] }
 0x114   : > { %v1324_v62 = vld [vmem:[%s6493_s26 + $0x1fc0] sm:$0xff]  ;;  %1321 = vst [vmem:[%s6498_s10 + $0x7e0] sm:$0xff] %v1320_v60  ;;  %1323 = vst [vmem:[%s6498_s10 + $0x7e8] sm:$0xff] %v1322_v61  ;;  %v1326_v63 = vld [vmem:[%s6493_s26 + $0x1fc8] sm:$0xff] }
 0x115   : > { %1325 = vst [vmem:[%s6498_s10 + $0x7f0] sm:$0xff] %v1324_v62  ;;  %1327 = vst [vmem:[%s6498_s10 + $0x7f8] sm:$0xff] %v1326_v63 }
 0x116 PF: > { %p4493_p5 = scmp.ge.s32.totalorder %s5862_s29, 1  ;;  %p1341_p6 = scmp.lt.s32.totalorder %s5862_s29, 5 }
 0x118   : > { %p1342_p7 = pnand %p4493_p5, %p1341_p6 }
 0x11a   : > { %1345 = sbr.rel (%p1342_p7) target bundleno = 2014 (0x7de), region = 90 }
 0x121   : > { %v1425_v0 = vld [vmem:[%s9832_s1 + $0x80] sm:$0xff]  ;;  %v1426_v1 = vld [vmem:[%s9832_s1 + $0x88] sm:$0xff]  ;;  %v1427_v5 = vld [vmem:[%s9832_s1 + $0x90] sm:$0xff]  ;;  %v5864_v53 = vmov 0.0|0.0   ;;  %vm5866_vm0 = vmmov 0   ;;  %vm1552_vm1 = vcmask 982016  }
 0x122   : > { %v1409_v2 = vld [vmem:[%s9832_s1] sm:$0xff]  ;;  %v4634_v3 = vpack.c.bf16 %v1426_v1, %v1425_v0  ;;  %v1410_v4 = vld [vmem:[%s9832_s1 + $0x8] sm:$0xff]  ;;  %v1428_v6 = vld [vmem:[%s9832_s1 + $0x98] sm:$0xff]  ;;  %s1348_s26 = sand.u32 1, %s5854_s27   ;;  %s4496_s13 = sshll.u32 %s5944_s30, 5 }
 0x123   : > { %v4636_v7 = vpack.c.bf16 %v1410_v4, %v1409_v2  ;;  %v4638_v8 = vpack.c.bf16 %v1428_v6, %v1427_v5  ;;  %v1411_v9 = vld [vmem:[%s9832_s1 + $0x10] sm:$0xff]  ;;  %v1412_v10 = vld [vmem:[%s9832_s1 + $0x18] sm:$0xff]  ;;  %v1429_v11 = vld [vmem:[%s9832_s1 + $0xa0] sm:$0xff]  ;;  %s7170_s10 = sshll.u32 %s1348_s26, 11  ;;  %p1399_p8 = scmp.lt.s32.totalorder %s4496_s13, 127 }
 0x124   : > { %4635 = vmatprep.subr.bf16.mxu0 %v4634_v3  ;;  %v1430_v12 = vld [vmem:[%s9832_s1 + $0xa8] sm:$0xff]  ;;  %v4640_v13 = vpack.c.bf16 %v1412_v10, %v1411_v9  ;;  %v1413_v15 = vld [vmem:[%s9832_s1 + $0x20] sm:$0xff]  ;;  %v1431_v17 = vld [vmem:[%s9832_s1 + $0xb0] sm:$0xff]  ;;  %s7173_s11 = scalar_lea.vmem [#allocation2], %s7170_s10  ;;  %s8902_s27 = scalar_lea.vmem [#allocation3], %s7170_s10 }
 0x125   : > { %4637 = vmatpush3.bf16.msra.mxu0 %v4636_v7  ;;  %v4642_v14 = vpack.c.bf16 %v1430_v12, %v1429_v11  ;;  %v1414_v16 = vld [vmem:[%s9832_s1 + $0x28] sm:$0xff]  ;;  %v1432_v18 = vld [vmem:[%s9832_s1 + $0xb8] sm:$0xff]  ;;  %v1415_v21 = vld [vmem:[%s9832_s1 + $0x30] sm:$0xff]  ;;  %s10425_s13 = smov (!%p1399_p8, %s4496_s13), 127  ;;  %p1404_p9 = scmp.lt.s32.totalorder %s5944_s30, 3 }
 0x126   : > { %4639 = vmatprep.subr.bf16.mxu0 %v4638_v8  ;;  %v4644_v19 = vpack.c.bf16 %v1414_v16, %v1413_v15  ;;  %v4646_v20 = vpack.c.bf16 %v1432_v18, %v1431_v17  ;;  %v1416_v22 = vld [vmem:[%s9832_s1 + $0x38] sm:$0xff]  ;;  %v1433_v23 = vld [vmem:[%s9832_s1 + $0xc0] sm:$0xff]  ;;  %v1434_v24 = vld [vmem:[%s9832_s1 + $0xc8] sm:$0xff]  ;;  %v9840_v8 = vmov 0.0   ;;  %v5867_v16 = vmov 1   ;;  %s4497_s14 = sshll.u32 %s10425_s13, 3 }
 0x127   : > { %v4500_v25 = vld.sshfl [vmem:[%s9831_s0] sm:$0x33 pattern:$0x76325410]  ;;  %v4648_v27 = vpack.c.bf16 %v1416_v22, %v1415_v21  ;;  %v4650_v28 = vpack.c.bf16 %v1434_v24, %v1433_v23  ;;  %v1418_v30 = vld [vmem:[%s9832_s1 + $0x48] sm:$0xff]  ;;  %v1435_v31 = vld [vmem:[%s9832_s1 + $0xd0] sm:$0xff]  ;;  %5817 = vset.pattern.permute.xlu1 %v5867_v16  ;;  %s9762_s17 = scalar_lea.vmem %s9838_s7, %s4497_s14 }
 0x128   : > { %v1456_v26 = vcombine.high %v4500_v25, %v4500_v25  ;;  %v1417_v29 = vld [vmem:[%s9832_s1 + $0x40] sm:$0xff]  ;;  %v1436_v32 = vld [vmem:[%s9832_s1 + $0xd8] sm:$0xff]  ;;  %v1419_v35 = vld [vmem:[%s9832_s1 + $0x50] sm:$0xff]  ;;  %v5868_v17 = vmov 0   ;;  %s10427_s30 = smov (!%p1404_p9, %s5944_s30), 3 }
 0x129   : > { %4641 = vmatpush3.bf16.msra.mxu0 %v4640_v13  ;;  %v4652_v33 = vpack.c.bf16 %v1418_v30, %v1417_v29  ;;  %v4654_v34 = vpack.c.bf16 %v1436_v32, %v1435_v31  ;;  %v1420_v36 = vld [vmem:[%s9832_s1 + $0x58] sm:$0xff]  ;;  %v1437_v37 = vld [vmem:[%s9832_s1 + $0xe0] sm:$0xff]  ;;  %v1438_v38 = vld [vmem:[%s9832_s1 + $0xe8] sm:$0xff]  ;;  %5816 = vset.pattern.permute.xlu0 %v5868_v17  ;;  %s4498_s18 = sshll.u32 %s10427_s30, 1 }
 0x12a   : > { %4643 = vmatprep.subr.bf16.mxu0 %v4642_v14  ;;  %1523 = vmatprep.mubr.f32.mxu0 %v1456_v26  ;;  %v4656_v39 = vpack.c.bf16 %v1420_v36, %v1419_v35  ;;  %v4658_v40 = vpack.c.bf16 %v1438_v38, %v1437_v37  ;;  %v1421_v41 = vld [vmem:[%s9832_s1 + $0x60] sm:$0xff]  ;;  %v1422_v42 = vld [vmem:[%s9832_s1 + $0x68] sm:$0xff]  ;;  %v1439_v43 = vld [vmem:[%s9832_s1 + $0xf0] sm:$0xff]  ;;  %s1407_s20 = scalar_lea.vmem %s9839_s8, %s4498_s18 }
 0x12b   : > { %v1440_v44 = vld [vmem:[%s9832_s1 + $0xf8] sm:$0xff]  ;;  %v4660_v45 = vpack.c.bf16 %v1422_v42, %v1421_v41  ;;  %v1423_v47 = vld [vmem:[%s9832_s1 + $0x70] sm:$0xff]  ;;  %v1530_v50 = vld [vmem:[%s9834_s3] sm:$0xff] }
 0x12c   : > { %v4662_v46 = vpack.c.bf16 %v1440_v44, %v1439_v43  ;;  %v1424_v48 = vld [vmem:[%s9832_s1 + $0x78] sm:$0xff]  ;;  %v1531_v51 = vld [vmem:[%s9834_s3 + $0x8] sm:$0xff]  ;;  %v1532_v54 = vld [vmem:[%s9834_s3 + $0x10] sm:$0xff] }
 0x12d   : > { %4645 = vmatpush3.bf16.msra.mxu0 %v4644_v19  ;;  %v4664_v49 = vpack.c.bf16 %v1424_v48, %v1423_v47  ;;  %v4667_v52 = vpack.c.bf16 %v1531_v51, %v1530_v50  ;;  %v1533_v55 = vld [vmem:[%s9834_s3 + $0x18] sm:$0xff]  ;;  %v1534_v57 = vld [vmem:[%s9834_s3 + $0x20] sm:$0xff]  ;;  %v1535_v58 = vld [vmem:[%s9834_s3 + $0x28] sm:$0xff]  ;;  %v5870_v51 = vmov 2475754826  }
 0x12e   : > { %4647 = vmatprep.subr.bf16.mxu0 %v4646_v20  ;;  %v4670_v56 = vpack.c.bf16 %v1533_v55, %v1532_v54  ;;  %v4673_v59 = vpack.c.bf16 %v1535_v58, %v1534_v57  ;;  %v1536_v60 = vld [vmem:[%s9834_s3 + $0x30] sm:$0xff]  ;;  %v1537_v61 = vld [vmem:[%s9834_s3 + $0x38] sm:$0xff]  ;;  %v1538_v63 = vld [vmem:[%s9834_s3 + $0x40] sm:$0xff]  ;;  %v5872_v55 = vmov 2102212464  }
 0x12f   : > { %v4676_v62 = vpack.c.bf16 %v1537_v61, %v1536_v60  ;;  %v1539_v0 = vld [vmem:[%s9834_s3 + $0x48] sm:$0xff]  ;;  %v1540_v2 = vld [vmem:[%s9834_s3 + $0x50] sm:$0xff]  ;;  %v1541_v3 = vld [vmem:[%s9834_s3 + $0x58] sm:$0xff] }
 0x130   : > { %v4679_v1 = vpack.c.bf16 %v1539_v0, %v1538_v63  ;;  %v4682_v4 = vpack.c.bf16 %v1541_v3, %v1540_v2  ;;  %v1542_v5 = vld [vmem:[%s9834_s3 + $0x60] sm:$0xff]  ;;  %v1543_v6 = vld [vmem:[%s9834_s3 + $0x68] sm:$0xff]  ;;  %v1544_v9 = vld [vmem:[%s9834_s3 + $0x70] sm:$0xff]  ;;  %v5873_v0 = vmov 920167782  }
 0x131   : > { %4649 = vmatpush3.bf16.msra.mxu0 %v4648_v27  ;;  %v4685_v7 = vpack.c.bf16 %v1543_v6, %v1542_v5  ;;  %v4499_v11 = vld [vmem:[%s9833_s2] ss:$0 sm:$0xff]  ;;  %v2636_v37 = vld [vmem:[%s7173_s11 + $0x8] sm:$0xff]  ;;  %v2638_v38 = vld [vmem:[%s7173_s11 + $0x18] sm:$0xff]  ;;  %v5874_v6 = vmov 1326507024  }
 0x132   : > { %4651 = vmatprep.subr.bf16.mxu0 %v4650_v28  ;;  %v4501_v18 = vld [vmem:[%s9835_s4] ss:$0 sm:$0xff]  ;;  %v7178_v41 = vpack.c.bf16 %v2638_v38, %v2636_v37  ;;  %v2830_v42 = vld [vmem:[%s7173_s11 + $0x618] sm:$0xff]  ;;  %v2637_v44 = vld [vmem:[%s7173_s11 + $0x10] sm:$0xff] }
 0x133   : > { %v2635_v43 = vld [vmem:[%s7173_s11] sm:$0xff]  ;;  %v2640_v60 = vld [vmem:[%s7173_s11 + $0x28] sm:$0xff]  ;;  %v2642_v2 = vld [vmem:[%s7173_s11 + $0x38] sm:$0xff] }
 0x134   : > { %v7187_v47 = vpack.c.bf16 %v2637_v44, %v2635_v43  ;;  %v2827_v58 = vld [vmem:[%s7173_s11 + $0x600] sm:$0xff]  ;;  %v2832_v3 = vld [vmem:[%s7173_s11 + $0x628] sm:$0xff]  ;;  %v7204_v17 = vpack.c.bf16 %v2642_v2, %v2640_v60 }
 0x135   : > { %4653 = vmatpush3.bf16.msra.mxu0 %v4652_v33 }
 0x136   : > { %4655 = vmatprep.subr.bf16.mxu0 %v4654_v34  ;;  %10029 = vst [vmem:[#allocation5_spill] sm:$0xff] %v7187_v47  ;;  %10031 = vst [vmem:[#allocation7_spill] sm:$0xff] %v7204_v17 }
 0x139   : > { %4657 = vmatpush3.bf16.msra.mxu0 %v4656_v39  ;;  %v2828_v39 = vld [vmem:[%s7173_s11 + $0x608] sm:$0xff] }
 0x13a   : > { %4659 = vmatprep.subr.bf16.mxu0 %v4658_v40 }
 0x13d   : > { %4661 = vmatpush3.bf16.msra.mxu0 %v4660_v45 }
 0x13e   : > { %4663 = vmatprep.subr.bf16.mxu0 %v4662_v46  ;;  %v7185_v46 = vpack.c.bf16 %v2830_v42, %v2828_v39 }
 0x140   : > { %10028 = vst [vmem:[#allocation4_spill] sm:$0xff] %v7185_v46  ;;  %4880 = vmatprep.subr.bf16.mxu1 %v7185_v46 }
 0x141   : > { %4665 = vmatpush3.bf16.msra.mxu0 %v4664_v49  ;;  %v5869_v49 = vmov 683565275  }
 0x142   : > { %4666 = vmatprep.subr.bf16.mxu0 %v5864_v53 }
 0x144   : > { %1524 = vmatmul.mubr.f32.vlgmr.msra.gmra.mrb[0].mxu0 %v4500_v25 }
 0x145   : > { %4668 = vmatpush3.bf16.msra.mxu0 %v4667_v52  ;;  %4631 = vmatprep.mubr.msk.f32.mxu0 %vm5866_vm0, %v9840_v8 }
 0x146   : > { %4669 = vmatprep.subr.bf16.mxu0 %v5864_v53 }
 0x149   : > { %4671 = vmatpush3.bf16.msra.mxu0 %v4670_v56 }
 0x14a   : > { %4672 = vmatprep.subr.bf16.mxu0 %v5864_v53 }
 0x14d   : > { %4674 = vmatpush3.bf16.msra.mxu0 %v4673_v59  ;;  %v2829_v59 = vld [vmem:[%s7173_s11 + $0x610] sm:$0xff] }
 0x14e   : > { %4675 = vmatprep.subr.bf16.mxu0 %v5864_v53 }
 0x151   : > { %4677 = vmatpush3.bf16.msra.mxu0 %v4676_v62 }
 0x152   : > { %4678 = vmatprep.subr.bf16.mxu0 %v5864_v53 }
 0x155   : > { %4680 = vmatpush3.bf16.msra.mxu0 %v4679_v1 }
 0x156   : > { %4681 = vmatprep.subr.bf16.mxu0 %v5864_v53 }
 0x159   : > { %4683 = vmatpush3.bf16.msra.mxu0 %v4682_v4  ;;  %v2834_v4 = vld [vmem:[%s7173_s11 + $0x638] sm:$0xff] }
 0x15a   : > { %4684 = vmatprep.subr.bf16.mxu0 %v5864_v53  ;;  %v5871_v53 = vmov 2131351028  }
 0x15d   : > { %4686 = vmatpush3.bf16.msra.mxu0 %v4685_v7 }
 0x15e   : > { %4629 = vmatprep.subr.mxu0 %v9840_v8  ;;  %v2879_v8 = vld [vmem:[%s7173_s11 + $0x7a0] sm:$0xff] }
 0x161   : > { %4630 = vmatpush3.msra.mxu0 %v1544_v9 }
 0x162   : > { %4688 = vmatprep.subr.bf16.mxu0 %v7178_v41 }
 0x217   : > { %v4547_v10 = vpop.f32.mrb[0].mxu0 }
 0x218   : > { %v4548_v12 = vpop.f32.mrb[1].mxu0 }
 0x219   : > { %v4549_v13 = vadd.f32 %v4548_v12, %v4547_v10  ;;  %v7200_v12 = vpack.c.bf16 %v2829_v59, %v2827_v58 }
 0x21b   : > { %v1526_v14 = vadd.f32 %v4549_v13, %v4499_v11  ;;  %10030 = vst [vmem:[#allocation6_spill] sm:$0xff] %v7200_v12  ;;  %v2639_v13 = vld [vmem:[%s7173_s11 + $0x20] sm:$0xff]  ;;  %4882 = vmatpush1.bf16.msra.mxu1 %v7200_v12 }
 0x21d   : > { %v1529_v15 = vmax.f32 %v1526_v14, 0.0  ;;  %v2641_v14 = vld [vmem:[%s7173_s11 + $0x30] sm:$0xff] }
 0x21f   : > { %4632 = vmatmul.mubr.msk.f32.vlgmr.msra.gmra.mrb[2].mxu0 %vm1552_vm1, %v1529_v15 }
 0x220   : > { %4690 = vmatpush1.bf16.msra.mxu0 %v7187_v47 }
 0x221   : > { %4692 = vmatprep.subr.bf16.mxu0 %v7204_v17 }
 0x2f2   : > { %v1622_v19 = vpop.f32.mrb[2].mxu0 }
 0x2f3   : > { %v1623_v20 = vadd.f32 %v4501_v18, %v1622_v19  ;;  %v4633_v21 = vpop.f32.mrb[3].mxu0  ;;  %v7206_v18 = vpack.c.bf16 %v2834_v4, %v2832_v3  ;;  %v2831_v19 = vld [vmem:[%s7173_s11 + $0x620] sm:$0xff] }
 0x2f5   : > { %v1626_v22 = vsub.f32 0.0, %v1623_v20  ;;  %10032 = vst [vmem:[#allocation8_spill] sm:$0xff] %v7206_v18  ;;  %v2833_v20 = vld [vmem:[%s7173_s11 + $0x630] sm:$0xff]  ;;  %4884 = vmatprep.subr.bf16.mxu1 %v7206_v18 }
 0x2f7   : > { %v1627_v23 = vmul.f32 1.442695, %v1626_v22 }
 0x2f9   : > { %5832 = vpow2.f32 %v1627_v23 }
 0x303   : > { %v5833_v24 = vpop.eup %5832 }
 0x304   : > { %v1629_v25 = vadd.f32 1.0, %v5833_v24 }
 0x306   : > { %5834 = vrcp.f32 %v1629_v25 }
 0x310   : > { %v5835_v26 = vpop.eup %5834 }
 0x311   : > { %v1631_v27 = vmul.f32 3.1415927, %v5835_v26 }
 0x313   : > { %v7163_v28 = vmul.f32 0.5, %v1631_v27  ;;  %v7224_v27 = vpack.c.bf16 %v2641_v14, %v2639_v13 }
 0x315   : > { %v1636_v29 = vand.u32 2139095040, %v7163_v28  ;;  %v1633_v30 = vand.u32 2147483647, %v7163_v28  ;;  %10033 = vst [vmem:[#allocation9_spill] sm:$0xff] %v7224_v27  ;;  %4694 = vmatpush1.bf16.msra.mxu0 %v7224_v27  ;;  %vm1635_vm9 = vcmp.lt.s32.totalorder %v7163_v28, 0  ;;  %vm1725_vm1 = vweird.f32 %v7163_v28 }
 0x317   : > { %v1637_v31 = vshrl.u32 %v1636_v29, 23  ;;  %v1640_v33 = vand.u32 8388607, %v1633_v30  ;;  %vm1634_vm10 = vcmp.le.f32.partialorder %v1633_v30, 0.7853982 }
 0x319   : > { %v4503_v32 = vadd.s32 4294967169, %v1637_v31  ;;  %v1641_v35 = vor.u32 8388608, %v1640_v33 }
 0x31b   : > { %v1643_v34 = vadd.s32 1, %v4503_v32  ;;  %v1681_v57 = vshll.u32 %v1641_v35, 8  ;;  %v7227_v32 = vpack.c.bf16 %v2833_v20, %v2831_v19 }
 0x31d   : > { %vm1644_vm2 = vcmp.gt.s32.totalorder %v1643_v34, 0  ;;  %10034 = vst [vmem:[#allocation10_spill] sm:$0xff] %v7227_v32  ;;  %4886 = vmatpush1.bf16.msra.mxu1 %v7227_v32 }
 0x31e   : > { %v1645_v36 = vsel %vm1644_vm2, %v1643_v34, 0 }
 0x31f   : > { %v1647_v40 = vand.u32 31, %v1645_v36  ;;  %v7183_v45 = vshrl.u32 %v1645_v36, 5 }
 0x321   : > { %v1648_v48 = vsub.s32 32, %v1647_v40  ;;  %v1650_v50 = vshll.u32 %v5869_v49, %v1647_v40  ;;  %v1653_v52 = vshll.u32 %v5870_v51, %v1647_v40  ;;  %v1656_v54 = vshll.u32 %v5871_v53, %v1647_v40 }
 0x322   : > { %v1659_v56 = vshll.u32 %v5872_v55, %v1647_v40  ;;  %v1662_v1 = vshll.u32 %v5873_v0, %v1647_v40  ;;  %vm1665_vm3 = vcmp.lt.s32.totalorder %v7183_v45, 1  ;;  %vm1668_vm4 = vcmp.lt.s32.totalorder %v7183_v45, 4 }
 0x323   : > { %v1651_v61 = vshrl.u32 %v5870_v51, %v1648_v48  ;;  %v1654_v62 = vshrl.u32 %v5871_v53, %v1648_v48  ;;  %v1657_v63 = vshrl.u32 %v5872_v55, %v1648_v48  ;;  %v1660_v5 = vshrl.u32 %v5873_v0, %v1648_v48 }
 0x324   : > { %v1663_v7 = vshrl.u32 %v5874_v6, %v1648_v48  ;;  %v1649_v21 = vshrl.u32 %v5869_v49, %v1648_v48  ;;  %vm1667_vm5 = vcmp.lt.s32.totalorder %v7183_v45, 3  ;;  %vm1666_vm6 = vcmp.lt.s32.totalorder %v7183_v45, 2 }
 0x325   : > { %v1652_v9 = vor.u32 %v1651_v61, %v1650_v50  ;;  %v1655_v10 = vor.u32 %v1654_v62, %v1653_v52  ;;  %v1658_v11 = vor.u32 %v1657_v63, %v1656_v54  ;;  %v1661_v15 = vor.u32 %v1660_v5, %v1659_v56 }
 0x326   : > { %v1664_v16 = vor.u32 %v1663_v7, %v1662_v1 }
 0x327   : > { %v1670_v22 = vsel %vm1668_vm4, %v1658_v11, 2102212464  ;;  %v1673_v23 = vsel %vm1665_vm3, %v1652_v9, %v1655_v10  ;;  %v1677_v24 = vsel %vm1665_vm3, %v1655_v10, %v1658_v11  ;;  %v1674_v25 = vsel %vm1668_vm4, %v1661_v15, 920167782 }
 0x328   : > { %v1678_v26 = vsel %vm1668_vm4, %v1664_v16, 1326507024  ;;  %v1675_v29 = vsel %vm1667_vm5, %v1658_v11, %v1674_v25  ;;  %v1669_v33 = vsel %vm1665_vm3, %v1649_v21, %v1652_v9  ;;  %v1671_v34 = vsel %vm1667_vm5, %v1655_v10, %v1670_v22 }
 0x329   : > { %v1679_v31 = vsel %vm1667_vm5, %v1661_v15, %v1678_v26  ;;  %v1676_v35 = vsel %vm1666_vm6, %v1673_v23, %v1675_v29  ;;  %v1672_v42 = vsel %vm1666_vm6, %v1669_v33, %v1671_v34  ;;  %v2644_v34 = vld [vmem:[%s7173_s11 + $0x48] sm:$0xff] }
 0x32a   : > { %v1680_v36 = vsel %vm1666_vm6, %v1677_v24, %v1679_v31  ;;  %v7235_v39 = vmul.u32.u64.low %v1681_v57, %v1676_v35  ;;  %v7236_v40 = vmul.u32.u64.high %v1681_v57, %v1676_v35, %v7235_v39  ;;  %v1688_v44 = vmul.u32 %v1681_v57, %v1672_v42  ;;  %v2646_v35 = vld [vmem:[%s7173_s11 + $0x58] sm:$0xff] }
 0x32b   : > { %v7232_v37 = vmul.u32.u64.low %v1681_v57, %v1680_v36  ;;  %v7233_v38 = vmul.u32.u64.high %v1681_v57, %v1680_v36, %v7232_v37  ;;  %v2836_v36 = vld [vmem:[%s7173_s11 + $0x648] sm:$0xff] }
 0x32c   : > { %v1691_v43 = vadd.s32 1, %v7236_v40  ;;  %v7257_v37 = vpack.c.bf16 %v2646_v35, %v2644_v34 }
 0x32d   : > { %vm1690_vm7 = vc.u32 %v7233_v38, %v7235_v39  ;;  %v1689_v59 = vadd.s32 %v7235_v39, %v7233_v38  ;;  %v2838_v38 = vld [vmem:[%s7173_s11 + $0x658] sm:$0xff]  ;;  %v2643_v39 = vld [vmem:[%s7173_s11 + $0x40] sm:$0xff] }
 0x32e   : > { %v1692_v45 = vsel %vm1690_vm7, %v1691_v43, %v7236_v40  ;;  %10035 = vst [vmem:[#allocation11_spill] sm:$0xff] %v7257_v37  ;;  %v7262_v40 = vpack.c.bf16 %v2838_v38, %v2836_v36  ;;  %v2835_v43 = vld [vmem:[%s7173_s11 + $0x640] sm:$0xff]  ;;  %4696 = vmatprep.subr.bf16.mxu0 %v7257_v37 }
 0x32f   : > { %v1693_v48 = vadd.s32 %v1692_v45, %v1688_v44  ;;  %v2837_v44 = vld [vmem:[%s7173_s11 + $0x650] sm:$0xff]  ;;  %v2659_v38 = vld [vmem:[%s7173_s11 + $0xc0] sm:$0xff] }
 0x330   : > { %10036 = vst [vmem:[#allocation12_spill] sm:$0xff] %v7262_v40  ;;  %v7269_v45 = vpack.c.bf16 %v2837_v44, %v2835_v43  ;;  %4888 = vmatprep.subr.bf16.mxu1 %v7262_v40  ;;  %v5880_v43 = vmov 8  }
 0x331   : > { %v1694_v49 = vadd.s32 536870912, %v1693_v48 }
 0x332   : > { %10038 = vst [vmem:[#allocation14_spill] sm:$0xff] %v7269_v45  ;;  %4890 = vmatpush1.bf16.msra.mxu1 %v7269_v45 }
 0x333   : > { %v1695_v50 = vshrl.u32 %v1694_v49, 30  ;;  %v2648_v49 = vld [vmem:[%s7173_s11 + $0x68] sm:$0xff] }
 0x335   : > { %v1696_v51 = vshll.u32 %v1695_v50, 30  ;;  %v1719_v6 = vsub.s32 4, %v1695_v50 }
 0x337   : > { %v1697_v52 = vsub.s32 %v1693_v48, %v1696_v51  ;;  %v1720_v10 = vsel %vm1635_vm9, %v1719_v6, %v1695_v50  ;;  %v5875_v48 = vmov 2   ;;  %v2650_v50 = vld [vmem:[%s7173_s11 + $0x78] sm:$0xff]  ;;  %v5876_v51 = vmov 3   ;;  %v2653_v6 = vld [vmem:[%s7173_s11 + $0x90] sm:$0xff] }
 0x338   : > { %v1722_v13 = vsel %vm1634_vm10, 0, %v1720_v10  ;;  %v2656_v10 = vld [vmem:[%s7173_s11 + $0xa8] sm:$0xff] }
 0x339   : > { %v1699_v53 = vsub.s32 0, %v1697_v52  ;;  %v1829_v14 = vadd.s32 3, %v1722_v13  ;;  %v1726_v15 = vand.u32 3, %v1722_v13  ;;  %v2848_v13 = vld [vmem:[%s7173_s11 + $0x6a8] sm:$0xff] }
 0x33b   : > { %v4504_v54 = vmin.u32 %v1699_v53, %v1697_v52  ;;  %v1830_v16 = vand.u32 3, %v1829_v14  ;;  %vm1731_vm11 = vcmp.eq.s32.totalorder %v1726_v15, 2  ;;  %vm1728_vm13 = vcmp.eq.s32.totalorder %v1726_v15, 0  ;;  %v2842_v53 = vld [vmem:[%s7173_s11 + $0x678] sm:$0xff] }
 0x33c   : > { %vm1727_vm15 = vcmp.lt.s32.totalorder %v1726_v15, 2  ;;  %v5879_v14 = vmov 6   ;;  %v2850_v15 = vld [vmem:[%s7173_s11 + $0x6b8] sm:$0xff] }
 0x33d   : > { %v1701_v55 = vclz %v4504_v54  ;;  %vm1835_vm12 = vcmp.eq.s32.totalorder %v1830_v16, 2  ;;  %vm1832_vm14 = vcmp.eq.s32.totalorder %v1830_v16, 0  ;;  %vm1831_vm0 = vcmp.lt.s32.totalorder %v1830_v16, 2  ;;  %v2647_v54 = vld [vmem:[%s7173_s11 + $0x60] sm:$0xff] }
 0x33e   : > { %v2655_v16 = vld [vmem:[%s7173_s11 + $0xa0] sm:$0xff]  ;;  %v7337_v35 = vpack.c.bf16 %v2850_v15, %v2848_v13  ;;  %v2669_v15 = vld [vmem:[%s7173_s11 + $0x110] sm:$0xff] }
 0x33f   : > { %v4505_v56 = vadd.s32 4294967294, %v1701_v55  ;;  %v2649_v55 = vld [vmem:[%s7173_s11 + $0x70] sm:$0xff] }
 0x340   : > { %10048 = vst [vmem:[#allocation24_spill] sm:$0xff] %v7337_v35 }
 0x341   : > { %vm4506_vm8 = vcmp.lt.s32.totalorder %v4505_v56, 0 }
 0x342   : > { %v1704_v58 = vsel %vm4506_vm8, 0, %v4505_v56  ;;  %v2839_v56 = vld [vmem:[%s7173_s11 + $0x660] sm:$0xff] }
 0x343   : > { %v1705_v60 = vsub.s32 32, %v1704_v58  ;;  %v1709_v61 = vsub.s32 4294967266, %v1704_v58  ;;  %v1706_v62 = vshll.u32 %v1697_v52, %v1704_v58  ;;  %v2840_v52 = vld [vmem:[%s7173_s11 + $0x668] sm:$0xff]  ;;  %v2841_v58 = vld [vmem:[%s7173_s11 + $0x670] sm:$0xff] }
 0x345   : > { %v1707_v63 = vshrl.u32 %v1689_v59, %v1705_v60  ;;  %v1710_v57 = vadd.s32 127, %v1709_v61  ;;  %v7288_v59 = vpack.c.bf16 %v2650_v50, %v2648_v49  ;;  %v7290_v60 = vpack.c.bf16 %v2842_v53, %v2840_v52  ;;  %v2652_v61 = vld [vmem:[%s7173_s11 + $0x88] sm:$0xff]  ;;  %v2853_v50 = vld [vmem:[%s7173_s11 + $0x6d0] sm:$0xff]  ;;  %v2666_v52 = vld [vmem:[%s7173_s11 + $0xf8] sm:$0xff] }
 0x346   : > { %v2856_v53 = vld [vmem:[%s7173_s11 + $0x6e8] sm:$0xff] }
 0x347   : > { %v1708_v0 = vor.u32 %v1707_v63, %v1706_v62  ;;  %v1711_v1 = vshll.u32 %v1710_v57, 23  ;;  %10039 = vst [vmem:[#allocation15_spill] sm:$0xff] %v7288_v59  ;;  %10040 = vst [vmem:[#allocation16_spill] sm:$0xff] %v7290_v60  ;;  %v2654_v62 = vld [vmem:[%s7173_s11 + $0x98] sm:$0xff]  ;;  %v7294_v63 = vpack.c.bf16 %v2649_v55, %v2647_v54  ;;  %v7296_v57 = vpack.c.bf16 %v2841_v58, %v2839_v56 }
 0x348   : > { %4892 = vmatprep.subr.bf16.mxu1 %v7290_v60  ;;  %v2858_v54 = vld [vmem:[%s7173_s11 + $0x6f8] sm:$0xff] }
 0x349   : > { %v1712_v2 = vor.u32 4788187, %v1711_v1  ;;  %v1715_v4 = vcvt.s32.f32 %v1708_v0  ;;  %10041 = vst [vmem:[#allocation17_spill] sm:$0xff] %v7294_v63  ;;  %10042 = vst [vmem:[#allocation18_spill] sm:$0xff] %v7296_v57  ;;  %v5877_v0 = vmov 4   ;;  %v5878_v1 = vmov 5   ;;  %4894 = vmatpush1.bf16.msra.mxu1 %v7296_v57 }
 0x34b   : > { %v1713_v3 = vand.u32 2147483647, %v1712_v2  ;;  %v7300_v2 = vpack.c.bf16 %v2654_v62, %v2652_v61  ;;  %v2663_v61 = vld [vmem:[%s7173_s11 + $0xe0] sm:$0xff]  ;;  %v2665_v62 = vld [vmem:[%s7173_s11 + $0xf0] sm:$0xff] }
 0x34d   : > { %v1716_v5 = vmul.f32 %v1715_v4, %v1713_v3  ;;  %10043 = vst [vmem:[#allocation19_spill] sm:$0xff] %v7300_v2  ;;  %v2844_v3 = vld [vmem:[%s7173_s11 + $0x688] sm:$0xff]  ;;  %v2846_v4 = vld [vmem:[%s7173_s11 + $0x698] sm:$0xff] }
 0x34f   : > { %v1717_v7 = vxor.u32 2147483648, %v1716_v5 }
 0x351   : > { %v1718_v9 = vsel %vm1635_vm9, %v1717_v7, %v1716_v5  ;;  %v2651_v5 = vld [vmem:[%s7173_s11 + $0x80] sm:$0xff] }
 0x352   : > { %v1721_v11 = vsel %vm1634_vm10, %v7163_v28, %v1718_v9  ;;  %v2645_v28 = vld [vmem:[%s7173_s11 + $0x50] sm:$0xff]  ;;  %v2843_v7 = vld [vmem:[%s7173_s11 + $0x680] sm:$0xff] }
 0x353   : > { %5836 = vcosq.f32 %v1721_v11  ;;  %v7264_v42 = vpack.c.bf16 %v2645_v28, %v2643_v39  ;;  %v2845_v9 = vld [vmem:[%s7173_s11 + $0x690] sm:$0xff]  ;;  %v2851_v28 = vld [vmem:[%s7173_s11 + $0x6c0] sm:$0xff] }
 0x354   : > { %5838 = vsinq.f32 %v1721_v11  ;;  %v2658_v11 = vld [vmem:[%s7173_s11 + $0xb8] sm:$0xff]  ;;  %v2661_v39 = vld [vmem:[%s7173_s11 + $0xd0] sm:$0xff]  ;;  %v7366_v56 = vpack.c.bf16 %v2853_v50, %v2851_v28  ;;  %v2671_v50 = vld [vmem:[%s7173_s11 + $0x120] sm:$0xff] }
 0x355   : > { %10037 = vst [vmem:[#allocation13_spill] sm:$0xff] %v7264_v42  ;;  %4698 = vmatpush1.bf16.msra.mxu0 %v7264_v42  ;;  %v7335_v34 = vpack.c.bf16 %v2658_v11, %v2656_v10  ;;  %v7362_v55 = vpack.c.bf16 %v2661_v39, %v2659_v38  ;;  %v7385_v10 = vpack.c.bf16 %v2665_v62, %v2663_v61  ;;  %v2676_v61 = vld [vmem:[%s7173_s11 + $0x148] sm:$0xff]  ;;  %v2678_v62 = vld [vmem:[%s7173_s11 + $0x158] sm:$0xff] }
 0x356   : > { %4700 = vmatprep.subr.bf16.mxu0 %v7288_v59  ;;  %10054 = vst [vmem:[#allocation30_spill] sm:$0xff] %v7366_v56 }
 0x357   : > { %10047 = vst [vmem:[#allocation23_spill] sm:$0xff] %v7335_v34  ;;  %10053 = vst [vmem:[#allocation29_spill] sm:$0xff] %v7362_v55 }
 0x358   : > { %10057 = vst [vmem:[#allocation33_spill] sm:$0xff] %v7385_v10 }
 0x359   : > { %4702 = vmatpush1.bf16.msra.mxu0 %v7294_v63 }
 0x35a   : > { %4704 = vmatprep.subr.bf16.mxu0 %v7300_v2 }
 0x35d   : > { %v5837_v19 = vpop.eup %5836 }
 0x35e   : > { %v5839_v20 = vpop.eup %5838  ;;  %v1732_v21 = vxor.u32 2147483648, %v5837_v19 }
 0x35f   : > { %v1729_v22 = vxor.u32 2147483648, %v5839_v20 }
 0x360   : > { %v1733_v30 = vsel %vm1731_vm11, %v1732_v21, %v5839_v20  ;;  %v1837_v23 = vsel %vm1835_vm12, %v1732_v21, %v5839_v20  ;;  %v7321_v20 = vpack.c.bf16 %v2846_v4, %v2844_v3  ;;  %v7323_v21 = vpack.c.bf16 %v2653_v6, %v2651_v5  ;;  %v2857_v3 = vld [vmem:[%s7173_s11 + $0x6f0] sm:$0xff]  ;;  %v2668_v4 = vld [vmem:[%s7173_s11 + $0x108] sm:$0xff]  ;;  %v2670_v5 = vld [vmem:[%s7173_s11 + $0x118] sm:$0xff] }
 0x361   : > { %v1730_v24 = vsel %vm1728_vm13, %v5837_v19, %v1729_v22  ;;  %v1834_v25 = vsel %vm1832_vm14, %v5837_v19, %v1729_v22  ;;  %v2657_v19 = vld [vmem:[%s7173_s11 + $0xb0] sm:$0xff]  ;;  %v2847_v22 = vld [vmem:[%s7173_s11 + $0x6a0] sm:$0xff]  ;;  %v5881_v6 = vmov 9   ;;  %v7391_v13 = vpack.c.bf16 %v2670_v5, %v2668_v4 }
 0x362   : > { %v1734_v26 = vsel %vm1727_vm15, %v1730_v24, %v1733_v30  ;;  %v1838_v29 = vsel %vm1831_vm0, %v1834_v25, %v1837_v23  ;;  %10044 = vst [vmem:[#allocation20_spill] sm:$0xff] %v7321_v20  ;;  %10045 = vst [vmem:[#allocation21_spill] sm:$0xff] %v7323_v21  ;;  %v2849_v30 = vld [vmem:[%s7173_s11 + $0x6b0] sm:$0xff]  ;;  %v2660_v23 = vld [vmem:[%s7173_s11 + $0xc8] sm:$0xff]  ;;  %v7328_v24 = vpack.c.bf16 %v2845_v9, %v2843_v7  ;;  %4896 = vmatprep.subr.bf16.mxu1 %v7321_v20 }
 0x363   : > { %v7248_v31 = vsel %vm1725_vm1, nan, %v1734_v26  ;;  %v7250_v33 = vsel %vm1725_vm1, nan, %v1838_v29  ;;  %v2662_v25 = vld [vmem:[%s7173_s11 + $0xd8] sm:$0xff]  ;;  %v2852_v26 = vld [vmem:[%s7173_s11 + $0x6c8] sm:$0xff]  ;;  %4706 = vmatpush1.bf16.msra.mxu0 %v7323_v21  ;;  %v7339_v36 = vpack.c.bf16 %v2657_v19, %v2655_v16  ;;  %v7347_v44 = vpack.c.bf16 %v2849_v30, %v2847_v22  ;;  %10059 = vst [vmem:[#allocation35_spill] sm:$0xff] %v7391_v13  ;;  %v2859_v16 = vld [vmem:[%s7173_s11 + $0x700] sm:$0xff] }
 0x364   : > { %1948 = vperm.xlu1 %5817, %v7250_v33   ;;  %1891 = vperm.xlu0 %5816, %v7250_v33   ;;  %10046 = vst [vmem:[#allocation22_spill] sm:$0xff] %v7328_v24  ;;  %v2854_v29 = vld [vmem:[%s7173_s11 + $0x6d8] sm:$0xff]  ;;  %v2860_v7 = vld [vmem:[%s7173_s11 + $0x708] sm:$0xff]  ;;  %v2861_v22 = vld [vmem:[%s7173_s11 + $0x710] sm:$0xff] }
 0x365   : > { %10049 = vst [vmem:[#allocation25_spill] sm:$0xff] %v7339_v36  ;;  %4898 = vmatpush1.bf16.msra.mxu1 %v7328_v24  ;;  %10050 = vst [vmem:[#allocation26_spill] sm:$0xff] %v7347_v44  ;;  %v7351_v49 = vpack.c.bf16 %v2854_v29, %v2852_v26  ;;  %4708 = vmatprep.subr.bf16.mxu0 %v7335_v34  ;;  %v2862_v9 = vld [vmem:[%s7173_s11 + $0x718] sm:$0xff]  ;;  %v2672_v30 = vld [vmem:[%s7173_s11 + $0x128] sm:$0xff]  ;;  %v7410_v39 = vpack.c.bf16 %v2861_v22, %v2859_v16 }
 0x366   : > { %4900 = vmatprep.subr.bf16.mxu1 %v7337_v35  ;;  %v7397_v19 = vpack.c.bf16 %v2862_v9, %v2860_v7  ;;  %v2864_v26 = vld [vmem:[%s7173_s11 + $0x728] sm:$0xff]  ;;  %v2866_v29 = vld [vmem:[%s7173_s11 + $0x738] sm:$0xff]  ;;  %v2675_v7 = vld [vmem:[%s7173_s11 + $0x140] sm:$0xff] }
 0x367   : > { %10052 = vst [vmem:[#allocation28_spill] sm:$0xff] %v7351_v49  ;;  %4710 = vmatpush1.bf16.msra.mxu0 %v7339_v36  ;;  %10062 = vst [vmem:[#allocation38_spill] sm:$0xff] %v7410_v39  ;;  %v2677_v9 = vld [vmem:[%s7173_s11 + $0x150] sm:$0xff]  ;;  %v2867_v16 = vld [vmem:[%s7173_s11 + $0x740] sm:$0xff] }
 0x368   : > { %1952 = vperm.xlu1 %5817, %v7248_v31   ;;  %1896 = vperm.xlu0 %5816, %v7248_v31   ;;  %10060 = vst [vmem:[#allocation36_spill] sm:$0xff] %v7397_v19  ;;  %v2869_v22 = vld [vmem:[%s7173_s11 + $0x750] sm:$0xff] }
 0x369   : > { %4902 = vmatpush1.bf16.msra.mxu1 %v7347_v44 }
 0x36a   : > { %4904 = vmatprep.subr.bf16.mxu1 %v7351_v49 }
 0x36c   : > { %5819 = vset.pattern.permute.xlu1 %v5875_v48  ;;  %5818 = vset.pattern.permute.xlu0 %v5875_v48  ;;  %v7349_v48 = vpack.c.bf16 %v2662_v25, %v2660_v23  ;;  %v2674_v23 = vld [vmem:[%s7173_s11 + $0x138] sm:$0xff]  ;;  %v5882_v25 = vmov 7  }
 0x36d   : > { %2024 = vperm.xlu1 %5819, %v7248_v31   ;;  %2020 = vperm.xlu0 %5818, %v7250_v33   ;;  %v7412_v28 = vpack.c.bf16 %v2674_v23, %v2672_v30  ;;  %v2680_v30 = vld [vmem:[%s7173_s11 + $0x168] sm:$0xff]  ;;  %v2682_v23 = vld [vmem:[%s7173_s11 + $0x178] sm:$0xff] }
 0x36e   : > { %10051 = vst [vmem:[#allocation27_spill] sm:$0xff] %v7349_v48  ;;  %4712 = vmatprep.subr.bf16.mxu0 %v7349_v48  ;;  %4906 = vmatpush1.bf16.msra.mxu1 %v7366_v56 }
 0x36f   : > { %4714 = vmatpush1.bf16.msra.mxu0 %v7362_v55  ;;  %10063 = vst [vmem:[#allocation39_spill] sm:$0xff] %v7412_v28 }
 0x371   : > { %5820 = vset.pattern.permute.xlu1 %v5876_v51  ;;  %5821 = vset.pattern.permute.xlu0 %v5876_v51  ;;  %v2664_v51 = vld [vmem:[%s7173_s11 + $0xe8] sm:$0xff] }
 0x372   : > { %2092 = vperm.xlu1 %5820, %v7250_v33   ;;  %2096 = vperm.xlu0 %5821, %v7248_v31   ;;  %v7368_v58 = vpack.c.bf16 %v2666_v52, %v2664_v51  ;;  %v2673_v51 = vld [vmem:[%s7173_s11 + $0x130] sm:$0xff]  ;;  %v7417_v52 = vpack.c.bf16 %v2866_v29, %v2864_v26  ;;  %v2872_v26 = vld [vmem:[%s7173_s11 + $0x768] sm:$0xff]  ;;  %v2874_v29 = vld [vmem:[%s7173_s11 + $0x778] sm:$0xff] }
 0x373   : > { %v7427_v4 = vpack.c.bf16 %v2673_v51, %v2671_v50  ;;  %v7452_v50 = vpack.c.bf16 %v2869_v22, %v2867_v16  ;;  %v2679_v51 = vld [vmem:[%s7173_s11 + $0x160] sm:$0xff] }
 0x374   : > { %10055 = vst [vmem:[#allocation31_spill] sm:$0xff] %v7368_v58  ;;  %4716 = vmatprep.subr.bf16.mxu0 %v7368_v58  ;;  %10064 = vst [vmem:[#allocation40_spill] sm:$0xff] %v7417_v52 }
 0x375   : > { %4718 = vmatpush1.bf16.msra.mxu0 %v7385_v10  ;;  %10065 = vst [vmem:[#allocation41_spill] sm:$0xff] %v7427_v4  ;;  %10070 = vst [vmem:[#allocation46_spill] sm:$0xff] %v7452_v50 }
 0x376   : > { %5822 = vset.pattern.permute.xlu1 %v5877_v0  ;;  %5823 = vset.pattern.permute.xlu0 %v5878_v1  ;;  %v2855_v0 = vld [vmem:[%s7173_s11 + $0x6e0] sm:$0xff] }
 0x377   : > { %2164 = vperm.xlu1 %5822, %v7250_v33   ;;  %2236 = vperm.xlu0 %5823, %v7250_v33   ;;  %v7389_v11 = vpack.c.bf16 %v2857_v3, %v2855_v0  ;;  %v2868_v0 = vld [vmem:[%s7173_s11 + $0x748] sm:$0xff]  ;;  %v2870_v3 = vld [vmem:[%s7173_s11 + $0x758] sm:$0xff] }
 0x378   : > { %4720 = vmatprep.subr.bf16.mxu0 %v7391_v13 }
 0x379   : > { %10058 = vst [vmem:[#allocation34_spill] sm:$0xff] %v7389_v11 }
 0x37b   : > { %2168 = vperm.xlu1 %5822, %v7248_v31   ;;  %5826 = vset.pattern.permute.xlu0 %v5879_v14 }
 0x37c   : > { %2312 = vperm.xlu0 %5826, %v7248_v31  }
 0x37f   : > { %5824 = vset.pattern.permute.xlu1 %v5878_v1  ;;  %v7374_v1 = vpack.c.bf16 %v2858_v54, %v2856_v53  ;;  %v2863_v53 = vld [vmem:[%s7173_s11 + $0x720] sm:$0xff]  ;;  %v2865_v54 = vld [vmem:[%s7173_s11 + $0x730] sm:$0xff] }
 0x380   : > { %2240 = vperm.xlu1 %5824, %v7248_v31   ;;  %5828 = vset.pattern.permute.xlu0 %v5880_v43  ;;  %v7431_v5 = vpack.c.bf16 %v2865_v54, %v2863_v53  ;;  %v2681_v53 = vld [vmem:[%s7173_s11 + $0x170] sm:$0xff]  ;;  %v2871_v54 = vld [vmem:[%s7173_s11 + $0x760] sm:$0xff] }
 0x381   : > { %2452 = vperm.xlu0 %5828, %v7250_v33   ;;  %10056 = vst [vmem:[#allocation32_spill] sm:$0xff] %v7374_v1  ;;  %4908 = vmatprep.subr.bf16.mxu1 %v7374_v1  ;;  %v2702_v1 = vld [vmem:[%s7173_s11 + $0x218] sm:$0xff] }
 0x382   : > { %4910 = vmatpush1.bf16.msra.mxu1 %v7389_v11  ;;  %10066 = vst [vmem:[#allocation42_spill] sm:$0xff] %v7431_v5  ;;  %v2700_v11 = vld [vmem:[%s7173_s11 + $0x208] sm:$0xff] }
 0x383   : > { %4912 = vmatprep.subr.bf16.mxu1 %v7397_v19  ;;  %v2889_v19 = vld [vmem:[%s7173_s11 + $0x7f0] sm:$0xff] }
 0x384   : > { %5825 = vset.pattern.permute.xlu1 %v5879_v14  ;;  %v2667_v14 = vld [vmem:[%s7173_s11 + $0x100] sm:$0xff] }
 0x385   : > { %2308 = vperm.xlu1 %5825, %v7250_v33   ;;  %5831 = vset.pattern.permute.xlu0 %v5881_v6  ;;  %v7406_v38 = vpack.c.bf16 %v2669_v15, %v2667_v14  ;;  %v7436_v14 = vpack.c.bf16 %v2678_v62, %v2676_v61  ;;  %v7438_v15 = vpack.c.bf16 %v2870_v3, %v2868_v0  ;;  %v2873_v61 = vld [vmem:[%s7173_s11 + $0x770] sm:$0xff]  ;;  %v2684_v62 = vld [vmem:[%s7173_s11 + $0x188] sm:$0xff]  ;;  %v2686_v0 = vld [vmem:[%s7173_s11 + $0x198] sm:$0xff] }
 0x386   : > { %2520 = vperm.xlu0 %5831, %v7248_v31   ;;  %4914 = vmatpush1.bf16.msra.mxu1 %v7410_v39  ;;  %v2876_v3 = vld [vmem:[%s7173_s11 + $0x788] sm:$0xff]  ;;  %v7473_v16 = vpack.c.bf16 %v2873_v61, %v2871_v54  ;;  %v7475_v22 = vpack.c.bf16 %v2686_v0, %v2684_v62  ;;  %v2882_v61 = vld [vmem:[%s7173_s11 + $0x7b8] sm:$0xff]  ;;  %v2887_v39 = vld [vmem:[%s7173_s11 + $0x7e0] sm:$0xff] }
 0x387   : > { %10061 = vst [vmem:[#allocation37_spill] sm:$0xff] %v7406_v38  ;;  %4722 = vmatpush1.bf16.msra.mxu0 %v7406_v38  ;;  %4916 = vmatprep.subr.bf16.mxu1 %v7417_v52  ;;  %10067 = vst [vmem:[#allocation43_spill] sm:$0xff] %v7436_v14  ;;  %v2880_v54 = vld [vmem:[%s7173_s11 + $0x7a8] sm:$0xff] }
 0x388   : > { %4724 = vmatprep.subr.bf16.mxu0 %v7412_v28  ;;  %10068 = vst [vmem:[#allocation44_spill] sm:$0xff] %v7438_v15  ;;  %10074 = vst [vmem:[#allocation50_spill] sm:$0xff] %v7473_v16 }
 0x389   : > { %5827 = vset.pattern.permute.xlu1 %v5882_v25  ;;  %v7446_v25 = vpack.c.bf16 %v2677_v9, %v2675_v7  ;;  %v2878_v7 = vld [vmem:[%s7173_s11 + $0x798] sm:$0xff]  ;;  %v7469_v9 = vpack.c.bf16 %v2681_v53, %v2679_v51  ;;  %10075 = vst [vmem:[#allocation51_spill] sm:$0xff] %v7475_v22  ;;  %v2877_v51 = vld [vmem:[%s7173_s11 + $0x790] sm:$0xff] }
 0x38a   : > { %2380 = vperm.xlu1 %5827, %v7250_v33   ;;  %4918 = vmatpush1.bf16.msra.mxu1 %v7431_v5  ;;  %v2690_v53 = vld [vmem:[%s7173_s11 + $0x1b8] sm:$0xff] }
 0x38b   : > { %4726 = vmatpush1.bf16.msra.mxu0 %v7427_v4  ;;  %10069 = vst [vmem:[#allocation45_spill] sm:$0xff] %v7446_v25  ;;  %4920 = vmatprep.subr.bf16.mxu1 %v7438_v15  ;;  %10073 = vst [vmem:[#allocation49_spill] sm:$0xff] %v7469_v9  ;;  %v2883_v15 = vld [vmem:[%s7173_s11 + $0x7c0] sm:$0xff] }
 0x38c   : > { %4728 = vmatprep.subr.bf16.mxu0 %v7436_v14 }
 0x38e   : > { %2384 = vperm.xlu1 %5827, %v7248_v31   ;;  %4922 = vmatpush1.bf16.msra.mxu1 %v7452_v50  ;;  %v1840_v50 = vlaneseq }
 0x38f   : > { %4730 = vmatpush1.bf16.msra.mxu0 %v7446_v25 }
 0x390   : > { %v7528_v52 = vand.u32 127, %v1840_v50 }
 0x392   : > { %5829 = vset.pattern.permute.xlu1 %v5880_v43  ;;  %v7459_v43 = vpack.c.bf16 %v2682_v23, %v2680_v30  ;;  %v2683_v30 = vld [vmem:[%s7173_s11 + $0x180] sm:$0xff]  ;;  %v2685_v23 = vld [vmem:[%s7173_s11 + $0x190] sm:$0xff]  ;;  %10085 = vst [vmem:[#allocation61_spill] sm:$0xff] %v7528_v52  ;;  %v1849_v20 = vshra.s32 %v7528_v52, 9 }
 0x393   : > { %2456 = vperm.xlu1 %5829, %v7248_v31   ;;  %v7464_v31 = vpack.c.bf16 %v2874_v29, %v2872_v26  ;;  %v2875_v26 = vld [vmem:[%s7173_s11 + $0x780] sm:$0xff]  ;;  %v7482_v29 = vpack.c.bf16 %v2878_v7, %v2876_v3  ;;  %v2689_v7 = vld [vmem:[%s7173_s11 + $0x1b0] sm:$0xff] }
 0x394   : > { %10071 = vst [vmem:[#allocation47_spill] sm:$0xff] %v7459_v43  ;;  %4732 = vmatprep.subr.bf16.mxu0 %v7459_v43  ;;  %v7495_v62 = vpack.c.bf16 %v2877_v51, %v2875_v26  ;;  %v2687_v3 = vld [vmem:[%s7173_s11 + $0x1a0] sm:$0xff]  ;;  %v2884_v26 = vld [vmem:[%s7173_s11 + $0x7c8] sm:$0xff]  ;;  %v2886_v51 = vld [vmem:[%s7173_s11 + $0x7d8] sm:$0xff] }
 0x395   : > { %10072 = vst [vmem:[#allocation48_spill] sm:$0xff] %v7464_v31  ;;  %10076 = vst [vmem:[#allocation52_spill] sm:$0xff] %v7482_v29  ;;  %4924 = vmatprep.subr.bf16.mxu1 %v7464_v31  ;;  %4734 = vmatpush1.bf16.msra.mxu0 %v7469_v9  ;;  %v7503_v31 = vpack.c.bf16 %v2882_v61, %v2880_v54  ;;  %v2691_v61 = vld [vmem:[%s7173_s11 + $0x1c0] sm:$0xff]  ;;  %v7523_v5 = vpack.c.bf16 %v2886_v51, %v2884_v26 }
 0x396   : > { %4926 = vmatpush1.bf16.msra.mxu1 %v7473_v16  ;;  %4736 = vmatprep.subr.bf16.mxu0 %v7475_v22  ;;  %10078 = vst [vmem:[#allocation54_spill] sm:$0xff] %v7495_v62  ;;  %v2694_v16 = vld [vmem:[%s7173_s11 + $0x1d8] sm:$0xff]  ;;  %v2695_v51 = vld [vmem:[%s7173_s11 + $0x1e0] sm:$0xff] }
 0x397   : > { %5830 = vset.pattern.permute.xlu1 %v5881_v6  ;;  %v2688_v6 = vld [vmem:[%s7173_s11 + $0x1a8] sm:$0xff]  ;;  %4928 = vmatprep.subr.bf16.mxu1 %v7482_v29  ;;  %10080 = vst [vmem:[#allocation56_spill] sm:$0xff] %v7503_v31  ;;  %v2693_v29 = vld [vmem:[%s7173_s11 + $0x1d0] sm:$0xff]  ;;  %10084 = vst [vmem:[#allocation60_spill] sm:$0xff] %v7523_v5 }
 0x398   : > { %2516 = vperm.xlu1 %5830, %v7250_v33   ;;  %v7491_v33 = vpack.c.bf16 %v2685_v23, %v2683_v30  ;;  %v7497_v0 = vpack.c.bf16 %v2690_v53, %v2688_v6  ;;  %v2881_v30 = vld [vmem:[%s7173_s11 + $0x7b0] sm:$0xff]  ;;  %v2692_v23 = vld [vmem:[%s7173_s11 + $0x1c8] sm:$0xff]  ;;  %v7511_v6 = vpack.c.bf16 %v2689_v7, %v2687_v3 }
 0x399   : > { %v7515_v53 = vpack.c.bf16 %v2881_v30, %v2879_v8  ;;  %v7517_v54 = vpack.c.bf16 %v2694_v16, %v2692_v23  ;;  %v2885_v3 = vld [vmem:[%s7173_s11 + $0x7d0] sm:$0xff]  ;;  %v2696_v7 = vld [vmem:[%s7173_s11 + $0x1e8] sm:$0xff]  ;;  %v2890_v16 = vld [vmem:[%s7173_s11 + $0x7f8] sm:$0xff]  ;;  %v7533_v30 = vpack.c.bf16 %v2693_v29, %v2691_v61  ;;  %v7551_v29 = vadd.s32 128, %v7528_v52 }
 0x39a   : > { %10077 = vst [vmem:[#allocation53_spill] sm:$0xff] %v7491_v33  ;;  %10079 = vst [vmem:[#allocation55_spill] sm:$0xff] %v7497_v0  ;;  %4738 = vmatpush1.bf16.msra.mxu0 %v7491_v33  ;;  %4930 = vmatpush1.bf16.msra.mxu1 %v7495_v62  ;;  %v2698_v62 = vld [vmem:[%s7173_s11 + $0x1f8] sm:$0xff]  ;;  %v2888_v8 = vld [vmem:[%s7173_s11 + $0x7e8] sm:$0xff]  ;;  %v7537_v23 = vpack.c.bf16 %v2885_v3, %v2883_v15  ;;  %v7558_v15 = vpack.c.bf16 %v2889_v19, %v2887_v39  ;;  %v7563_v3 = vadd.s32 256, %v7528_v52 }
 0x39b   : > { %10081 = vst [vmem:[#allocation57_spill] sm:$0xff] %v7511_v6  ;;  %4740 = vmatprep.subr.bf16.mxu0 %v7497_v0  ;;  %10082 = vst [vmem:[#allocation58_spill] sm:$0xff] %v7515_v53  ;;  %4932 = vmatprep.subr.bf16.mxu1 %v7503_v31  ;;  %v7539_v26 = vpack.c.bf16 %v2698_v62, %v2696_v7  ;;  %v2697_v31 = vld [vmem:[%s7173_s11 + $0x1f0] sm:$0xff]  ;;  %v7545_v50 = vpack.c.bf16 %v2890_v16, %v2888_v8  ;;  %v7567_v7 = vadd.s32 384, %v7528_v52 }
 0x39c   : > { %10083 = vst [vmem:[#allocation59_spill] sm:$0xff] %v7517_v54  ;;  %10086 = vst [vmem:[#allocation62_spill] sm:$0xff] %v7533_v30  ;;  %v7554_v61 = vpack.c.bf16 %v2697_v31, %v2695_v51  ;;  %v7560_v62 = vpack.c.bf16 %v2702_v1, %v2700_v11  ;;  %v1908_v8 = vshra.s32 %v7551_v29, 8  ;;  %v1850_v31 = vshra.s32 %v7551_v29, 9 }
 0x39d   : > { %10087 = vst [vmem:[#allocation63_spill] sm:$0xff] %v7537_v23  ;;  %10088 = vst [vmem:[#allocation64_spill] sm:$0xff] %v7539_v26  ;;  %v7572_v16 = vadd.s32 896, %v7528_v52  ;;  %v7576_v1 = vadd.s32 512, %v7528_v52  ;;  %v7581_v11 = vadd.s32 640, %v7528_v52  ;;  %v7584_v19 = vadd.s32 768, %v7528_v52 }
 0x39e   : > { %4742 = vmatpush1.bf16.msra.mxu0 %v7511_v6  ;;  %4934 = vmatpush1.bf16.msra.mxu1 %v7515_v53  ;;  %10089 = vst [vmem:[#allocation65_spill] sm:$0xff] %v7545_v50  ;;  %10090 = vst [vmem:[#allocation66_spill] sm:$0xff] %v7551_v29  ;;  %v1907_v39 = vshra.s32 %v7528_v52, 8  ;;  %v1909_v51 = vshra.s32 %v7563_v3, 8  ;;  %v2052_v60 = vshra.s32 %v7551_v29, 6  ;;  %v1851_v40 = vshra.s32 %v7563_v3, 9 }
 0x39f   : > { %4744 = vmatprep.subr.bf16.mxu0 %v7517_v54  ;;  %4936 = vmatprep.subr.bf16.mxu1 %v7523_v5  ;;  %10091 = vst [vmem:[#allocation67_spill] sm:$0xff] %v7554_v61  ;;  %10092 = vst [vmem:[#allocation68_spill] sm:$0xff] %v7558_v15  ;;  %v7592_v5 = vand.u32 1, %v1850_v31  ;;  %v1914_v53 = vshra.s32 %v7572_v16, 8  ;;  %v1856_v56 = vshra.s32 %v7572_v16, 9  ;;  %v1911_v49 = vshra.s32 %v7576_v1, 8 }
 0x3a0   : > { %10093 = vst [vmem:[#allocation69_spill] sm:$0xff] %v7560_v62  ;;  %10094 = vst [vmem:[#allocation70_spill] sm:$0xff] %v7567_v7  ;;  %v1912_v35 = vshra.s32 %v7581_v11, 8  ;;  %v7602_v24 = vand.u32 1, %v1907_v39  ;;  %v1986_v18 = vshra.s32 %v7572_v16, 7  ;;  %v1852_v39 = vshra.s32 %v7567_v7, 9 }
 0x3a1   : > { %10095 = vst [vmem:[#allocation71_spill] sm:$0xff] %v7572_v16  ;;  %10096 = vst [vmem:[#allocation72_spill] sm:$0xff] %v7584_v19  ;;  %v7612_v45 = vand.u32 1, %v1914_v53  ;;  %v7615_v32 = vand.u32 1, %v1856_v56  ;;  %v1855_v53 = vshra.s32 %v7584_v19, 9  ;;  %v7636_v54 = vand.u32 1, %v1851_v40 }
 0x3a2   : > { %4746 = vmatpush1.bf16.msra.mxu0 %v7533_v30  ;;  %4938 = vmatpush1.bf16.msra.mxu1 %v7537_v23  ;;  %v7590_v23 = vand.u32 1, %v1908_v8  ;;  %v7604_v8 = vand.u32 1, %v1909_v51  ;;  %v1853_v51 = vshra.s32 %v7576_v1, 9  ;;  %v7624_v46 = vand.u32 1, %v1912_v35 }
 0x3a3   : > { %4748 = vmatprep.subr.bf16.mxu0 %v7539_v26  ;;  %4940 = vmatprep.subr.bf16.mxu1 %v7545_v50  ;;  %v1910_v50 = vshra.s32 %v7567_v7, 8  ;;  %v1978_v56 = vadd.s32 %v7612_v45, %v7615_v32  ;;  %v7633_v26 = vand.u32 1, %v2052_v60  ;;  %v2124_v30 = vshra.s32 %v7551_v29, 5 }
 0x3a4   : > { %v1972_v44 = vadd.s32 %v7590_v23, %v7592_v5  ;;  %v2058_v35 = vshra.s32 %v7572_v16, 6  ;;  %v7642_v6 = vand.u32 1, %v1852_v39  ;;  %v7644_v0 = vand.u32 1, %v1853_v51 }
 0x3a5   : > { %v7606_v31 = vand.u32 1, %v1910_v50  ;;  %v1854_v50 = vshra.s32 %v7581_v11, 9  ;;  %v7649_v60 = vand.u32 1, %v1855_v53  ;;  %v1973_v33 = vadd.s32 %v7604_v8, %v7636_v54 }
 0x3a6   : > { %4750 = vmatpush1.bf16.msra.mxu0 %v7554_v61  ;;  %4942 = vmatpush1.bf16.msra.mxu1 %v7558_v15  ;;  %v1980_v15 = vshra.s32 %v7551_v29, 7  ;;  %v7631_v61 = vand.u32 1, %v1849_v20  ;;  %v1985_v51 = vshra.s32 %v7584_v19, 7  ;;  %v7659_v22 = vand.u32 1, %v2124_v30 }
 0x3a7   : > { %4752 = vmatprep.subr.bf16.mxu0 %v7560_v62  ;;  %5200 = vmatprep.subr.bf16.mxu1 %v7178_v41  ;;  %v1913_v41 = vshra.s32 %v7584_v19, 8  ;;  %v1974_v39 = vadd.s32 %v7606_v31, %v7642_v6  ;;  %v2051_v53 = vshra.s32 %v7528_v52, 6  ;;  %v7665_v9 = vand.u32 1, %v2058_v35 }
 0x3a8   : > { %v7609_v57 = vand.u32 1, %v1980_v15  ;;  %v7622_v15 = vand.u32 1, %v1911_v49  ;;  %v7639_v49 = vand.u32 1, %v1986_v18  ;;  %v1971_v40 = vadd.s32 %v7602_v24, %v7631_v61  ;;  %10097 = vst [vmem:[#allocation73_spill] sm:$0xff] %v7659_v22 }
 0x3a9   : > { %v7629_v62 = vand.u32 1, %v1913_v41  ;;  %v7646_v41 = vand.u32 1, %v1854_v50  ;;  %v2196_v50 = vshra.s32 %v7551_v29, 4  ;;  %10098 = vst [vmem:[#allocation74_spill] sm:$0xff] %v7665_v9  ;;  %v2130_v43 = vshra.s32 %v7572_v16, 5 }
 0x3aa   : > { %v2044_v12 = vadd.s32 %v7609_v57, %v1972_v44  ;;  %v1979_v44 = vshra.s32 %v7528_v52, 7  ;;  %v2050_v18 = vadd.s32 %v7639_v49, %v1978_v56  ;;  %v7670_v56 = vadd.s32 %v7622_v15, %v7644_v0 }
 0x3ab   : > { %v7674_v25 = vadd.s32 %v7624_v46, %v7646_v41  ;;  %v1977_v30 = vadd.s32 %v7629_v62, %v7649_v60  ;;  %v1981_v14 = vshra.s32 %v7563_v3, 7  ;;  %v1982_v35 = vshra.s32 %v7567_v7, 7 }
 0x3ac   : > { %v2116_v20 = vadd.s32 %v7633_v26, %v2044_v12  ;;  %v7662_v12 = vand.u32 1, %v1979_v44  ;;  %v2122_v28 = vadd.s32 %v7665_v9, %v2050_v18  ;;  %v7683_v38 = vand.u32 1, %v1985_v51 }
 0x3ad   : > { %v7685_v13 = vand.u32 1, %v2196_v50  ;;  %v2268_v10 = vshra.s32 %v7551_v29, 3  ;;  %v2057_v58 = vshra.s32 %v7584_v19, 6  ;;  %v7689_v55 = vand.u32 1, %v2051_v53 }
 0x3ae   : > { %v2188_v44 = vadd.s32 %v7659_v22, %v2116_v20  ;;  %v2043_v4 = vadd.s32 %v7662_v12, %v1971_v40  ;;  %v2123_v20 = vshra.s32 %v7528_v52, 5  ;;  %v7692_v48 = vand.u32 1, %v2130_v43 }
 0x3af   : > { %10099 = vst [vmem:[#allocation75_spill] sm:$0xff] %v7685_v13  ;;  %v2202_v36 = vshra.s32 %v7572_v16, 4  ;;  %v1983_v40 = vshra.s32 %v7576_v1, 7  ;;  %v1984_v18 = vshra.s32 %v7581_v11, 7  ;;  %v2049_v51 = vadd.s32 %v7683_v38, %v1977_v30 }
 0x3b0   : > { %10100 = vst [vmem:[#allocation76_spill] sm:$0xff] %v7692_v48  ;;  %v2260_v50 = vadd.s32 %v7685_v13, %v2188_v44  ;;  %v7699_v34 = vand.u32 1, %v1981_v14  ;;  %v7701_v21 = vand.u32 1, %v1982_v35  ;;  %v2115_v53 = vadd.s32 %v7689_v55, %v2043_v4 }
 0x3b1   : > { %v2194_v2 = vadd.s32 %v7692_v48, %v2122_v28  ;;  %v7705_v43 = vand.u32 1, %v2268_v10  ;;  %v2340_v63 = vshra.s32 %v7551_v29, 2  ;;  %v7708_v59 = vand.u32 1, %v2057_v58 }
 0x3b2   : > { %v2129_v42 = vshra.s32 %v7584_v19, 5  ;;  %v7711_v37 = vand.u32 1, %v2123_v20  ;;  %v7713_v30 = vand.u32 1, %v2202_v36  ;;  %v2274_v14 = vshra.s32 %v7572_v16, 3 }
 0x3b3   : > { %10101 = vst [vmem:[#allocation77_spill] sm:$0xff] %v7705_v43  ;;  %10102 = vst [vmem:[#allocation78_spill] sm:$0xff] %v7708_v59  ;;  %v2195_v44 = vshra.s32 %v7528_v52, 4  ;;  %v7717_v35 = vand.u32 1, %v1983_v40  ;;  %v2332_v28 = vadd.s32 %v7705_v43, %v2260_v50  ;;  %v2412_v10 = vshra.s32 %v7551_v29, 1 }
 0x3b4   : > { %10103 = vst [vmem:[#allocation79_spill] sm:$0xff] %v7711_v37  ;;  %10104 = vst [vmem:[#allocation80_spill] sm:$0xff] %v7713_v30  ;;  %v2121_v4 = vadd.s32 %v7708_v59, %v2049_v51  ;;  %v7722_v58 = vand.u32 1, %v1984_v18  ;;  %v2053_v27 = vshra.s32 %v7563_v3, 6  ;;  %v2187_v20 = vadd.s32 %v7711_v37, %v2115_v53 }
 0x3b5   : > { %v2266_v36 = vadd.s32 %v7713_v30, %v2194_v2  ;;  %v7727_v17 = vand.u32 1, %v2340_v63  ;;  %v7729_v47 = vand.u32 1, %v2129_v42  ;;  %v2201_v40 = vshra.s32 %v7584_v19, 4 }
 0x3b6   : > { %v2054_v50 = vshra.s32 %v7567_v7, 6  ;;  %v7733_v43 = vand.u32 1, %v2274_v14  ;;  %v2346_v51 = vshra.s32 %v7572_v16, 2  ;;  %v7736_v18 = vand.u32 1, %v2195_v44 }
 0x3b7   : > { %10105 = vst [vmem:[#allocation81_spill] sm:$0xff] %v7727_v17  ;;  %10106 = vst [vmem:[#allocation82_spill] sm:$0xff] %v7729_v47  ;;  %v2267_v13 = vshra.s32 %v7528_v52, 3  ;;  %v2046_v53 = vadd.s32 %v7701_v21, %v1974_v39  ;;  %v2404_v2 = vadd.s32 %v7727_v17, %v2332_v28  ;;  %v7741_v63 = vand.u32 1, %v2412_v10 }
 0x3b8   : > { %10107 = vst [vmem:[#allocation83_spill] sm:$0xff] %v7733_v43  ;;  %10108 = vst [vmem:[#allocation84_spill] sm:$0xff] %v7736_v18  ;;  %v2193_v42 = vadd.s32 %v7729_v47, %v2121_v4  ;;  %v2045_v30 = vadd.s32 %v7699_v34, %v1973_v33  ;;  %v2338_v48 = vadd.s32 %v7733_v43, %v2266_v36  ;;  %v2418_v14 = vshra.s32 %v7572_v16, 1 }
 0x3b9   : > { %10109 = vst [vmem:[#allocation85_spill] sm:$0xff] %v7741_v63  ;;  %v2259_v37 = vadd.s32 %v7736_v18, %v2187_v20  ;;  %v7748_v44 = vand.u32 1, %v2201_v40  ;;  %v2273_v22 = vshra.s32 %v7584_v19, 3  ;;  %v7751_v9 = vand.u32 1, %v2054_v50 }
 0x3ba   : > { %v2126_v39 = vshra.s32 %v7567_v7, 5  ;;  %v7754_v28 = vand.u32 1, %v2053_v27  ;;  %v7756_v10 = vand.u32 1, %v2346_v51  ;;  %v7758_v4 = vand.u32 1, %v2267_v13 }
 0x3bb   : > { %10110 = vst [vmem:[#allocation86_spill] sm:$0xff] %v7748_v44  ;;  %10111 = vst [vmem:[#allocation87_spill] sm:$0xff] %v7751_v9  ;;  %v2339_v33 = vshra.s32 %v7528_v52, 2  ;;  %v2476_v36 = vadd.s32 %v7741_v63, %v2404_v2  ;;  %v2265_v40 = vadd.s32 %v7748_v44, %v2193_v42  ;;  %v2118_v17 = vadd.s32 %v7751_v9, %v2046_v53 }
 0x3bc   : > { %10112 = vst [vmem:[#allocation88_spill] sm:$0xff] %v7756_v10  ;;  %10113 = vst [vmem:[#allocation89_spill] sm:$0xff] %v7758_v4  ;;  %v2410_v50 = vadd.s32 %v7756_v10, %v2338_v48  ;;  %v7766_v43 = vand.u32 1, %v2418_v14  ;;  %v2331_v27 = vadd.s32 %v7758_v4, %v2259_v37  ;;  %v2411_v51 = vshra.s32 %v7528_v52, 1 }
 0x3bd   : > { %v7770_v13 = vand.u32 1, %v2273_v22  ;;  %v2345_v18 = vshra.s32 %v7584_v19, 2  ;;  %v7773_v47 = vand.u32 1, %v2126_v39  ;;  %v2198_v2 = vshra.s32 %v7567_v7, 4 }
 0x3be   : > { %10114 = vst [vmem:[#allocation90_spill] sm:$0xff] %v7766_v43  ;;  %v2048_v42 = vadd.s32 %v7722_v58, %v7674_v25  ;;  %v2125_v53 = vshra.s32 %v7563_v3, 5  ;;  %v7779_v48 = vand.u32 1, %v2339_v33  ;;  %v2056_v14 = vshra.s32 %v7581_v11, 6 }
 0x3bf   : > { %10115 = vst [vmem:[#allocation91_spill] sm:$0xff] %v7770_v13  ;;  %10116 = vst [vmem:[#allocation92_spill] sm:$0xff] %v7773_v47  ;;  %v2117_v37 = vadd.s32 %v7754_v28, %v2045_v30  ;;  %v2337_v22 = vadd.s32 %v7770_v13, %v2265_v40  ;;  %v2417_v20 = vshra.s32 %v7584_v19, 1  ;;  %v2190_v39 = vadd.s32 %v7773_v47, %v2118_v17 }
 0x3c0   : > { %10117 = vst [vmem:[#allocation93_spill] sm:$0xff] %v7779_v48  ;;  %v10118_v63 = vand.u32 1, %v7551_v29  ;;  %v2403_v25 = vadd.s32 %v7779_v48, %v2331_v27  ;;  %v7790_v44 = vand.u32 1, %v2411_v51  ;;  %v2482_v33 = vadd.s32 %v7766_v43, %v2410_v50 }
 0x3c1   : > { %v7793_v9 = vand.u32 1, %v2345_v18  ;;  %v7795_v30 = vand.u32 1, %v2198_v2  ;;  %v2270_v40 = vshra.s32 %v7567_v7, 3  ;;  %v2055_v13 = vshra.s32 %v7576_v1, 6 }
 0x3c2   : > { %v2540_v10 = vadd.s32 %v10118_v63, %v2476_v36  ;;  %10119 = vst [vmem:[#allocation94_spill] sm:$0xff] %v7790_v44  ;;  %v7799_v17 = vand.u32 1, %v2125_v53  ;;  %v7801_v29 = vand.u32 1, %v2056_v14  ;;  %v2128_v63 = vshra.s32 %v7581_v11, 5 }
 0x3c3   : > { %10120 = vst [vmem:[#allocation95_spill] sm:$0xff] %v7793_v9  ;;  %10121 = vst [vmem:[#allocation96_spill] sm:$0xff] %v7795_v30  ;;  %v2409_v36 = vadd.s32 %v7793_v9, %v2337_v22  ;;  %v7805_v27 = vand.u32 1, %v2417_v20  ;;  %v2262_v50 = vadd.s32 %v7795_v30, %v2190_v39  ;;  %v2197_v18 = vshra.s32 %v7563_v3, 4  ;;  %v2701_v30 = vld [vmem:[%s7173_s11 + $0x210] sm:$0xff] }
 0x3c4   : > { %v2189_v51 = vadd.s32 %v7799_v17, %v2117_v37  ;;  %v2475_v2 = vadd.s32 %v7790_v44, %v2403_v25  ;;  %v2120_v53 = vadd.s32 %v7801_v29, %v2048_v42  ;;  %v7813_v14 = vand.u32 3, %v2540_v10 }
 0x3c5   : > { %10122 = vst [vmem:[#allocation97_spill] sm:$0xff] %v7805_v27  ;;  %v10123_v43 = vand.u32 1, %v7572_v16  ;;  %v7817_v22 = vand.u32 1, %v2270_v40  ;;  %v2342_v20 = vshra.s32 %v7567_v7, 2  ;;  %v2414_v9 = vshra.s32 %v7567_v7, 1 }
 0x3c6   : > { %v7822_v37 = vand.u32 1, %v2128_v63  ;;  %v2200_v25 = vshra.s32 %v7581_v11, 4  ;;  %v2481_v4 = vadd.s32 %v7805_v27, %v2409_v36  ;;  %v7827_v42 = vand.u32 1, %v2197_v18 }
 0x3c7   : > { %v2546_v48 = vadd.s32 %v10123_v43, %v2482_v33  ;;  %10124 = vst [vmem:[#allocation98_spill] sm:$0xff] %v7817_v22  ;;  %v2334_v10 = vadd.s32 %v7817_v22, %v2262_v50  ;;  %v2269_v43 = vshra.s32 %v7563_v3, 3  ;;  %v2047_v33 = vadd.s32 %v7717_v35, %v7670_v56 }
 0x3c8   : > { %10125 = vst [vmem:[#allocation99_spill] sm:$0xff] %v7822_v37  ;;  %v7832_v40 = vand.u32 1, %v2055_v13  ;;  %v10126_v39 = vand.u32 1, %v7528_v52  ;;  %v2192_v63 = vadd.s32 %v7822_v37, %v2120_v53  ;;  %v2127_v44 = vshra.s32 %v7576_v1, 5 }
 0x3c9   : > { %vm2564_vm2 = vcmp.eq.s32.totalorder %v7813_v14, 2  ;;  %v7839_v36 = vand.u32 1, %v2342_v20  ;;  %v2261_v50 = vadd.s32 %v7827_v42, %v2189_v51  ;;  %v7842_v18 = vand.u32 3, %v2546_v48 }
 0x3ca   : > { %v2539_v16 = vadd.s32 %v10126_v39, %v2475_v2  ;;  %v7844_v27 = vand.u32 1, %v2414_v9  ;;  %v7846_v56 = vand.u32 1, %v2200_v25  ;;  %v2272_v13 = vshra.s32 %v7581_v11, 3 }
 0x3cb   : > { %10127 = vst [vmem:[#allocation100_spill] sm:$0xff] %v7839_v36  ;;  %v10130_v2 = vand.u32 1, %v7584_v19  ;;  %v2406_v53 = vadd.s32 %v7839_v36, %v2334_v10  ;;  %v7852_v52 = vand.u32 1, %v2269_v43  ;;  %v2341_v20 = vshra.s32 %v7563_v3, 2  ;;  %v2699_v36 = vld [vmem:[%s7173_s11 + $0x200] sm:$0xff] }
 0x3cc   : > { %10128 = vst [vmem:[#allocation101_spill] sm:$0xff] %v7844_v27  ;;  %10129 = vst [vmem:[#allocation102_spill] sm:$0xff] %v7846_v56  ;;  %v2119_v22 = vadd.s32 %v7832_v40, %v2047_v33  ;;  %v7856_v51 = vand.u32 3, %v2539_v16  ;;  %v2264_v9 = vadd.s32 %v7846_v56, %v2192_v63  ;;  %vm1925_vm3 = vcmp.eq.s32.totalorder %v7604_v8, 1 }
 0x3cd   : > { %v2545_v39 = vadd.s32 %v10130_v2, %v2481_v4  ;;  %10131 = vst [vmem:[#allocation103_spill] sm:$0xff] %v7852_v52  ;;  %v7860_v48 = vand.u32 1, %v2127_v44  ;;  %vm2556_vm4 = vcmp.eq.s32.totalorder %v7813_v14, 0  ;;  %v2333_v4 = vadd.s32 %v7852_v52, %v2261_v50 }
 0x3ce   : > { %v2413_v25 = vshra.s32 %v7563_v3, 1  ;;  %vm1927_vm5 = vcmp.eq.s32.totalorder %v7622_v15, 1  ;;  %vm1928_vm6 = vcmp.eq.s32.totalorder %v7624_v46, 1  ;;  %v10132_v10 = vmov 0.0  }
 0x3cf   : > { %v2572_v16 = vsel %vm2564_vm2, -1.0, %v10132_v10  ;;  %vm2570_vm7 = vcmp.eq.s32.totalorder %v7842_v18, 2  ;;  %v7871_v43 = vand.u32 1, %v2272_v13  ;;  %v2344_v44 = vshra.s32 %v7581_v11, 2 }
 0x3d0   : > { %vm1867_vm8 = vcmp.eq.s32.totalorder %v7636_v54, 1  ;;  %v7875_v33 = vand.u32 3, %v2545_v39  ;;  %v2478_v63 = vadd.s32 %v7844_v27, %v2406_v53  ;;  %v7879_v2 = vand.u32 1, %v2341_v20 }
 0x3d1   : > { %10133 = vst [vmem:[#allocation104_spill] sm:$0xff] %v7871_v43  ;;  %vm1869_vm9 = vcmp.eq.s32.totalorder %v7644_v0, 1  ;;  %vm1870_vm10 = vcmp.eq.s32.totalorder %v7646_v41, 1  ;;  %vm2563_vm11 = vcmp.eq.s32.totalorder %v7856_v51, 2  ;;  %v2336_v13 = vadd.s32 %v7871_v43, %v2264_v9 }
 0x3d2   : > { %10134 = vst [vmem:[#allocation105_spill] sm:$0xff] %v7879_v2  ;;  %v2416_v19 = vshra.s32 %v7581_v11, 1  ;;  %v2199_v39 = vshra.s32 %v7576_v1, 4  ;;  %v2191_v53 = vadd.s32 %v7860_v48, %v2119_v22  ;;  %v7890_v50 = vsel %vm2556_vm4, 1.0, %v2572_v16 }
 0x3d3   : > { %10135 = vst [vmem:[#allocation106_spill] sm:$0xff] %v7890_v50  ;;  %v2405_v20 = vadd.s32 %v7879_v2, %v2333_v4  ;;  %v7893_v27 = vand.u32 1, %v2413_v25  ;;  %vm2562_vm12 = vcmp.eq.s32.totalorder %v7842_v18, 0  ;;  %v2578_v9 = vsel %vm2570_vm7, -1.0, %v10132_v10 }
 0x3d4   : > { %vm2555_vm13 = vcmp.eq.s32.totalorder %v7856_v51, 0  ;;  %v7902_v47 = vand.u32 1, %v2344_v44  ;;  %vm1997_vm14 = vcmp.eq.s32.totalorder %v7699_v34, 1  ;;  %vm1999_vm15 = vcmp.eq.s32.totalorder %v7717_v35, 1 }
 0x3d5   : > { %10136 = vst [vmem:[#allocation107_spill] sm:$0xff] %v7893_v27  ;;  %v2571_v4 = vsel %vm2563_vm11, -1.0, %v10132_v10  ;;  %vm2569_vm0 = vcmp.eq.s32.totalorder %v7875_v33, 2  ;;  %v10138_v25 = vand.u32 1, %v7567_v7  ;;  %vm2596_vm1 = vcmp.eq.s32.totalorder %v7813_v14, 3 }
 0x3d6   : > { %10137 = vst [vmem:[#allocation108_spill] sm:$0xff] %v7902_v47  ;;  %vm2000_vm2 = vcmp.eq.s32.totalorder %v7722_v58, 1  ;;  %v2408_v44 = vadd.s32 %v7902_v47, %v2336_v13  ;;  %v7919_v2 = vand.u32 1, %v2416_v19  ;;  %v7921_v43 = vand.u32 1, %v2199_v39 }
 0x3d7   : > { %v2542_v50 = vadd.s32 %v10138_v25, %v2478_v63  ;;  %v2271_v52 = vshra.s32 %v7576_v1, 3  ;;  %v7926_v56 = vsel %vm2562_vm12, 1.0, %v2578_v9  ;;  %v7928_v7 = vpack.c.bf16 %v2701_v30, %v2699_v36  ;;  %v2706_v25 = vld [vmem:[%s7173_s11 + $0x238] sm:$0xff] }
 0x3d8   : > { %10139 = vst [vmem:[#allocation109_spill] sm:$0xff] %v7919_v2  ;;  %10140 = vst [vmem:[#allocation110_spill] sm:$0xff] %v7921_v43  ;;  %v2477_v63 = vadd.s32 %v7893_v27, %v2405_v20  ;;  %v7934_v19 = vsel %vm2555_vm13, 1.0, %v2571_v4  ;;  %vm2588_vm4 = vcmp.eq.s32.totalorder %v7813_v14, 1  ;;  %v2604_v13 = vsel %vm2596_vm1, 1.0, %v10132_v10  ;;  %v2704_v4 = vld [vmem:[%s7173_s11 + $0x228] sm:$0xff] }
 0x3d9   : > { %10141 = vst [vmem:[#allocation111_spill] sm:$0xff] %v7926_v56  ;;  %10142 = vst [vmem:[#allocation112_spill] sm:$0xff] %v7928_v7  ;;  %v2263_v39 = vadd.s32 %v7921_v43, %v2191_v53  ;;  %vm2069_vm7 = vcmp.eq.s32.totalorder %v7754_v28, 1  ;;  %vm2071_vm11 = vcmp.eq.s32.totalorder %v7832_v40, 1  ;;  %vm2561_vm12 = vcmp.eq.s32.totalorder %v7875_v33, 0  ;;  %v2705_v56 = vld [vmem:[%s7173_s11 + $0x230] sm:$0xff] }
 0x3da   : > { %10143 = vst [vmem:[#allocation113_spill] sm:$0xff] %v7934_v19  ;;  %v2577_v36 = vsel %vm2569_vm0, -1.0, %v10132_v10  ;;  %v7949_v20 = vand.u32 3, %v2542_v50  ;;  %v2703_v19 = vld [vmem:[%s7173_s11 + $0x220] sm:$0xff]  ;;  %v2480_v27 = vadd.s32 %v7919_v2, %v2408_v44  ;;  %v7961_v47 = vand.u32 1, %v2271_v52 }
 0x3db   : > { %v2343_v43 = vshra.s32 %v7576_v1, 2  ;;  %v7974_v8 = vsel %vm2588_vm4, -1.0, %v2604_v13  ;;  %v10145_v44 = vand.u32 1, %v7563_v3  ;;  %v7982_v37 = vpack.c.bf16 %v2706_v25, %v2704_v4 }
 0x3dc   : > { %10144 = vst [vmem:[#allocation114_spill] sm:$0xff] %v7974_v8  ;;  %v2335_v15 = vadd.s32 %v7961_v47, %v2263_v39  ;;  %v2415_v59 = vshra.s32 %v7576_v1, 1  ;;  %v7996_v54 = vsel %vm2561_vm12, 1.0, %v2577_v36  ;;  %v10148_v0 = vand.u32 1, %v7581_v11 }
 0x3dd   : > { %v2541_v52 = vadd.s32 %v10145_v44, %v2477_v63  ;;  %10146 = vst [vmem:[#allocation115_spill] sm:$0xff] %v7982_v37  ;;  %v7998_v63 = vpack.c.bf16 %v2705_v56, %v2703_v19  ;;  %v8007_v44 = vand.u32 1, %v2343_v43 }
 0x3de   : > { %v2544_v4 = vadd.s32 %v10148_v0, %v2480_v27  ;;  %v8022_v43 = vand.u32 1, %v2415_v59 }
 0x3df   : > { %10147 = vst [vmem:[#allocation116_spill] sm:$0xff] %v7998_v63  ;;  %v8009_v8 = vand.u32 3, %v2541_v52  ;;  %v2407_v56 = vadd.s32 %v8007_v44, %v2335_v15  ;;  %v9987_v52 = vand.u32 1, %v7576_v1 }
 0x3e0   : > { %v8036_v58 = vand.u32 3, %v2544_v4 }
 0x3e1   : > { %vm2565_vm12 = vcmp.eq.s32.totalorder %v8009_v8, 2  ;;  %vm2597_vm4 = vcmp.eq.s32.totalorder %v8009_v8, 3  ;;  %vm2589_vm13 = vcmp.eq.s32.totalorder %v8009_v8, 1 }
 0x3e2   : > { %v2573_v28 = vsel %vm2565_vm12, -1.0, %v10132_v10  ;;  %v2605_v4 = vsel %vm2597_vm4, 1.0, %v10132_v10  ;;  %vm2560_vm0 = vcmp.eq.s32.totalorder %v8036_v58, 0  ;;  %vm2592_vm12 = vcmp.eq.s32.totalorder %v8036_v58, 1 }
 0x3e3   : > { %v7904_v22 = vpop.permute.xlu1 %1948  ;;  %v7906_v16 = vpop.permute.xlu0 %1891 }
 0x3e7   : > { %v7939_v9 = vpop.permute.xlu1 %1952  ;;  %v7941_v30 = vpop.permute.xlu0 %1896 }
 0x3e8   : > { %v1957_v7 = vsel %vm1925_vm3, %v7904_v22, %v7939_v9  ;;  %v1959_v50 = vsel %vm1927_vm5, %v7904_v22, %v7939_v9  ;;  %v1960_v53 = vsel %vm1928_vm6, %v7904_v22, %v7939_v9  ;;  %v1901_v2 = vsel %vm1867_vm8, %v7906_v16, %v7941_v30 }
 0x3e9   : > { %v1903_v46 = vsel %vm1869_vm9, %v7906_v16, %v7941_v30  ;;  %v1904_v14 = vsel %vm1870_vm10, %v7906_v16, %v7941_v30  ;;  %v1965_v25 = vmul.f32 %v1957_v7, %v1901_v2  ;;  %vm2566_vm3 = vcmp.eq.s32.totalorder %v7949_v20, 2 }
 0x3ea   : > { %v1967_v41 = vmul.f32 %v1959_v50, %v1903_v46  ;;  %v1968_v37 = vmul.f32 %v1960_v53, %v1904_v14  ;;  %vm2587_vm5 = vcmp.eq.s32.totalorder %v7856_v51, 1  ;;  %vm2595_vm6 = vcmp.eq.s32.totalorder %v7856_v51, 3 }
 0x3eb   : > { %vm2558_vm8 = vcmp.eq.s32.totalorder %v7949_v20, 0  ;;  %v2574_v34 = vsel %vm2566_vm3, -1.0, %v10132_v10  ;;  %vm1923_vm9 = vcmp.eq.s32.totalorder %v7602_v24, 1  ;;  %vm1924_vm10 = vcmp.eq.s32.totalorder %v7590_v23, 1 }
 0x3ec   : > { %v8000_v13 = vpop.permute.xlu1 %2024  ;;  %v8002_v39 = vpop.permute.xlu0 %2020  ;;  %v2603_v59 = vsel %vm2595_vm6, 1.0, %v10132_v10  ;;  %vm2598_vm3 = vcmp.eq.s32.totalorder %v7949_v20, 3  ;;  %v2479_v46 = vadd.s32 %v8022_v43, %v2407_v56  ;;  %vm2600_vm6 = vcmp.eq.s32.totalorder %v8036_v58, 3 }
 0x3ed   : > { %v2029_v7 = vsel %vm1997_vm14, %v8002_v39, %v8000_v13  ;;  %v2031_v27 = vsel %vm1999_vm15, %v8002_v39, %v8000_v13  ;;  %v2032_v2 = vsel %vm2000_vm2, %v8002_v39, %v8000_v13  ;;  %vm2072_vm15 = vcmp.eq.s32.totalorder %v7801_v29, 1 }
 0x3ee   : > { %v2037_v19 = vmul.f32 %v2029_v7, %v1965_v25  ;;  %v2039_v35 = vmul.f32 %v2031_v27, %v1967_v41  ;;  %v2040_v50 = vmul.f32 %v2032_v2, %v1968_v37  ;;  %vm2602_vm2 = vcmp.eq.s32.totalorder %v7842_v18, 3 }
 0x3ef   : > { %vm2557_vm14 = vcmp.eq.s32.totalorder %v8009_v8, 0  ;;  %v2606_v0 = vsel %vm2598_vm3, 1.0, %v10132_v10  ;;  %v2543_v27 = vadd.s32 %v9987_v52, %v2479_v46  ;;  %v2610_v29 = vsel %vm2602_vm2, 1.0, %v10132_v10  ;;  %v10154_v46 = vld [vmem:[#allocation102_spill] sm:$0xff] }
 0x3f0   : > { %v2608_v2 = vsel %vm2600_vm6, 1.0, %v10132_v10  ;;  %vm2216_vm4 = vcmp.eq.s32.totalorder %v10154_v46, 1  ;;  %v8123_v52 = vsel %vm2557_vm14, 1.0, %v2573_v28  ;;  %v8132_v51 = vsel %vm2589_vm13, -1.0, %v2605_v4 }
 0x3f1   : > { %v8042_v36 = vpop.permute.xlu1 %2092  ;;  %v8044_v53 = vpop.permute.xlu0 %2096  ;;  %v8141_v28 = vand.u32 3, %v2543_v27  ;;  %v1955_v8 = vsel %vm1923_vm9, %v7904_v22, %v7939_v9  ;;  %v1956_v4 = vsel %vm1924_vm10, %v7904_v22, %v7939_v9  ;;  %v10162_v27 = vld [vmem:[#allocation79_spill] sm:$0xff]  ;;  %vm10163_vm14 = vcmp.eq.s32.totalorder %v7799_v17, 1 }
 0x3f2   : > { %v2101_v15 = vsel %vm2069_vm7, %v8042_v36, %v8044_v53  ;;  %v2103_v37 = vsel %vm2071_vm11, %v8042_v36, %v8044_v53  ;;  %vm2590_vm7 = vcmp.eq.s32.totalorder %v7949_v20, 1  ;;  %vm2568_vm11 = vcmp.eq.s32.totalorder %v8036_v58, 2 }
 0x3f3   : > { %v2109_v14 = vmul.f32 %v2101_v15, %v2037_v19  ;;  %v8065_v25 = vmul.f32 %v2103_v37, %v2039_v35  ;;  %v2104_v40 = vsel %vm2072_vm15, %v8042_v36, %v8044_v53  ;;  %vm2594_vm15 = vcmp.eq.s32.totalorder %v7842_v18, 1  ;;  %v10149_v19 = vld [vmem:[#allocation78_spill] sm:$0xff]  ;;  %v10150_v35 = vld [vmem:[#allocation87_spill] sm:$0xff] }
 0x3f4   : > { %v2112_v7 = vmul.f32 %v2104_v40, %v2040_v50  ;;  %v2576_v56 = vsel %vm2568_vm11, -1.0, %v10132_v10  ;;  %vm2073_vm2 = vcmp.eq.s32.totalorder %v10149_v19, 1  ;;  %vm2070_vm3 = vcmp.eq.s32.totalorder %v10150_v35, 1  ;;  %v10153_v37 = vld [vmem:[#allocation99_spill] sm:$0xff]  ;;  %v10155_v40 = vld [vmem:[#allocation74_spill] sm:$0xff] }
 0x3f5   : > { %v8112_v50 = vsel %vm2558_vm8, 1.0, %v2574_v34  ;;  %v8116_v15 = vsel %vm2587_vm5, -1.0, %v2603_v59  ;;  %vm2144_vm11 = vcmp.eq.s32.totalorder %v10153_v37, 1  ;;  %vm2074_vm1 = vcmp.eq.s32.totalorder %v10155_v40, 1  ;;  %v10156_v34 = vld [vmem:[#allocation110_spill] sm:$0xff]  ;;  %10157 = vst [vmem:[#allocation99_spill] sm:$0xff] %v8132_v51 }
 0x3f6   : > { %v8088_v41 = vpop.permute.xlu1 %2164  ;;  %10151 = vst [vmem:[#allocation78_spill] sm:$0xff] %v8112_v50  ;;  %10152 = vst [vmem:[#allocation87_spill] sm:$0xff] %v8116_v15  ;;  %v8127_v63 = vsel %vm2590_vm7, -1.0, %v2606_v0  ;;  %vm2215_vm8 = vcmp.eq.s32.totalorder %v10156_v34, 1  ;;  %v10158_v50 = vld [vmem:[#allocation73_spill] sm:$0xff]  ;;  %v8139_v15 = vsel %vm2560_vm0, 1.0, %v2576_v56  ;;  %v2106_v46 = vsel %vm2074_vm1, %v8042_v36, %v8044_v53 }
 0x3f7   : > { %vm2140_vm5 = vcmp.eq.s32.totalorder %v10158_v50, 1  ;;  %10159 = vst [vmem:[#allocation102_spill] sm:$0xff] %v8139_v15  ;;  %v8145_v20 = vsel %vm2592_vm12, -1.0, %v2608_v2  ;;  %v8149_v0 = vsel %vm2594_vm15, -1.0, %v2610_v29  ;;  %vm2139_vm13 = vcmp.eq.s32.totalorder %v10162_v27, 1  ;;  %v10169_v29 = vld [vmem:[#allocation76_spill] sm:$0xff] }
 0x3f8   : > { %10160 = vst [vmem:[#allocation74_spill] sm:$0xff] %v8145_v20  ;;  %10161 = vst [vmem:[#allocation110_spill] sm:$0xff] %v8149_v0  ;;  %vm10164_vm0 = vcmp.eq.s32.totalorder %v7860_v48, 1  ;;  %vm10165_vm9 = vcmp.eq.s32.totalorder %v7606_v31, 1  ;;  %vm10166_vm10 = vcmp.eq.s32.totalorder %v7629_v62, 1  ;;  %vm10167_vm6 = vcmp.eq.s32.totalorder %v7631_v61, 1 }
 0x3f9   : > { %v1958_v24 = vsel %vm10165_vm9, %v7904_v22, %v7939_v9  ;;  %v1961_v23 = vsel %vm10166_vm10, %v7904_v22, %v7939_v9  ;;  %v1899_v17 = vsel %vm10167_vm6, %v7906_v16, %v7941_v30  ;;  %vm10168_vm7 = vcmp.eq.s32.totalorder %v7592_v5, 1  ;;  %v10170_v56 = vld [vmem:[#allocation103_spill] sm:$0xff]  ;;  %v10171_v31 = vld [vmem:[#allocation104_spill] sm:$0xff]  ;;  %v10175_v2 = vld [vmem:[#allocation82_spill] sm:$0xff] }
 0x3fa   : > { %v8134_v59 = vpop.permute.xlu1 %2168  ;;  %v1900_v48 = vsel %vm10168_vm7, %v7906_v16, %v7941_v30  ;;  %vm2146_vm12 = vcmp.eq.s32.totalorder %v10169_v29, 1  ;;  %vm2285_vm15 = vcmp.eq.s32.totalorder %v10170_v56, 1  ;;  %vm10173_vm9 = vcmp.eq.s32.totalorder %v7642_v6, 1  ;;  %v10195_v19 = vld [vmem:[#allocation98_spill] sm:$0xff]  ;;  %v10197_v40 = vld [vmem:[#allocation88_spill] sm:$0xff]  ;;  %v10200_v50 = vld [vmem:[#allocation93_spill] sm:$0xff] }
 0x3fb   : > { %v2173_v58 = vsel %vm10163_vm14, %v8088_v41, %v8134_v59  ;;  %v2175_v18 = vsel %vm10164_vm0, %v8088_v41, %v8134_v59  ;;  %vm10172_vm0 = vcmp.eq.s32.totalorder %v7612_v45, 1  ;;  %v1902_v61 = vsel %vm10173_vm9, %v7906_v16, %v7941_v30 }
 0x3fc   : > { %v1962_v62 = vsel %vm10172_vm0, %v7904_v22, %v7939_v9  ;;  %vm10174_vm10 = vcmp.eq.s32.totalorder %v7649_v60, 1  ;;  %v2181_v0 = vmul.f32 %v2173_v58, %v2109_v14  ;;  %vm10176_vm7 = vcmp.eq.s32.totalorder %v7615_v32, 1  ;;  %v10179_v60 = vld [vmem:[#allocation92_spill] sm:$0xff] }
 0x3fd   : > { %v1905_v5 = vsel %vm10174_vm10, %v7906_v16, %v7941_v30  ;;  %v1906_v20 = vsel %vm10176_vm7, %v7906_v16, %v7941_v30  ;;  %vm10177_vm0 = vcmp.eq.s32.totalorder %v7662_v12, 1  ;;  %vm10178_vm9 = vcmp.eq.s32.totalorder %v7609_v57, 1  ;;  %v10180_v12 = vld [vmem:[#allocation75_spill] sm:$0xff]  ;;  %v10181_v30 = vld [vmem:[#allocation80_spill] sm:$0xff] }
 0x3fe   : > { %v2027_v45 = vsel %vm10177_vm0, %v8002_v39, %v8000_v13  ;;  %v2028_v6 = vsel %vm10178_vm9, %v8002_v39, %v8000_v13  ;;  %vm2142_vm10 = vcmp.eq.s32.totalorder %v10179_v60, 1  ;;  %v2176_v22 = vsel %vm2144_vm11, %v8088_v41, %v8134_v59  ;;  %v10182_v14 = vld [vmem:[#allocation84_spill] sm:$0xff] }
 0x3ff   : > { %v1963_v32 = vmul.f32 %v1955_v8, %v1899_v17  ;;  %v1964_v16 = vmul.f32 %v1956_v4, %v1900_v48  ;;  %v8218_v9 = vpop.permute.xlu1 %2240  ;;  %v2184_v57 = vmul.f32 %v2176_v22, %v2112_v7  ;;  %v8224_v58 = vmul.f32 %v2175_v18, %v8065_v25  ;;  %v8234_v4 = vpop.permute.xlu0 %2236  ;;  %v10185_v17 = vld [vmem:[#allocation86_spill] sm:$0xff]  ;;  %v10186_v7 = vld [vmem:[#allocation96_spill] sm:$0xff]  ;;  %v10189_v48 = vld [vmem:[#allocation83_spill] sm:$0xff] }
 0x400   : > { %v1966_v51 = vmul.f32 %v1958_v24, %v1902_v61  ;;  %v1969_v15 = vmul.f32 %v1961_v23, %v1905_v5  ;;  %vm10183_vm11 = vcmp.eq.s32.totalorder %v7701_v21, 1  ;;  %vm10184_vm9 = vcmp.eq.s32.totalorder %v7683_v38, 1  ;;  %v10187_v24 = vld [vmem:[#allocation77_spill] sm:$0xff] }
 0x401   : > { %v2030_v37 = vsel %vm10183_vm11, %v8002_v39, %v8000_v13  ;;  %v2033_v8 = vsel %vm10184_vm9, %v8002_v39, %v8000_v13  ;;  %v2035_v25 = vmul.f32 %v2027_v45, %v1963_v32  ;;  %v2036_v18 = vmul.f32 %v2028_v6, %v1964_v16  ;;  %v10190_v38 = vld [vmem:[#allocation89_spill] sm:$0xff] }
 0x402   : > { %v1970_v23 = vmul.f32 %v1962_v62, %v1906_v20  ;;  %vm10188_vm11 = vcmp.eq.s32.totalorder %v7639_v49, 1  ;;  %vm2290_vm6 = vcmp.eq.s32.totalorder %v10189_v48, 1  ;;  %vm2283_vm9 = vcmp.eq.s32.totalorder %v10190_v38, 1  ;;  %v10196_v32 = vld [vmem:[#allocation81_spill] sm:$0xff]  ;;  %v10223_v48 = vld [vmem:[#allocation71_spill] sm:$0xff] }
 0x403   : > { %v2034_v21 = vsel %vm10188_vm11, %v8002_v39, %v8000_v13  ;;  %vm10191_vm14 = vcmp.eq.s32.totalorder %v7689_v55, 1  ;;  %vm10192_vm0 = vcmp.eq.s32.totalorder %v7633_v26, 1  ;;  %vm10193_vm7 = vcmp.eq.s32.totalorder %v7827_v42, 1  ;;  %v10194_v39 = vld [vmem:[#allocation91_spill] sm:$0xff]  ;;  %v2313_v34 = vpop.permute.xlu0 %2312 }
 0x404   : > { %v2099_v61 = vsel %vm10191_vm14, %v8042_v36, %v8044_v53  ;;  %v2100_v5 = vsel %vm10192_vm0, %v8042_v36, %v8044_v53  ;;  %v2245_v49 = vsel %vm10193_vm7, %v8234_v4, %v8218_v9  ;;  %v2248_v13 = vsel %vm2216_vm4, %v8234_v4, %v8218_v9  ;;  %v8271_v62 = vpop.permute.xlu1 %2308 }
 0x405   : > { %vm2601_vm11 = vcmp.eq.s32.totalorder %v7875_v33, 3  ;;  %v2105_v55 = vsel %vm2073_vm2, %v8042_v36, %v8044_v53  ;;  %vm2289_vm14 = vcmp.eq.s32.totalorder %v10194_v39, 1  ;;  %v2102_v26 = vsel %vm2070_vm3, %v8042_v36, %v8044_v53  ;;  %v10198_v36 = vld [vmem:[#allocation105_spill] sm:$0xff]  ;;  %v10199_v53 = vld [vmem:[#allocation108_spill] sm:$0xff] }
 0x406   : > { %v2253_v42 = vmul.f32 %v2245_v49, %v2181_v0  ;;  %v2256_v20 = vmul.f32 %v2248_v13, %v2184_v57  ;;  %v2041_v45 = vmul.f32 %v2033_v8, %v1969_v15  ;;  %v2038_v6 = vmul.f32 %v2030_v37, %v1966_v51  ;;  %v10201_v37 = vld [vmem:[#allocation95_spill] sm:$0xff]  ;;  %v10205_v49 = vld [vmem:[#allocation90_spill] sm:$0xff] }
 0x407   : > { %vm2286_vm4 = vcmp.eq.s32.totalorder %v10195_v19, 1  ;;  %v2247_v22 = vsel %vm2215_vm8, %v8234_v4, %v8218_v9  ;;  %v2107_v35 = vmul.f32 %v2099_v61, %v2035_v25  ;;  %v2172_v0 = vsel %vm2140_vm5, %v8088_v41, %v8134_v59  ;;  %v10206_v13 = vld [vmem:[#allocation94_spill] sm:$0xff] }
 0x408   : > { %vm2356_vm3 = vcmp.eq.s32.totalorder %v10196_v32, 1  ;;  %v2042_v16 = vmul.f32 %v2034_v21, %v1970_v23  ;;  %vm2567_vm0 = vcmp.eq.s32.totalorder %v8141_v28, 2  ;;  %v2171_v15 = vsel %vm2139_vm13, %v8088_v41, %v8134_v59  ;;  %v10202_v21 = vld [vmem:[#allocation100_spill] sm:$0xff] }
 0x409   : > { %v2108_v51 = vmul.f32 %v2100_v5, %v2036_v18  ;;  %v2113_v57 = vmul.f32 %v2105_v55, %v2041_v45  ;;  %v2110_v8 = vmul.f32 %v2102_v26, %v2038_v6  ;;  %v2178_v23 = vsel %vm2146_vm12, %v8088_v41, %v8134_v59  ;;  %v10204_v5 = vld [vmem:[#allocation85_spill] sm:$0xff]  ;;  %v2381_v26 = vpop.permute.xlu1 %2380 }
 0x40a   : > { %v2114_v25 = vmul.f32 %v2106_v46, %v2042_v16  ;;  %vm2358_vm7 = vcmp.eq.s32.totalorder %v10202_v21, 1  ;;  %v2317_v27 = vsel %vm2285_vm15, %v8271_v62, %v2313_v34  ;;  %vm10203_vm13 = vcmp.eq.s32.totalorder %v10171_v31, 1  ;;  %v10208_v31 = vld [vmem:[#allocation97_spill] sm:$0xff] }
 0x40b   : > { %v2320_v18 = vsel %vm10203_vm13, %v8271_v62, %v2313_v34  ;;  %vm2359_vm8 = vcmp.eq.s32.totalorder %v8007_v44, 1  ;;  %v2180_v61 = vmul.f32 %v2172_v0, %v2108_v51  ;;  %vm2428_vm5 = vcmp.eq.s32.totalorder %v10204_v5, 1  ;;  %v10218_v16 = vld [vmem:[#allocation101_spill] sm:$0xff] }
 0x40c   : > { %vm10207_vm12 = vcmp.eq.s32.totalorder %v10175_v2, 1  ;;  %v2325_v56 = vmul.f32 %v2317_v27, %v2253_v42  ;;  %v2328_v55 = vmul.f32 %v2320_v18, %v2256_v20  ;;  %v2179_v46 = vmul.f32 %v2171_v15, %v2107_v35  ;;  %v10231_v18 = vld [vmem:[#allocation72_spill] sm:$0xff]  ;;  %v10260_v27 = vld [vmem:[#allocation106_spill] sm:$0xff] }
 0x40d   : > { %v2177_v29 = vsel %vm10207_vm12, %v8088_v41, %v8134_v59  ;;  %v2174_v45 = vsel %vm2142_vm10, %v8088_v41, %v8134_v59  ;;  %v2255_v6 = vmul.f32 %v2247_v22, %v8224_v58  ;;  %vm10209_vm13 = vcmp.eq.s32.totalorder %v7961_v47, 1  ;;  %v10213_v59 = vld [vmem:[#allocation107_spill] sm:$0xff]  ;;  %v10214_v47 = vld [vmem:[#allocation109_spill] sm:$0xff] }
 0x40e   : > { %v2319_v0 = vsel %vm10209_vm13, %v8271_v62, %v2313_v34  ;;  %vm10210_vm12 = vcmp.eq.s32.totalorder %v10180_v12, 1  ;;  %v2186_v42 = vmul.f32 %v2178_v23, %v2114_v25  ;;  %vm10211_vm15 = vcmp.eq.s32.totalorder %v10181_v30, 1 }
 0x40f   : > { %v2244_v2 = vsel %vm10210_vm12, %v8234_v4, %v8218_v9  ;;  %v2250_v20 = vsel %vm10211_vm15, %v8234_v4, %v8218_v9  ;;  %vm10212_vm10 = vcmp.eq.s32.totalorder %v10182_v14, 1  ;;  %v2185_v60 = vmul.f32 %v2177_v29, %v2113_v57  ;;  %v10261_v29 = vld [vmem:[#allocation111_spill] sm:$0xff] }
 0x410   : > { %v2243_v41 = vsel %vm10212_vm10, %v8234_v4, %v8218_v9  ;;  %vm10215_vm12 = vcmp.eq.s32.totalorder %v10185_v17, 1  ;;  %vm10216_vm2 = vcmp.eq.s32.totalorder %v10186_v7, 1  ;;  %v8347_v58 = vmul.f32 %v2319_v0, %v2255_v6  ;;  %v10219_v7 = vld [vmem:[#allocation66_spill] sm:$0xff] }
 0x411   : > { %v2249_v12 = vsel %vm10215_vm12, %v8234_v4, %v8218_v9  ;;  %v2246_v30 = vsel %vm10216_vm2, %v8234_v4, %v8218_v9  ;;  %vm10217_vm15 = vcmp.eq.s32.totalorder %v10187_v24, 1  ;;  %v2322_v22 = vsel %vm2290_vm6, %v8271_v62, %v2313_v34  ;;  %v2385_v9 = vpop.permute.xlu1 %2384 }
 0x412   : > { %v2316_v14 = vsel %vm10217_vm15, %v8271_v62, %v2313_v34  ;;  %v2315_v17 = vsel %vm2283_vm9, %v8271_v62, %v2313_v34  ;;  %v2182_v35 = vmul.f32 %v2174_v45, %v2110_v8  ;;  %v2252_v4 = vmul.f32 %v2244_v2, %v2180_v61  ;;  %v10227_v8 = vld [vmem:[#allocation61_spill] sm:$0xff] }
 0x413   : > { %v10220_v15 = vand.u32 1, %v10219_v7  ;;  %v2258_v51 = vmul.f32 %v2250_v20, %v2186_v42  ;;  %v10224_v57 = vand.u32 1, %v10223_v48  ;;  %v2251_v38 = vmul.f32 %v2243_v41, %v2179_v46 }
 0x414   : > { %v10228_v23 = vand.u32 1, %v10227_v8  ;;  %v10232_v61 = vand.u32 1, %v10231_v18  ;;  %v8387_v45 = vsel %vm2601_vm11, 1.0, %v10132_v10  ;;  %v2257_v6 = vmul.f32 %v2249_v12, %v2185_v60 }
 0x415   : > { %vm8362_vm2 = vcmp.eq.s32.totalorder %v10220_v15, 1  ;;  %vm8368_vm6 = vcmp.eq.s32.totalorder %v10224_v57, 1  ;;  %v2321_v46 = vsel %vm2289_vm14, %v8271_v62, %v2313_v34  ;;  %v2254_v0 = vmul.f32 %v2246_v30, %v2182_v35  ;;  %v10235_v15 = vld [vmem:[#allocation70_spill] sm:$0xff]  ;;  %v2457_v32 = vpop.permute.xlu1 %2456 }
 0x416   : > { %vm8374_vm9 = vcmp.eq.s32.totalorder %v10228_v23, 1  ;;  %vm8380_vm15 = vcmp.eq.s32.totalorder %v10232_v61, 1  ;;  %v8395_v2 = vsel %vm2567_vm0, -1.0, %v10132_v10  ;;  %v2324_v42 = vmul.f32 %v2316_v14, %v2252_v4 }
 0x417   : > { %v2330_v20 = vmul.f32 %v2322_v22, %v2258_v51  ;;  %v2323_v41 = vmul.f32 %v2315_v17, %v2251_v38  ;;  %v2318_v7 = vsel %vm2286_vm4, %v8271_v62, %v2313_v34  ;;  %v10236_v48 = vand.u32 1, %v10235_v15  ;;  %v2453_v22 = vpop.permute.xlu0 %2452 }
 0x418   : > { %v10239_v39 = vand.u32 1, %v7563_v3  ;;  %v10242_v30 = vand.u32 1, %v7581_v11  ;;  %v2388_v62 = vsel %vm2356_vm3, %v2381_v26, %v2385_v9  ;;  %vm10245_vm4 = vcmp.eq.s32.totalorder %v10197_v40, 1 }
 0x419   : > { %vm8402_vm11 = vcmp.eq.s32.totalorder %v10236_v48, 1  ;;  %v2394_v19 = vsel %vm10245_vm4, %v2381_v26, %v2385_v9  ;;  %vm10246_vm12 = vcmp.eq.s32.totalorder %v10198_v36, 1  ;;  %vm10247_vm10 = vcmp.eq.s32.totalorder %v10199_v53, 1 }
 0x41a   : > { %vm8408_vm14 = vcmp.eq.s32.totalorder %v10239_v39, 1  ;;  %vm8414_vm0 = vcmp.eq.s32.totalorder %v10242_v30, 1  ;;  %v2389_v34 = vsel %vm10246_vm12, %v2381_v26, %v2385_v9  ;;  %v2392_v3 = vsel %vm10247_vm10, %v2381_v26, %v2385_v9 }
 0x41b   : > { %vm10248_vm13 = vcmp.eq.s32.totalorder %v10200_v50, 1  ;;  %vm10249_vm1 = vcmp.eq.s32.totalorder %v10201_v37, 1  ;;  %v2397_v35 = vmul.f32 %v2389_v34, %v2325_v56  ;;  %v2400_v4 = vmul.f32 %v2392_v3, %v2328_v55 }
 0x41c   : > { %v2387_v11 = vsel %vm10248_vm13, %v2381_v26, %v2385_v9  ;;  %v2393_v17 = vsel %vm10249_vm1, %v2381_v26, %v2385_v9  ;;  %vm2599_vm3 = vcmp.eq.s32.totalorder %v8141_v28, 3  ;;  %v2329_v40 = vmul.f32 %v2321_v46, %v2257_v6  ;;  %v2521_v6 = vpop.permute.xlu0 %2520 }
 0x41d   : > { %v2326_v51 = vmul.f32 %v2318_v7, %v2254_v0  ;;  %v2390_v36 = vsel %vm2358_vm7, %v2381_v26, %v2385_v9  ;;  %v2391_v53 = vsel %vm2359_vm8, %v2381_v26, %v2385_v9  ;;  %vm2593_vm10 = vcmp.eq.s32.totalorder %v7875_v33, 1  ;;  %v10275_v9 = vld [vmem:[#allocation115_spill] sm:$0xff] }
 0x41e   : > { %v2396_v50 = vmul.f32 %v2388_v62, %v2324_v42  ;;  %v2460_v37 = vsel %vm2428_vm5, %v2453_v22, %v2457_v32  ;;  %vm10250_vm1 = vcmp.eq.s32.totalorder %v10205_v49, 1  ;;  %vm10251_vm13 = vcmp.eq.s32.totalorder %v10206_v13, 1 }
 0x41f   : > { %v2466_v56 = vsel %vm10250_vm1, %v2453_v22, %v2457_v32  ;;  %v2459_v55 = vsel %vm10251_vm13, %v2453_v22, %v2457_v32  ;;  %vm2559_vm12 = vcmp.eq.s32.totalorder %v8141_v28, 0  ;;  %v2402_v57 = vmul.f32 %v2394_v19, %v2330_v20  ;;  %v10263_v19 = vld [vmem:[#allocation113_spill] sm:$0xff] }
 0x420   : > { %v2395_v21 = vmul.f32 %v2387_v11, %v2323_v41  ;;  %v2401_v38 = vmul.f32 %v2393_v17, %v2329_v40  ;;  %vm10252_vm7 = vcmp.eq.s32.totalorder %v10208_v31, 1  ;;  %v10253_v26 = vand.u32 1, %v7576_v1  ;;  %v2517_v1 = vpop.permute.xlu1 %2516  ;;  %v10265_v11 = vld [vmem:[#allocation87_spill] sm:$0xff]  ;;  %v10266_v17 = vld [vmem:[#allocation114_spill] sm:$0xff] }
 0x421   : > { %v2465_v44 = vsel %vm10252_vm7, %v2453_v22, %v2457_v32  ;;  %vm2591_vm5 = vcmp.eq.s32.totalorder %v8141_v28, 1  ;;  %v2468_v5 = vmul.f32 %v2460_v37, %v2396_v50  ;;  %v2398_v49 = vmul.f32 %v2390_v36, %v2326_v51  ;;  %v10270_v37 = vld [vmem:[#allocation5_spill] sm:$0xff] }
 0x422   : > { %vm8447_vm8 = vcmp.eq.s32.totalorder %v10253_v26, 1  ;;  %vm10256_vm4 = vcmp.eq.s32.totalorder %v10213_v59, 1  ;;  %vm10257_vm1 = vcmp.eq.s32.totalorder %v10214_v47, 1  ;;  %v2474_v23 = vmul.f32 %v2466_v56, %v2402_v57  ;;  %v10271_v56 = vld [vmem:[#allocation102_spill] sm:$0xff]  ;;  %v10273_v57 = vld [vmem:[#allocation99_spill] sm:$0xff]  ;;  %v2712_v28 = vld [vmem:[%s7173_s11 + $0x268] sm:$0xff] }
 0x423   : > { %v2461_v13 = vsel %vm10256_vm4, %v2453_v22, %v2457_v32  ;;  %v2464_v8 = vsel %vm10257_vm1, %v2453_v22, %v2457_v32  ;;  %v2467_v18 = vmul.f32 %v2459_v55, %v2395_v21  ;;  %v2473_v46 = vmul.f32 %v2465_v44, %v2401_v38  ;;  %v2707_v38 = vld [vmem:[%s7173_s11 + $0x240] sm:$0xff]  ;;  %v2709_v44 = vld [vmem:[%s7173_s11 + $0x250] sm:$0xff] }
 0x424   : > { %v2469_v31 = vmul.f32 %v2461_v13, %v2397_v35  ;;  %v2472_v61 = vmul.f32 %v2464_v8, %v2400_v4  ;;  %vm10258_vm13 = vcmp.eq.s32.totalorder %v10218_v16, 1  ;;  %v2399_v42 = vmul.f32 %v2391_v53, %v8347_v58  ;;  %v2708_v4 = vld [vmem:[%s7173_s11 + $0x248] sm:$0xff]  ;;  %v10276_v13 = vld [vmem:[#allocation7_spill] sm:$0xff] }
 0x425   : > { %v2462_v0 = vsel %vm10258_vm13, %v2453_v22, %v2457_v32  ;;  %vm10259_vm7 = vcmp.eq.s32.totalorder %v8022_v43, 1  ;;  %v2524_v59 = vsel %vm8362_vm2, %v2517_v1, %v2521_v6  ;;  %v2530_v47 = vsel %vm8368_vm6, %v2517_v1, %v2521_v6  ;;  %v2714_v8 = vld [vmem:[%s7173_s11 + $0x278] sm:$0xff] }
 0x426   : > { %v2463_v20 = vsel %vm10259_vm7, %v2453_v22, %v2457_v32  ;;  %v2523_v41 = vsel %vm8374_vm9, %v2517_v1, %v2521_v6  ;;  %v2529_v7 = vsel %vm8380_vm15, %v2517_v1, %v2521_v6  ;;  %v2532_v15 = vmul.f32 %v2524_v59, %v2468_v5  ;;  %v2710_v32 = vld [vmem:[%s7173_s11 + $0x258] sm:$0xff]  ;;  %v10274_v5 = vld [vmem:[#allocation74_spill] sm:$0xff]  ;;  %v2711_v59 = vld [vmem:[%s7173_s11 + $0x260] sm:$0xff] }
 0x427   : > { %v2538_v16 = vmul.f32 %v2530_v47, %v2474_v23  ;;  %v2531_v48 = vmul.f32 %v2523_v41, %v2467_v18  ;;  %v2537_v39 = vmul.f32 %v2529_v7, %v2473_v46  ;;  %v2470_v58 = vmul.f32 %v2462_v0, %v2398_v49  ;;  %v10277_v23 = vld [vmem:[#allocation110_spill] sm:$0xff]  ;;  %v10280_v46 = vld [vmem:[#allocation9_spill] sm:$0xff]  ;;  %v2718_v7 = vld [vmem:[%s7173_s11 + $0x298] sm:$0xff] }
 0x428   : > { %v2526_v43 = vsel %vm8402_vm11, %v2517_v1, %v2521_v6  ;;  %v2525_v24 = vsel %vm8408_vm14, %v2517_v1, %v2521_v6  ;;  %v2528_v25 = vsel %vm8414_vm0, %v2517_v1, %v2521_v6  ;;  %v8476_v30 = vmul.f32 %v10260_v27, %v2532_v15  ;;  %v2713_v47 = vld [vmem:[%s7173_s11 + $0x270] sm:$0xff]  ;;  %v2716_v41 = vld [vmem:[%s7173_s11 + $0x288] sm:$0xff] }
 0x429   : > { %v8479_v62 = vmul.f32 %v10261_v29, %v2538_v16  ;;  %v8482_v34 = vmul.f32 %v10263_v19, %v2531_v48  ;;  %v8485_v3 = vmul.f32 %v7996_v54, %v2537_v39  ;;  %v2534_v60 = vmul.f32 %v2526_v43, %v2470_v58  ;;  %v2715_v58 = vld [vmem:[%s7173_s11 + $0x280] sm:$0xff]  ;;  %v2717_v43 = vld [vmem:[%s7173_s11 + $0x290] sm:$0xff]  ;;  %v10284_v27 = vld [vmem:[#allocation17_spill] sm:$0xff] }
 0x42a   : > { %v2533_v22 = vmul.f32 %v2525_v24, %v2469_v31  ;;  %v8488_v12 = vmul.f32 %v10265_v11, %v2531_v48  ;;  %v2607_v14 = vsel %vm2599_vm3, 1.0, %v10132_v10  ;;  %3211 = vmatprep.mubr.f32.mxu0 %v8476_v30  ;;  %v8496_v35 = vmul.f32 %v10266_v17, %v2532_v15  ;;  %v10267_v10 = vld [vmem:[#allocation78_spill] sm:$0xff]  ;;  %v10282_v15 = vld [vmem:[#allocation13_spill] sm:$0xff]  ;;  %v10283_v48 = vld [vmem:[#allocation15_spill] sm:$0xff] }
 0x42b   : > { %10262 = vst [vmem:[#allocation73_spill] sm:$0xff] %v8479_v62  ;;  %10264 = vst [vmem:[#allocation79_spill] sm:$0xff] %v8485_v3  ;;  %3424 = vmatprep.mubr.f32.mxu1 %v8479_v62  ;;  %v2536_v54 = vmul.f32 %v2528_v25, %v2472_v61  ;;  %v2471_v40 = vmul.f32 %v2463_v20, %v2399_v42  ;;  %v2617_v51 = vsel %vm2593_vm10, -1.0, %v8387_v45  ;;  %3212 = vmatmul.mubr.f32.vlgmr.msra.gmra.mrb[4].mxu0 %v8482_v34  ;;  %v10269_v45 = vld [vmem:[#allocation112_spill] sm:$0xff]  ;;  %v10281_v42 = vld [vmem:[#allocation11_spill] sm:$0xff] }
 0x42c   : > { %3425 = vmatmul.mubr.f32.vlgmr.msra.gmra.mrb[0].mxu1 %v8485_v3  ;;  %v8506_v36 = vmul.f32 %v10267_v10, %v2534_v60  ;;  %v8509_v53 = vmul.f32 %v8123_v52, %v2533_v22  ;;  %v8512_v50 = vmul.f32 %v8127_v63, %v2534_v60  ;;  %v2583_v33 = vsel %vm2559_vm12, 1.0, %v8395_v2  ;;  %4754 = vmatpush1.bf16.msra.mxu0 %v10269_v45  ;;  %v2720_v24 = vld [vmem:[%s7173_s11 + $0x2a8] sm:$0xff]  ;;  %v2722_v25 = vld [vmem:[%s7173_s11 + $0x2b8] sm:$0xff]  ;;  %v2721_v11 = vld [vmem:[%s7173_s11 + $0x2b0] sm:$0xff] }
 0x42d   : > { %5202 = vmatpush1.bf16.msra.mxu1 %v10270_v37  ;;  %v8520_v55 = vmul.f32 %v10271_v56, %v2536_v54  ;;  %v2527_v52 = vsel %vm8447_vm8, %v2517_v1, %v2521_v6  ;;  %v8525_v21 = vmul.f32 %v10273_v57, %v2533_v22  ;;  %v2615_v63 = vsel %vm2591_vm5, -1.0, %v2607_v14  ;;  %3781 = vmatprep.mubr.f32.mxu1 %v8496_v35  ;;  %v10279_v1 = vld [vmem:[#allocation116_spill] sm:$0xff]  ;;  %v10285_v19 = vld [vmem:[#allocation19_spill] sm:$0xff]  ;;  %v2724_v14 = vld [vmem:[%s7173_s11 + $0x2c8] sm:$0xff] }
 0x42e   : > { %10268 = vst [vmem:[#allocation76_spill] sm:$0xff] %v8509_v53  ;;  %3282 = vmatprep.mubr.f32.mxu0 %v8506_v36  ;;  %v8531_v2 = vpack.c.bf16 %v2710_v32, %v2708_v4  ;;  %v2535_v26 = vmul.f32 %v2527_v52, %v2471_v40  ;;  %v8536_v49 = vmul.f32 %v10274_v5, %v2536_v54  ;;  %v2719_v22 = vld [vmem:[%s7173_s11 + $0x2a0] sm:$0xff]  ;;  %v2726_v17 = vld [vmem:[%s7173_s11 + $0x2d8] sm:$0xff]  ;;  %v10286_v4 = vld [vmem:[#allocation21_spill] sm:$0xff] }
 0x42f   : > { %10272 = vst [vmem:[#allocation103_spill] sm:$0xff] %v8520_v55  ;;  %4756 = vmatprep.subr.bf16.mxu0 %v10275_v9  ;;  %5204 = vmatprep.subr.bf16.mxu1 %v10276_v13  ;;  %v8543_v18 = vmul.f32 %v10277_v23, %v2538_v16  ;;  %v8545_v31 = vmul.f32 %v2617_v51, %v2537_v39  ;;  %v10287_v54 = vld [vmem:[#allocation23_spill] sm:$0xff]  ;;  %v2723_v51 = vld [vmem:[%s7173_s11 + $0x2c0] sm:$0xff]  ;;  %v2725_v10 = vld [vmem:[%s7173_s11 + $0x2d0] sm:$0xff] }
 0x430   : > { %v8547_v61 = vmul.f32 %v2583_v33, %v2535_v26  ;;  %v8549_v6 = vmul.f32 %v2615_v63, %v2535_v26  ;;  %4758 = vmatpush1.bf16.msra.mxu0 %v10279_v1  ;;  %v8553_v0 = vpack.c.bf16 %v2709_v44, %v2707_v38  ;;  %v8557_v20 = vpack.c.bf16 %v2714_v8, %v2712_v28  ;;  %v2728_v33 = vld [vmem:[%s7173_s11 + $0x2e8] sm:$0xff]  ;;  %v2730_v37 = vld [vmem:[%s7173_s11 + $0x2f8] sm:$0xff]  ;;  %v2727_v38 = vld [vmem:[%s7173_s11 + $0x2e0] sm:$0xff] }
 0x431   : > { %5206 = vmatpush1.bf16.msra.mxu1 %v10280_v46  ;;  %4760 = vmatprep.subr.bf16.mxu0 %v8531_v2  ;;  %v8565_v16 = vpack.c.bf16 %v2713_v47, %v2711_v59  ;;  %v8569_v39 = vpack.c.bf16 %v2718_v7, %v2716_v41  ;;  %v8577_v29 = vpack.c.bf16 %v2717_v43, %v2715_v58  ;;  %v10288_v56 = vld [vmem:[#allocation25_spill] sm:$0xff]  ;;  %v10289_v57 = vld [vmem:[#allocation27_spill] sm:$0xff]  ;;  %v2729_v44 = vld [vmem:[%s7173_s11 + $0x2f0] sm:$0xff] }
 0x432   : > { %10278 = vst [vmem:[#allocation104_spill] sm:$0xff] %v8547_v61  ;;  %5208 = vmatprep.subr.bf16.mxu1 %v10281_v42  ;;  %v8581_v60 = vpack.c.bf16 %v2722_v25, %v2720_v24  ;;  %v8589_v32 = vpack.c.bf16 %v2721_v11, %v2719_v22  ;;  %v8593_v40 = vpack.c.bf16 %v2726_v17, %v2724_v14  ;;  %v2732_v26 = vld [vmem:[%s7173_s11 + $0x308] sm:$0xff]  ;;  %v2734_v5 = vld [vmem:[%s7173_s11 + $0x318] sm:$0xff]  ;;  %v2731_v46 = vld [vmem:[%s7173_s11 + $0x300] sm:$0xff] }
 0x433   : > { %v8601_v52 = vpack.c.bf16 %v2725_v10, %v2723_v51  ;;  %v8605_v63 = vpack.c.bf16 %v2730_v37, %v2728_v33  ;;  %v10290_v13 = vld [vmem:[#allocation29_spill] sm:$0xff]  ;;  %v8613_v28 = vpack.c.bf16 %v2729_v44, %v2727_v38  ;;  %v10291_v8 = vld [vmem:[#allocation31_spill] sm:$0xff]  ;;  %v8617_v23 = vpack.c.bf16 %v2734_v5, %v2732_v26  ;;  %v2733_v42 = vld [vmem:[%s7173_s11 + $0x310] sm:$0xff] }
 0x434   : > { %4762 = vmatpush1.bf16.msra.mxu0 %v8553_v0  ;;  %v2736_v59 = vld [vmem:[%s7173_s11 + $0x328] sm:$0xff]  ;;  %v2738_v47 = vld [vmem:[%s7173_s11 + $0x338] sm:$0xff]  ;;  %v8625_v7 = vpack.c.bf16 %v2733_v42, %v2731_v46  ;;  %v2735_v58 = vld [vmem:[%s7173_s11 + $0x320] sm:$0xff] }
 0x435   : > { %5210 = vmatpush1.bf16.msra.mxu1 %v10282_v15  ;;  %4764 = vmatprep.subr.bf16.mxu0 %v8557_v20  ;;  %v10292_v41 = vld [vmem:[#allocation33_spill] sm:$0xff]  ;;  %v10293_v15 = vld [vmem:[#allocation35_spill] sm:$0xff]  ;;  %v2737_v43 = vld [vmem:[%s7173_s11 + $0x330] sm:$0xff] }
 0x436   : > { %5212 = vmatprep.subr.bf16.mxu1 %v10283_v48  ;;  %v8629_v48 = vpack.c.bf16 %v2738_v47, %v2736_v59  ;;  %v2740_v24 = vld [vmem:[%s7173_s11 + $0x348] sm:$0xff]  ;;  %v2742_v25 = vld [vmem:[%s7173_s11 + $0x358] sm:$0xff]  ;;  %v2739_v14 = vld [vmem:[%s7173_s11 + $0x340] sm:$0xff] }
 0x437   : > { %v10295_v22 = vld [vmem:[#allocation39_spill] sm:$0xff]  ;;  %v8641_v11 = vpack.c.bf16 %v2742_v25, %v2740_v24  ;;  %v2741_v17 = vld [vmem:[%s7173_s11 + $0x350] sm:$0xff]  ;;  %v10296_v51 = vld [vmem:[#allocation41_spill] sm:$0xff] }
 0x438   : > { %4766 = vmatpush1.bf16.msra.mxu0 %v8565_v16  ;;  %v8649_v10 = vpack.c.bf16 %v2741_v17, %v2739_v14  ;;  %v10297_v33 = vld [vmem:[#allocation43_spill] sm:$0xff]  ;;  %v2748_v38 = vld [vmem:[%s7173_s11 + $0x388] sm:$0xff]  ;;  %v2747_v46 = vld [vmem:[%s7173_s11 + $0x380] sm:$0xff] }
 0x439   : > { %5214 = vmatpush1.bf16.msra.mxu1 %v10284_v27  ;;  %4768 = vmatprep.subr.bf16.mxu0 %v8569_v39  ;;  %v10294_v27 = vld [vmem:[#allocation37_spill] sm:$0xff]  ;;  %v2750_v44 = vld [vmem:[%s7173_s11 + $0x398] sm:$0xff]  ;;  %v2749_v42 = vld [vmem:[%s7173_s11 + $0x390] sm:$0xff] }
 0x43a   : > { %5216 = vmatprep.subr.bf16.mxu1 %v10285_v19  ;;  %v8637_v19 = vpack.c.bf16 %v2737_v43, %v2735_v58  ;;  %v10298_v26 = vld [vmem:[#allocation45_spill] sm:$0xff]  ;;  %v2754_v47 = vld [vmem:[%s7173_s11 + $0x3b8] sm:$0xff]  ;;  %v2751_v24 = vld [vmem:[%s7173_s11 + $0x3a0] sm:$0xff] }
 0x43b   : > { %v2752_v59 = vld [vmem:[%s7173_s11 + $0x3a8] sm:$0xff]  ;;  %v10301_v58 = vld [vmem:[#allocation51_spill] sm:$0xff]  ;;  %v2753_v25 = vld [vmem:[%s7173_s11 + $0x3b0] sm:$0xff] }
 0x43c   : > { %4770 = vmatpush1.bf16.msra.mxu0 %v8577_v29  ;;  %v8677_v43 = vpack.c.bf16 %v2754_v47, %v2752_v59  ;;  %v10302_v14 = vld [vmem:[#allocation53_spill] sm:$0xff]  ;;  %v8685_v17 = vpack.c.bf16 %v2753_v25, %v2751_v24  ;;  %v2766_v47 = vld [vmem:[%s7173_s11 + $0x418] sm:$0xff]  ;;  %v10307_v24 = vld [vmem:[#allocation64_spill] sm:$0xff] }
 0x43d   : > { %5218 = vmatpush1.bf16.msra.mxu1 %v10286_v4  ;;  %4772 = vmatprep.subr.bf16.mxu0 %v8581_v60  ;;  %v2744_v4 = vld [vmem:[%s7173_s11 + $0x368] sm:$0xff]  ;;  %v10320_v3 = vld [vmem:[#allocation20_spill] sm:$0xff]  ;;  %v2982_v62 = vld [vmem:[%s8902_s27 + $0x2d8] sm:$0xff] }
 0x43e   : > { %5220 = vmatprep.subr.bf16.mxu1 %v10287_v54  ;;  %v2746_v54 = vld [vmem:[%s7173_s11 + $0x378] sm:$0xff]  ;;  %v2764_v59 = vld [vmem:[%s7173_s11 + $0x408] sm:$0xff] }
 0x43f   : > { %v8653_v37 = vpack.c.bf16 %v2746_v54, %v2744_v4  ;;  %v10303_v4 = vld [vmem:[#allocation55_spill] sm:$0xff]  ;;  %v8713_v25 = vpack.c.bf16 %v2766_v47, %v2764_v59 }
 0x440   : > { %4774 = vmatpush1.bf16.msra.mxu0 %v8589_v32 }
 0x441   : > { %5222 = vmatpush1.bf16.msra.mxu1 %v10288_v56  ;;  %4776 = vmatprep.subr.bf16.mxu0 %v8593_v40  ;;  %v2743_v56 = vld [vmem:[%s7173_s11 + $0x360] sm:$0xff] }
 0x442   : > { %5224 = vmatprep.subr.bf16.mxu1 %v10289_v57  ;;  %v2745_v57 = vld [vmem:[%s7173_s11 + $0x370] sm:$0xff] }
 0x443   : > { %v8661_v5 = vpack.c.bf16 %v2745_v57, %v2743_v56  ;;  %v2760_v56 = vld [vmem:[%s7173_s11 + $0x3e8] sm:$0xff]  ;;  %v2762_v57 = vld [vmem:[%s7173_s11 + $0x3f8] sm:$0xff] }
 0x444   : > { %4778 = vmatpush1.bf16.msra.mxu0 %v8601_v52 }
 0x445   : > { %5226 = vmatpush1.bf16.msra.mxu1 %v10290_v13  ;;  %4780 = vmatprep.subr.bf16.mxu0 %v8605_v63  ;;  %v10299_v13 = vld [vmem:[#allocation47_spill] sm:$0xff] }
 0x446   : > { %5228 = vmatprep.subr.bf16.mxu1 %v10291_v8  ;;  %v8665_v8 = vpack.c.bf16 %v2750_v44, %v2748_v38  ;;  %v10304_v38 = vld [vmem:[#allocation57_spill] sm:$0xff] }
 0x448   : > { %4782 = vmatpush1.bf16.msra.mxu0 %v8613_v28 }
 0x449   : > { %5230 = vmatpush1.bf16.msra.mxu1 %v10292_v41  ;;  %4784 = vmatprep.subr.bf16.mxu0 %v8617_v23  ;;  %v10300_v41 = vld [vmem:[#allocation49_spill] sm:$0xff] }
 0x44a   : > { %5232 = vmatprep.subr.bf16.mxu1 %v10293_v15  ;;  %v8673_v15 = vpack.c.bf16 %v2749_v42, %v2747_v46  ;;  %v2759_v46 = vld [vmem:[%s7173_s11 + $0x3e0] sm:$0xff]  ;;  %v2761_v42 = vld [vmem:[%s7173_s11 + $0x3f0] sm:$0xff] }
 0x44c   : > { %4786 = vmatpush1.bf16.msra.mxu0 %v8625_v7 }
 0x44d   : > { %5234 = vmatpush1.bf16.msra.mxu1 %v10294_v27  ;;  %4788 = vmatprep.subr.bf16.mxu0 %v8629_v48  ;;  %v2756_v27 = vld [vmem:[%s7173_s11 + $0x3c8] sm:$0xff] }
 0x44e   : > { %5236 = vmatprep.subr.bf16.mxu1 %v10295_v22  ;;  %v2758_v22 = vld [vmem:[%s7173_s11 + $0x3d8] sm:$0xff] }
 0x44f   : > { %v8689_v54 = vpack.c.bf16 %v2758_v22, %v2756_v27  ;;  %v2763_v27 = vld [vmem:[%s7173_s11 + $0x400] sm:$0xff]  ;;  %v2765_v22 = vld [vmem:[%s7173_s11 + $0x410] sm:$0xff] }
 0x450   : > { %4790 = vmatpush1.bf16.msra.mxu0 %v8637_v19 }
 0x451   : > { %5238 = vmatpush1.bf16.msra.mxu1 %v10296_v51  ;;  %4792 = vmatprep.subr.bf16.mxu0 %v8641_v11  ;;  %v2755_v51 = vld [vmem:[%s7173_s11 + $0x3c0] sm:$0xff] }
 0x452   : > { %5240 = vmatprep.subr.bf16.mxu1 %v10297_v33  ;;  %v2757_v33 = vld [vmem:[%s7173_s11 + $0x3d0] sm:$0xff] }
 0x453   : > { %v8697_v44 = vpack.c.bf16 %v2757_v33, %v2755_v51  ;;  %v10308_v51 = vld [vmem:[#allocation67_spill] sm:$0xff]  ;;  %v8721_v33 = vpack.c.bf16 %v2765_v22, %v2763_v27  ;;  %v2776_v27 = vld [vmem:[%s7173_s11 + $0x468] sm:$0xff] }
 0x454   : > { %4794 = vmatpush1.bf16.msra.mxu0 %v8649_v10  ;;  %v2778_v22 = vld [vmem:[%s7173_s11 + $0x478] sm:$0xff] }
 0x455   : > { %5242 = vmatpush1.bf16.msra.mxu1 %v10298_v26  ;;  %4796 = vmatprep.subr.bf16.mxu0 %v8653_v37  ;;  %v10305_v26 = vld [vmem:[#allocation59_spill] sm:$0xff] }
 0x456   : > { %5244 = vmatprep.subr.bf16.mxu1 %v10299_v13  ;;  %v8701_v13 = vpack.c.bf16 %v2762_v57, %v2760_v56  ;;  %v10309_v56 = vld [vmem:[#allocation69_spill] sm:$0xff]  ;;  %v2767_v57 = vld [vmem:[%s7173_s11 + $0x420] sm:$0xff] }
 0x458   : > { %4798 = vmatpush1.bf16.msra.mxu0 %v8661_v5 }
 0x459   : > { %5246 = vmatpush1.bf16.msra.mxu1 %v10300_v41  ;;  %4800 = vmatprep.subr.bf16.mxu0 %v8665_v8  ;;  %v10306_v41 = vld [vmem:[#allocation62_spill] sm:$0xff] }
 0x45a   : > { %5248 = vmatprep.subr.bf16.mxu1 %v10301_v58  ;;  %v8709_v58 = vpack.c.bf16 %v2761_v42, %v2759_v46  ;;  %v2772_v46 = vld [vmem:[%s7173_s11 + $0x448] sm:$0xff]  ;;  %v2774_v42 = vld [vmem:[%s7173_s11 + $0x458] sm:$0xff] }
 0x45b   : > { %v8739_v47 = vpack.c.bf16 %v2774_v42, %v2772_v46  ;;  %v2781_v46 = vld [vmem:[%s7173_s11 + $0x490] sm:$0xff]  ;;  %v2786_v42 = vld [vmem:[%s7173_s11 + $0x4b8] sm:$0xff] }
 0x45c   : > { %4802 = vmatpush1.bf16.msra.mxu0 %v8673_v15 }
 0x45d   : > { %5250 = vmatpush1.bf16.msra.mxu1 %v10302_v14  ;;  %4804 = vmatprep.subr.bf16.mxu0 %v8677_v43  ;;  %v2768_v14 = vld [vmem:[%s7173_s11 + $0x428] sm:$0xff] }
 0x45e   : > { %5252 = vmatprep.subr.bf16.mxu1 %v10303_v4  ;;  %v2770_v4 = vld [vmem:[%s7173_s11 + $0x438] sm:$0xff] }
 0x460   : > { %4806 = vmatpush1.bf16.msra.mxu0 %v8685_v17 }
 0x461   : > { %5254 = vmatpush1.bf16.msra.mxu1 %v10304_v38  ;;  %4808 = vmatprep.subr.bf16.mxu0 %v8689_v54  ;;  %v2769_v38 = vld [vmem:[%s7173_s11 + $0x430] sm:$0xff] }
 0x462   : > { %5256 = vmatprep.subr.bf16.mxu1 %v10305_v26  ;;  %v8727_v26 = vpack.c.bf16 %v2770_v4, %v2768_v14  ;;  %v8735_v59 = vpack.c.bf16 %v2769_v38, %v2767_v57  ;;  %v2775_v4 = vld [vmem:[%s7173_s11 + $0x460] sm:$0xff] }
 0x463   : > { %v2779_v38 = vld [vmem:[%s7173_s11 + $0x480] sm:$0xff] }
 0x464   : > { %4810 = vmatpush1.bf16.msra.mxu0 %v8697_v44 }
 0x465   : > { %5258 = vmatpush1.bf16.msra.mxu1 %v10306_v41  ;;  %4812 = vmatprep.subr.bf16.mxu0 %v8701_v13  ;;  %v2771_v41 = vld [vmem:[%s7173_s11 + $0x440] sm:$0xff] }
 0x466   : > { %5260 = vmatprep.subr.bf16.mxu1 %v10307_v24  ;;  %v2773_v24 = vld [vmem:[%s7173_s11 + $0x450] sm:$0xff] }
 0x467   : > { %v8748_v14 = vpack.c.bf16 %v2773_v24, %v2771_v41  ;;  %v8772_v41 = vpack.c.bf16 %v2781_v46, %v2779_v38  ;;  %v2783_v24 = vld [vmem:[%s7173_s11 + $0x4a0] sm:$0xff] }
 0x468   : > { %4814 = vmatpush1.bf16.msra.mxu0 %v8709_v58  ;;  %v2791_v46 = vld [vmem:[%s7173_s11 + $0x4e0] sm:$0xff] }
 0x469   : > { %5262 = vmatpush1.bf16.msra.mxu1 %v10308_v51  ;;  %4816 = vmatprep.subr.bf16.mxu0 %v8713_v25  ;;  %v2777_v51 = vld [vmem:[%s7173_s11 + $0x470] sm:$0xff] }
 0x46a   : > { %5264 = vmatprep.subr.bf16.mxu1 %v10309_v56  ;;  %v2782_v56 = vld [vmem:[%s7173_s11 + $0x498] sm:$0xff]  ;;  %v8760_v57 = vpack.c.bf16 %v2777_v51, %v2775_v4  ;;  %v2787_v51 = vld [vmem:[%s7173_s11 + $0x4c0] sm:$0xff] }
 0x46b   : > { %3283 = vmatmul.mubr.f32.vlgmr.msra.gmra.mrb[4].mxu0 %v8509_v53  ;;  %v2986_v53 = vld [vmem:[%s8902_s27 + $0x2f8] sm:$0xff] }
 0x46c   : > { %3782 = vmatmul.mubr.f32.vlgmr.msra.gmra.mrb[2].mxu1 %v8488_v12  ;;  %4818 = vmatpush1.bf16.msra.mxu0 %v8721_v33 }
 0x46d   : > { %3353 = vmatprep.mubr.f32.mxu0 %v8520_v55  ;;  %5266 = vmatpush1.bf16.msra.mxu1 %v10269_v45  ;;  %v8752_v45 = vpack.c.bf16 %v2778_v22, %v2776_v27  ;;  %v2785_v27 = vld [vmem:[%s7173_s11 + $0x4b0] sm:$0xff]  ;;  %v2790_v22 = vld [vmem:[%s7173_s11 + $0x4d8] sm:$0xff]  ;;  %v2984_v55 = vld [vmem:[%s8902_s27 + $0x2e8] sm:$0xff] }
 0x46e   : > { %3852 = vmatprep.mubr.f32.mxu1 %v8512_v50  ;;  %4820 = vmatprep.subr.bf16.mxu0 %v8727_v26  ;;  %v8784_v4 = vpack.c.bf16 %v2785_v27, %v2783_v24  ;;  %v2795_v27 = vld [vmem:[%s7173_s11 + $0x500] sm:$0xff] }
 0x46f   : > { %5268 = vmatprep.subr.bf16.mxu1 %v10275_v9  ;;  %v2780_v9 = vld [vmem:[%s7173_s11 + $0x488] sm:$0xff] }
 0x470   : > { %4822 = vmatpush1.bf16.msra.mxu0 %v8735_v59 }
 0x471   : > { %5270 = vmatpush1.bf16.msra.mxu1 %v10279_v1  ;;  %4824 = vmatprep.subr.bf16.mxu0 %v8739_v47  ;;  %v8764_v1 = vpack.c.bf16 %v2782_v56, %v2780_v9  ;;  %v2789_v9 = vld [vmem:[%s7173_s11 + $0x4d0] sm:$0xff]  ;;  %v2794_v56 = vld [vmem:[%s7173_s11 + $0x4f8] sm:$0xff] }
 0x472   : > { %5272 = vmatprep.subr.bf16.mxu1 %v8531_v2  ;;  %v2784_v2 = vld [vmem:[%s7173_s11 + $0x4a8] sm:$0xff]  ;;  %v8796_v38 = vpack.c.bf16 %v2789_v9, %v2787_v51  ;;  %v2799_v9 = vld [vmem:[%s7173_s11 + $0x520] sm:$0xff] }
 0x474   : > { %4826 = vmatpush1.bf16.msra.mxu0 %v8748_v14 }
 0x475   : > { %5274 = vmatpush1.bf16.msra.mxu1 %v8553_v0  ;;  %4828 = vmatprep.subr.bf16.mxu0 %v8752_v45  ;;  %v8776_v0 = vpack.c.bf16 %v2786_v42, %v2784_v2  ;;  %v2793_v2 = vld [vmem:[%s7173_s11 + $0x4f0] sm:$0xff]  ;;  %v2798_v42 = vld [vmem:[%s7173_s11 + $0x518] sm:$0xff] }
 0x476   : > { %5276 = vmatprep.subr.bf16.mxu1 %v8557_v20  ;;  %v2788_v20 = vld [vmem:[%s7173_s11 + $0x4c8] sm:$0xff]  ;;  %v8808_v24 = vpack.c.bf16 %v2793_v2, %v2791_v46  ;;  %v2803_v2 = vld [vmem:[%s7173_s11 + $0x540] sm:$0xff] }
 0x478   : > { %4830 = vmatpush1.bf16.msra.mxu0 %v8760_v57 }
 0x479   : > { %5278 = vmatpush1.bf16.msra.mxu1 %v8565_v16  ;;  %4832 = vmatprep.subr.bf16.mxu0 %v8764_v1  ;;  %v8788_v16 = vpack.c.bf16 %v2790_v22, %v2788_v20  ;;  %v2797_v20 = vld [vmem:[%s7173_s11 + $0x510] sm:$0xff]  ;;  %v2802_v22 = vld [vmem:[%s7173_s11 + $0x538] sm:$0xff] }
 0x47a   : > { %5280 = vmatprep.subr.bf16.mxu1 %v8569_v39  ;;  %v2792_v39 = vld [vmem:[%s7173_s11 + $0x4e8] sm:$0xff]  ;;  %v8820_v51 = vpack.c.bf16 %v2797_v20, %v2795_v27  ;;  %v2807_v20 = vld [vmem:[%s7173_s11 + $0x560] sm:$0xff] }
 0x47c   : > { %4834 = vmatpush1.bf16.msra.mxu0 %v8772_v41 }
 0x47d   : > { %5282 = vmatpush1.bf16.msra.mxu1 %v8577_v29  ;;  %4836 = vmatprep.subr.bf16.mxu0 %v8776_v0  ;;  %v8800_v29 = vpack.c.bf16 %v2794_v56, %v2792_v39  ;;  %v2801_v39 = vld [vmem:[%s7173_s11 + $0x530] sm:$0xff]  ;;  %v2806_v56 = vld [vmem:[%s7173_s11 + $0x558] sm:$0xff] }
 0x47e   : > { %5284 = vmatprep.subr.bf16.mxu1 %v8581_v60  ;;  %v2796_v60 = vld [vmem:[%s7173_s11 + $0x508] sm:$0xff]  ;;  %v8832_v46 = vpack.c.bf16 %v2801_v39, %v2799_v9  ;;  %v2811_v39 = vld [vmem:[%s7173_s11 + $0x580] sm:$0xff] }
 0x480   : > { %4838 = vmatpush1.bf16.msra.mxu0 %v8784_v4 }
 0x481   : > { %5286 = vmatpush1.bf16.msra.mxu1 %v8589_v32  ;;  %4840 = vmatprep.subr.bf16.mxu0 %v8788_v16  ;;  %v8812_v32 = vpack.c.bf16 %v2798_v42, %v2796_v60  ;;  %v2805_v60 = vld [vmem:[%s7173_s11 + $0x550] sm:$0xff]  ;;  %v2810_v42 = vld [vmem:[%s7173_s11 + $0x578] sm:$0xff] }
 0x482   : > { %5288 = vmatprep.subr.bf16.mxu1 %v8593_v40  ;;  %v2800_v40 = vld [vmem:[%s7173_s11 + $0x528] sm:$0xff]  ;;  %v8844_v27 = vpack.c.bf16 %v2805_v60, %v2803_v2  ;;  %v2815_v60 = vld [vmem:[%s7173_s11 + $0x5a0] sm:$0xff] }
 0x484   : > { %4842 = vmatpush1.bf16.msra.mxu0 %v8796_v38 }
 0x485   : > { %5290 = vmatpush1.bf16.msra.mxu1 %v8601_v52  ;;  %4844 = vmatprep.subr.bf16.mxu0 %v8800_v29  ;;  %v8824_v52 = vpack.c.bf16 %v2802_v22, %v2800_v40  ;;  %v2809_v40 = vld [vmem:[%s7173_s11 + $0x570] sm:$0xff]  ;;  %v2814_v22 = vld [vmem:[%s7173_s11 + $0x598] sm:$0xff] }
 0x486   : > { %5292 = vmatprep.subr.bf16.mxu1 %v8605_v63  ;;  %v2804_v63 = vld [vmem:[%s7173_s11 + $0x548] sm:$0xff]  ;;  %v8856_v9 = vpack.c.bf16 %v2809_v40, %v2807_v20  ;;  %v2819_v40 = vld [vmem:[%s7173_s11 + $0x5c0] sm:$0xff] }
 0x488   : > { %4846 = vmatpush1.bf16.msra.mxu0 %v8808_v24 }
 0x489   : > { %5294 = vmatpush1.bf16.msra.mxu1 %v8613_v28  ;;  %4848 = vmatprep.subr.bf16.mxu0 %v8812_v32  ;;  %v8836_v28 = vpack.c.bf16 %v2806_v56, %v2804_v63  ;;  %v2813_v63 = vld [vmem:[%s7173_s11 + $0x590] sm:$0xff]  ;;  %v2818_v56 = vld [vmem:[%s7173_s11 + $0x5b8] sm:$0xff] }
 0x48a   : > { %5296 = vmatprep.subr.bf16.mxu1 %v8617_v23  ;;  %v2808_v23 = vld [vmem:[%s7173_s11 + $0x568] sm:$0xff]  ;;  %v8868_v2 = vpack.c.bf16 %v2813_v63, %v2811_v39  ;;  %v2823_v63 = vld [vmem:[%s7173_s11 + $0x5e0] sm:$0xff] }
 0x48c   : > { %4850 = vmatpush1.bf16.msra.mxu0 %v8820_v51 }
 0x48d   : > { %5298 = vmatpush1.bf16.msra.mxu1 %v8625_v7  ;;  %4852 = vmatprep.subr.bf16.mxu0 %v8824_v52  ;;  %v8848_v7 = vpack.c.bf16 %v2810_v42, %v2808_v23  ;;  %v2817_v23 = vld [vmem:[%s7173_s11 + $0x5b0] sm:$0xff]  ;;  %v2822_v42 = vld [vmem:[%s7173_s11 + $0x5d8] sm:$0xff] }
 0x48e   : > { %5300 = vmatprep.subr.bf16.mxu1 %v8629_v48  ;;  %v2812_v48 = vld [vmem:[%s7173_s11 + $0x588] sm:$0xff]  ;;  %v8880_v20 = vpack.c.bf16 %v2817_v23, %v2815_v60  ;;  %v2891_v60 = vld [vmem:[%s8902_s27] sm:$0xff]  ;;  %v2893_v23 = vld [vmem:[%s8902_s27 + $0x10] sm:$0xff] }
 0x490   : > { %4854 = vmatpush1.bf16.msra.mxu0 %v8832_v46 }
 0x491   : > { %5302 = vmatpush1.bf16.msra.mxu1 %v8637_v19  ;;  %4856 = vmatprep.subr.bf16.mxu0 %v8836_v28  ;;  %v8860_v19 = vpack.c.bf16 %v2814_v22, %v2812_v48  ;;  %v2821_v48 = vld [vmem:[%s7173_s11 + $0x5d0] sm:$0xff]  ;;  %v2826_v22 = vld [vmem:[%s7173_s11 + $0x5f8] sm:$0xff] }
 0x492   : > { %5304 = vmatprep.subr.bf16.mxu1 %v8641_v11  ;;  %v2816_v11 = vld [vmem:[%s7173_s11 + $0x5a8] sm:$0xff]  ;;  %v8892_v39 = vpack.c.bf16 %v2821_v48, %v2819_v40  ;;  %v8919_v40 = vpack.c.bf16 %v2893_v23, %v2891_v60  ;;  %v2897_v48 = vld [vmem:[%s8902_s27 + $0x30] sm:$0xff]  ;;  %v2903_v60 = vld [vmem:[%s8902_s27 + $0x60] sm:$0xff] }
 0x493   : > { %v2905_v23 = vld [vmem:[%s8902_s27 + $0x70] sm:$0xff] }
 0x494   : > { %4858 = vmatpush1.bf16.msra.mxu0 %v8844_v27 }
 0x495   : > { %5306 = vmatpush1.bf16.msra.mxu1 %v8649_v10  ;;  %4860 = vmatprep.subr.bf16.mxu0 %v8848_v7  ;;  %v8872_v10 = vpack.c.bf16 %v2818_v56, %v2816_v11  ;;  %v2825_v11 = vld [vmem:[%s7173_s11 + $0x5f0] sm:$0xff]  ;;  %v2894_v56 = vld [vmem:[%s8902_s27 + $0x18] sm:$0xff] }
 0x496   : > { %5308 = vmatprep.subr.bf16.mxu1 %v8653_v37  ;;  %v2820_v37 = vld [vmem:[%s7173_s11 + $0x5c8] sm:$0xff] }
 0x498   : > { %4862 = vmatpush1.bf16.msra.mxu0 %v8856_v9 }
 0x499   : > { %5310 = vmatpush1.bf16.msra.mxu1 %v8661_v5  ;;  %4864 = vmatprep.subr.bf16.mxu0 %v8860_v19  ;;  %v8884_v5 = vpack.c.bf16 %v2822_v42, %v2820_v37  ;;  %v2896_v37 = vld [vmem:[%s8902_s27 + $0x28] sm:$0xff]  ;;  %v2898_v42 = vld [vmem:[%s8902_s27 + $0x38] sm:$0xff] }
 0x49a   : > { %5312 = vmatprep.subr.bf16.mxu1 %v8665_v8  ;;  %v2824_v8 = vld [vmem:[%s7173_s11 + $0x5e8] sm:$0xff] }
 0x49c   : > { %4866 = vmatpush1.bf16.msra.mxu0 %v8868_v2 }
 0x49d   : > { %5314 = vmatpush1.bf16.msra.mxu1 %v8673_v15  ;;  %4868 = vmatprep.subr.bf16.mxu0 %v8872_v10  ;;  %v8896_v15 = vpack.c.bf16 %v2826_v22, %v2824_v8  ;;  %v8926_v8 = vpack.c.bf16 %v2898_v42, %v2896_v37  ;;  %v2902_v22 = vld [vmem:[%s8902_s27 + $0x58] sm:$0xff]  ;;  %v2908_v37 = vld [vmem:[%s8902_s27 + $0x88] sm:$0xff]  ;;  %v8959_v42 = vpack.c.bf16 %v2905_v23, %v2903_v60  ;;  %v2915_v60 = vld [vmem:[%s8902_s27 + $0xc0] sm:$0xff] }
 0x49e   : > { %5316 = vmatprep.subr.bf16.mxu1 %v8677_v43  ;;  %v2892_v43 = vld [vmem:[%s8902_s27 + $0x8] sm:$0xff]  ;;  %v2917_v23 = vld [vmem:[%s8902_s27 + $0xd0] sm:$0xff] }
 0x4a0   : > { %4870 = vmatpush1.bf16.msra.mxu0 %v8880_v20 }
 0x4a1   : > { %5318 = vmatpush1.bf16.msra.mxu1 %v8685_v17  ;;  %4872 = vmatprep.subr.bf16.mxu0 %v8884_v5  ;;  %v8907_v17 = vpack.c.bf16 %v2825_v11, %v2823_v63  ;;  %v2899_v63 = vld [vmem:[%s8902_s27 + $0x40] sm:$0xff]  ;;  %v2901_v11 = vld [vmem:[%s8902_s27 + $0x50] sm:$0xff] }
 0x4a2   : > { %5320 = vmatprep.subr.bf16.mxu1 %v8689_v54  ;;  %v8911_v54 = vpack.c.bf16 %v2894_v56, %v2892_v43  ;;  %v2904_v43 = vld [vmem:[%s8902_s27 + $0x68] sm:$0xff]  ;;  %v2906_v56 = vld [vmem:[%s8902_s27 + $0x78] sm:$0xff] }
 0x4a4   : > { %4874 = vmatpush1.bf16.msra.mxu0 %v8892_v39 }
 0x4a5   : > { %5322 = vmatpush1.bf16.msra.mxu1 %v8697_v44  ;;  %4876 = vmatprep.subr.bf16.mxu0 %v8896_v15  ;;  %v2895_v44 = vld [vmem:[%s8902_s27 + $0x20] sm:$0xff] }
 0x4a6   : > { %5324 = vmatprep.subr.bf16.mxu1 %v8701_v13  ;;  %v2900_v13 = vld [vmem:[%s8902_s27 + $0x48] sm:$0xff] }
 0x4a8   : > { %4878 = vmatpush1.bf16.msra.mxu0 %v8907_v17 }
 0x4a9   : > { %5326 = vmatpush1.bf16.msra.mxu1 %v8709_v58  ;;  %4944 = vmatprep.subr.bf16.mxu0 %v8911_v54  ;;  %v8933_v58 = vpack.c.bf16 %v2897_v48, %v2895_v44  ;;  %v2907_v44 = vld [vmem:[%s8902_s27 + $0x80] sm:$0xff]  ;;  %v2909_v48 = vld [vmem:[%s8902_s27 + $0x90] sm:$0xff] }
 0x4aa   : > { %5328 = vmatprep.subr.bf16.mxu1 %v8713_v25  ;;  %v8937_v25 = vpack.c.bf16 %v2902_v22, %v2900_v13  ;;  %v2914_v13 = vld [vmem:[%s8902_s27 + $0xb8] sm:$0xff]  ;;  %v8971_v22 = vpack.c.bf16 %v2909_v48, %v2907_v44  ;;  %v2919_v44 = vld [vmem:[%s8902_s27 + $0xe0] sm:$0xff]  ;;  %v2921_v48 = vld [vmem:[%s8902_s27 + $0xf0] sm:$0xff] }
 0x4ab   : > { %3354 = vmatmul.mubr.f32.vlgmr.msra.gmra.mrb[4].mxu0 %v8547_v61 }
 0x4ac   : > { %3853 = vmatmul.mubr.f32.vlgmr.msra.gmra.mrb[2].mxu1 %v8525_v21  ;;  %4946 = vmatpush1.bf16.msra.mxu0 %v8919_v40 }
 0x4ad   : > { %3495 = vmatprep.mubr.f32.mxu0 %v8496_v35  ;;  %5330 = vmatpush1.bf16.msra.mxu1 %v8721_v33  ;;  %v8947_v35 = vpack.c.bf16 %v2901_v11, %v2899_v63  ;;  %v8951_v33 = vpack.c.bf16 %v2906_v56, %v2904_v43  ;;  %v2911_v63 = vld [vmem:[%s8902_s27 + $0xa0] sm:$0xff]  ;;  %v2913_v11 = vld [vmem:[%s8902_s27 + $0xb0] sm:$0xff]  ;;  %v2918_v43 = vld [vmem:[%s8902_s27 + $0xd8] sm:$0xff] }
 0x4ae   : > { %3923 = vmatprep.mubr.f32.mxu1 %v8536_v49  ;;  %4948 = vmatprep.subr.bf16.mxu0 %v8926_v8  ;;  %v8983_v56 = vpack.c.bf16 %v2913_v11, %v2911_v63  ;;  %v2923_v63 = vld [vmem:[%s8902_s27 + $0x100] sm:$0xff]  ;;  %v2925_v11 = vld [vmem:[%s8902_s27 + $0x110] sm:$0xff] }
 0x4af   : > { %5332 = vmatprep.subr.bf16.mxu1 %v8727_v26  ;;  %v2910_v26 = vld [vmem:[%s8902_s27 + $0x98] sm:$0xff] }
 0x4b0   : > { %4950 = vmatpush1.bf16.msra.mxu0 %v8933_v58 }
 0x4b1   : > { %5334 = vmatpush1.bf16.msra.mxu1 %v8735_v59  ;;  %4952 = vmatprep.subr.bf16.mxu0 %v8937_v25  ;;  %v8963_v59 = vpack.c.bf16 %v2910_v26, %v2908_v37  ;;  %v2922_v37 = vld [vmem:[%s8902_s27 + $0xf8] sm:$0xff]  ;;  %v8995_v26 = vpack.c.bf16 %v2917_v23, %v2915_v60  ;;  %v2927_v60 = vld [vmem:[%s8902_s27 + $0x120] sm:$0xff]  ;;  %v2929_v23 = vld [vmem:[%s8902_s27 + $0x130] sm:$0xff] }
 0x4b2   : > { %5336 = vmatprep.subr.bf16.mxu1 %v8739_v47  ;;  %v2912_v47 = vld [vmem:[%s8902_s27 + $0xa8] sm:$0xff] }
 0x4b4   : > { %4954 = vmatpush1.bf16.msra.mxu0 %v8947_v35 }
 0x4b5   : > { %5338 = vmatpush1.bf16.msra.mxu1 %v8748_v14  ;;  %4956 = vmatprep.subr.bf16.mxu0 %v8951_v33  ;;  %v8975_v14 = vpack.c.bf16 %v2914_v13, %v2912_v47  ;;  %v2926_v47 = vld [vmem:[%s8902_s27 + $0x118] sm:$0xff]  ;;  %v9007_v13 = vpack.c.bf16 %v2921_v48, %v2919_v44  ;;  %v2931_v44 = vld [vmem:[%s8902_s27 + $0x140] sm:$0xff]  ;;  %v2933_v48 = vld [vmem:[%s8902_s27 + $0x150] sm:$0xff] }
 0x4b6   : > { %5340 = vmatprep.subr.bf16.mxu1 %v8752_v45  ;;  %v2916_v45 = vld [vmem:[%s8902_s27 + $0xc8] sm:$0xff] }
 0x4b8   : > { %4958 = vmatpush1.bf16.msra.mxu0 %v8959_v42 }
 0x4b9   : > { %5342 = vmatpush1.bf16.msra.mxu1 %v8760_v57  ;;  %4960 = vmatprep.subr.bf16.mxu0 %v8963_v59  ;;  %v8987_v57 = vpack.c.bf16 %v2918_v43, %v2916_v45  ;;  %v2930_v45 = vld [vmem:[%s8902_s27 + $0x138] sm:$0xff]  ;;  %v9019_v43 = vpack.c.bf16 %v2925_v11, %v2923_v63  ;;  %v2935_v63 = vld [vmem:[%s8902_s27 + $0x160] sm:$0xff]  ;;  %v2937_v11 = vld [vmem:[%s8902_s27 + $0x170] sm:$0xff] }
 0x4ba   : > { %5344 = vmatprep.subr.bf16.mxu1 %v8764_v1  ;;  %v2920_v1 = vld [vmem:[%s8902_s27 + $0xe8] sm:$0xff] }
 0x4bc   : > { %4962 = vmatpush1.bf16.msra.mxu0 %v8971_v22 }
 0x4bd   : > { %5346 = vmatpush1.bf16.msra.mxu1 %v8772_v41  ;;  %4964 = vmatprep.subr.bf16.mxu0 %v8975_v14  ;;  %v8999_v41 = vpack.c.bf16 %v2922_v37, %v2920_v1  ;;  %v2934_v1 = vld [vmem:[%s8902_s27 + $0x158] sm:$0xff]  ;;  %v9031_v37 = vpack.c.bf16 %v2929_v23, %v2927_v60  ;;  %v2939_v60 = vld [vmem:[%s8902_s27 + $0x180] sm:$0xff]  ;;  %v2941_v23 = vld [vmem:[%s8902_s27 + $0x190] sm:$0xff] }
 0x4be   : > { %5348 = vmatprep.subr.bf16.mxu1 %v8776_v0  ;;  %v2924_v0 = vld [vmem:[%s8902_s27 + $0x108] sm:$0xff] }
 0x4c0   : > { %4966 = vmatpush1.bf16.msra.mxu0 %v8983_v56 }
 0x4c1   : > { %5350 = vmatpush1.bf16.msra.mxu1 %v8784_v4  ;;  %4968 = vmatprep.subr.bf16.mxu0 %v8987_v57  ;;  %v9011_v4 = vpack.c.bf16 %v2926_v47, %v2924_v0  ;;  %v2938_v0 = vld [vmem:[%s8902_s27 + $0x178] sm:$0xff]  ;;  %v9043_v47 = vpack.c.bf16 %v2933_v48, %v2931_v44  ;;  %v2943_v44 = vld [vmem:[%s8902_s27 + $0x1a0] sm:$0xff]  ;;  %v2945_v48 = vld [vmem:[%s8902_s27 + $0x1b0] sm:$0xff] }
 0x4c2   : > { %5352 = vmatprep.subr.bf16.mxu1 %v8788_v16  ;;  %v2928_v16 = vld [vmem:[%s8902_s27 + $0x128] sm:$0xff] }
 0x4c4   : > { %4970 = vmatpush1.bf16.msra.mxu0 %v8995_v26 }
 0x4c5   : > { %5354 = vmatpush1.bf16.msra.mxu1 %v8796_v38  ;;  %4972 = vmatprep.subr.bf16.mxu0 %v8999_v41  ;;  %v9023_v38 = vpack.c.bf16 %v2930_v45, %v2928_v16  ;;  %v2942_v16 = vld [vmem:[%s8902_s27 + $0x198] sm:$0xff]  ;;  %v9055_v45 = vpack.c.bf16 %v2937_v11, %v2935_v63  ;;  %v2947_v63 = vld [vmem:[%s8902_s27 + $0x1c0] sm:$0xff]  ;;  %v2949_v11 = vld [vmem:[%s8902_s27 + $0x1d0] sm:$0xff] }
 0x4c6   : > { %5356 = vmatprep.subr.bf16.mxu1 %v8800_v29  ;;  %v2932_v29 = vld [vmem:[%s8902_s27 + $0x148] sm:$0xff] }
 0x4c8   : > { %4974 = vmatpush1.bf16.msra.mxu0 %v9007_v13 }
 0x4c9   : > { %5358 = vmatpush1.bf16.msra.mxu1 %v8808_v24  ;;  %4976 = vmatprep.subr.bf16.mxu0 %v9011_v4  ;;  %v9035_v24 = vpack.c.bf16 %v2934_v1, %v2932_v29  ;;  %v2946_v29 = vld [vmem:[%s8902_s27 + $0x1b8] sm:$0xff]  ;;  %v9067_v1 = vpack.c.bf16 %v2941_v23, %v2939_v60  ;;  %v2951_v60 = vld [vmem:[%s8902_s27 + $0x1e0] sm:$0xff]  ;;  %v2953_v23 = vld [vmem:[%s8902_s27 + $0x1f0] sm:$0xff] }
 0x4ca   : > { %5360 = vmatprep.subr.bf16.mxu1 %v8812_v32  ;;  %v2936_v32 = vld [vmem:[%s8902_s27 + $0x168] sm:$0xff] }
 0x4cc   : > { %4978 = vmatpush1.bf16.msra.mxu0 %v9019_v43 }
 0x4cd   : > { %5362 = vmatpush1.bf16.msra.mxu1 %v8820_v51  ;;  %4980 = vmatprep.subr.bf16.mxu0 %v9023_v38  ;;  %v9047_v51 = vpack.c.bf16 %v2938_v0, %v2936_v32  ;;  %v2950_v32 = vld [vmem:[%s8902_s27 + $0x1d8] sm:$0xff]  ;;  %v9079_v0 = vpack.c.bf16 %v2945_v48, %v2943_v44  ;;  %v2955_v44 = vld [vmem:[%s8902_s27 + $0x200] sm:$0xff]  ;;  %v2957_v48 = vld [vmem:[%s8902_s27 + $0x210] sm:$0xff] }
 0x4ce   : > { %5364 = vmatprep.subr.bf16.mxu1 %v8824_v52  ;;  %v2940_v52 = vld [vmem:[%s8902_s27 + $0x188] sm:$0xff] }
 0x4d0   : > { %4982 = vmatpush1.bf16.msra.mxu0 %v9031_v37 }
 0x4d1   : > { %5366 = vmatpush1.bf16.msra.mxu1 %v8832_v46  ;;  %4984 = vmatprep.subr.bf16.mxu0 %v9035_v24  ;;  %v9059_v46 = vpack.c.bf16 %v2942_v16, %v2940_v52  ;;  %v2954_v52 = vld [vmem:[%s8902_s27 + $0x1f8] sm:$0xff]  ;;  %v9091_v16 = vpack.c.bf16 %v2949_v11, %v2947_v63  ;;  %v2961_v63 = vld [vmem:[%s8902_s27 + $0x230] sm:$0xff]  ;;  %v10310_v11 = vld [vmem:[#allocation4_spill] sm:$0xff] }
 0x4d2   : > { %5368 = vmatprep.subr.bf16.mxu1 %v8836_v28  ;;  %v2944_v28 = vld [vmem:[%s8902_s27 + $0x1a8] sm:$0xff] }
 0x4d4   : > { %4986 = vmatpush1.bf16.msra.mxu0 %v9043_v47 }
 0x4d5   : > { %5370 = vmatpush1.bf16.msra.mxu1 %v8844_v27  ;;  %4988 = vmatprep.subr.bf16.mxu0 %v9047_v51  ;;  %v9071_v27 = vpack.c.bf16 %v2946_v29, %v2944_v28  ;;  %v2958_v28 = vld [vmem:[%s8902_s27 + $0x218] sm:$0xff]  ;;  %v9103_v29 = vpack.c.bf16 %v2953_v23, %v2951_v60  ;;  %v10311_v60 = vld [vmem:[#allocation6_spill] sm:$0xff] }
 0x4d6   : > { %5372 = vmatprep.subr.bf16.mxu1 %v8848_v7  ;;  %v2948_v7 = vld [vmem:[%s8902_s27 + $0x1c8] sm:$0xff] }
 0x4d8   : > { %4990 = vmatpush1.bf16.msra.mxu0 %v9055_v45 }
 0x4d9   : > { %5374 = vmatpush1.bf16.msra.mxu1 %v8856_v9  ;;  %4992 = vmatprep.subr.bf16.mxu0 %v9059_v46  ;;  %v9083_v9 = vpack.c.bf16 %v2950_v32, %v2948_v7  ;;  %v2962_v7 = vld [vmem:[%s8902_s27 + $0x238] sm:$0xff]  ;;  %v9115_v32 = vpack.c.bf16 %v2957_v48, %v2955_v44  ;;  %v10312_v48 = vld [vmem:[#allocation8_spill] sm:$0xff] }
 0x4da   : > { %5376 = vmatprep.subr.bf16.mxu1 %v8860_v19  ;;  %v2952_v19 = vld [vmem:[%s8902_s27 + $0x1e8] sm:$0xff]  ;;  %v2970_v44 = vld [vmem:[%s8902_s27 + $0x278] sm:$0xff] }
 0x4dc   : > { %4994 = vmatpush1.bf16.msra.mxu0 %v9067_v1 }
 0x4dd   : > { %5378 = vmatpush1.bf16.msra.mxu1 %v8868_v2  ;;  %4996 = vmatprep.subr.bf16.mxu0 %v9071_v27  ;;  %v9095_v2 = vpack.c.bf16 %v2954_v52, %v2952_v19  ;;  %v2966_v52 = vld [vmem:[%s8902_s27 + $0x258] sm:$0xff] }
 0x4de   : > { %5380 = vmatprep.subr.bf16.mxu1 %v8872_v10  ;;  %v2956_v10 = vld [vmem:[%s8902_s27 + $0x208] sm:$0xff] }
 0x4e0   : > { %4998 = vmatpush1.bf16.msra.mxu0 %v9079_v0 }
 0x4e1   : > { %5382 = vmatpush1.bf16.msra.mxu1 %v8880_v20  ;;  %5000 = vmatprep.subr.bf16.mxu0 %v9083_v9  ;;  %v9107_v20 = vpack.c.bf16 %v2958_v28, %v2956_v10  ;;  %v2963_v10 = vld [vmem:[%s8902_s27 + $0x240] sm:$0xff]  ;;  %v2965_v28 = vld [vmem:[%s8902_s27 + $0x250] sm:$0xff] }
 0x4e2   : > { %5384 = vmatprep.subr.bf16.mxu1 %v8884_v5  ;;  %v2960_v5 = vld [vmem:[%s8902_s27 + $0x228] sm:$0xff] }
 0x4e3   : > { %v9122_v19 = vpack.c.bf16 %v2962_v7, %v2960_v5  ;;  %v10313_v5 = vld [vmem:[#allocation10_spill] sm:$0xff] }
 0x4e4   : > { %5002 = vmatpush1.bf16.msra.mxu0 %v9091_v16 }
 0x4e5   : > { %5386 = vmatpush1.bf16.msra.mxu1 %v8892_v39  ;;  %5004 = vmatprep.subr.bf16.mxu0 %v9095_v2  ;;  %v2959_v39 = vld [vmem:[%s8902_s27 + $0x220] sm:$0xff] }
 0x4e6   : > { %5388 = vmatprep.subr.bf16.mxu1 %v8896_v15  ;;  %v2964_v15 = vld [vmem:[%s8902_s27 + $0x248] sm:$0xff] }
 0x4e7   : > { %v9133_v23 = vpack.c.bf16 %v2966_v52, %v2964_v15  ;;  %v2972_v15 = vld [vmem:[%s8902_s27 + $0x288] sm:$0xff]  ;;  %v2974_v52 = vld [vmem:[%s8902_s27 + $0x298] sm:$0xff] }
 0x4e8   : > { %5006 = vmatpush1.bf16.msra.mxu0 %v9103_v29 }
 0x4e9   : > { %5390 = vmatpush1.bf16.msra.mxu1 %v8907_v17  ;;  %5008 = vmatprep.subr.bf16.mxu0 %v9107_v20  ;;  %v9129_v17 = vpack.c.bf16 %v2961_v63, %v2959_v39  ;;  %v2967_v39 = vld [vmem:[%s8902_s27 + $0x260] sm:$0xff]  ;;  %v2969_v63 = vld [vmem:[%s8902_s27 + $0x270] sm:$0xff] }
 0x4ea   : > { %5392 = vmatprep.subr.bf16.mxu1 %v10310_v11  ;;  %v10314_v11 = vld [vmem:[#allocation12_spill] sm:$0xff] }
 0x4eb   : > { %3496 = vmatmul.mubr.f32.vlgmr.msra.gmra.mrb[6].mxu0 %v8488_v12  ;;  %v2968_v12 = vld [vmem:[%s8902_s27 + $0x268] sm:$0xff] }
 0x4ec   : > { %3924 = vmatmul.mubr.f32.vlgmr.msra.gmra.mrb[2].mxu1 %v8549_v6  ;;  %5010 = vmatpush1.bf16.msra.mxu0 %v9115_v32  ;;  %v9147_v7 = vpack.c.bf16 %v2970_v44, %v2968_v12  ;;  %v2971_v12 = vld [vmem:[%s8902_s27 + $0x280] sm:$0xff]  ;;  %v2973_v44 = vld [vmem:[%s8902_s27 + $0x290] sm:$0xff] }
 0x4ed   : > { %3566 = vmatprep.mubr.f32.mxu0 %v8512_v50  ;;  %5394 = vmatpush1.bf16.msra.mxu1 %v10311_v60  ;;  %v9143_v50 = vpack.c.bf16 %v2965_v28, %v2963_v10  ;;  %v9155_v60 = vpack.c.bf16 %v2969_v63, %v2967_v39  ;;  %v10315_v10 = vld [vmem:[#allocation14_spill] sm:$0xff]  ;;  %v9159_v28 = vpack.c.bf16 %v2974_v52, %v2972_v15  ;;  %v2975_v15 = vld [vmem:[%s8902_s27 + $0x2a0] sm:$0xff] }
 0x4ee   : > { %3994 = vmatprep.mubr.f32.mxu1 %v8543_v18  ;;  %5012 = vmatprep.subr.bf16.mxu0 %v9122_v19  ;;  %v9167_v39 = vpack.c.bf16 %v2973_v44, %v2971_v12  ;;  %v10318_v63 = vld [vmem:[#allocation18_spill] sm:$0xff] }
 0x4ef   : > { %5396 = vmatprep.subr.bf16.mxu1 %v10312_v48  ;;  %v10316_v48 = vld [vmem:[#allocation16_spill] sm:$0xff]  ;;  %v2977_v52 = vld [vmem:[%s8902_s27 + $0x2b0] sm:$0xff] }
 0x4f0   : > { %5014 = vmatpush1.bf16.msra.mxu0 %v9129_v17  ;;  %10317 = vst [vmem:[#allocation82_spill] sm:$0xff] %v9167_v39  ;;  %v9179_v61 = vpack.c.bf16 %v2977_v52, %v2975_v15  ;;  %v10322_v12 = vld [vmem:[#allocation22_spill] sm:$0xff] }
 0x4f1   : > { %5398 = vmatpush1.bf16.msra.mxu1 %v10313_v5  ;;  %5016 = vmatprep.subr.bf16.mxu0 %v9133_v23  ;;  %v2976_v5 = vld [vmem:[%s8902_s27 + $0x2a8] sm:$0xff] }
 0x4f2   : > { %5400 = vmatprep.subr.bf16.mxu1 %v10314_v11  ;;  %v2978_v11 = vld [vmem:[%s8902_s27 + $0x2b8] sm:$0xff]  ;;  %10321 = vst [vmem:[#allocation75_spill] sm:$0xff] %v9179_v61 }
 0x4f4   : > { %5018 = vmatpush1.bf16.msra.mxu0 %v9143_v50 }
 0x4f5   : > { %5402 = vmatpush1.bf16.msra.mxu1 %v10315_v10  ;;  %5020 = vmatprep.subr.bf16.mxu0 %v9147_v7  ;;  %v9171_v10 = vpack.c.bf16 %v2978_v11, %v2976_v5  ;;  %v2979_v5 = vld [vmem:[%s8902_s27 + $0x2c0] sm:$0xff]  ;;  %v2981_v11 = vld [vmem:[%s8902_s27 + $0x2d0] sm:$0xff] }
 0x4f6   : > { %5404 = vmatprep.subr.bf16.mxu1 %v10316_v48  ;;  %v2980_v48 = vld [vmem:[%s8902_s27 + $0x2c8] sm:$0xff]  ;;  %v9195_v52 = vpack.c.bf16 %v2981_v11, %v2979_v5  ;;  %v10332_v11 = vld [vmem:[#allocation30_spill] sm:$0xff] }
 0x4f7   : > { %10319 = vst [vmem:[#allocation92_spill] sm:$0xff] %v9171_v10  ;;  %v9183_v44 = vpack.c.bf16 %v2982_v62, %v2980_v48  ;;  %v10328_v62 = vld [vmem:[#allocation26_spill] sm:$0xff]  ;;  %v9199_v48 = vpack.c.bf16 %v2986_v53, %v2984_v55  ;;  %v2987_v55 = vld [vmem:[%s8902_s27 + $0x300] sm:$0xff] }
 0x4f8   : > { %5022 = vmatpush1.bf16.msra.mxu0 %v9155_v60  ;;  %10327 = vst [vmem:[#allocation96_spill] sm:$0xff] %v9195_v52 }
 0x4f9   : > { %5406 = vmatpush1.bf16.msra.mxu1 %v10318_v63  ;;  %5024 = vmatprep.subr.bf16.mxu0 %v9159_v28  ;;  %10323 = vst [vmem:[#allocation80_spill] sm:$0xff] %v9183_v44  ;;  %10329 = vst [vmem:[#allocation77_spill] sm:$0xff] %v9199_v48 }
 0x4fa   : > { %5408 = vmatprep.subr.bf16.mxu1 %v10320_v3  ;;  %v10325_v3 = vld [vmem:[#allocation24_spill] sm:$0xff] }
 0x4fc   : > { %5026 = vmatpush1.bf16.msra.mxu0 %v9167_v39 }
 0x4fd   : > { %5410 = vmatpush1.bf16.msra.mxu1 %v10322_v12  ;;  %5028 = vmatprep.subr.bf16.mxu0 %v9171_v10  ;;  %v2983_v12 = vld [vmem:[%s8902_s27 + $0x2e0] sm:$0xff]  ;;  %v2988_v10 = vld [vmem:[%s8902_s27 + $0x308] sm:$0xff] }
 0x4fe   : > { %5412 = vmatprep.subr.bf16.mxu1 %v10325_v3  ;;  %v2985_v3 = vld [vmem:[%s8902_s27 + $0x2f0] sm:$0xff] }
 0x4ff   : > { %v9187_v63 = vpop.f32.mrb[0].mxu1  ;;  %v9207_v5 = vpack.c.bf16 %v2985_v3, %v2983_v12  ;;  %v10336_v3 = vld [vmem:[#allocation34_spill] sm:$0xff] }
 0x500   : > { %10324 = vst [vmem:[#allocation84_spill] sm:$0xff] %v9187_v63  ;;  %v9192_v15 = vpop.f32.mrb[1].mxu1  ;;  %5030 = vmatpush1.bf16.msra.mxu0 %v9179_v61  ;;  %v10330_v63 = vld [vmem:[#allocation28_spill] sm:$0xff]  ;;  %v2994_v61 = vld [vmem:[%s8902_s27 + $0x338] sm:$0xff] }
 0x501   : > { %10326 = vst [vmem:[#allocation86_spill] sm:$0xff] %v9192_v15  ;;  %5414 = vmatpush1.bf16.msra.mxu1 %v10328_v62  ;;  %5032 = vmatprep.subr.bf16.mxu0 %v9183_v44  ;;  %v2990_v15 = vld [vmem:[%s8902_s27 + $0x318] sm:$0xff]  ;;  %10331 = vst [vmem:[#allocation83_spill] sm:$0xff] %v9207_v5  ;;  %v2989_v62 = vld [vmem:[%s8902_s27 + $0x310] sm:$0xff] }
 0x502   : > { %5416 = vmatprep.subr.bf16.mxu1 %v10330_v63  ;;  %v9211_v53 = vpack.c.bf16 %v2990_v15, %v2988_v10  ;;  %v10334_v44 = vld [vmem:[#allocation32_spill] sm:$0xff]  ;;  %v2992_v63 = vld [vmem:[%s8902_s27 + $0x328] sm:$0xff]  ;;  %v9219_v12 = vpack.c.bf16 %v2989_v62, %v2987_v55  ;;  %v10340_v62 = vld [vmem:[#allocation38_spill] sm:$0xff] }
 0x503   : > { %v9223_v10 = vpack.c.bf16 %v2994_v61, %v2992_v63  ;;  %v2991_v15 = vld [vmem:[%s8902_s27 + $0x320] sm:$0xff] }
 0x504   : > { %5034 = vmatpush1.bf16.msra.mxu0 %v9195_v52  ;;  %10333 = vst [vmem:[#allocation89_spill] sm:$0xff] %v9211_v53  ;;  %10335 = vst [vmem:[#allocation91_spill] sm:$0xff] %v9219_v12  ;;  %v2998_v52 = vld [vmem:[%s8902_s27 + $0x358] sm:$0xff]  ;;  %v2995_v63 = vld [vmem:[%s8902_s27 + $0x340] sm:$0xff] }
 0x505   : > { %5418 = vmatpush1.bf16.msra.mxu1 %v10332_v11  ;;  %5036 = vmatprep.subr.bf16.mxu0 %v9199_v48  ;;  %10337 = vst [vmem:[#allocation98_spill] sm:$0xff] %v9223_v10  ;;  %v2993_v11 = vld [vmem:[%s8902_s27 + $0x330] sm:$0xff]  ;;  %v10338_v48 = vld [vmem:[#allocation36_spill] sm:$0xff] }
 0x506   : > { %5420 = vmatprep.subr.bf16.mxu1 %v10334_v44  ;;  %v2996_v44 = vld [vmem:[%s8902_s27 + $0x348] sm:$0xff]  ;;  %v9231_v55 = vpack.c.bf16 %v2993_v11, %v2991_v15  ;;  %v10344_v11 = vld [vmem:[#allocation42_spill] sm:$0xff] }
 0x507   : > { %v9235_v61 = vpack.c.bf16 %v2998_v52, %v2996_v44  ;;  %v2999_v44 = vld [vmem:[%s8902_s27 + $0x360] sm:$0xff] }
 0x508   : > { %5038 = vmatpush1.bf16.msra.mxu0 %v9207_v5  ;;  %10339 = vst [vmem:[#allocation81_spill] sm:$0xff] %v9231_v55  ;;  %v3002_v5 = vld [vmem:[%s8902_s27 + $0x378] sm:$0xff] }
 0x509   : > { %5422 = vmatpush1.bf16.msra.mxu1 %v10336_v3  ;;  %5040 = vmatprep.subr.bf16.mxu0 %v9211_v53  ;;  %10341 = vst [vmem:[#allocation88_spill] sm:$0xff] %v9235_v61  ;;  %v2997_v3 = vld [vmem:[%s8902_s27 + $0x350] sm:$0xff]  ;;  %v10342_v53 = vld [vmem:[#allocation40_spill] sm:$0xff] }
 0x50a   : > { %5424 = vmatprep.subr.bf16.mxu1 %v10338_v48  ;;  %v3000_v48 = vld [vmem:[%s8902_s27 + $0x368] sm:$0xff]  ;;  %v9243_v15 = vpack.c.bf16 %v2997_v3, %v2995_v63  ;;  %v10348_v3 = vld [vmem:[#allocation46_spill] sm:$0xff] }
 0x50b   : > { %v9247_v52 = vpack.c.bf16 %v3002_v5, %v3000_v48  ;;  %v3003_v48 = vld [vmem:[%s8902_s27 + $0x380] sm:$0xff] }
 0x50c   : > { %5042 = vmatpush1.bf16.msra.mxu0 %v9219_v12  ;;  %10343 = vst [vmem:[#allocation105_spill] sm:$0xff] %v9243_v15  ;;  %v3006_v12 = vld [vmem:[%s8902_s27 + $0x398] sm:$0xff] }
 0x50d   : > { %5426 = vmatpush1.bf16.msra.mxu1 %v10340_v62  ;;  %5044 = vmatprep.subr.bf16.mxu0 %v9223_v10  ;;  %10345 = vst [vmem:[#allocation108_spill] sm:$0xff] %v9247_v52  ;;  %v3001_v62 = vld [vmem:[%s8902_s27 + $0x370] sm:$0xff]  ;;  %v10346_v10 = vld [vmem:[#allocation44_spill] sm:$0xff] }
 0x50e   : > { %5428 = vmatprep.subr.bf16.mxu1 %v10342_v53  ;;  %v3004_v53 = vld [vmem:[%s8902_s27 + $0x388] sm:$0xff]  ;;  %v9255_v63 = vpack.c.bf16 %v3001_v62, %v2999_v44  ;;  %v10352_v62 = vld [vmem:[#allocation50_spill] sm:$0xff] }
 0x50f   : > { %v9259_v5 = vpack.c.bf16 %v3006_v12, %v3004_v53  ;;  %v3007_v53 = vld [vmem:[%s8902_s27 + $0x3a0] sm:$0xff] }
 0x510   : > { %5046 = vmatpush1.bf16.msra.mxu0 %v9231_v55  ;;  %10347 = vst [vmem:[#allocation93_spill] sm:$0xff] %v9255_v63  ;;  %v3010_v55 = vld [vmem:[%s8902_s27 + $0x3b8] sm:$0xff] }
 0x511   : > { %5430 = vmatpush1.bf16.msra.mxu1 %v10344_v11  ;;  %5048 = vmatprep.subr.bf16.mxu0 %v9235_v61  ;;  %10349 = vst [vmem:[#allocation95_spill] sm:$0xff] %v9259_v5  ;;  %v3005_v11 = vld [vmem:[%s8902_s27 + $0x390] sm:$0xff]  ;;  %v10350_v61 = vld [vmem:[#allocation48_spill] sm:$0xff] }
 0x512   : > { %5432 = vmatprep.subr.bf16.mxu1 %v10346_v10  ;;  %v3008_v10 = vld [vmem:[%s8902_s27 + $0x3a8] sm:$0xff]  ;;  %v9267_v44 = vpack.c.bf16 %v3005_v11, %v3003_v48  ;;  %v10356_v11 = vld [vmem:[#allocation54_spill] sm:$0xff] }
 0x513   : > { %v9271_v12 = vpack.c.bf16 %v3010_v55, %v3008_v10  ;;  %v3011_v10 = vld [vmem:[%s8902_s27 + $0x3c0] sm:$0xff] }
 0x514   : > { %5050 = vmatpush1.bf16.msra.mxu0 %v9243_v15  ;;  %10351 = vst [vmem:[#allocation100_spill] sm:$0xff] %v9267_v44  ;;  %v3014_v15 = vld [vmem:[%s8902_s27 + $0x3d8] sm:$0xff] }
 0x515   : > { %5434 = vmatpush1.bf16.msra.mxu1 %v10348_v3  ;;  %5052 = vmatprep.subr.bf16.mxu0 %v9247_v52  ;;  %10353 = vst [vmem:[#allocation85_spill] sm:$0xff] %v9271_v12  ;;  %v3009_v3 = vld [vmem:[%s8902_s27 + $0x3b0] sm:$0xff]  ;;  %v10354_v52 = vld [vmem:[#allocation52_spill] sm:$0xff] }
 0x516   : > { %5436 = vmatprep.subr.bf16.mxu1 %v10350_v61  ;;  %v3012_v61 = vld [vmem:[%s8902_s27 + $0x3c8] sm:$0xff]  ;;  %v9279_v48 = vpack.c.bf16 %v3009_v3, %v3007_v53  ;;  %v10359_v3 = vld [vmem:[#allocation58_spill] sm:$0xff] }
 0x517   : > { %v9283_v55 = vpack.c.bf16 %v3014_v15, %v3012_v61  ;;  %v3015_v61 = vld [vmem:[%s8902_s27 + $0x3e0] sm:$0xff] }
 0x518   : > { %5054 = vmatpush1.bf16.msra.mxu0 %v9255_v63  ;;  %10355 = vst [vmem:[#allocation90_spill] sm:$0xff] %v9279_v48  ;;  %v3018_v63 = vld [vmem:[%s8902_s27 + $0x3f8] sm:$0xff] }
 0x519   : > { %5438 = vmatpush1.bf16.msra.mxu1 %v10352_v62  ;;  %5056 = vmatprep.subr.bf16.mxu0 %v9259_v5  ;;  %10357 = vst [vmem:[#allocation94_spill] sm:$0xff] %v9283_v55  ;;  %v3013_v62 = vld [vmem:[%s8902_s27 + $0x3d0] sm:$0xff]  ;;  %v10358_v5 = vld [vmem:[#allocation56_spill] sm:$0xff] }
 0x51a   : > { %5440 = vmatprep.subr.bf16.mxu1 %v10354_v52  ;;  %v3016_v52 = vld [vmem:[%s8902_s27 + $0x3e8] sm:$0xff]  ;;  %v9291_v53 = vpack.c.bf16 %v3013_v62, %v3011_v10  ;;  %v10361_v62 = vld [vmem:[#allocation63_spill] sm:$0xff] }
 0x51b   : > { %v9295_v15 = vpack.c.bf16 %v3018_v63, %v3016_v52  ;;  %v3019_v52 = vld [vmem:[%s8902_s27 + $0x400] sm:$0xff] }
 0x51c   : > { %5058 = vmatpush1.bf16.msra.mxu0 %v9267_v44  ;;  %v3022_v44 = vld [vmem:[%s8902_s27 + $0x418] sm:$0xff] }
 0x51d   : > { %5442 = vmatpush1.bf16.msra.mxu1 %v10356_v11  ;;  %5060 = vmatprep.subr.bf16.mxu0 %v9271_v12  ;;  %v3017_v11 = vld [vmem:[%s8902_s27 + $0x3f0] sm:$0xff]  ;;  %v10360_v12 = vld [vmem:[#allocation60_spill] sm:$0xff] }
 0x51e   : > { %5444 = vmatprep.subr.bf16.mxu1 %v10358_v5  ;;  %v3020_v5 = vld [vmem:[%s8902_s27 + $0x408] sm:$0xff]  ;;  %v9303_v10 = vpack.c.bf16 %v3017_v11, %v3015_v61  ;;  %v10363_v61 = vld [vmem:[#allocation68_spill] sm:$0xff] }
 0x51f   : > { %v9307_v63 = vpack.c.bf16 %v3022_v44, %v3020_v5  ;;  %v3023_v11 = vld [vmem:[%s8902_s27 + $0x420] sm:$0xff]  ;;  %v3030_v5 = vld [vmem:[%s8902_s27 + $0x458] sm:$0xff] }
 0x520   : > { %5062 = vmatpush1.bf16.msra.mxu0 %v9279_v48  ;;  %v3026_v48 = vld [vmem:[%s8902_s27 + $0x438] sm:$0xff] }
 0x521   : > { %5446 = vmatpush1.bf16.msra.mxu1 %v10359_v3  ;;  %5064 = vmatprep.subr.bf16.mxu0 %v9283_v55  ;;  %v3021_v3 = vld [vmem:[%s8902_s27 + $0x410] sm:$0xff]  ;;  %v10362_v55 = vld [vmem:[#allocation65_spill] sm:$0xff] }
 0x522   : > { %5448 = vmatprep.subr.bf16.mxu1 %v10360_v12  ;;  %v3024_v12 = vld [vmem:[%s8902_s27 + $0x428] sm:$0xff]  ;;  %v9315_v39 = vpack.c.bf16 %v3021_v3, %v3019_v52  ;;  %v3029_v3 = vld [vmem:[%s8902_s27 + $0x450] sm:$0xff] }
 0x523   : > { %v9322_v44 = vpack.c.bf16 %v3026_v48, %v3024_v12  ;;  %v3027_v48 = vld [vmem:[%s8902_s27 + $0x440] sm:$0xff]  ;;  %v3034_v12 = vld [vmem:[%s8902_s27 + $0x478] sm:$0xff] }
 0x524   : > { %5066 = vmatpush1.bf16.msra.mxu0 %v9291_v53 }
 0x525   : > { %5450 = vmatpush1.bf16.msra.mxu1 %v10361_v62  ;;  %5068 = vmatprep.subr.bf16.mxu0 %v9295_v15  ;;  %v3025_v62 = vld [vmem:[%s8902_s27 + $0x430] sm:$0xff] }
 0x526   : > { %5452 = vmatprep.subr.bf16.mxu1 %v10362_v55  ;;  %v3028_v55 = vld [vmem:[%s8902_s27 + $0x448] sm:$0xff]  ;;  %v9329_v52 = vpack.c.bf16 %v3025_v62, %v3023_v11 }
 0x527   : > { %v3036_v11 = vld [vmem:[%s8902_s27 + $0x488] sm:$0xff] }
 0x528   : > { %5070 = vmatpush1.bf16.msra.mxu0 %v9303_v10 }
 0x529   : > { %5454 = vmatpush1.bf16.msra.mxu1 %v10363_v61  ;;  %5072 = vmatprep.subr.bf16.mxu0 %v9307_v63  ;;  %v3033_v61 = vld [vmem:[%s8902_s27 + $0x470] sm:$0xff] }
 0x52a   : > { %5456 = vmatprep.subr.bf16.mxu1 %v8911_v54  ;;  %v9333_v54 = vpack.c.bf16 %v3030_v5, %v3028_v55  ;;  %v3035_v55 = vld [vmem:[%s8902_s27 + $0x480] sm:$0xff]  ;;  %v3037_v5 = vld [vmem:[%s8902_s27 + $0x490] sm:$0xff] }
 0x52b   : > { %3567 = vmatmul.mubr.f32.vlgmr.msra.gmra.mrb[6].mxu0 %v8525_v21  ;;  %v3032_v21 = vld [vmem:[%s8902_s27 + $0x468] sm:$0xff] }
 0x52c   : > { %3995 = vmatmul.mubr.f32.vlgmr.msra.gmra.mrb[2].mxu1 %v8545_v31  ;;  %5074 = vmatpush1.bf16.msra.mxu0 %v9315_v39 }
 0x52d   : > { %3637 = vmatprep.mubr.f32.mxu0 %v8536_v49  ;;  %5458 = vmatpush1.bf16.msra.mxu1 %v8919_v40  ;;  %v9343_v49 = vpack.c.bf16 %v3029_v3, %v3027_v48  ;;  %v9347_v40 = vpack.c.bf16 %v3034_v12, %v3032_v21  ;;  %v3042_v48 = vld [vmem:[%s8902_s27 + $0x4b8] sm:$0xff]  ;;  %v9367_v3 = vpack.c.bf16 %v3037_v5, %v3035_v55  ;;  %v3039_v21 = vld [vmem:[%s8902_s27 + $0x4a0] sm:$0xff]  ;;  %v3041_v12 = vld [vmem:[%s8902_s27 + $0x4b0] sm:$0xff] }
 0x52e   : > { %4065 = vmatprep.mubr.f32.mxu1 %v8476_v30  ;;  %5076 = vmatprep.subr.bf16.mxu0 %v9322_v44  ;;  %v3031_v30 = vld [vmem:[%s8902_s27 + $0x460] sm:$0xff]  ;;  %v3050_v55 = vld [vmem:[%s8902_s27 + $0x4f8] sm:$0xff] }
 0x52f   : > { %5460 = vmatprep.subr.bf16.mxu1 %v8926_v8  ;;  %v3038_v8 = vld [vmem:[%s8902_s27 + $0x498] sm:$0xff]  ;;  %v9355_v62 = vpack.c.bf16 %v3033_v61, %v3031_v30  ;;  %v9379_v61 = vpack.c.bf16 %v3041_v12, %v3039_v21 }
 0x530   : > { %5078 = vmatpush1.bf16.msra.mxu0 %v9329_v52  ;;  %v3046_v30 = vld [vmem:[%s8902_s27 + $0x4d8] sm:$0xff] }
 0x531   : > { %5462 = vmatpush1.bf16.msra.mxu1 %v8933_v58  ;;  %5080 = vmatprep.subr.bf16.mxu0 %v9333_v54  ;;  %v9359_v58 = vpack.c.bf16 %v3038_v8, %v3036_v11  ;;  %v3043_v11 = vld [vmem:[%s8902_s27 + $0x4c0] sm:$0xff]  ;;  %v3045_v8 = vld [vmem:[%s8902_s27 + $0x4d0] sm:$0xff]  ;;  %v3054_v21 = vld [vmem:[%s8902_s27 + $0x518] sm:$0xff] }
 0x532   : > { %5464 = vmatprep.subr.bf16.mxu1 %v8937_v25  ;;  %v3040_v25 = vld [vmem:[%s8902_s27 + $0x4a8] sm:$0xff]  ;;  %v9391_v5 = vpack.c.bf16 %v3045_v8, %v3043_v11  ;;  %v3058_v11 = vld [vmem:[%s8902_s27 + $0x538] sm:$0xff] }
 0x534   : > { %5082 = vmatpush1.bf16.msra.mxu0 %v9343_v49 }
 0x535   : > { %5466 = vmatpush1.bf16.msra.mxu1 %v8947_v35  ;;  %5084 = vmatprep.subr.bf16.mxu0 %v9347_v40  ;;  %v9371_v35 = vpack.c.bf16 %v3042_v48, %v3040_v25  ;;  %v3047_v25 = vld [vmem:[%s8902_s27 + $0x4e0] sm:$0xff]  ;;  %v3049_v48 = vld [vmem:[%s8902_s27 + $0x4f0] sm:$0xff] }
 0x536   : > { %5468 = vmatprep.subr.bf16.mxu1 %v8951_v33  ;;  %v3044_v33 = vld [vmem:[%s8902_s27 + $0x4c8] sm:$0xff]  ;;  %v9403_v12 = vpack.c.bf16 %v3049_v48, %v3047_v25  ;;  %v3062_v25 = vld [vmem:[%s8902_s27 + $0x558] sm:$0xff] }
 0x538   : > { %5086 = vmatpush1.bf16.msra.mxu0 %v9355_v62 }
 0x539   : > { %5470 = vmatpush1.bf16.msra.mxu1 %v8959_v42  ;;  %5088 = vmatprep.subr.bf16.mxu0 %v9359_v58  ;;  %v9383_v42 = vpack.c.bf16 %v3046_v30, %v3044_v33  ;;  %v3051_v33 = vld [vmem:[%s8902_s27 + $0x500] sm:$0xff]  ;;  %v3053_v30 = vld [vmem:[%s8902_s27 + $0x510] sm:$0xff] }
 0x53a   : > { %5472 = vmatprep.subr.bf16.mxu1 %v8963_v59  ;;  %v3048_v59 = vld [vmem:[%s8902_s27 + $0x4e8] sm:$0xff]  ;;  %v9415_v8 = vpack.c.bf16 %v3053_v30, %v3051_v33  ;;  %v3066_v33 = vld [vmem:[%s8902_s27 + $0x578] sm:$0xff] }
 0x53c   : > { %5090 = vmatpush1.bf16.msra.mxu0 %v9367_v3 }
 0x53d   : > { %5474 = vmatpush1.bf16.msra.mxu1 %v8971_v22  ;;  %5092 = vmatprep.subr.bf16.mxu0 %v9371_v35  ;;  %v9395_v22 = vpack.c.bf16 %v3050_v55, %v3048_v59  ;;  %v3055_v59 = vld [vmem:[%s8902_s27 + $0x520] sm:$0xff]  ;;  %v3057_v55 = vld [vmem:[%s8902_s27 + $0x530] sm:$0xff] }
 0x53e   : > { %5476 = vmatprep.subr.bf16.mxu1 %v8975_v14  ;;  %v3052_v14 = vld [vmem:[%s8902_s27 + $0x508] sm:$0xff]  ;;  %v9427_v48 = vpack.c.bf16 %v3057_v55, %v3055_v59  ;;  %v3070_v59 = vld [vmem:[%s8902_s27 + $0x598] sm:$0xff] }
 0x540   : > { %5094 = vmatpush1.bf16.msra.mxu0 %v9379_v61 }
 0x541   : > { %5478 = vmatpush1.bf16.msra.mxu1 %v8983_v56  ;;  %5096 = vmatprep.subr.bf16.mxu0 %v9383_v42  ;;  %v9407_v56 = vpack.c.bf16 %v3054_v21, %v3052_v14  ;;  %v3059_v14 = vld [vmem:[%s8902_s27 + $0x540] sm:$0xff]  ;;  %v3061_v21 = vld [vmem:[%s8902_s27 + $0x550] sm:$0xff] }
 0x542   : > { %5480 = vmatprep.subr.bf16.mxu1 %v8987_v57  ;;  %v3056_v57 = vld [vmem:[%s8902_s27 + $0x528] sm:$0xff]  ;;  %v9439_v30 = vpack.c.bf16 %v3061_v21, %v3059_v14  ;;  %v3074_v14 = vld [vmem:[%s8902_s27 + $0x5b8] sm:$0xff] }
 0x544   : > { %5098 = vmatpush1.bf16.msra.mxu0 %v9391_v5 }
 0x545   : > { %5482 = vmatpush1.bf16.msra.mxu1 %v8995_v26  ;;  %5100 = vmatprep.subr.bf16.mxu0 %v9395_v22  ;;  %v9419_v26 = vpack.c.bf16 %v3058_v11, %v3056_v57  ;;  %v3063_v57 = vld [vmem:[%s8902_s27 + $0x560] sm:$0xff]  ;;  %v3065_v11 = vld [vmem:[%s8902_s27 + $0x570] sm:$0xff] }
 0x546   : > { %5484 = vmatprep.subr.bf16.mxu1 %v8999_v41  ;;  %v3060_v41 = vld [vmem:[%s8902_s27 + $0x548] sm:$0xff]  ;;  %v9451_v55 = vpack.c.bf16 %v3065_v11, %v3063_v57  ;;  %v3078_v57 = vld [vmem:[%s8902_s27 + $0x5d8] sm:$0xff] }
 0x548   : > { %5102 = vmatpush1.bf16.msra.mxu0 %v9403_v12 }
 0x549   : > { %5486 = vmatpush1.bf16.msra.mxu1 %v9007_v13  ;;  %5104 = vmatprep.subr.bf16.mxu0 %v9407_v56  ;;  %v9431_v13 = vpack.c.bf16 %v3062_v25, %v3060_v41  ;;  %v3067_v41 = vld [vmem:[%s8902_s27 + $0x580] sm:$0xff]  ;;  %v3069_v25 = vld [vmem:[%s8902_s27 + $0x590] sm:$0xff] }
 0x54a   : > { %5488 = vmatprep.subr.bf16.mxu1 %v9011_v4  ;;  %v3064_v4 = vld [vmem:[%s8902_s27 + $0x568] sm:$0xff]  ;;  %v9463_v21 = vpack.c.bf16 %v3069_v25, %v3067_v41  ;;  %v3082_v41 = vld [vmem:[%s8902_s27 + $0x5f8] sm:$0xff] }
 0x54c   : > { %5106 = vmatpush1.bf16.msra.mxu0 %v9415_v8 }
 0x54d   : > { %5490 = vmatpush1.bf16.msra.mxu1 %v9019_v43  ;;  %5108 = vmatprep.subr.bf16.mxu0 %v9419_v26  ;;  %v9443_v43 = vpack.c.bf16 %v3066_v33, %v3064_v4  ;;  %v3071_v4 = vld [vmem:[%s8902_s27 + $0x5a0] sm:$0xff]  ;;  %v3073_v33 = vld [vmem:[%s8902_s27 + $0x5b0] sm:$0xff] }
 0x54e   : > { %5492 = vmatprep.subr.bf16.mxu1 %v9023_v38  ;;  %v3068_v38 = vld [vmem:[%s8902_s27 + $0x588] sm:$0xff]  ;;  %v9475_v11 = vpack.c.bf16 %v3073_v33, %v3071_v4  ;;  %v3086_v4 = vld [vmem:[%s8902_s27 + $0x618] sm:$0xff] }
 0x550   : > { %5110 = vmatpush1.bf16.msra.mxu0 %v9427_v48 }
 0x551   : > { %5494 = vmatpush1.bf16.msra.mxu1 %v9031_v37  ;;  %5112 = vmatprep.subr.bf16.mxu0 %v9431_v13  ;;  %v9455_v37 = vpack.c.bf16 %v3070_v59, %v3068_v38  ;;  %v3075_v38 = vld [vmem:[%s8902_s27 + $0x5c0] sm:$0xff]  ;;  %v3077_v59 = vld [vmem:[%s8902_s27 + $0x5d0] sm:$0xff] }
 0x552   : > { %5496 = vmatprep.subr.bf16.mxu1 %v9035_v24  ;;  %v3072_v24 = vld [vmem:[%s8902_s27 + $0x5a8] sm:$0xff]  ;;  %v9487_v25 = vpack.c.bf16 %v3077_v59, %v3075_v38  ;;  %v3090_v38 = vld [vmem:[%s8902_s27 + $0x638] sm:$0xff] }
 0x554   : > { %5114 = vmatpush1.bf16.msra.mxu0 %v9439_v30 }
 0x555   : > { %5498 = vmatpush1.bf16.msra.mxu1 %v9043_v47  ;;  %5116 = vmatprep.subr.bf16.mxu0 %v9443_v43  ;;  %v9467_v47 = vpack.c.bf16 %v3074_v14, %v3072_v24  ;;  %v3079_v24 = vld [vmem:[%s8902_s27 + $0x5e0] sm:$0xff]  ;;  %v3081_v14 = vld [vmem:[%s8902_s27 + $0x5f0] sm:$0xff] }
 0x556   : > { %5500 = vmatprep.subr.bf16.mxu1 %v9047_v51  ;;  %v3076_v51 = vld [vmem:[%s8902_s27 + $0x5c8] sm:$0xff]  ;;  %v9499_v33 = vpack.c.bf16 %v3081_v14, %v3079_v24  ;;  %v3094_v24 = vld [vmem:[%s8902_s27 + $0x658] sm:$0xff]  ;;  %v3091_v14 = vld [vmem:[%s8902_s27 + $0x640] sm:$0xff] }
 0x558   : > { %5118 = vmatpush1.bf16.msra.mxu0 %v9451_v55 }
 0x559   : > { %5502 = vmatpush1.bf16.msra.mxu1 %v9055_v45  ;;  %5120 = vmatprep.subr.bf16.mxu0 %v9455_v37  ;;  %v9479_v45 = vpack.c.bf16 %v3078_v57, %v3076_v51  ;;  %v3083_v51 = vld [vmem:[%s8902_s27 + $0x600] sm:$0xff]  ;;  %v3085_v57 = vld [vmem:[%s8902_s27 + $0x610] sm:$0xff] }
 0x55a   : > { %5504 = vmatprep.subr.bf16.mxu1 %v9059_v46  ;;  %v3080_v46 = vld [vmem:[%s8902_s27 + $0x5e8] sm:$0xff]  ;;  %v9511_v59 = vpack.c.bf16 %v3085_v57, %v3083_v51 }
 0x55b   : > { %v3100_v51 = vld [vmem:[%s8902_s27 + $0x688] sm:$0xff] }
 0x55c   : > { %5122 = vmatpush1.bf16.msra.mxu0 %v9463_v21 }
 0x55d   : > { %5506 = vmatpush1.bf16.msra.mxu1 %v9067_v1  ;;  %5124 = vmatprep.subr.bf16.mxu0 %v9467_v47  ;;  %v9491_v1 = vpack.c.bf16 %v3082_v41, %v3080_v46  ;;  %v3089_v46 = vld [vmem:[%s8902_s27 + $0x630] sm:$0xff] }
 0x55e   : > { %5508 = vmatprep.subr.bf16.mxu1 %v9071_v27  ;;  %v3084_v27 = vld [vmem:[%s8902_s27 + $0x608] sm:$0xff] }
 0x560   : > { %5126 = vmatpush1.bf16.msra.mxu0 %v9475_v11 }
 0x561   : > { %5510 = vmatpush1.bf16.msra.mxu1 %v9079_v0  ;;  %5128 = vmatprep.subr.bf16.mxu0 %v9479_v45  ;;  %v9503_v0 = vpack.c.bf16 %v3086_v4, %v3084_v27  ;;  %v3093_v27 = vld [vmem:[%s8902_s27 + $0x650] sm:$0xff] }
 0x562   : > { %5512 = vmatprep.subr.bf16.mxu1 %v9083_v9  ;;  %v3088_v9 = vld [vmem:[%s8902_s27 + $0x628] sm:$0xff]  ;;  %v3097_v4 = vld [vmem:[%s8902_s27 + $0x670] sm:$0xff] }
 0x563   : > { %v9518_v41 = vpack.c.bf16 %v3090_v38, %v3088_v9  ;;  %v3099_v9 = vld [vmem:[%s8902_s27 + $0x680] sm:$0xff]  ;;  %v3101_v38 = vld [vmem:[%s8902_s27 + $0x690] sm:$0xff] }
 0x564   : > { %5130 = vmatpush1.bf16.msra.mxu0 %v9487_v25 }
 0x565   : > { %5514 = vmatpush1.bf16.msra.mxu1 %v9091_v16  ;;  %5132 = vmatprep.subr.bf16.mxu0 %v9491_v1  ;;  %v3087_v16 = vld [vmem:[%s8902_s27 + $0x620] sm:$0xff] }
 0x566   : > { %5516 = vmatprep.subr.bf16.mxu1 %v9095_v2  ;;  %v3092_v2 = vld [vmem:[%s8902_s27 + $0x648] sm:$0xff] }
 0x568   : > { %5134 = vmatpush1.bf16.msra.mxu0 %v9499_v33 }
 0x569   : > { %5518 = vmatpush1.bf16.msra.mxu1 %v9103_v29  ;;  %5136 = vmatprep.subr.bf16.mxu0 %v9503_v0  ;;  %v9525_v29 = vpack.c.bf16 %v3089_v46, %v3087_v16  ;;  %v3106_v16 = vld [vmem:[%s8902_s27 + $0x6b8] sm:$0xff]  ;;  %v9563_v46 = vpack.c.bf16 %v3101_v38, %v3099_v9  ;;  %v10366_v9 = vld [vmem:[#allocation84_spill] sm:$0xff] }
 0x56a   : > { %5520 = vmatprep.subr.bf16.mxu1 %v9107_v20  ;;  %v9529_v20 = vpack.c.bf16 %v3094_v24, %v3092_v2  ;;  %v3103_v2 = vld [vmem:[%s8902_s27 + $0x6a0] sm:$0xff]  ;;  %v3105_v24 = vld [vmem:[%s8902_s27 + $0x6b0] sm:$0xff] }
 0x56b   : > { %3638 = vmatmul.mubr.f32.vlgmr.msra.gmra.mrb[6].mxu0 %v8549_v6  ;;  %v3098_v6 = vld [vmem:[%s8902_s27 + $0x678] sm:$0xff] }
 0x56c   : > { %4066 = vmatmul.mubr.f32.vlgmr.msra.gmra.mrb[2].mxu1 %v8482_v34  ;;  %5138 = vmatpush1.bf16.msra.mxu0 %v9511_v59  ;;  %v3096_v34 = vld [vmem:[%s8902_s27 + $0x668] sm:$0xff] }
 0x56d   : > { %3708 = vmatprep.mubr.f32.mxu0 %v8543_v18  ;;  %5522 = vmatpush1.bf16.msra.mxu1 %v9115_v32  ;;  %v9539_v18 = vpack.c.bf16 %v3093_v27, %v3091_v14  ;;  %v9543_v32 = vpack.c.bf16 %v3098_v6, %v3096_v34  ;;  %v3110_v14 = vld [vmem:[%s8902_s27 + $0x6d8] sm:$0xff]  ;;  %v9575_v27 = vpack.c.bf16 %v3105_v24, %v3103_v2  ;;  %v10364_v34 = vld [vmem:[#allocation82_spill] sm:$0xff]  ;;  %v3107_v6 = vld [vmem:[%s8902_s27 + $0x6c0] sm:$0xff] }
 0x56e   : > { %4136 = vmatprep.mubr.f32.mxu1 %v8506_v36  ;;  %5140 = vmatprep.subr.bf16.mxu0 %v9518_v41  ;;  %v3095_v36 = vld [vmem:[%s8902_s27 + $0x660] sm:$0xff] }
 0x56f   : > { %5524 = vmatprep.subr.bf16.mxu1 %v9122_v19  ;;  %v3102_v19 = vld [vmem:[%s8902_s27 + $0x698] sm:$0xff]  ;;  %v9551_v57 = vpack.c.bf16 %v3097_v4, %v3095_v36  ;;  %v3109_v36 = vld [vmem:[%s8902_s27 + $0x6d0] sm:$0xff] }
 0x570   : > { %5142 = vmatpush1.bf16.msra.mxu0 %v9525_v29  ;;  %v9593_v24 = vpack.c.bf16 %v3109_v36, %v3107_v6  ;;  %v10375_v36 = vld [vmem:[#allocation96_spill] sm:$0xff] }
 0x571   : > { %5526 = vmatpush1.bf16.msra.mxu1 %v9129_v17  ;;  %5144 = vmatprep.subr.bf16.mxu0 %v9529_v20  ;;  %v9555_v17 = vpack.c.bf16 %v3102_v19, %v3100_v51  ;;  %v10365_v51 = vld [vmem:[#allocation92_spill] sm:$0xff]  ;;  %v3114_v19 = vld [vmem:[%s8902_s27 + $0x6f8] sm:$0xff] }
 0x572   : > { %5528 = vmatprep.subr.bf16.mxu1 %v9133_v23  ;;  %v3104_v23 = vld [vmem:[%s8902_s27 + $0x6a8] sm:$0xff]  ;;  %10370 = vst [vmem:[#allocation109_spill] sm:$0xff] %v9593_v24 }
 0x574   : > { %5146 = vmatpush1.bf16.msra.mxu0 %v9539_v18 }
 0x575   : > { %5530 = vmatpush1.bf16.msra.mxu1 %v9143_v50  ;;  %5148 = vmatprep.subr.bf16.mxu0 %v9543_v32  ;;  %v9567_v50 = vpack.c.bf16 %v3106_v16, %v3104_v23  ;;  %v10368_v16 = vld [vmem:[#allocation86_spill] sm:$0xff] }
 0x576   : > { %5532 = vmatprep.subr.bf16.mxu1 %v9147_v7  ;;  %v3108_v7 = vld [vmem:[%s8902_s27 + $0x6c8] sm:$0xff] }
 0x578   : > { %5150 = vmatpush1.bf16.msra.mxu0 %v9551_v57 }
 0x579   : > { %5534 = vmatpush1.bf16.msra.mxu1 %v9155_v60  ;;  %5152 = vmatprep.subr.bf16.mxu0 %v9555_v17  ;;  %v9579_v60 = vpack.c.bf16 %v3110_v14, %v3108_v7  ;;  %v10371_v7 = vld [vmem:[#allocation75_spill] sm:$0xff] }
 0x57a   : > { %5536 = vmatprep.subr.bf16.mxu1 %v9159_v28  ;;  %v3112_v28 = vld [vmem:[%s8902_s27 + $0x6e8] sm:$0xff] }
 0x57b   : > { %v9597_v14 = vpack.c.bf16 %v3114_v19, %v3112_v28  ;;  %v3115_v19 = vld [vmem:[%s8902_s27 + $0x700] sm:$0xff] }
 0x57c   : > { %5154 = vmatpush1.bf16.msra.mxu0 %v9563_v46 }
 0x57d   : > { %5538 = vmatpush1.bf16.msra.mxu1 %v10364_v34  ;;  %5156 = vmatprep.subr.bf16.mxu0 %v9567_v50  ;;  %10372 = vst [vmem:[#allocation101_spill] sm:$0xff] %v9597_v14  ;;  %v3111_v34 = vld [vmem:[%s8902_s27 + $0x6e0] sm:$0xff] }
 0x57e   : > { %v3355_v4 = vpop.f32.mrb[4].mxu0  ;;  %5540 = vmatprep.subr.bf16.mxu1 %v10365_v51  ;;  %v10373_v51 = vld [vmem:[#allocation80_spill] sm:$0xff] }
 0x57f   : > { %v9587_v38 = vadd.f32 %v10366_v9, %v3355_v4  ;;  %v3357_v23 = vpop.f32.mrb[5].mxu0  ;;  %v3113_v4 = vld [vmem:[%s8902_s27 + $0x6f0] sm:$0xff]  ;;  %v3116_v9 = vld [vmem:[%s8902_s27 + $0x708] sm:$0xff] }
 0x580   : > { %v9590_v2 = vadd.f32 %v10368_v16, %v3357_v23  ;;  %5158 = vmatpush1.bf16.msra.mxu0 %v9575_v27  ;;  %v3118_v23 = vld [vmem:[%s8902_s27 + $0x718] sm:$0xff]  ;;  %v9605_v6 = vpack.c.bf16 %v3113_v4, %v3111_v34  ;;  %v3117_v16 = vld [vmem:[%s8902_s27 + $0x710] sm:$0xff] }
 0x581   : > { %10367 = vst [vmem:[#allocation97_spill] sm:$0xff] %v9587_v38  ;;  %5542 = vmatpush1.bf16.msra.mxu1 %v10371_v7  ;;  %5160 = vmatprep.subr.bf16.mxu0 %v9579_v60  ;;  %v9609_v28 = vpack.c.bf16 %v3118_v23, %v3116_v9  ;;  %v10377_v7 = vld [vmem:[#allocation77_spill] sm:$0xff]  ;;  %v9617_v34 = vpack.c.bf16 %v3117_v16, %v3115_v19  ;;  %v10379_v4 = vld [vmem:[#allocation83_spill] sm:$0xff]  ;;  %v3119_v23 = vld [vmem:[%s8902_s27 + $0x720] sm:$0xff] }
 0x582   : > { %10369 = vst [vmem:[#allocation107_spill] sm:$0xff] %v9590_v2  ;;  %5544 = vmatprep.subr.bf16.mxu1 %v10373_v51  ;;  %10374 = vst [vmem:[#allocation66_spill] sm:$0xff] %v9605_v6  ;;  %v3120_v51 = vld [vmem:[%s8902_s27 + $0x728] sm:$0xff]  ;;  %v3122_v2 = vld [vmem:[%s8902_s27 + $0x738] sm:$0xff] }
 0x583   : > { %10376 = vst [vmem:[#allocation71_spill] sm:$0xff] %v9609_v28  ;;  %10378 = vst [vmem:[#allocation61_spill] sm:$0xff] %v9617_v34  ;;  %v9621_v9 = vpack.c.bf16 %v3122_v2, %v3120_v51  ;;  %v10381_v38 = vld [vmem:[#allocation89_spill] sm:$0xff]  ;;  %v10383_v16 = vld [vmem:[#allocation91_spill] sm:$0xff] }
 0x584   : > { %5162 = vmatpush1.bf16.msra.mxu0 %v9593_v24  ;;  %v3123_v51 = vld [vmem:[%s8902_s27 + $0x740] sm:$0xff] }
 0x585   : > { %5546 = vmatpush1.bf16.msra.mxu1 %v10375_v36  ;;  %5164 = vmatprep.subr.bf16.mxu0 %v9597_v14  ;;  %10380 = vst [vmem:[#allocation72_spill] sm:$0xff] %v9621_v9  ;;  %v3121_v36 = vld [vmem:[%s8902_s27 + $0x730] sm:$0xff]  ;;  %v3126_v14 = vld [vmem:[%s8902_s27 + $0x758] sm:$0xff] }
 0x586   : > { %5548 = vmatprep.subr.bf16.mxu1 %v10377_v7  ;;  %v3124_v7 = vld [vmem:[%s8902_s27 + $0x748] sm:$0xff]  ;;  %v9629_v19 = vpack.c.bf16 %v3121_v36, %v3119_v23 }
 0x587   : > { %v9633_v2 = vpack.c.bf16 %v3126_v14, %v3124_v7  ;;  %v10387_v36 = vld [vmem:[#allocation81_spill] sm:$0xff]  ;;  %v3127_v7 = vld [vmem:[%s8902_s27 + $0x760] sm:$0xff] }
 0x588   : > { %5166 = vmatpush1.bf16.msra.mxu0 %v9605_v6  ;;  %10382 = vst [vmem:[#allocation70_spill] sm:$0xff] %v9629_v19  ;;  %v3130_v6 = vld [vmem:[%s8902_s27 + $0x778] sm:$0xff] }
 0x589   : > { %5550 = vmatpush1.bf16.msra.mxu1 %v10379_v4  ;;  %5168 = vmatprep.subr.bf16.mxu0 %v9609_v28  ;;  %10384 = vst [vmem:[#allocation106_spill] sm:$0xff] %v9633_v2  ;;  %v3125_v4 = vld [vmem:[%s8902_s27 + $0x750] sm:$0xff] }
 0x58a   : > { %5552 = vmatprep.subr.bf16.mxu1 %v10381_v38  ;;  %v10385_v28 = vld [vmem:[#allocation98_spill] sm:$0xff]  ;;  %v3128_v38 = vld [vmem:[%s8902_s27 + $0x768] sm:$0xff]  ;;  %v9641_v23 = vpack.c.bf16 %v3125_v4, %v3123_v51 }
 0x58b   : > { %v9645_v14 = vpack.c.bf16 %v3130_v6, %v3128_v38  ;;  %v10391_v4 = vld [vmem:[#allocation105_spill] sm:$0xff]  ;;  %v3131_v38 = vld [vmem:[%s8902_s27 + $0x780] sm:$0xff] }
 0x58c   : > { %5170 = vmatpush1.bf16.msra.mxu0 %v9617_v34  ;;  %10386 = vst [vmem:[#allocation111_spill] sm:$0xff] %v9641_v23  ;;  %v3134_v34 = vld [vmem:[%s8902_s27 + $0x798] sm:$0xff] }
 0x58d   : > { %5554 = vmatpush1.bf16.msra.mxu1 %v10383_v16  ;;  %5172 = vmatprep.subr.bf16.mxu0 %v9621_v9  ;;  %10388 = vst [vmem:[#allocation113_spill] sm:$0xff] %v9645_v14  ;;  %v3129_v16 = vld [vmem:[%s8902_s27 + $0x770] sm:$0xff]  ;;  %v10389_v9 = vld [vmem:[#allocation88_spill] sm:$0xff] }
 0x58e   : > { %5556 = vmatprep.subr.bf16.mxu1 %v10385_v28  ;;  %v3132_v28 = vld [vmem:[%s8902_s27 + $0x788] sm:$0xff]  ;;  %v9653_v51 = vpack.c.bf16 %v3129_v16, %v3127_v7 }
 0x58f   : > { %v9657_v6 = vpack.c.bf16 %v3134_v34, %v3132_v28  ;;  %v10395_v16 = vld [vmem:[#allocation93_spill] sm:$0xff]  ;;  %v3135_v28 = vld [vmem:[%s8902_s27 + $0x7a0] sm:$0xff] }
 0x590   : > { %5174 = vmatpush1.bf16.msra.mxu0 %v9629_v19  ;;  %10390 = vst [vmem:[#allocation87_spill] sm:$0xff] %v9653_v51  ;;  %v3138_v19 = vld [vmem:[%s8902_s27 + $0x7b8] sm:$0xff] }
 0x591   : > { %5558 = vmatpush1.bf16.msra.mxu1 %v10387_v36  ;;  %5176 = vmatprep.subr.bf16.mxu0 %v9633_v2  ;;  %10392 = vst [vmem:[#allocation114_spill] sm:$0xff] %v9657_v6  ;;  %v3133_v36 = vld [vmem:[%s8902_s27 + $0x790] sm:$0xff]  ;;  %v10393_v2 = vld [vmem:[#allocation108_spill] sm:$0xff] }
 0x592   : > { %5560 = vmatprep.subr.bf16.mxu1 %v10389_v9  ;;  %v3136_v9 = vld [vmem:[%s8902_s27 + $0x7a8] sm:$0xff]  ;;  %v9665_v7 = vpack.c.bf16 %v3133_v36, %v3131_v38  ;;  %v10397_v36 = vld [vmem:[#allocation100_spill] sm:$0xff] }
 0x593   : > { %v9669_v34 = vpack.c.bf16 %v3138_v19, %v3136_v9  ;;  %v3139_v19 = vld [vmem:[%s8902_s27 + $0x7c0] sm:$0xff]  ;;  %v3141_v9 = vld [vmem:[%s8902_s27 + $0x7d0] sm:$0xff] }
 0x594   : > { %5178 = vmatpush1.bf16.msra.mxu0 %v9641_v23  ;;  %10394 = vst [vmem:[#allocation78_spill] sm:$0xff] %v9665_v7  ;;  %v3142_v23 = vld [vmem:[%s8902_s27 + $0x7d8] sm:$0xff]  ;;  %v9689_v24 = vpack.c.bf16 %v3141_v9, %v3139_v19  ;;  %v4320_v19 = vld [vmem:[%s9762_s17 + $0xe8] sm:$0xff] }
 0x595   : > { %5562 = vmatpush1.bf16.msra.mxu1 %v10391_v4  ;;  %5180 = vmatprep.subr.bf16.mxu0 %v9645_v14  ;;  %v3137_v4 = vld [vmem:[%s8902_s27 + $0x7b0] sm:$0xff]  ;;  %v10396_v14 = vld [vmem:[#allocation95_spill] sm:$0xff] }
 0x596   : > { %5564 = vmatprep.subr.bf16.mxu1 %v10393_v2  ;;  %v3140_v2 = vld [vmem:[%s8902_s27 + $0x7c8] sm:$0xff]  ;;  %v9677_v38 = vpack.c.bf16 %v3137_v4, %v3135_v28  ;;  %v3143_v4 = vld [vmem:[%s8902_s27 + $0x7e0] sm:$0xff] }
 0x598   : > { %5182 = vmatpush1.bf16.msra.mxu0 %v9653_v51  ;;  %v3144_v51 = vld [vmem:[%s8902_s27 + $0x7e8] sm:$0xff] }
 0x599   : > { %5566 = vmatpush1.bf16.msra.mxu1 %v10395_v16  ;;  %5184 = vmatprep.subr.bf16.mxu0 %v9657_v6  ;;  %v9681_v16 = vpack.c.bf16 %v3142_v23, %v3140_v2  ;;  %v10398_v6 = vld [vmem:[#allocation85_spill] sm:$0xff]  ;;  %v10400_v23 = vld [vmem:[#allocation94_spill] sm:$0xff] }
 0x59a   : > { %5568 = vmatprep.subr.bf16.mxu1 %v10396_v14  ;;  %v3146_v14 = vld [vmem:[%s8902_s27 + $0x7f8] sm:$0xff] }
 0x59b   : > { %v9693_v28 = vpack.c.bf16 %v3146_v14, %v3144_v51  ;;  %v10401_v51 = vld [vmem:[#allocation76_spill] sm:$0xff]  ;;  %v10417_v9 = vld [vmem:[#allocation78_spill] sm:$0xff] }
 0x59c   : > { %5186 = vmatpush1.bf16.msra.mxu0 %v9665_v7  ;;  %v10399_v7 = vld [vmem:[#allocation90_spill] sm:$0xff] }
 0x59d   : > { %5570 = vmatpush1.bf16.msra.mxu1 %v10397_v36  ;;  %5188 = vmatprep.subr.bf16.mxu0 %v9669_v34  ;;  %v3145_v36 = vld [vmem:[%s8902_s27 + $0x7f0] sm:$0xff] }
 0x59e   : > { %5572 = vmatprep.subr.bf16.mxu1 %v10398_v6  ;;  %v9699_v2 = vpack.c.bf16 %v3145_v36, %v3143_v4  ;;  %v10402_v6 = vld [vmem:[#allocation103_spill] sm:$0xff] }
 0x5a0   : > { %5190 = vmatpush1.bf16.msra.mxu0 %v9677_v38 }
 0x5a1   : > { %5574 = vmatpush1.bf16.msra.mxu1 %v10399_v7  ;;  %5192 = vmatprep.subr.bf16.mxu0 %v9681_v16  ;;  %v4319_v7 = vld [vmem:[%s9762_s17 + $0xe0] sm:$0xff] }
 0x5a2   : > { %5576 = vmatprep.subr.bf16.mxu1 %v10400_v23  ;;  %v5735_v4 = vpack.c.bf16 %v4320_v19, %v4319_v7  ;;  %v10419_v23 = vld [vmem:[#allocation97_spill] sm:$0xff] }
 0x5a4   : > { %5194 = vmatpush1.bf16.msra.mxu0 %v9689_v24 }
 0x5a5   : > { %5578 = vmatpush1.bf16.msra.mxu1 %v9291_v53  ;;  %5196 = vmatprep.subr.bf16.mxu0 %v9693_v28  ;;  %v10405_v53 = vld [vmem:[#allocation109_spill] sm:$0xff] }
 0x5a6   : > { %5580 = vmatprep.subr.bf16.mxu1 %v9295_v15  ;;  %v10406_v15 = vld [vmem:[#allocation101_spill] sm:$0xff] }
 0x5a8   : > { %5198 = vmatpush1.bf16.msra.mxu0 %v9699_v2 }
 0x5a9   : > { %5582 = vmatpush1.bf16.msra.mxu1 %v9303_v10  ;;  %v10407_v10 = vld [vmem:[#allocation66_spill] sm:$0xff] }
 0x5aa   : > { %5584 = vmatprep.subr.bf16.mxu1 %v9307_v63  ;;  %v4307_v63 = vld [vmem:[%s9762_s17 + $0x80] sm:$0xff] }
 0x5ab   : > { %3709 = vmatmul.mubr.f32.vlgmr.msra.gmra.mrb[6].mxu0 %v8545_v31  ;;  %v10403_v31 = vld [vmem:[#allocation104_spill] sm:$0xff] }
 0x5ac   : > { %4137 = vmatmul.mubr.f32.vlgmr.msra.gmra.mrb[2].mxu1 %v10401_v51 }
 0x5ad   : > { %5586 = vmatpush1.bf16.msra.mxu1 %v9315_v39  ;;  %4207 = vmatprep.mubr.f32.mxu1 %v10402_v6  ;;  %v10404_v39 = vld [vmem:[#allocation73_spill] sm:$0xff] }
 0x5ae   : > { %5588 = vmatprep.subr.bf16.mxu1 %v9322_v44  ;;  %v4308_v44 = vld [vmem:[%s9762_s17 + $0x88] sm:$0xff] }
 0x5b1   : > { %5590 = vmatpush1.bf16.msra.mxu1 %v9329_v52  ;;  %v4291_v52 = vld [vmem:[%s9762_s17] sm:$0xff] }
 0x5b2   : > { %5592 = vmatprep.subr.bf16.mxu1 %v9333_v54  ;;  %v10408_v54 = vld [vmem:[#allocation71_spill] sm:$0xff] }
 0x5b5   : > { %5594 = vmatpush1.bf16.msra.mxu1 %v9343_v49  ;;  %v5711_v49 = vpack.c.bf16 %v4308_v44, %v4307_v63  ;;  %v4305_v63 = vld [vmem:[%s9762_s17 + $0x70] sm:$0xff] }
 0x5b6   : > { %5596 = vmatprep.subr.bf16.mxu1 %v9347_v40  ;;  %v4292_v40 = vld [vmem:[%s9762_s17 + $0x8] sm:$0xff] }
 0x5b7   : > { %5712 = vmatprep.subr.bf16.mxu0 %v5711_v49 }
 0x5b9   : > { %5598 = vmatpush1.bf16.msra.mxu1 %v9355_v62  ;;  %v4309_v62 = vld [vmem:[%s9762_s17 + $0x90] sm:$0xff] }
 0x5ba   : > { %5600 = vmatprep.subr.bf16.mxu1 %v9359_v58  ;;  %v4310_v58 = vld [vmem:[%s9762_s17 + $0x98] sm:$0xff] }
 0x5bd   : > { %5602 = vmatpush1.bf16.msra.mxu1 %v9367_v3  ;;  %v5713_v3 = vpack.c.bf16 %v4292_v40, %v4291_v52 }
 0x5be   : > { %5604 = vmatprep.subr.bf16.mxu1 %v9371_v35  ;;  %v5715_v35 = vpack.c.bf16 %v4310_v58, %v4309_v62 }
 0x5bf   : > { %5714 = vmatpush3.bf16.msra.mxu0 %v5713_v3 }
 0x5c0   : > { %5716 = vmatprep.subr.bf16.mxu0 %v5715_v35 }
 0x5c1   : > { %5606 = vmatpush1.bf16.msra.mxu1 %v9379_v61  ;;  %v4293_v61 = vld [vmem:[%s9762_s17 + $0x10] sm:$0xff] }
 0x5c2   : > { %5608 = vmatprep.subr.bf16.mxu1 %v9383_v42  ;;  %v4294_v42 = vld [vmem:[%s9762_s17 + $0x18] sm:$0xff] }
 0x5c5   : > { %5610 = vmatpush1.bf16.msra.mxu1 %v9391_v5  ;;  %v4311_v5 = vld [vmem:[%s9762_s17 + $0xa0] sm:$0xff] }
 0x5c6   : > { %5612 = vmatprep.subr.bf16.mxu1 %v9395_v22  ;;  %v4312_v22 = vld [vmem:[%s9762_s17 + $0xa8] sm:$0xff] }
 0x5c9   : > { %5614 = vmatpush1.bf16.msra.mxu1 %v9403_v12  ;;  %v10409_v12 = vld [vmem:[#allocation61_spill] sm:$0xff] }
 0x5ca   : > { %5616 = vmatprep.subr.bf16.mxu1 %v9407_v56  ;;  %v5717_v56 = vpack.c.bf16 %v4294_v42, %v4293_v61 }
 0x5cc   : > { %5718 = vmatpush3.bf16.msra.mxu0 %v5717_v56 }
 0x5cd   : > { %5618 = vmatpush1.bf16.msra.mxu1 %v9415_v8  ;;  %v10410_v8 = vld [vmem:[#allocation72_spill] sm:$0xff] }
 0x5ce   : > { %5620 = vmatprep.subr.bf16.mxu1 %v9419_v26  ;;  %v5719_v26 = vpack.c.bf16 %v4312_v22, %v4311_v5 }
 0x5d0   : > { %5720 = vmatprep.subr.bf16.mxu0 %v5719_v26 }
 0x5d1   : > { %5622 = vmatpush1.bf16.msra.mxu1 %v9427_v48  ;;  %v4295_v48 = vld [vmem:[%s9762_s17 + $0x20] sm:$0xff] }
 0x5d2   : > { %5624 = vmatprep.subr.bf16.mxu1 %v9431_v13  ;;  %v4296_v13 = vld [vmem:[%s9762_s17 + $0x28] sm:$0xff] }
 0x5d5   : > { %5626 = vmatpush1.bf16.msra.mxu1 %v9439_v30  ;;  %v4313_v30 = vld [vmem:[%s9762_s17 + $0xb0] sm:$0xff] }
 0x5d6   : > { %5628 = vmatprep.subr.bf16.mxu1 %v9443_v43  ;;  %v4314_v43 = vld [vmem:[%s9762_s17 + $0xb8] sm:$0xff] }
 0x5d9   : > { %5630 = vmatpush1.bf16.msra.mxu1 %v9451_v55  ;;  %v10411_v55 = vld [vmem:[#allocation70_spill] sm:$0xff] }
 0x5da   : > { %5632 = vmatprep.subr.bf16.mxu1 %v9455_v37  ;;  %v5721_v37 = vpack.c.bf16 %v4296_v13, %v4295_v48 }
 0x5dc   : > { %5722 = vmatpush3.bf16.msra.mxu0 %v5721_v37 }
 0x5dd   : > { %5634 = vmatpush1.bf16.msra.mxu1 %v9463_v21  ;;  %v10412_v21 = vld [vmem:[#allocation106_spill] sm:$0xff] }
 0x5de   : > { %5636 = vmatprep.subr.bf16.mxu1 %v9467_v47  ;;  %v5723_v47 = vpack.c.bf16 %v4314_v43, %v4313_v30 }
 0x5e0   : > { %5724 = vmatprep.subr.bf16.mxu0 %v5723_v47 }
 0x5e1   : > { %5638 = vmatpush1.bf16.msra.mxu1 %v9475_v11  ;;  %v4297_v11 = vld [vmem:[%s9762_s17 + $0x30] sm:$0xff] }
 0x5e2   : > { %5640 = vmatprep.subr.bf16.mxu1 %v9479_v45  ;;  %v4298_v45 = vld [vmem:[%s9762_s17 + $0x38] sm:$0xff] }
 0x5e5   : > { %5642 = vmatpush1.bf16.msra.mxu1 %v9487_v25  ;;  %v4315_v25 = vld [vmem:[%s9762_s17 + $0xc0] sm:$0xff] }
 0x5e6   : > { %5644 = vmatprep.subr.bf16.mxu1 %v9491_v1  ;;  %v4316_v1 = vld [vmem:[%s9762_s17 + $0xc8] sm:$0xff] }
 0x5e9   : > { %5646 = vmatpush1.bf16.msra.mxu1 %v9499_v33  ;;  %v10413_v33 = vld [vmem:[#allocation111_spill] sm:$0xff] }
 0x5ea   : > { %5648 = vmatprep.subr.bf16.mxu1 %v9503_v0  ;;  %v5725_v0 = vpack.c.bf16 %v4298_v45, %v4297_v11 }
 0x5ec   : > { %4208 = vmatmul.mubr.f32.vlgmr.msra.gmra.mrb[2].mxu1 %v10403_v31  ;;  %5726 = vmatpush3.bf16.msra.mxu0 %v5725_v0 }
 0x5ed   : > { %5650 = vmatpush1.bf16.msra.mxu1 %v9511_v59  ;;  %4278 = vmatprep.mubr.f32.mxu1 %v10404_v39  ;;  %v10414_v59 = vld [vmem:[#allocation113_spill] sm:$0xff]  ;;  %v4303_v39 = vld [vmem:[%s9762_s17 + $0x60] sm:$0xff] }
 0x5ee   : > { %5652 = vmatprep.subr.bf16.mxu1 %v9518_v41  ;;  %v5727_v41 = vpack.c.bf16 %v4316_v1, %v4315_v25 }
 0x5f0   : > { %5728 = vmatprep.subr.bf16.mxu0 %v5727_v41 }
 0x5f1   : > { %5654 = vmatpush1.bf16.msra.mxu1 %v9525_v29  ;;  %v4299_v29 = vld [vmem:[%s9762_s17 + $0x40] sm:$0xff] }
 0x5f2   : > { %5656 = vmatprep.subr.bf16.mxu1 %v9529_v20  ;;  %v4300_v20 = vld [vmem:[%s9762_s17 + $0x48] sm:$0xff] }
 0x5f5   : > { %5658 = vmatpush1.bf16.msra.mxu1 %v9539_v18  ;;  %v4317_v18 = vld [vmem:[%s9762_s17 + $0xd0] sm:$0xff] }
 0x5f6   : > { %5660 = vmatprep.subr.bf16.mxu1 %v9543_v32  ;;  %v4318_v32 = vld [vmem:[%s9762_s17 + $0xd8] sm:$0xff] }
 0x5f9   : > { %5662 = vmatpush1.bf16.msra.mxu1 %v9551_v57  ;;  %v10415_v57 = vld [vmem:[#allocation87_spill] sm:$0xff] }
 0x5fa   : > { %5664 = vmatprep.subr.bf16.mxu1 %v9555_v17  ;;  %v5729_v17 = vpack.c.bf16 %v4300_v20, %v4299_v29 }
 0x5fc   : > { %5730 = vmatpush3.bf16.msra.mxu0 %v5729_v17 }
 0x5fd   : > { %5666 = vmatpush1.bf16.msra.mxu1 %v9563_v46  ;;  %v10416_v46 = vld [vmem:[#allocation114_spill] sm:$0xff] }
 0x5fe   : > { %5668 = vmatprep.subr.bf16.mxu1 %v9567_v50  ;;  %v5731_v50 = vpack.c.bf16 %v4318_v32, %v4317_v18 }
 0x600   : > { %5732 = vmatprep.subr.bf16.mxu0 %v5731_v50 }
 0x601   : > { %5670 = vmatpush1.bf16.msra.mxu1 %v9575_v27  ;;  %v4301_v27 = vld [vmem:[%s9762_s17 + $0x50] sm:$0xff] }
 0x602   : > { %5672 = vmatprep.subr.bf16.mxu1 %v9579_v60  ;;  %v4302_v60 = vld [vmem:[%s9762_s17 + $0x58] sm:$0xff] }
 0x603   : > { %v5733_v14 = vpack.c.bf16 %v4302_v60, %v4301_v27 }
 0x605   : > { %5674 = vmatpush1.bf16.msra.mxu1 %v10405_v53  ;;  %5734 = vmatpush3.bf16.msra.mxu0 %v5733_v14  ;;  %v4304_v53 = vld [vmem:[%s9762_s17 + $0x68] sm:$0xff] }
 0x606   : > { %5676 = vmatprep.subr.bf16.mxu1 %v10406_v15  ;;  %5736 = vmatprep.subr.bf16.mxu0 %v5735_v4  ;;  %v5737_v15 = vpack.c.bf16 %v4304_v53, %v4303_v39 }
 0x609   : > { %5678 = vmatpush1.bf16.msra.mxu1 %v10407_v10  ;;  %v4322_v10 = vld [vmem:[%s9762_s17 + $0xf8] sm:$0xff]  ;;  %5738 = vmatpush3.bf16.msra.mxu0 %v5737_v15 }
 0x60a   : > { %5680 = vmatprep.subr.bf16.mxu1 %v10408_v54 }
 0x60d   : > { %5682 = vmatpush1.bf16.msra.mxu1 %v10409_v12 }
 0x60e   : > { %5684 = vmatprep.subr.bf16.mxu1 %v10410_v8 }
 0x611   : > { %5686 = vmatpush1.bf16.msra.mxu1 %v10411_v55 }
 0x612   : > { %5688 = vmatprep.subr.bf16.mxu1 %v10412_v21 }
 0x615   : > { %5690 = vmatpush1.bf16.msra.mxu1 %v10413_v33 }
 0x616   : > { %5692 = vmatprep.subr.bf16.mxu1 %v10414_v59 }
 0x619   : > { %5694 = vmatpush1.bf16.msra.mxu1 %v10415_v57 }
 0x61a   : > { %5696 = vmatprep.subr.bf16.mxu1 %v10416_v46 }
 0x61d   : > { %5698 = vmatpush1.bf16.msra.mxu1 %v10417_v9 }
 0x61e   : > { %5700 = vmatprep.subr.bf16.mxu1 %v9669_v34  ;;  %v10418_v34 = vld [vmem:[#allocation79_spill] sm:$0xff] }
 0x621   : > { %5702 = vmatpush1.bf16.msra.mxu1 %v9677_v38  ;;  %v10420_v38 = vld [vmem:[#allocation107_spill] sm:$0xff] }
 0x622   : > { %5704 = vmatprep.subr.bf16.mxu1 %v9681_v16  ;;  %v4321_v16 = vld [vmem:[%s9762_s17 + $0xf0] sm:$0xff] }
 0x623   : > { %v5739_v44 = vpack.c.bf16 %v4322_v10, %v4321_v16 }
 0x625   : > { %5706 = vmatpush1.bf16.msra.mxu1 %v9689_v24  ;;  %v4306_v24 = vld [vmem:[%s9762_s17 + $0x78] sm:$0xff]  ;;  %5740 = vmatprep.subr.bf16.mxu0 %v5739_v44 }
 0x626   : > { %5708 = vmatprep.subr.bf16.mxu1 %v9693_v28  ;;  %v5741_v28 = vpack.c.bf16 %v4306_v24, %v4305_v63 }
 0x628   : > { %5742 = vmatpush3.bf16.msra.mxu0 %v5741_v28 }
 0x629   : > { %5710 = vmatpush1.bf16.msra.mxu1 %v9699_v2 }
 0x62c   : > { %4279 = vmatmul.mubr.f32.vlgmr.msra.gmra.mrb[2].mxu1 %v10418_v34 }
 0x67e   : > { %v3710_v36 = vpop.f32.mrb[6].mxu0 }
 0x67f   : > { %v3715_v51 = vsub.f32 %v10419_v23, %v3710_v36  ;;  %v3712_v6 = vpop.f32.mrb[7].mxu0 }
 0x680   : > { %v3716_v31 = vsub.f32 %v10420_v38, %v3712_v6 }
 0x681   : > { %v4285_v52 = vmul.f32 %v3715_v51, %v3715_v51 }
 0x682   : > { %v4286_v40 = vmul.f32 %v3716_v31, %v3716_v31 }
 0x6ff   : > { %v4280_v2 = vpop.f32.mrb[2].mxu1 }
 0x700   : > { %v4287_v54 = vmul.f32 %v4280_v2, %v4280_v2  ;;  %v4282_v49 = vpop.f32.mrb[3].mxu1 }
 0x701   : > { %v4288_v62 = vmul.f32 %v4282_v49, %v4282_v49 }
 0x702   : > { %v4289_v58 = vadd.f32 %v4287_v54, %v4285_v52 }
 0x703   : > { %v4290_v3 = vadd.f32 %v4288_v62, %v4286_v40 }
 0x705   : > { %4387 = vmatprep.mubr.f32.mxu0 %v4290_v3 }
 0x706   : > { %4388 = vmatmul.mubr.f32.vlgmr.msra.gmra.mrb[8].mxu0 %v4289_v58 }
 0x7d9   : > { %v4598_v35 = vpop.f32.mrb[8].mxu0 }
 0x7da   : > { %v4599_v61 = vpop.f32.mrb[9].mxu0 }
 0x7db   : > { %v4600_v42 = vadd.f32 %v4599_v61, %v4598_v35 }
 0x7dd   : > { %4393 = vst [vmem:[%s1407_s20] sm:$0x3] %v4600_v42 }
 0x7de PF: > { %p15_p10 = scmp.ge.s32.totalorder %s5947_s9, 6   ;;  %s10421_s27 = smov %s5858_s28 }
 0x7df   : > { %s10422_s28 = smov %s5956_s12  ;;  %s10423_s29 = smov %s5947_s9 }
 0x7e0   :  { %17 = sbr.rel (!%p15_p10) target bundleno = 2 (0x2), region = 144 }

</bundles_post_ra>
